<compile_context>
chip_gen: v5e
topology: v5e:2x2
jax: 0.10.0
libtpu: 0.0.40
codegen_flags: <defaults>
</compile_context>

<pallas_src>
import functools

import jax
import jax.numpy as jnp
from jax.experimental import pallas as pl
from jax.experimental.pallas import tpu as pltpu


def _round_up(x, m):
    return (x + m - 1) // m * m


# ----------------------------------------------------------------------------
# Fused decoder kernel: [hoisted input proj -> recurrence] x num_layers -> FC.
# All activations are 2-D (T*Bp, feature) and stay in VMEM scratch.
# ----------------------------------------------------------------------------
def _decoder_kernel(x_ref, *refs, num_layers, seq_len, batch_pad, hidden_pad):
    T, Bp, Hp = seq_len, batch_pad, hidden_pad
    lstm_refs = refs[: 3 * num_layers]
    wfc_ref, bfc_ref, out_ref, g_sc, h_sc = refs[3 * num_layers:]

    for layer in range(num_layers):
        wih_ref, whh_ref, b_ref = lstm_refs[3 * layer: 3 * layer + 3]

        # ---- Hoisted input projection: ONE big bf16 MXU matmul over the whole
        #      sequence, bias folded in here (f32 accumulate).
        if layer == 0:
            inp = x_ref[...]                               # (T*Bp, E) bf16
        else:
            inp = h_sc[...].astype(jnp.bfloat16)           # (T*Bp, Hp)
        g_sc[...] = (jnp.dot(inp, wih_ref[...],
                             preferred_element_type=jnp.float32)
                     + b_ref[...])                         # (T*Bp, 4*Hp) f32

        # ---- Sequential recurrence: only h @ W_hh^T per step.
        def step(t, carry):
            h, c = carry
            r0 = pl.multiple_of(t * Bp, Bp)                # sublane-aligned
            gates = g_sc[pl.ds(r0, Bp), :] + jnp.dot(
                h.astype(jnp.bfloat16), whh_ref[...],
                preferred_element_type=jnp.float32)        # (Bp, 4*Hp)
            # PyTorch gate order: i, f, g, o (each slice = whole 128-lane group)
            i_g = jax.nn.sigmoid(gates[:, 0 * Hp:1 * Hp])
            f_g = jax.nn.sigmoid(gates[:, 1 * Hp:2 * Hp])
            g_g = jnp.tanh(gates[:, 2 * Hp:3 * Hp])
            o_g = jax.nn.sigmoid(gates[:, 3 * Hp:4 * Hp])
            c_new = f_g * c + i_g * g_g
            h_new = o_g * jnp.tanh(c_new)
            h_sc[pl.ds(r0, Bp), :] = h_new                 # aligned full-tile store
            return h_new, c_new

        h0 = jnp.zeros((Bp, Hp), jnp.float32)
        c0 = jnp.zeros((Bp, Hp), jnp.float32)
        jax.lax.fori_loop(0, T, step, (h0, c0), unroll=True)
        # TODO(synk): inter-layer dropout(p=0.25) is identity in eval mode.

    # ---- Fused FC head: one big matmul; output minor dim (V) is lane-dense.
    out_ref[...] = (jnp.dot(h_sc[...].astype(jnp.bfloat16), wfc_ref[...],
                            preferred_element_type=jnp.float32)
                    + bfc_ref[...])


def _decoder_pallas(x2d, lstm_params, wfc, bfc, *, T, Bp, Hp, V):
    num_layers = len(lstm_params)
    flat_ws = [w for lw in lstm_params for w in lw]
    kernel = functools.partial(_decoder_kernel, num_layers=num_layers,
                               seq_len=T, batch_pad=Bp, hidden_pad=Hp)
    n_in = 1 + len(flat_ws) + 2
    return pl.pallas_call(
        kernel,
        out_shape=jax.ShapeDtypeStruct((T * Bp, V), jnp.float32),
        in_specs=[pl.BlockSpec(memory_space=pltpu.MemorySpace.VMEM)] * n_in,
        out_specs=pl.BlockSpec(memory_space=pltpu.MemorySpace.VMEM),
        scratch_shapes=[
            pltpu.VMEM((T * Bp, 4 * Hp), jnp.float32),   # per-layer gate inputs
            pltpu.VMEM((T * Bp, Hp), jnp.float32),       # per-layer hidden seq
        ],
    )(x2d, *flat_ws, wfc, bfc)


# ----------------------------------------------------------------------------
# DecoderRNN forward (embedding gather + layout glue in plain JAX).
# ----------------------------------------------------------------------------
@jax.jit
def decoder_forward(kparams, features, captions):
    """features: (B, E) f32, captions: (B, Tc) int32 -> logits (B, Tc, V) f32."""
    captions = captions[:, :-1]                                   # (B, Tc-1)
    emb = jnp.take(kparams["embed"], captions, axis=0)            # (B, Tc-1, E)
    inputs = jnp.concatenate(
        [features[:, None, :].astype(jnp.float32), emb], axis=1)  # (B, T, E)

    B, T, E = inputs.shape
    Hp = kparams["lstm"][0][1].shape[0]
    V = kparams["wfc"].shape[1]
    Bp = _round_up(B, 8)

    x = jnp.transpose(inputs, (1, 0, 2))                          # (T, B, E)
    if Bp != B:
        x = jnp.pad(x, ((0, 0), (0, Bp - B), (0, 0)))             # (T, Bp, E)
    x2d = x.reshape(T * Bp, E).astype(jnp.bfloat16)

    out2d = _decoder_pallas(x2d, kparams["lstm"], kparams["wfc"],
                            kparams["bfc"], T=T, Bp=Bp, Hp=Hp, V=V)  # (T*Bp, V)
    out = out2d.reshape(T, Bp, V)[:, :B, :]
    return jnp.transpose(out, (1, 0, 2))                          # (B, T, V)


# ----------------------------------------------------------------------------
# Parameter init (PyTorch layout) and conversion to the kernel layout.
# ----------------------------------------------------------------------------
def init_params(key, embed_size, hidden_size, vocab_size, num_layers=2):
    params = {}
    keys = jax.random.split(key, 3 + 4 * num_layers)
    ki = iter(keys)
    # nn.Embedding: N(0, 1)
    params["embed"] = jax.random.normal(next(ki), (vocab_size, embed_size),
                                        jnp.float32)
    # nn.LSTM / nn.Linear: uniform(-1/sqrt(H), 1/sqrt(H))
    s = 1.0 / float(hidden_size) ** 0.5
    for l in range(num_layers):
        in_dim = embed_size if l == 0 else hidden_size
        params[f"w_ih{l}"] = jax.random.uniform(
            next(ki), (4 * hidden_size, in_dim), jnp.float32, -s, s)
        params[f"w_hh{l}"] = jax.random.uniform(
            next(ki), (4 * hidden_size, hidden_size), jnp.float32, -s, s)
        params[f"b_ih{l}"] = jax.random.uniform(
            next(ki), (4 * hidden_size,), jnp.float32, -s, s)
        params[f"b_hh{l}"] = jax.random.uniform(
            next(ki), (4 * hidden_size,), jnp.float32, -s, s)
    params["w_fc"] = jax.random.uniform(next(ki), (vocab_size, hidden_size),
                                        jnp.float32, -s, s)
    params["b_fc"] = jax.random.uniform(next(ki), (vocab_size,),
                                        jnp.float32, -s, s)
    return params


def prepare_kernel_params(params, embed_size, hidden_size, vocab_size,
                          num_layers=2):
    """Transpose, lane-pad (H -> Hp multiple of 128) and cast weights to bf16.

    Zero-padding is exact: padded gate pre-activations are 0, so sigmoid(0)=0.5,
    tanh(0)=0 -> padded c and h columns stay exactly 0 for all time steps, and
    all padded weight rows are 0 so they never contribute to real outputs.
    """
    H = hidden_size
    Hp = _round_up(H, 128)

    def pad_gate_cols(w_t):                       # (in_dim, 4H) -> (in_dim, 4Hp)
        in_dim = w_t.shape[0]
        w4 = jnp.pad(w_t.reshape(in_dim, 4, H), ((0, 0), (0, 0), (0, Hp - H)))
        return w4.reshape(in_dim, 4 * Hp)

    kp = {"embed": params["embed"].astype(jnp.float32)}
    lstm = []
    for l in range(num_layers):
        wih_t = pad_gate_cols(params[f"w_ih{l}"].T)               # (in_dim, 4Hp)
        if l > 0:                                                  # rows H -> Hp
            wih_t = jnp.pad(wih_t, ((0, Hp - H), (0, 0)))
        whh_t = jnp.pad(pad_gate_cols(params[f"w_hh{l}"].T),
                        ((0, Hp - H), (0, 0)))                     # (Hp, 4Hp)
        b = (params[f"b_ih{l}"] + params[f"b_hh{l}"]).reshape(4, H)
        b_row = jnp.pad(b, ((0, 0), (0, Hp - H))).reshape(1, 4 * Hp)
        lstm.append((wih_t.astype(jnp.bfloat16),
                     whh_t.astype(jnp.bfloat16),
                     b_row.astype(jnp.float32)))
    kp["lstm"] = tuple(lstm)
    kp["wfc"] = jnp.pad(params["w_fc"].T,
                        ((0, Hp - H), (0, 0))).astype(jnp.bfloat16)  # (Hp, V)
    kp["bfc"] = params["b_fc"].reshape(1, -1).astype(jnp.float32)    # (1, V)
    return kp


# ----------------------------------------------------------------------------
# Pure-JAX reference (mimics the kernel's precision: bf16 matmul operands,
# f32 accumulation / gate math) for a correctness check.
# ----------------------------------------------------------------------------
def reference_forward(params, features, captions, hidden_size, num_layers=2):
    H = hidden_size
    q = lambda a: a.astype(jnp.bfloat16).astype(jnp.float32)
    cap = captions[:, :-1]
    emb = jnp.take(params["embed"], cap, axis=0)
    x = jnp.concatenate([features[:, None, :], emb], axis=1)      # (B, T, E)
    B, T, _ = x.shape
    layer_in = q(x)
    for l in range(num_layers):
        wih = q(params[f"w_ih{l}"])
        whh = q(params[f"w_hh{l}"])
        b = params[f"b_ih{l}"] + params[f"b_hh{l}"]
        h = jnp.zeros((B, H), jnp.float32)
        c = jnp.zeros((B, H), jnp.float32)
        outs = []
        for t in range(T):
            gates = layer_in[:, t, :] @ wih.T + q(h) @ whh.T + b
            i_g = jax.nn.sigmoid(gates[:, 0 * H:1 * H])
            f_g = jax.nn.sigmoid(gates[:, 1 * H:2 * H])
            g_g = jnp.tanh(gates[:, 2 * H:3 * H])
            o_g = jax.nn.sigmoid(gates[:, 3 * H:4 * H])
            c = f_g * c + i_g * g_g
            h = o_g * jnp.tanh(c)
            outs.append(h)
        layer_in = q(jnp.stack(outs, axis=1))                     # (B, T, H)
    return layer_in @ q(params["w_fc"]).T + params["b_fc"]


if __name__ == "__main__":
    embed_size = 32
    hidden_size = 32
    vocab_size = 128
    num_layers = 2
    batch = 2
    caption_len = 8          # forward sees T = caption_len (1 feature + 7 tokens)

    key = jax.random.PRNGKey(0)
    k_params, k_feat, k_cap = jax.random.split(key, 3)

    params = init_params(k_params, embed_size, hidden_size, vocab_size,
                         num_layers)
    kparams = prepare_kernel_params(params, embed_size, hidden_size,
                                    vocab_size, num_layers)

    features = jax.random.normal(k_feat, (batch, embed_size), jnp.float32)
    captions = jax.random.randint(k_cap, (batch, caption_len), 0, vocab_size,
                                  dtype=jnp.int32)

    out = decoder_forward(kparams, features, captions)
    out = jax.block_until_ready(out)

    assert out.shape == (batch, caption_len, vocab_size), out.shape
    assert bool(jnp.all(jnp.isfinite(out)))

    ref = reference_forward(params, features, captions, hidden_size, num_layers)
    assert bool(jnp.allclose(out, ref, atol=5e-3, rtol=5e-3)), \
        float(jnp.max(jnp.abs(out - ref)))

    print("KERNEL_OK")
</pallas_src>

<mosaic_0001>
module attributes {stable_mosaic.version = 11 : i64} {
  func.func @_decoder_kernel(%arg0: memref<64x32xbf16, #tpu.memory_space<vmem>>, %arg1: memref<32x512xbf16, #tpu.memory_space<vmem>>, %arg2: memref<128x512xbf16, #tpu.memory_space<vmem>>, %arg3: memref<1x512xf32, #tpu.memory_space<vmem>>, %arg4: memref<128x512xbf16, #tpu.memory_space<vmem>>, %arg5: memref<128x512xbf16, #tpu.memory_space<vmem>>, %arg6: memref<1x512xf32, #tpu.memory_space<vmem>>, %arg7: memref<128x128xbf16, #tpu.memory_space<vmem>>, %arg8: memref<1x128xf32, #tpu.memory_space<vmem>>, %arg9: memref<64x128xf32, #tpu.memory_space<vmem>>, %arg10: memref<64x512xf32, #tpu.memory_space<vmem>>, %arg11: memref<64x128xf32, #tpu.memory_space<vmem>>) attributes {dimension_semantics = [], scalar_prefetch = 0 : i64, scratch_operands = 2 : i64, tpu.core_type = #tpu.core_type<tc>} {
    %c0 = arith.constant 0 : index
    %c0_0 = arith.constant 0 : index
    %0 = vector.load %arg0[%c0, %c0_0] : memref<64x32xbf16, #tpu.memory_space<vmem>>, vector<64x32xbf16>
    %c0_1 = arith.constant 0 : index
    %c0_2 = arith.constant 0 : index
    %1 = vector.load %arg1[%c0_1, %c0_2] : memref<32x512xbf16, #tpu.memory_space<vmem>>, vector<32x512xbf16>
    %cst = arith.constant dense<0.000000e+00> : vector<64x512xf32>
    %2 = tpu.matmul %0, %1, %cst {dimension_numbers = #tpu.dot_dimension_numbers<[1], [0], [0], [1], [0, 0, 1, 1], [], []>} : vector<64x32xbf16>, vector<32x512xbf16>, vector<64x512xf32> -> vector<64x512xf32>
    %c0_3 = arith.constant 0 : index
    %c0_4 = arith.constant 0 : index
    %3 = vector.load %arg3[%c0_3, %c0_4] : memref<1x512xf32, #tpu.memory_space<vmem>>, vector<1x512xf32>
    %4 = vector.broadcast %3 : vector<1x512xf32> to vector<64x512xf32>
    %5 = arith.addf %2, %4 : vector<64x512xf32>
    %c0_5 = arith.constant 0 : index
    %c0_6 = arith.constant 0 : index
    %6 = vector.load %arg10[%c0_5, %c0_6] : memref<64x512xf32, #tpu.memory_space<vmem>>, vector<64x512xf32>
    tpu.vector_store %arg10[%c0_5, %c0_6], %5 {strides = array<i32>} : memref<64x512xf32, #tpu.memory_space<vmem>>, vector<64x512xf32>,
    %cst_7 = arith.constant 0.000000e+00 : f32
    %7 = vector.broadcast %cst_7 : f32 to vector<8x128xf32>
    %cst_8 = arith.constant 0.000000e+00 : f32
    %8 = vector.broadcast %cst_8 : f32 to vector<8x128xf32>
    %c0_i32 = arith.constant 0 : i32
    %c8_i32 = arith.constant 8 : i32
    %9 = arith.muli %c0_i32, %c8_i32 : i32
    %10 = tpu.assume_multiple %9, 8 : i32
    %11 = arith.index_cast %10 : i32 to index
    %c0_9 = arith.constant 0 : index
    %12 = vector.load %arg10[%11, %c0_9] : memref<64x512xf32, #tpu.memory_space<vmem>>, vector<8x512xf32>
    %13 = arith.truncf %7 : vector<8x128xf32> to vector<8x128xbf16>
    %c0_10 = arith.constant 0 : index
    %c0_11 = arith.constant 0 : index
    %14 = vector.load %arg2[%c0_10, %c0_11] : memref<128x512xbf16, #tpu.memory_space<vmem>>, vector<128x512xbf16>
    %cst_12 = arith.constant dense<0.000000e+00> : vector<8x512xf32>
    %15 = tpu.matmul %13, %14, %cst_12 {dimension_numbers = #tpu.dot_dimension_numbers<[1], [0], [0], [1], [0, 0, 1, 1], [], []>} : vector<8x128xbf16>, vector<128x512xbf16>, vector<8x512xf32> -> vector<8x512xf32>
    %16 = arith.addf %12, %15 : vector<8x512xf32>
    %17 = vector.extract_strided_slice %16 {offsets = [0, 0], sizes = [8, 128], strides = [1, 1]} : vector<8x512xf32> to vector<8x128xf32>
    %18 = arith.negf %17 : vector<8x128xf32>
    %19 = math.exp %18 : vector<8x128xf32>
    %cst_13 = arith.constant 1.000000e+00 : f32
    %20 = vector.broadcast %cst_13 : f32 to vector<8x128xf32>
    %21 = arith.addf %20, %19 : vector<8x128xf32>
    %22 = arith.divf %20, %21 : vector<8x128xf32>
    %23 = vector.extract_strided_slice %16 {offsets = [0, 128], sizes = [8, 128], strides = [1, 1]} : vector<8x512xf32> to vector<8x128xf32>
    %24 = arith.negf %23 : vector<8x128xf32>
    %25 = math.exp %24 : vector<8x128xf32>
    %cst_14 = arith.constant 1.000000e+00 : f32
    %26 = vector.broadcast %cst_14 : f32 to vector<8x128xf32>
    %27 = arith.addf %26, %25 : vector<8x128xf32>
    %28 = arith.divf %26, %27 : vector<8x128xf32>
    %29 = vector.extract_strided_slice %16 {offsets = [0, 256], sizes = [8, 128], strides = [1, 1]} : vector<8x512xf32> to vector<8x128xf32>
    %30 = math.tanh %29 : vector<8x128xf32>
    %31 = vector.extract_strided_slice %16 {offsets = [0, 384], sizes = [8, 128], strides = [1, 1]} : vector<8x512xf32> to vector<8x128xf32>
    %32 = arith.negf %31 : vector<8x128xf32>
    %33 = math.exp %32 : vector<8x128xf32>
    %cst_15 = arith.constant 1.000000e+00 : f32
    %34 = vector.broadcast %cst_15 : f32 to vector<8x128xf32>
    %35 = arith.addf %34, %33 : vector<8x128xf32>
    %36 = arith.divf %34, %35 : vector<8x128xf32>
    %37 = arith.mulf %28, %8 : vector<8x128xf32>
    %38 = arith.mulf %22, %30 : vector<8x128xf32>
    %39 = arith.addf %37, %38 : vector<8x128xf32>
    %40 = math.tanh %39 : vector<8x128xf32>
    %41 = arith.mulf %36, %40 : vector<8x128xf32>
    %42 = arith.index_cast %10 : i32 to index
    %c0_16 = arith.constant 0 : index
    %43 = vector.load %arg11[%42, %c0_16] : memref<64x128xf32, #tpu.memory_space<vmem>>, vector<8x128xf32>
    tpu.vector_store %arg11[%42, %c0_16], %41 {strides = array<i32>} : memref<64x128xf32, #tpu.memory_space<vmem>>, vector<8x128xf32>,
    %c1_i32 = arith.constant 1 : i32
    %c8_i32_17 = arith.constant 8 : i32
    %44 = arith.muli %c1_i32, %c8_i32_17 : i32
    %45 = tpu.assume_multiple %44, 8 : i32
    %46 = arith.index_cast %45 : i32 to index
    %c0_18 = arith.constant 0 : index
    %47 = vector.load %arg10[%46, %c0_18] : memref<64x512xf32, #tpu.memory_space<vmem>>, vector<8x512xf32>
    %48 = arith.truncf %41 : vector<8x128xf32> to vector<8x128xbf16>
    %c0_19 = arith.constant 0 : index
    %c0_20 = arith.constant 0 : index
    %49 = vector.load %arg2[%c0_19, %c0_20] : memref<128x512xbf16, #tpu.memory_space<vmem>>, vector<128x512xbf16>
    %cst_21 = arith.constant dense<0.000000e+00> : vector<8x512xf32>
    %50 = tpu.matmul %48, %49, %cst_21 {dimension_numbers = #tpu.dot_dimension_numbers<[1], [0], [0], [1], [0, 0, 1, 1], [], []>} : vector<8x128xbf16>, vector<128x512xbf16>, vector<8x512xf32> -> vector<8x512xf32>
    %51 = arith.addf %47, %50 : vector<8x512xf32>
    %52 = vector.extract_strided_slice %51 {offsets = [0, 0], sizes = [8, 128], strides = [1, 1]} : vector<8x512xf32> to vector<8x128xf32>
    %53 = arith.negf %52 : vector<8x128xf32>
    %54 = math.exp %53 : vector<8x128xf32>
    %cst_22 = arith.constant 1.000000e+00 : f32
    %55 = vector.broadcast %cst_22 : f32 to vector<8x128xf32>
    %56 = arith.addf %55, %54 : vector<8x128xf32>
    %57 = arith.divf %55, %56 : vector<8x128xf32>
    %58 = vector.extract_strided_slice %51 {offsets = [0, 128], sizes = [8, 128], strides = [1, 1]} : vector<8x512xf32> to vector<8x128xf32>
    %59 = arith.negf %58 : vector<8x128xf32>
    %60 = math.exp %59 : vector<8x128xf32>
    %cst_23 = arith.constant 1.000000e+00 : f32
    %61 = vector.broadcast %cst_23 : f32 to vector<8x128xf32>
    %62 = arith.addf %61, %60 : vector<8x128xf32>
    %63 = arith.divf %61, %62 : vector<8x128xf32>
    %64 = vector.extract_strided_slice %51 {offsets = [0, 256], sizes = [8, 128], strides = [1, 1]} : vector<8x512xf32> to vector<8x128xf32>
    %65 = math.tanh %64 : vector<8x128xf32>
    %66 = vector.extract_strided_slice %51 {offsets = [0, 384], sizes = [8, 128], strides = [1, 1]} : vector<8x512xf32> to vector<8x128xf32>
    %67 = arith.negf %66 : vector<8x128xf32>
    %68 = math.exp %67 : vector<8x128xf32>
    %cst_24 = arith.constant 1.000000e+00 : f32
    %69 = vector.broadcast %cst_24 : f32 to vector<8x128xf32>
    %70 = arith.addf %69, %68 : vector<8x128xf32>
    %71 = arith.divf %69, %70 : vector<8x128xf32>
    %72 = arith.mulf %63, %39 : vector<8x128xf32>
    %73 = arith.mulf %57, %65 : vector<8x128xf32>
    %74 = arith.addf %72, %73 : vector<8x128xf32>
    %75 = math.tanh %74 : vector<8x128xf32>
    %76 = arith.mulf %71, %75 : vector<8x128xf32>
    %77 = arith.index_cast %45 : i32 to index
    %c0_25 = arith.constant 0 : index
    %78 = vector.load %arg11[%77, %c0_25] : memref<64x128xf32, #tpu.memory_space<vmem>>, vector<8x128xf32>
    tpu.vector_store %arg11[%77, %c0_25], %76 {strides = array<i32>} : memref<64x128xf32, #tpu.memory_space<vmem>>, vector<8x128xf32>,
    %c2_i32 = arith.constant 2 : i32
    %c8_i32_26 = arith.constant 8 : i32
    %79 = arith.muli %c2_i32, %c8_i32_26 : i32
    %80 = tpu.assume_multiple %79, 8 : i32
    %81 = arith.index_cast %80 : i32 to index
    %c0_27 = arith.constant 0 : index
    %82 = vector.load %arg10[%81, %c0_27] : memref<64x512xf32, #tpu.memory_space<vmem>>, vector<8x512xf32>
    %83 = arith.truncf %76 : vector<8x128xf32> to vector<8x128xbf16>
    %c0_28 = arith.constant 0 : index
    %c0_29 = arith.constant 0 : index
    %84 = vector.load %arg2[%c0_28, %c0_29] : memref<128x512xbf16, #tpu.memory_space<vmem>>, vector<128x512xbf16>
    %cst_30 = arith.constant dense<0.000000e+00> : vector<8x512xf32>
    %85 = tpu.matmul %83, %84, %cst_30 {dimension_numbers = #tpu.dot_dimension_numbers<[1], [0], [0], [1], [0, 0, 1, 1], [], []>} : vector<8x128xbf16>, vector<128x512xbf16>, vector<8x512xf32> -> vector<8x512xf32>
    %86 = arith.addf %82, %85 : vector<8x512xf32>
    %87 = vector.extract_strided_slice %86 {offsets = [0, 0], sizes = [8, 128], strides = [1, 1]} : vector<8x512xf32> to vector<8x128xf32>
    %88 = arith.negf %87 : vector<8x128xf32>
    %89 = math.exp %88 : vector<8x128xf32>
    %cst_31 = arith.constant 1.000000e+00 : f32
    %90 = vector.broadcast %cst_31 : f32 to vector<8x128xf32>
    %91 = arith.addf %90, %89 : vector<8x128xf32>
    %92 = arith.divf %90, %91 : vector<8x128xf32>
    %93 = vector.extract_strided_slice %86 {offsets = [0, 128], sizes = [8, 128], strides = [1, 1]} : vector<8x512xf32> to vector<8x128xf32>
    %94 = arith.negf %93 : vector<8x128xf32>
    %95 = math.exp %94 : vector<8x128xf32>
    %cst_32 = arith.constant 1.000000e+00 : f32
    %96 = vector.broadcast %cst_32 : f32 to vector<8x128xf32>
    %97 = arith.addf %96, %95 : vector<8x128xf32>
    %98 = arith.divf %96, %97 : vector<8x128xf32>
    %99 = vector.extract_strided_slice %86 {offsets = [0, 256], sizes = [8, 128], strides = [1, 1]} : vector<8x512xf32> to vector<8x128xf32>
    %100 = math.tanh %99 : vector<8x128xf32>
    %101 = vector.extract_strided_slice %86 {offsets = [0, 384], sizes = [8, 128], strides = [1, 1]} : vector<8x512xf32> to vector<8x128xf32>
    %102 = arith.negf %101 : vector<8x128xf32>
    %103 = math.exp %102 : vector<8x128xf32>
    %cst_33 = arith.constant 1.000000e+00 : f32
    %104 = vector.broadcast %cst_33 : f32 to vector<8x128xf32>
    %105 = arith.addf %104, %103 : vector<8x128xf32>
    %106 = arith.divf %104, %105 : vector<8x128xf32>
    %107 = arith.mulf %98, %74 : vector<8x128xf32>
    %108 = arith.mulf %92, %100 : vector<8x128xf32>
    %109 = arith.addf %107, %108 : vector<8x128xf32>
    %110 = math.tanh %109 : vector<8x128xf32>
    %111 = arith.mulf %106, %110 : vector<8x128xf32>
    %112 = arith.index_cast %80 : i32 to index
    %c0_34 = arith.constant 0 : index
    %113 = vector.load %arg11[%112, %c0_34] : memref<64x128xf32, #tpu.memory_space<vmem>>, vector<8x128xf32>
    tpu.vector_store %arg11[%112, %c0_34], %111 {strides = array<i32>} : memref<64x128xf32, #tpu.memory_space<vmem>>, vector<8x128xf32>,
    %c3_i32 = arith.constant 3 : i32
    %c8_i32_35 = arith.constant 8 : i32
    %114 = arith.muli %c3_i32, %c8_i32_35 : i32
    %115 = tpu.assume_multiple %114, 8 : i32
    %116 = arith.index_cast %115 : i32 to index
    %c0_36 = arith.constant 0 : index
    %117 = vector.load %arg10[%116, %c0_36] : memref<64x512xf32, #tpu.memory_space<vmem>>, vector<8x512xf32>
    %118 = arith.truncf %111 : vector<8x128xf32> to vector<8x128xbf16>
    %c0_37 = arith.constant 0 : index
    %c0_38 = arith.constant 0 : index
    %119 = vector.load %arg2[%c0_37, %c0_38] : memref<128x512xbf16, #tpu.memory_space<vmem>>, vector<128x512xbf16>
    %cst_39 = arith.constant dense<0.000000e+00> : vector<8x512xf32>
    %120 = tpu.matmul %118, %119, %cst_39 {dimension_numbers = #tpu.dot_dimension_numbers<[1], [0], [0], [1], [0, 0, 1, 1], [], []>} : vector<8x128xbf16>, vector<128x512xbf16>, vector<8x512xf32> -> vector<8x512xf32>
    %121 = arith.addf %117, %120 : vector<8x512xf32>
    %122 = vector.extract_strided_slice %121 {offsets = [0, 0], sizes = [8, 128], strides = [1, 1]} : vector<8x512xf32> to vector<8x128xf32>
    %123 = arith.negf %122 : vector<8x128xf32>
    %124 = math.exp %123 : vector<8x128xf32>
    %cst_40 = arith.constant 1.000000e+00 : f32
    %125 = vector.broadcast %cst_40 : f32 to vector<8x128xf32>
    %126 = arith.addf %125, %124 : vector<8x128xf32>
    %127 = arith.divf %125, %126 : vector<8x128xf32>
    %128 = vector.extract_strided_slice %121 {offsets = [0, 128], sizes = [8, 128], strides = [1, 1]} : vector<8x512xf32> to vector<8x128xf32>
    %129 = arith.negf %128 : vector<8x128xf32>
    %130 = math.exp %129 : vector<8x128xf32>
    %cst_41 = arith.constant 1.000000e+00 : f32
    %131 = vector.broadcast %cst_41 : f32 to vector<8x128xf32>
    %132 = arith.addf %131, %130 : vector<8x128xf32>
    %133 = arith.divf %131, %132 : vector<8x128xf32>
    %134 = vector.extract_strided_slice %121 {offsets = [0, 256], sizes = [8, 128], strides = [1, 1]} : vector<8x512xf32> to vector<8x128xf32>
    %135 = math.tanh %134 : vector<8x128xf32>
    %136 = vector.extract_strided_slice %121 {offsets = [0, 384], sizes = [8, 128], strides = [1, 1]} : vector<8x512xf32> to vector<8x128xf32>
    %137 = arith.negf %136 : vector<8x128xf32>
    %138 = math.exp %137 : vector<8x128xf32>
    %cst_42 = arith.constant 1.000000e+00 : f32
    %139 = vector.broadcast %cst_42 : f32 to vector<8x128xf32>
    %140 = arith.addf %139, %138 : vector<8x128xf32>
    %141 = arith.divf %139, %140 : vector<8x128xf32>
    %142 = arith.mulf %133, %109 : vector<8x128xf32>
    %143 = arith.mulf %127, %135 : vector<8x128xf32>
    %144 = arith.addf %142, %143 : vector<8x128xf32>
    %145 = math.tanh %144 : vector<8x128xf32>
    %146 = arith.mulf %141, %145 : vector<8x128xf32>
    %147 = arith.index_cast %115 : i32 to index
    %c0_43 = arith.constant 0 : index
    %148 = vector.load %arg11[%147, %c0_43] : memref<64x128xf32, #tpu.memory_space<vmem>>, vector<8x128xf32>
    tpu.vector_store %arg11[%147, %c0_43], %146 {strides = array<i32>} : memref<64x128xf32, #tpu.memory_space<vmem>>, vector<8x128xf32>,
    %c4_i32 = arith.constant 4 : i32
    %c8_i32_44 = arith.constant 8 : i32
    %149 = arith.muli %c4_i32, %c8_i32_44 : i32
    %150 = tpu.assume_multiple %149, 8 : i32
    %151 = arith.index_cast %150 : i32 to index
    %c0_45 = arith.constant 0 : index
    %152 = vector.load %arg10[%151, %c0_45] : memref<64x512xf32, #tpu.memory_space<vmem>>, vector<8x512xf32>
    %153 = arith.truncf %146 : vector<8x128xf32> to vector<8x128xbf16>
    %c0_46 = arith.constant 0 : index
    %c0_47 = arith.constant 0 : index
    %154 = vector.load %arg2[%c0_46, %c0_47] : memref<128x512xbf16, #tpu.memory_space<vmem>>, vector<128x512xbf16>
    %cst_48 = arith.constant dense<0.000000e+00> : vector<8x512xf32>
    %155 = tpu.matmul %153, %154, %cst_48 {dimension_numbers = #tpu.dot_dimension_numbers<[1], [0], [0], [1], [0, 0, 1, 1], [], []>} : vector<8x128xbf16>, vector<128x512xbf16>, vector<8x512xf32> -> vector<8x512xf32>
    %156 = arith.addf %152, %155 : vector<8x512xf32>
    %157 = vector.extract_strided_slice %156 {offsets = [0, 0], sizes = [8, 128], strides = [1, 1]} : vector<8x512xf32> to vector<8x128xf32>
    %158 = arith.negf %157 : vector<8x128xf32>
    %159 = math.exp %158 : vector<8x128xf32>
    %cst_49 = arith.constant 1.000000e+00 : f32
    %160 = vector.broadcast %cst_49 : f32 to vector<8x128xf32>
    %161 = arith.addf %160, %159 : vector<8x128xf32>
    %162 = arith.divf %160, %161 : vector<8x128xf32>
    %163 = vector.extract_strided_slice %156 {offsets = [0, 128], sizes = [8, 128], strides = [1, 1]} : vector<8x512xf32> to vector<8x128xf32>
    %164 = arith.negf %163 : vector<8x128xf32>
    %165 = math.exp %164 : vector<8x128xf32>
    %cst_50 = arith.constant 1.000000e+00 : f32
    %166 = vector.broadcast %cst_50 : f32 to vector<8x128xf32>
    %167 = arith.addf %166, %165 : vector<8x128xf32>
    %168 = arith.divf %166, %167 : vector<8x128xf32>
    %169 = vector.extract_strided_slice %156 {offsets = [0, 256], sizes = [8, 128], strides = [1, 1]} : vector<8x512xf32> to vector<8x128xf32>
    %170 = math.tanh %169 : vector<8x128xf32>
    %171 = vector.extract_strided_slice %156 {offsets = [0, 384], sizes = [8, 128], strides = [1, 1]} : vector<8x512xf32> to vector<8x128xf32>
    %172 = arith.negf %171 : vector<8x128xf32>
    %173 = math.exp %172 : vector<8x128xf32>
    %cst_51 = arith.constant 1.000000e+00 : f32
    %174 = vector.broadcast %cst_51 : f32 to vector<8x128xf32>
    %175 = arith.addf %174, %173 : vector<8x128xf32>
    %176 = arith.divf %174, %175 : vector<8x128xf32>
    %177 = arith.mulf %168, %144 : vector<8x128xf32>
    %178 = arith.mulf %162, %170 : vector<8x128xf32>
    %179 = arith.addf %177, %178 : vector<8x128xf32>
    %180 = math.tanh %179 : vector<8x128xf32>
    %181 = arith.mulf %176, %180 : vector<8x128xf32>
    %182 = arith.index_cast %150 : i32 to index
    %c0_52 = arith.constant 0 : index
    %183 = vector.load %arg11[%182, %c0_52] : memref<64x128xf32, #tpu.memory_space<vmem>>, vector<8x128xf32>
    tpu.vector_store %arg11[%182, %c0_52], %181 {strides = array<i32>} : memref<64x128xf32, #tpu.memory_space<vmem>>, vector<8x128xf32>,
    %c5_i32 = arith.constant 5 : i32
    %c8_i32_53 = arith.constant 8 : i32
    %184 = arith.muli %c5_i32, %c8_i32_53 : i32
    %185 = tpu.assume_multiple %184, 8 : i32
    %186 = arith.index_cast %185 : i32 to index
    %c0_54 = arith.constant 0 : index
    %187 = vector.load %arg10[%186, %c0_54] : memref<64x512xf32, #tpu.memory_space<vmem>>, vector<8x512xf32>
    %188 = arith.truncf %181 : vector<8x128xf32> to vector<8x128xbf16>
    %c0_55 = arith.constant 0 : index
    %c0_56 = arith.constant 0 : index
    %189 = vector.load %arg2[%c0_55, %c0_56] : memref<128x512xbf16, #tpu.memory_space<vmem>>, vector<128x512xbf16>
    %cst_57 = arith.constant dense<0.000000e+00> : vector<8x512xf32>
    %190 = tpu.matmul %188, %189, %cst_57 {dimension_numbers = #tpu.dot_dimension_numbers<[1], [0], [0], [1], [0, 0, 1, 1], [], []>} : vector<8x128xbf16>, vector<128x512xbf16>, vector<8x512xf32> -> vector<8x512xf32>
    %191 = arith.addf %187, %190 : vector<8x512xf32>
    %192 = vector.extract_strided_slice %191 {offsets = [0, 0], sizes = [8, 128], strides = [1, 1]} : vector<8x512xf32> to vector<8x128xf32>
    %193 = arith.negf %192 : vector<8x128xf32>
    %194 = math.exp %193 : vector<8x128xf32>
    %cst_58 = arith.constant 1.000000e+00 : f32
    %195 = vector.broadcast %cst_58 : f32 to vector<8x128xf32>
    %196 = arith.addf %195, %194 : vector<8x128xf32>
    %197 = arith.divf %195, %196 : vector<8x128xf32>
    %198 = vector.extract_strided_slice %191 {offsets = [0, 128], sizes = [8, 128], strides = [1, 1]} : vector<8x512xf32> to vector<8x128xf32>
    %199 = arith.negf %198 : vector<8x128xf32>
    %200 = math.exp %199 : vector<8x128xf32>
    %cst_59 = arith.constant 1.000000e+00 : f32
    %201 = vector.broadcast %cst_59 : f32 to vector<8x128xf32>
    %202 = arith.addf %201, %200 : vector<8x128xf32>
    %203 = arith.divf %201, %202 : vector<8x128xf32>
    %204 = vector.extract_strided_slice %191 {offsets = [0, 256], sizes = [8, 128], strides = [1, 1]} : vector<8x512xf32> to vector<8x128xf32>
    %205 = math.tanh %204 : vector<8x128xf32>
    %206 = vector.extract_strided_slice %191 {offsets = [0, 384], sizes = [8, 128], strides = [1, 1]} : vector<8x512xf32> to vector<8x128xf32>
    %207 = arith.negf %206 : vector<8x128xf32>
    %208 = math.exp %207 : vector<8x128xf32>
    %cst_60 = arith.constant 1.000000e+00 : f32
    %209 = vector.broadcast %cst_60 : f32 to vector<8x128xf32>
    %210 = arith.addf %209, %208 : vector<8x128xf32>
    %211 = arith.divf %209, %210 : vector<8x128xf32>
    %212 = arith.mulf %203, %179 : vector<8x128xf32>
    %213 = arith.mulf %197, %205 : vector<8x128xf32>
    %214 = arith.addf %212, %213 : vector<8x128xf32>
    %215 = math.tanh %214 : vector<8x128xf32>
    %216 = arith.mulf %211, %215 : vector<8x128xf32>
    %217 = arith.index_cast %185 : i32 to index
    %c0_61 = arith.constant 0 : index
    %218 = vector.load %arg11[%217, %c0_61] : memref<64x128xf32, #tpu.memory_space<vmem>>, vector<8x128xf32>
    tpu.vector_store %arg11[%217, %c0_61], %216 {strides = array<i32>} : memref<64x128xf32, #tpu.memory_space<vmem>>, vector<8x128xf32>,
    %c6_i32 = arith.constant 6 : i32
    %c8_i32_62 = arith.constant 8 : i32
    %219 = arith.muli %c6_i32, %c8_i32_62 : i32
    %220 = tpu.assume_multiple %219, 8 : i32
    %221 = arith.index_cast %220 : i32 to index
    %c0_63 = arith.constant 0 : index
    %222 = vector.load %arg10[%221, %c0_63] : memref<64x512xf32, #tpu.memory_space<vmem>>, vector<8x512xf32>
    %223 = arith.truncf %216 : vector<8x128xf32> to vector<8x128xbf16>
    %c0_64 = arith.constant 0 : index
    %c0_65 = arith.constant 0 : index
    %224 = vector.load %arg2[%c0_64, %c0_65] : memref<128x512xbf16, #tpu.memory_space<vmem>>, vector<128x512xbf16>
    %cst_66 = arith.constant dense<0.000000e+00> : vector<8x512xf32>
    %225 = tpu.matmul %223, %224, %cst_66 {dimension_numbers = #tpu.dot_dimension_numbers<[1], [0], [0], [1], [0, 0, 1, 1], [], []>} : vector<8x128xbf16>, vector<128x512xbf16>, vector<8x512xf32> -> vector<8x512xf32>
    %226 = arith.addf %222, %225 : vector<8x512xf32>
    %227 = vector.extract_strided_slice %226 {offsets = [0, 0], sizes = [8, 128], strides = [1, 1]} : vector<8x512xf32> to vector<8x128xf32>
    %228 = arith.negf %227 : vector<8x128xf32>
    %229 = math.exp %228 : vector<8x128xf32>
    %cst_67 = arith.constant 1.000000e+00 : f32
    %230 = vector.broadcast %cst_67 : f32 to vector<8x128xf32>
    %231 = arith.addf %230, %229 : vector<8x128xf32>
    %232 = arith.divf %230, %231 : vector<8x128xf32>
    %233 = vector.extract_strided_slice %226 {offsets = [0, 128], sizes = [8, 128], strides = [1, 1]} : vector<8x512xf32> to vector<8x128xf32>
    %234 = arith.negf %233 : vector<8x128xf32>
    %235 = math.exp %234 : vector<8x128xf32>
    %cst_68 = arith.constant 1.000000e+00 : f32
    %236 = vector.broadcast %cst_68 : f32 to vector<8x128xf32>
    %237 = arith.addf %236, %235 : vector<8x128xf32>
    %238 = arith.divf %236, %237 : vector<8x128xf32>
    %239 = vector.extract_strided_slice %226 {offsets = [0, 256], sizes = [8, 128], strides = [1, 1]} : vector<8x512xf32> to vector<8x128xf32>
    %240 = math.tanh %239 : vector<8x128xf32>
    %241 = vector.extract_strided_slice %226 {offsets = [0, 384], sizes = [8, 128], strides = [1, 1]} : vector<8x512xf32> to vector<8x128xf32>
    %242 = arith.negf %241 : vector<8x128xf32>
    %243 = math.exp %242 : vector<8x128xf32>
    %cst_69 = arith.constant 1.000000e+00 : f32
    %244 = vector.broadcast %cst_69 : f32 to vector<8x128xf32>
    %245 = arith.addf %244, %243 : vector<8x128xf32>
    %246 = arith.divf %244, %245 : vector<8x128xf32>
    %247 = arith.mulf %238, %214 : vector<8x128xf32>
    %248 = arith.mulf %232, %240 : vector<8x128xf32>
    %249 = arith.addf %247, %248 : vector<8x128xf32>
    %250 = math.tanh %249 : vector<8x128xf32>
    %251 = arith.mulf %246, %250 : vector<8x128xf32>
    %252 = arith.index_cast %220 : i32 to index
    %c0_70 = arith.constant 0 : index
    %253 = vector.load %arg11[%252, %c0_70] : memref<64x128xf32, #tpu.memory_space<vmem>>, vector<8x128xf32>
    tpu.vector_store %arg11[%252, %c0_70], %251 {strides = array<i32>} : memref<64x128xf32, #tpu.memory_space<vmem>>, vector<8x128xf32>,
    %c7_i32 = arith.constant 7 : i32
    %c8_i32_71 = arith.constant 8 : i32
    %254 = arith.muli %c7_i32, %c8_i32_71 : i32
    %255 = tpu.assume_multiple %254, 8 : i32
    %256 = arith.index_cast %255 : i32 to index
    %c0_72 = arith.constant 0 : index
    %257 = vector.load %arg10[%256, %c0_72] : memref<64x512xf32, #tpu.memory_space<vmem>>, vector<8x512xf32>
    %258 = arith.truncf %251 : vector<8x128xf32> to vector<8x128xbf16>
    %c0_73 = arith.constant 0 : index
    %c0_74 = arith.constant 0 : index
    %259 = vector.load %arg2[%c0_73, %c0_74] : memref<128x512xbf16, #tpu.memory_space<vmem>>, vector<128x512xbf16>
    %cst_75 = arith.constant dense<0.000000e+00> : vector<8x512xf32>
    %260 = tpu.matmul %258, %259, %cst_75 {dimension_numbers = #tpu.dot_dimension_numbers<[1], [0], [0], [1], [0, 0, 1, 1], [], []>} : vector<8x128xbf16>, vector<128x512xbf16>, vector<8x512xf32> -> vector<8x512xf32>
    %261 = arith.addf %257, %260 : vector<8x512xf32>
    %262 = vector.extract_strided_slice %261 {offsets = [0, 0], sizes = [8, 128], strides = [1, 1]} : vector<8x512xf32> to vector<8x128xf32>
    %263 = arith.negf %262 : vector<8x128xf32>
    %264 = math.exp %263 : vector<8x128xf32>
    %cst_76 = arith.constant 1.000000e+00 : f32
    %265 = vector.broadcast %cst_76 : f32 to vector<8x128xf32>
    %266 = arith.addf %265, %264 : vector<8x128xf32>
    %267 = arith.divf %265, %266 : vector<8x128xf32>
    %268 = vector.extract_strided_slice %261 {offsets = [0, 128], sizes = [8, 128], strides = [1, 1]} : vector<8x512xf32> to vector<8x128xf32>
    %269 = arith.negf %268 : vector<8x128xf32>
    %270 = math.exp %269 : vector<8x128xf32>
    %cst_77 = arith.constant 1.000000e+00 : f32
    %271 = vector.broadcast %cst_77 : f32 to vector<8x128xf32>
    %272 = arith.addf %271, %270 : vector<8x128xf32>
    %273 = arith.divf %271, %272 : vector<8x128xf32>
    %274 = vector.extract_strided_slice %261 {offsets = [0, 256], sizes = [8, 128], strides = [1, 1]} : vector<8x512xf32> to vector<8x128xf32>
    %275 = math.tanh %274 : vector<8x128xf32>
    %276 = vector.extract_strided_slice %261 {offsets = [0, 384], sizes = [8, 128], strides = [1, 1]} : vector<8x512xf32> to vector<8x128xf32>
    %277 = arith.negf %276 : vector<8x128xf32>
    %278 = math.exp %277 : vector<8x128xf32>
    %cst_78 = arith.constant 1.000000e+00 : f32
    %279 = vector.broadcast %cst_78 : f32 to vector<8x128xf32>
    %280 = arith.addf %279, %278 : vector<8x128xf32>
    %281 = arith.divf %279, %280 : vector<8x128xf32>
    %282 = arith.mulf %273, %249 : vector<8x128xf32>
    %283 = arith.mulf %267, %275 : vector<8x128xf32>
    %284 = arith.addf %282, %283 : vector<8x128xf32>
    %285 = math.tanh %284 : vector<8x128xf32>
    %286 = arith.mulf %281, %285 : vector<8x128xf32>
    %287 = arith.index_cast %255 : i32 to index
    %c0_79 = arith.constant 0 : index
    %288 = vector.load %arg11[%287, %c0_79] : memref<64x128xf32, #tpu.memory_space<vmem>>, vector<8x128xf32>
    tpu.vector_store %arg11[%287, %c0_79], %286 {strides = array<i32>} : memref<64x128xf32, #tpu.memory_space<vmem>>, vector<8x128xf32>,
    %c8_i32_80 = arith.constant 8 : i32
    %c0_81 = arith.constant 0 : index
    %c0_82 = arith.constant 0 : index
    %289 = vector.load %arg11[%c0_81, %c0_82] : memref<64x128xf32, #tpu.memory_space<vmem>>, vector<64x128xf32>
    %290 = arith.truncf %289 : vector<64x128xf32> to vector<64x128xbf16>
    %c0_83 = arith.constant 0 : index
    %c0_84 = arith.constant 0 : index
    %291 = vector.load %arg4[%c0_83, %c0_84] : memref<128x512xbf16, #tpu.memory_space<vmem>>, vector<128x512xbf16>
    %cst_85 = arith.constant dense<0.000000e+00> : vector<64x512xf32>
    %292 = tpu.matmul %290, %291, %cst_85 {dimension_numbers = #tpu.dot_dimension_numbers<[1], [0], [0], [1], [0, 0, 1, 1], [], []>} : vector<64x128xbf16>, vector<128x512xbf16>, vector<64x512xf32> -> vector<64x512xf32>
    %c0_86 = arith.constant 0 : index
    %c0_87 = arith.constant 0 : index
    %293 = vector.load %arg6[%c0_86, %c0_87] : memref<1x512xf32, #tpu.memory_space<vmem>>, vector<1x512xf32>
    %294 = vector.broadcast %293 : vector<1x512xf32> to vector<64x512xf32>
    %295 = arith.addf %292, %294 : vector<64x512xf32>
    %c0_88 = arith.constant 0 : index
    %c0_89 = arith.constant 0 : index
    %296 = vector.load %arg10[%c0_88, %c0_89] : memref<64x512xf32, #tpu.memory_space<vmem>>, vector<64x512xf32>
    tpu.vector_store %arg10[%c0_88, %c0_89], %295 {strides = array<i32>} : memref<64x512xf32, #tpu.memory_space<vmem>>, vector<64x512xf32>,
    %cst_90 = arith.constant 0.000000e+00 : f32
    %297 = vector.broadcast %cst_90 : f32 to vector<8x128xf32>
    %cst_91 = arith.constant 0.000000e+00 : f32
    %298 = vector.broadcast %cst_91 : f32 to vector<8x128xf32>
    %c0_i32_92 = arith.constant 0 : i32
    %c8_i32_93 = arith.constant 8 : i32
    %299 = arith.muli %c0_i32_92, %c8_i32_93 : i32
    %300 = tpu.assume_multiple %299, 8 : i32
    %301 = arith.index_cast %300 : i32 to index
    %c0_94 = arith.constant 0 : index
    %302 = vector.load %arg10[%301, %c0_94] : memref<64x512xf32, #tpu.memory_space<vmem>>, vector<8x512xf32>
    %303 = arith.truncf %297 : vector<8x128xf32> to vector<8x128xbf16>
    %c0_95 = arith.constant 0 : index
    %c0_96 = arith.constant 0 : index
    %304 = vector.load %arg5[%c0_95, %c0_96] : memref<128x512xbf16, #tpu.memory_space<vmem>>, vector<128x512xbf16>
    %cst_97 = arith.constant dense<0.000000e+00> : vector<8x512xf32>
    %305 = tpu.matmul %303, %304, %cst_97 {dimension_numbers = #tpu.dot_dimension_numbers<[1], [0], [0], [1], [0, 0, 1, 1], [], []>} : vector<8x128xbf16>, vector<128x512xbf16>, vector<8x512xf32> -> vector<8x512xf32>
    %306 = arith.addf %302, %305 : vector<8x512xf32>
    %307 = vector.extract_strided_slice %306 {offsets = [0, 0], sizes = [8, 128], strides = [1, 1]} : vector<8x512xf32> to vector<8x128xf32>
    %308 = arith.negf %307 : vector<8x128xf32>
    %309 = math.exp %308 : vector<8x128xf32>
    %cst_98 = arith.constant 1.000000e+00 : f32
    %310 = vector.broadcast %cst_98 : f32 to vector<8x128xf32>
    %311 = arith.addf %310, %309 : vector<8x128xf32>
    %312 = arith.divf %310, %311 : vector<8x128xf32>
    %313 = vector.extract_strided_slice %306 {offsets = [0, 128], sizes = [8, 128], strides = [1, 1]} : vector<8x512xf32> to vector<8x128xf32>
    %314 = arith.negf %313 : vector<8x128xf32>
    %315 = math.exp %314 : vector<8x128xf32>
    %cst_99 = arith.constant 1.000000e+00 : f32
    %316 = vector.broadcast %cst_99 : f32 to vector<8x128xf32>
    %317 = arith.addf %316, %315 : vector<8x128xf32>
    %318 = arith.divf %316, %317 : vector<8x128xf32>
    %319 = vector.extract_strided_slice %306 {offsets = [0, 256], sizes = [8, 128], strides = [1, 1]} : vector<8x512xf32> to vector<8x128xf32>
    %320 = math.tanh %319 : vector<8x128xf32>
    %321 = vector.extract_strided_slice %306 {offsets = [0, 384], sizes = [8, 128], strides = [1, 1]} : vector<8x512xf32> to vector<8x128xf32>
    %322 = arith.negf %321 : vector<8x128xf32>
    %323 = math.exp %322 : vector<8x128xf32>
    %cst_100 = arith.constant 1.000000e+00 : f32
    %324 = vector.broadcast %cst_100 : f32 to vector<8x128xf32>
    %325 = arith.addf %324, %323 : vector<8x128xf32>
    %326 = arith.divf %324, %325 : vector<8x128xf32>
    %327 = arith.mulf %318, %298 : vector<8x128xf32>
    %328 = arith.mulf %312, %320 : vector<8x128xf32>
    %329 = arith.addf %327, %328 : vector<8x128xf32>
    %330 = math.tanh %329 : vector<8x128xf32>
    %331 = arith.mulf %326, %330 : vector<8x128xf32>
    %332 = arith.index_cast %300 : i32 to index
    %c0_101 = arith.constant 0 : index
    %333 = vector.load %arg11[%332, %c0_101] : memref<64x128xf32, #tpu.memory_space<vmem>>, vector<8x128xf32>
    tpu.vector_store %arg11[%332, %c0_101], %331 {strides = array<i32>} : memref<64x128xf32, #tpu.memory_space<vmem>>, vector<8x128xf32>,
    %c1_i32_102 = arith.constant 1 : i32
    %c8_i32_103 = arith.constant 8 : i32
    %334 = arith.muli %c1_i32_102, %c8_i32_103 : i32
    %335 = tpu.assume_multiple %334, 8 : i32
    %336 = arith.index_cast %335 : i32 to index
    %c0_104 = arith.constant 0 : index
    %337 = vector.load %arg10[%336, %c0_104] : memref<64x512xf32, #tpu.memory_space<vmem>>, vector<8x512xf32>
    %338 = arith.truncf %331 : vector<8x128xf32> to vector<8x128xbf16>
    %c0_105 = arith.constant 0 : index
    %c0_106 = arith.constant 0 : index
    %339 = vector.load %arg5[%c0_105, %c0_106] : memref<128x512xbf16, #tpu.memory_space<vmem>>, vector<128x512xbf16>
    %cst_107 = arith.constant dense<0.000000e+00> : vector<8x512xf32>
    %340 = tpu.matmul %338, %339, %cst_107 {dimension_numbers = #tpu.dot_dimension_numbers<[1], [0], [0], [1], [0, 0, 1, 1], [], []>} : vector<8x128xbf16>, vector<128x512xbf16>, vector<8x512xf32> -> vector<8x512xf32>
    %341 = arith.addf %337, %340 : vector<8x512xf32>
    %342 = vector.extract_strided_slice %341 {offsets = [0, 0], sizes = [8, 128], strides = [1, 1]} : vector<8x512xf32> to vector<8x128xf32>
    %343 = arith.negf %342 : vector<8x128xf32>
    %344 = math.exp %343 : vector<8x128xf32>
    %cst_108 = arith.constant 1.000000e+00 : f32
    %345 = vector.broadcast %cst_108 : f32 to vector<8x128xf32>
    %346 = arith.addf %345, %344 : vector<8x128xf32>
    %347 = arith.divf %345, %346 : vector<8x128xf32>
    %348 = vector.extract_strided_slice %341 {offsets = [0, 128], sizes = [8, 128], strides = [1, 1]} : vector<8x512xf32> to vector<8x128xf32>
    %349 = arith.negf %348 : vector<8x128xf32>
    %350 = math.exp %349 : vector<8x128xf32>
    %cst_109 = arith.constant 1.000000e+00 : f32
    %351 = vector.broadcast %cst_109 : f32 to vector<8x128xf32>
    %352 = arith.addf %351, %350 : vector<8x128xf32>
    %353 = arith.divf %351, %352 : vector<8x128xf32>
    %354 = vector.extract_strided_slice %341 {offsets = [0, 256], sizes = [8, 128], strides = [1, 1]} : vector<8x512xf32> to vector<8x128xf32>
    %355 = math.tanh %354 : vector<8x128xf32>
    %356 = vector.extract_strided_slice %341 {offsets = [0, 384], sizes = [8, 128], strides = [1, 1]} : vector<8x512xf32> to vector<8x128xf32>
    %357 = arith.negf %356 : vector<8x128xf32>
    %358 = math.exp %357 : vector<8x128xf32>
    %cst_110 = arith.constant 1.000000e+00 : f32
    %359 = vector.broadcast %cst_110 : f32 to vector<8x128xf32>
    %360 = arith.addf %359, %358 : vector<8x128xf32>
    %361 = arith.divf %359, %360 : vector<8x128xf32>
    %362 = arith.mulf %353, %329 : vector<8x128xf32>
    %363 = arith.mulf %347, %355 : vector<8x128xf32>
    %364 = arith.addf %362, %363 : vector<8x128xf32>
    %365 = math.tanh %364 : vector<8x128xf32>
    %366 = arith.mulf %361, %365 : vector<8x128xf32>
    %367 = arith.index_cast %335 : i32 to index
    %c0_111 = arith.constant 0 : index
    %368 = vector.load %arg11[%367, %c0_111] : memref<64x128xf32, #tpu.memory_space<vmem>>, vector<8x128xf32>
    tpu.vector_store %arg11[%367, %c0_111], %366 {strides = array<i32>} : memref<64x128xf32, #tpu.memory_space<vmem>>, vector<8x128xf32>,
    %c2_i32_112 = arith.constant 2 : i32
    %c8_i32_113 = arith.constant 8 : i32
    %369 = arith.muli %c2_i32_112, %c8_i32_113 : i32
    %370 = tpu.assume_multiple %369, 8 : i32
    %371 = arith.index_cast %370 : i32 to index
    %c0_114 = arith.constant 0 : index
    %372 = vector.load %arg10[%371, %c0_114] : memref<64x512xf32, #tpu.memory_space<vmem>>, vector<8x512xf32>
    %373 = arith.truncf %366 : vector<8x128xf32> to vector<8x128xbf16>
    %c0_115 = arith.constant 0 : index
    %c0_116 = arith.constant 0 : index
    %374 = vector.load %arg5[%c0_115, %c0_116] : memref<128x512xbf16, #tpu.memory_space<vmem>>, vector<128x512xbf16>
    %cst_117 = arith.constant dense<0.000000e+00> : vector<8x512xf32>
    %375 = tpu.matmul %373, %374, %cst_117 {dimension_numbers = #tpu.dot_dimension_numbers<[1], [0], [0], [1], [0, 0, 1, 1], [], []>} : vector<8x128xbf16>, vector<128x512xbf16>, vector<8x512xf32> -> vector<8x512xf32>
    %376 = arith.addf %372, %375 : vector<8x512xf32>
    %377 = vector.extract_strided_slice %376 {offsets = [0, 0], sizes = [8, 128], strides = [1, 1]} : vector<8x512xf32> to vector<8x128xf32>
    %378 = arith.negf %377 : vector<8x128xf32>
    %379 = math.exp %378 : vector<8x128xf32>
    %cst_118 = arith.constant 1.000000e+00 : f32
    %380 = vector.broadcast %cst_118 : f32 to vector<8x128xf32>
    %381 = arith.addf %380, %379 : vector<8x128xf32>
    %382 = arith.divf %380, %381 : vector<8x128xf32>
    %383 = vector.extract_strided_slice %376 {offsets = [0, 128], sizes = [8, 128], strides = [1, 1]} : vector<8x512xf32> to vector<8x128xf32>
    %384 = arith.negf %383 : vector<8x128xf32>
    %385 = math.exp %384 : vector<8x128xf32>
    %cst_119 = arith.constant 1.000000e+00 : f32
    %386 = vector.broadcast %cst_119 : f32 to vector<8x128xf32>
    %387 = arith.addf %386, %385 : vector<8x128xf32>
    %388 = arith.divf %386, %387 : vector<8x128xf32>
    %389 = vector.extract_strided_slice %376 {offsets = [0, 256], sizes = [8, 128], strides = [1, 1]} : vector<8x512xf32> to vector<8x128xf32>
    %390 = math.tanh %389 : vector<8x128xf32>
    %391 = vector.extract_strided_slice %376 {offsets = [0, 384], sizes = [8, 128], strides = [1, 1]} : vector<8x512xf32> to vector<8x128xf32>
    %392 = arith.negf %391 : vector<8x128xf32>
    %393 = math.exp %392 : vector<8x128xf32>
    %cst_120 = arith.constant 1.000000e+00 : f32
    %394 = vector.broadcast %cst_120 : f32 to vector<8x128xf32>
    %395 = arith.addf %394, %393 : vector<8x128xf32>
    %396 = arith.divf %394, %395 : vector<8x128xf32>
    %397 = arith.mulf %388, %364 : vector<8x128xf32>
    %398 = arith.mulf %382, %390 : vector<8x128xf32>
    %399 = arith.addf %397, %398 : vector<8x128xf32>
    %400 = math.tanh %399 : vector<8x128xf32>
    %401 = arith.mulf %396, %400 : vector<8x128xf32>
    %402 = arith.index_cast %370 : i32 to index
    %c0_121 = arith.constant 0 : index
    %403 = vector.load %arg11[%402, %c0_121] : memref<64x128xf32, #tpu.memory_space<vmem>>, vector<8x128xf32>
    tpu.vector_store %arg11[%402, %c0_121], %401 {strides = array<i32>} : memref<64x128xf32, #tpu.memory_space<vmem>>, vector<8x128xf32>,
    %c3_i32_122 = arith.constant 3 : i32
    %c8_i32_123 = arith.constant 8 : i32
    %404 = arith.muli %c3_i32_122, %c8_i32_123 : i32
    %405 = tpu.assume_multiple %404, 8 : i32
    %406 = arith.index_cast %405 : i32 to index
    %c0_124 = arith.constant 0 : index
    %407 = vector.load %arg10[%406, %c0_124] : memref<64x512xf32, #tpu.memory_space<vmem>>, vector<8x512xf32>
    %408 = arith.truncf %401 : vector<8x128xf32> to vector<8x128xbf16>
    %c0_125 = arith.constant 0 : index
    %c0_126 = arith.constant 0 : index
    %409 = vector.load %arg5[%c0_125, %c0_126] : memref<128x512xbf16, #tpu.memory_space<vmem>>, vector<128x512xbf16>
    %cst_127 = arith.constant dense<0.000000e+00> : vector<8x512xf32>
    %410 = tpu.matmul %408, %409, %cst_127 {dimension_numbers = #tpu.dot_dimension_numbers<[1], [0], [0], [1], [0, 0, 1, 1], [], []>} : vector<8x128xbf16>, vector<128x512xbf16>, vector<8x512xf32> -> vector<8x512xf32>
    %411 = arith.addf %407, %410 : vector<8x512xf32>
    %412 = vector.extract_strided_slice %411 {offsets = [0, 0], sizes = [8, 128], strides = [1, 1]} : vector<8x512xf32> to vector<8x128xf32>
    %413 = arith.negf %412 : vector<8x128xf32>
    %414 = math.exp %413 : vector<8x128xf32>
    %cst_128 = arith.constant 1.000000e+00 : f32
    %415 = vector.broadcast %cst_128 : f32 to vector<8x128xf32>
    %416 = arith.addf %415, %414 : vector<8x128xf32>
    %417 = arith.divf %415, %416 : vector<8x128xf32>
    %418 = vector.extract_strided_slice %411 {offsets = [0, 128], sizes = [8, 128], strides = [1, 1]} : vector<8x512xf32> to vector<8x128xf32>
    %419 = arith.negf %418 : vector<8x128xf32>
    %420 = math.exp %419 : vector<8x128xf32>
    %cst_129 = arith.constant 1.000000e+00 : f32
    %421 = vector.broadcast %cst_129 : f32 to vector<8x128xf32>
    %422 = arith.addf %421, %420 : vector<8x128xf32>
    %423 = arith.divf %421, %422 : vector<8x128xf32>
    %424 = vector.extract_strided_slice %411 {offsets = [0, 256], sizes = [8, 128], strides = [1, 1]} : vector<8x512xf32> to vector<8x128xf32>
    %425 = math.tanh %424 : vector<8x128xf32>
    %426 = vector.extract_strided_slice %411 {offsets = [0, 384], sizes = [8, 128], strides = [1, 1]} : vector<8x512xf32> to vector<8x128xf32>
    %427 = arith.negf %426 : vector<8x128xf32>
    %428 = math.exp %427 : vector<8x128xf32>
    %cst_130 = arith.constant 1.000000e+00 : f32
    %429 = vector.broadcast %cst_130 : f32 to vector<8x128xf32>
    %430 = arith.addf %429, %428 : vector<8x128xf32>
    %431 = arith.divf %429, %430 : vector<8x128xf32>
    %432 = arith.mulf %423, %399 : vector<8x128xf32>
    %433 = arith.mulf %417, %425 : vector<8x128xf32>
    %434 = arith.addf %432, %433 : vector<8x128xf32>
    %435 = math.tanh %434 : vector<8x128xf32>
    %436 = arith.mulf %431, %435 : vector<8x128xf32>
    %437 = arith.index_cast %405 : i32 to index
    %c0_131 = arith.constant 0 : index
    %438 = vector.load %arg11[%437, %c0_131] : memref<64x128xf32, #tpu.memory_space<vmem>>, vector<8x128xf32>
    tpu.vector_store %arg11[%437, %c0_131], %436 {strides = array<i32>} : memref<64x128xf32, #tpu.memory_space<vmem>>, vector<8x128xf32>,
    %c4_i32_132 = arith.constant 4 : i32
    %c8_i32_133 = arith.constant 8 : i32
    %439 = arith.muli %c4_i32_132, %c8_i32_133 : i32
    %440 = tpu.assume_multiple %439, 8 : i32
    %441 = arith.index_cast %440 : i32 to index
    %c0_134 = arith.constant 0 : index
    %442 = vector.load %arg10[%441, %c0_134] : memref<64x512xf32, #tpu.memory_space<vmem>>, vector<8x512xf32>
    %443 = arith.truncf %436 : vector<8x128xf32> to vector<8x128xbf16>
    %c0_135 = arith.constant 0 : index
    %c0_136 = arith.constant 0 : index
    %444 = vector.load %arg5[%c0_135, %c0_136] : memref<128x512xbf16, #tpu.memory_space<vmem>>, vector<128x512xbf16>
    %cst_137 = arith.constant dense<0.000000e+00> : vector<8x512xf32>
    %445 = tpu.matmul %443, %444, %cst_137 {dimension_numbers = #tpu.dot_dimension_numbers<[1], [0], [0], [1], [0, 0, 1, 1], [], []>} : vector<8x128xbf16>, vector<128x512xbf16>, vector<8x512xf32> -> vector<8x512xf32>
    %446 = arith.addf %442, %445 : vector<8x512xf32>
    %447 = vector.extract_strided_slice %446 {offsets = [0, 0], sizes = [8, 128], strides = [1, 1]} : vector<8x512xf32> to vector<8x128xf32>
    %448 = arith.negf %447 : vector<8x128xf32>
    %449 = math.exp %448 : vector<8x128xf32>
    %cst_138 = arith.constant 1.000000e+00 : f32
    %450 = vector.broadcast %cst_138 : f32 to vector<8x128xf32>
    %451 = arith.addf %450, %449 : vector<8x128xf32>
    %452 = arith.divf %450, %451 : vector<8x128xf32>
    %453 = vector.extract_strided_slice %446 {offsets = [0, 128], sizes = [8, 128], strides = [1, 1]} : vector<8x512xf32> to vector<8x128xf32>
    %454 = arith.negf %453 : vector<8x128xf32>
    %455 = math.exp %454 : vector<8x128xf32>
    %cst_139 = arith.constant 1.000000e+00 : f32
    %456 = vector.broadcast %cst_139 : f32 to vector<8x128xf32>
    %457 = arith.addf %456, %455 : vector<8x128xf32>
    %458 = arith.divf %456, %457 : vector<8x128xf32>
    %459 = vector.extract_strided_slice %446 {offsets = [0, 256], sizes = [8, 128], strides = [1, 1]} : vector<8x512xf32> to vector<8x128xf32>
    %460 = math.tanh %459 : vector<8x128xf32>
    %461 = vector.extract_strided_slice %446 {offsets = [0, 384], sizes = [8, 128], strides = [1, 1]} : vector<8x512xf32> to vector<8x128xf32>
    %462 = arith.negf %461 : vector<8x128xf32>
    %463 = math.exp %462 : vector<8x128xf32>
    %cst_140 = arith.constant 1.000000e+00 : f32
    %464 = vector.broadcast %cst_140 : f32 to vector<8x128xf32>
    %465 = arith.addf %464, %463 : vector<8x128xf32>
    %466 = arith.divf %464, %465 : vector<8x128xf32>
    %467 = arith.mulf %458, %434 : vector<8x128xf32>
    %468 = arith.mulf %452, %460 : vector<8x128xf32>
    %469 = arith.addf %467, %468 : vector<8x128xf32>
    %470 = math.tanh %469 : vector<8x128xf32>
    %471 = arith.mulf %466, %470 : vector<8x128xf32>
    %472 = arith.index_cast %440 : i32 to index
    %c0_141 = arith.constant 0 : index
    %473 = vector.load %arg11[%472, %c0_141] : memref<64x128xf32, #tpu.memory_space<vmem>>, vector<8x128xf32>
    tpu.vector_store %arg11[%472, %c0_141], %471 {strides = array<i32>} : memref<64x128xf32, #tpu.memory_space<vmem>>, vector<8x128xf32>,
    %c5_i32_142 = arith.constant 5 : i32
    %c8_i32_143 = arith.constant 8 : i32
    %474 = arith.muli %c5_i32_142, %c8_i32_143 : i32
    %475 = tpu.assume_multiple %474, 8 : i32
    %476 = arith.index_cast %475 : i32 to index
    %c0_144 = arith.constant 0 : index
    %477 = vector.load %arg10[%476, %c0_144] : memref<64x512xf32, #tpu.memory_space<vmem>>, vector<8x512xf32>
    %478 = arith.truncf %471 : vector<8x128xf32> to vector<8x128xbf16>
    %c0_145 = arith.constant 0 : index
    %c0_146 = arith.constant 0 : index
    %479 = vector.load %arg5[%c0_145, %c0_146] : memref<128x512xbf16, #tpu.memory_space<vmem>>, vector<128x512xbf16>
    %cst_147 = arith.constant dense<0.000000e+00> : vector<8x512xf32>
    %480 = tpu.matmul %478, %479, %cst_147 {dimension_numbers = #tpu.dot_dimension_numbers<[1], [0], [0], [1], [0, 0, 1, 1], [], []>} : vector<8x128xbf16>, vector<128x512xbf16>, vector<8x512xf32> -> vector<8x512xf32>
    %481 = arith.addf %477, %480 : vector<8x512xf32>
    %482 = vector.extract_strided_slice %481 {offsets = [0, 0], sizes = [8, 128], strides = [1, 1]} : vector<8x512xf32> to vector<8x128xf32>
    %483 = arith.negf %482 : vector<8x128xf32>
    %484 = math.exp %483 : vector<8x128xf32>
    %cst_148 = arith.constant 1.000000e+00 : f32
    %485 = vector.broadcast %cst_148 : f32 to vector<8x128xf32>
    %486 = arith.addf %485, %484 : vector<8x128xf32>
    %487 = arith.divf %485, %486 : vector<8x128xf32>
    %488 = vector.extract_strided_slice %481 {offsets = [0, 128], sizes = [8, 128], strides = [1, 1]} : vector<8x512xf32> to vector<8x128xf32>
    %489 = arith.negf %488 : vector<8x128xf32>
    %490 = math.exp %489 : vector<8x128xf32>
    %cst_149 = arith.constant 1.000000e+00 : f32
    %491 = vector.broadcast %cst_149 : f32 to vector<8x128xf32>
    %492 = arith.addf %491, %490 : vector<8x128xf32>
    %493 = arith.divf %491, %492 : vector<8x128xf32>
    %494 = vector.extract_strided_slice %481 {offsets = [0, 256], sizes = [8, 128], strides = [1, 1]} : vector<8x512xf32> to vector<8x128xf32>
    %495 = math.tanh %494 : vector<8x128xf32>
    %496 = vector.extract_strided_slice %481 {offsets = [0, 384], sizes = [8, 128], strides = [1, 1]} : vector<8x512xf32> to vector<8x128xf32>
    %497 = arith.negf %496 : vector<8x128xf32>
    %498 = math.exp %497 : vector<8x128xf32>
    %cst_150 = arith.constant 1.000000e+00 : f32
    %499 = vector.broadcast %cst_150 : f32 to vector<8x128xf32>
    %500 = arith.addf %499, %498 : vector<8x128xf32>
    %501 = arith.divf %499, %500 : vector<8x128xf32>
    %502 = arith.mulf %493, %469 : vector<8x128xf32>
    %503 = arith.mulf %487, %495 : vector<8x128xf32>
    %504 = arith.addf %502, %503 : vector<8x128xf32>
    %505 = math.tanh %504 : vector<8x128xf32>
    %506 = arith.mulf %501, %505 : vector<8x128xf32>
    %507 = arith.index_cast %475 : i32 to index
    %c0_151 = arith.constant 0 : index
    %508 = vector.load %arg11[%507, %c0_151] : memref<64x128xf32, #tpu.memory_space<vmem>>, vector<8x128xf32>
    tpu.vector_store %arg11[%507, %c0_151], %506 {strides = array<i32>} : memref<64x128xf32, #tpu.memory_space<vmem>>, vector<8x128xf32>,
    %c6_i32_152 = arith.constant 6 : i32
    %c8_i32_153 = arith.constant 8 : i32
    %509 = arith.muli %c6_i32_152, %c8_i32_153 : i32
    %510 = tpu.assume_multiple %509, 8 : i32
    %511 = arith.index_cast %510 : i32 to index
    %c0_154 = arith.constant 0 : index
    %512 = vector.load %arg10[%511, %c0_154] : memref<64x512xf32, #tpu.memory_space<vmem>>, vector<8x512xf32>
    %513 = arith.truncf %506 : vector<8x128xf32> to vector<8x128xbf16>
    %c0_155 = arith.constant 0 : index
    %c0_156 = arith.constant 0 : index
    %514 = vector.load %arg5[%c0_155, %c0_156] : memref<128x512xbf16, #tpu.memory_space<vmem>>, vector<128x512xbf16>
    %cst_157 = arith.constant dense<0.000000e+00> : vector<8x512xf32>
    %515 = tpu.matmul %513, %514, %cst_157 {dimension_numbers = #tpu.dot_dimension_numbers<[1], [0], [0], [1], [0, 0, 1, 1], [], []>} : vector<8x128xbf16>, vector<128x512xbf16>, vector<8x512xf32> -> vector<8x512xf32>
    %516 = arith.addf %512, %515 : vector<8x512xf32>
    %517 = vector.extract_strided_slice %516 {offsets = [0, 0], sizes = [8, 128], strides = [1, 1]} : vector<8x512xf32> to vector<8x128xf32>
    %518 = arith.negf %517 : vector<8x128xf32>
    %519 = math.exp %518 : vector<8x128xf32>
    %cst_158 = arith.constant 1.000000e+00 : f32
    %520 = vector.broadcast %cst_158 : f32 to vector<8x128xf32>
    %521 = arith.addf %520, %519 : vector<8x128xf32>
    %522 = arith.divf %520, %521 : vector<8x128xf32>
    %523 = vector.extract_strided_slice %516 {offsets = [0, 128], sizes = [8, 128], strides = [1, 1]} : vector<8x512xf32> to vector<8x128xf32>
    %524 = arith.negf %523 : vector<8x128xf32>
    %525 = math.exp %524 : vector<8x128xf32>
    %cst_159 = arith.constant 1.000000e+00 : f32
    %526 = vector.broadcast %cst_159 : f32 to vector<8x128xf32>
    %527 = arith.addf %526, %525 : vector<8x128xf32>
    %528 = arith.divf %526, %527 : vector<8x128xf32>
    %529 = vector.extract_strided_slice %516 {offsets = [0, 256], sizes = [8, 128], strides = [1, 1]} : vector<8x512xf32> to vector<8x128xf32>
    %530 = math.tanh %529 : vector<8x128xf32>
    %531 = vector.extract_strided_slice %516 {offsets = [0, 384], sizes = [8, 128], strides = [1, 1]} : vector<8x512xf32> to vector<8x128xf32>
    %532 = arith.negf %531 : vector<8x128xf32>
    %533 = math.exp %532 : vector<8x128xf32>
    %cst_160 = arith.constant 1.000000e+00 : f32
    %534 = vector.broadcast %cst_160 : f32 to vector<8x128xf32>
    %535 = arith.addf %534, %533 : vector<8x128xf32>
    %536 = arith.divf %534, %535 : vector<8x128xf32>
    %537 = arith.mulf %528, %504 : vector<8x128xf32>
    %538 = arith.mulf %522, %530 : vector<8x128xf32>
    %539 = arith.addf %537, %538 : vector<8x128xf32>
    %540 = math.tanh %539 : vector<8x128xf32>
    %541 = arith.mulf %536, %540 : vector<8x128xf32>
    %542 = arith.index_cast %510 : i32 to index
    %c0_161 = arith.constant 0 : index
    %543 = vector.load %arg11[%542, %c0_161] : memref<64x128xf32, #tpu.memory_space<vmem>>, vector<8x128xf32>
    tpu.vector_store %arg11[%542, %c0_161], %541 {strides = array<i32>} : memref<64x128xf32, #tpu.memory_space<vmem>>, vector<8x128xf32>,
    %c7_i32_162 = arith.constant 7 : i32
    %c8_i32_163 = arith.constant 8 : i32
    %544 = arith.muli %c7_i32_162, %c8_i32_163 : i32
    %545 = tpu.assume_multiple %544, 8 : i32
    %546 = arith.index_cast %545 : i32 to index
    %c0_164 = arith.constant 0 : index
    %547 = vector.load %arg10[%546, %c0_164] : memref<64x512xf32, #tpu.memory_space<vmem>>, vector<8x512xf32>
    %548 = arith.truncf %541 : vector<8x128xf32> to vector<8x128xbf16>
    %c0_165 = arith.constant 0 : index
    %c0_166 = arith.constant 0 : index
    %549 = vector.load %arg5[%c0_165, %c0_166] : memref<128x512xbf16, #tpu.memory_space<vmem>>, vector<128x512xbf16>
    %cst_167 = arith.constant dense<0.000000e+00> : vector<8x512xf32>
    %550 = tpu.matmul %548, %549, %cst_167 {dimension_numbers = #tpu.dot_dimension_numbers<[1], [0], [0], [1], [0, 0, 1, 1], [], []>} : vector<8x128xbf16>, vector<128x512xbf16>, vector<8x512xf32> -> vector<8x512xf32>
    %551 = arith.addf %547, %550 : vector<8x512xf32>
    %552 = vector.extract_strided_slice %551 {offsets = [0, 0], sizes = [8, 128], strides = [1, 1]} : vector<8x512xf32> to vector<8x128xf32>
    %553 = arith.negf %552 : vector<8x128xf32>
    %554 = math.exp %553 : vector<8x128xf32>
    %cst_168 = arith.constant 1.000000e+00 : f32
    %555 = vector.broadcast %cst_168 : f32 to vector<8x128xf32>
    %556 = arith.addf %555, %554 : vector<8x128xf32>
    %557 = arith.divf %555, %556 : vector<8x128xf32>
    %558 = vector.extract_strided_slice %551 {offsets = [0, 128], sizes = [8, 128], strides = [1, 1]} : vector<8x512xf32> to vector<8x128xf32>
    %559 = arith.negf %558 : vector<8x128xf32>
    %560 = math.exp %559 : vector<8x128xf32>
    %cst_169 = arith.constant 1.000000e+00 : f32
    %561 = vector.broadcast %cst_169 : f32 to vector<8x128xf32>
    %562 = arith.addf %561, %560 : vector<8x128xf32>
    %563 = arith.divf %561, %562 : vector<8x128xf32>
    %564 = vector.extract_strided_slice %551 {offsets = [0, 256], sizes = [8, 128], strides = [1, 1]} : vector<8x512xf32> to vector<8x128xf32>
    %565 = math.tanh %564 : vector<8x128xf32>
    %566 = vector.extract_strided_slice %551 {offsets = [0, 384], sizes = [8, 128], strides = [1, 1]} : vector<8x512xf32> to vector<8x128xf32>
    %567 = arith.negf %566 : vector<8x128xf32>
    %568 = math.exp %567 : vector<8x128xf32>
    %cst_170 = arith.constant 1.000000e+00 : f32
    %569 = vector.broadcast %cst_170 : f32 to vector<8x128xf32>
    %570 = arith.addf %569, %568 : vector<8x128xf32>
    %571 = arith.divf %569, %570 : vector<8x128xf32>
    %572 = arith.mulf %563, %539 : vector<8x128xf32>
    %573 = arith.mulf %557, %565 : vector<8x128xf32>
    %574 = arith.addf %572, %573 : vector<8x128xf32>
    %575 = math.tanh %574 : vector<8x128xf32>
    %576 = arith.mulf %571, %575 : vector<8x128xf32>
    %577 = arith.index_cast %545 : i32 to index
    %c0_171 = arith.constant 0 : index
    %578 = vector.load %arg11[%577, %c0_171] : memref<64x128xf32, #tpu.memory_space<vmem>>, vector<8x128xf32>
    tpu.vector_store %arg11[%577, %c0_171], %576 {strides = array<i32>} : memref<64x128xf32, #tpu.memory_space<vmem>>, vector<8x128xf32>,
    %c8_i32_172 = arith.constant 8 : i32
    %c0_173 = arith.constant 0 : index
    %c0_174 = arith.constant 0 : index
    %579 = vector.load %arg11[%c0_173, %c0_174] : memref<64x128xf32, #tpu.memory_space<vmem>>, vector<64x128xf32>
    %580 = arith.truncf %579 : vector<64x128xf32> to vector<64x128xbf16>
    %c0_175 = arith.constant 0 : index
    %c0_176 = arith.constant 0 : index
    %581 = vector.load %arg7[%c0_175, %c0_176] : memref<128x128xbf16, #tpu.memory_space<vmem>>, vector<128x128xbf16>
    %cst_177 = arith.constant dense<0.000000e+00> : vector<64x128xf32>
    %582 = tpu.matmul %580, %581, %cst_177 {dimension_numbers = #tpu.dot_dimension_numbers<[1], [0], [0], [1], [0, 0, 1, 1], [], []>} : vector<64x128xbf16>, vector<128x128xbf16>, vector<64x128xf32> -> vector<64x128xf32>
    %c0_178 = arith.constant 0 : index
    %c0_179 = arith.constant 0 : index
    %583 = vector.load %arg8[%c0_178, %c0_179] : memref<1x128xf32, #tpu.memory_space<vmem>>, vector<1x128xf32>
    %584 = vector.broadcast %583 : vector<1x128xf32> to vector<64x128xf32>
    %585 = arith.addf %582, %584 : vector<64x128xf32>
    %c0_180 = arith.constant 0 : index
    %c0_181 = arith.constant 0 : index
    %586 = vector.load %arg9[%c0_180, %c0_181] : memref<64x128xf32, #tpu.memory_space<vmem>>, vector<64x128xf32>
    tpu.vector_store %arg9[%c0_180, %c0_181], %585 {strides = array<i32>} : memref<64x128xf32, #tpu.memory_space<vmem>>, vector<64x128xf32>,
    return
  }
}

</mosaic_0001>

<bundles_post_ra>
// kernel: decoder_forward.1
= control target key start
LH: loop header
LB: loop body
LE: loop exit
PB: predicated region body
PF: predicated region fallthrough
CT: control target
= control target key end

     0   :  { %14 = vsyncpa [#allocation5], 0  ;;  %s11394_s0 = inlined_call_operand.vmem [shape: bf16[64,32], index: 0, kind: input, shape index: {}]   ;;  %s11395_s1 = inlined_call_operand.hbm [shape: bf16[32,512], index: 1, kind: input, shape index: {}]   ;;  %s11396_s2 = inlined_call_operand.vmem [shape: bf16[128,512], index: 2, kind: input, shape index: {}]   ;;  %s11397_s3 = inlined_call_operand.vmem [shape: f32[1,512], index: 3, kind: input, shape index: {}]   ;;  %s11398_s4 = inlined_call_operand.hbm [shape: bf16[128,512], index: 4, kind: input, shape index: {}]   ;;  %s11399_s5 = inlined_call_operand.hbm [shape: bf16[128,512], index: 5, kind: input, shape index: {}]   ;;  %s11400_s6 = inlined_call_operand.vmem [shape: f32[1,512], index: 6, kind: input, shape index: {}]   ;;  %s11401_s7 = inlined_call_operand.hbm [shape: bf16[128,128], index: 7, kind: input, shape index: {}]   ;;  %s11402_s8 = inlined_call_operand.vmem [shape: f32[1,128], index: 8, kind: input, shape index: {}]   ;;  %s11403_s9 = inlined_call_operand.vmem [shape: f32[64,128], index: 9, kind: output, shape index: {}]  }
   0x1   :  { %15 = vsyncpa [#allocation7], 0 }
   0x2   :  { %16 = vsyncpa [#allocation10], 0  ;;  %s40_s11 = sshll.u32 %s11398_s4, 4  ;;  %s9193_s12 = smov [#allocation6]   ;;  %s41_s11 = int_to_ptr.hbm [resolvable:$true] %s40_s11 }
   0x3   :  { %s42_s13 = sshll.u32 %s9193_s12, 4  ;;  %s23_s16 = sshll.u32 %s11395_s1, 4  ;;  %s43_s13 = int_to_ptr.vmem [resolvable:$true] %s42_s13  ;;  %s24_s16 = int_to_ptr.hbm [resolvable:$true] %s23_s16 }
   0x4   :  { %s9194_s17 = smov 256   ;;  %s9195_s18 = smov 16  }
   0x5   :  { %48 = dma.hbm_to_vmem [thread:$0]  %s41_s11, 4096, %s43_s13, [#allocation7], %s9194_s17, %s9194_s17, %s9195_s18  }
   0x6   :  { %s9196_s19 = smov [#allocation4]   ;;  %s53_s23 = sshll.u32 %s11399_s5, 4  ;;  %s54_s23 = int_to_ptr.hbm [resolvable:$true] %s53_s23 }
   0x7   :  { %s25_s20 = sshll.u32 %s9196_s19, 4  ;;  %s68_s25 = sshll.u32 %s11401_s7, 4  ;;  %s26_s20 = int_to_ptr.vmem [resolvable:$true] %s25_s20  ;;  %s69_s25 = int_to_ptr.hbm [resolvable:$true] %s68_s25 }
   0x8   :  { %31 = dma.hbm_to_vmem [thread:$0]  %s24_s16, 1024, %s26_s20, [#allocation5], %s9194_s17, %s9194_s17, %s9195_s18  }
   0x9   :  { %s9197_s26 = smov [#allocation8]   ;;  %s9198_s1 = smov [#allocation9]  }
   0xa   :  { %s55_s27 = sshll.u32 %s9197_s26, 4  ;;  %s70_s28 = sshll.u32 %s9198_s1, 4  ;;  %s56_s27 = int_to_ptr.vmem [resolvable:$true] %s55_s27  ;;  %s71_s28 = int_to_ptr.vmem [resolvable:$true] %s70_s28 }
   0xb   :  { %61 = dma.hbm_to_vmem [thread:$0]  %s54_s23, 4096, %s56_s27, [#allocation7], %s9194_s17, %s9194_s17, %s9195_s18  }
   0xc   :  { %s9199_s29 = smov 64   ;;  %s9200_s30 = smov 4  }
   0xd   :  { %76 = dma.hbm_to_vmem [thread:$0]  %s69_s25, 1024, %s71_s28, [#allocation10], %s9199_s29, %s9199_s29, %s9200_s30  }
   0xe   :  { %9187 = dma.done.wait [#allocation5], 1024  }
   0xf   :  { %9188 = vsyncadd [#allocation5], 4294966272 }
  0x10   :  { %9189 = dma.done.wait [#allocation7], 8192  }
  0x11   :  { %9190 = vsyncadd [#allocation7], 4294959104 }
  0x12   :  { %9191 = dma.done.wait [#allocation10], 1024  }
  0x13   :  { %9192 = vsyncadd [#allocation10], 4294966272  ;;  %v5971_v0 = vld [vmem:[#allocation4 + $0x20] sm:$0xf]  ;;  %v8267_v1 = vld [vmem:[#allocation4 + $0x2c] sm:$0xf0] }
  0x14   :  { %v5979_v2 = vld [vmem:[#allocation4 + $0x28] sm:$0xf]  ;;  %v5972_v3 = vor.u32 %v8267_v1, %v5971_v0  ;;  %v8268_v4 = vld [vmem:[#allocation4 + $0x34] sm:$0xf0]  ;;  %v5955_v5 = vld [vmem:[#allocation4] sm:$0xf] }
  0x15   :  { %v8263_v6 = vld [vmem:[#allocation4 + $0xc] sm:$0xf0]  ;;  %v5980_v7 = vor.u32 %v8268_v4, %v5979_v2  ;;  %v5963_v8 = vld [vmem:[#allocation4 + $0x8] sm:$0xf]  ;;  %v8264_v9 = vld [vmem:[#allocation4 + $0x14] sm:$0xf0] }
  0x16   :  { %8821 = vmatpush.bf16.msra.mxu1 %v5972_v3  ;;  %8822 = vmatpush.bf16.msra.mxu3 %v5972_v3  ;;  %v5956_v10 = vor.u32 %v8263_v6, %v5955_v5  ;;  %v8265_v11 = vld [vmem:[#allocation4 + $0x24] sm:$0xf]  ;;  %v5973_v12 = vld [vmem:[#allocation4 + $0x30] sm:$0xf0]  ;;  %v5964_v13 = vor.u32 %v8264_v9, %v5963_v8  ;;  %v9272_v15 = vld [vmem:[%s11394_s0 + $0x18] sm:$0xff]  ;;  %vm182_vm0 = vcmask 261120  }
  0x17   :  { %259 = vmatpush.bf16.msra.mxu2 %v5980_v7  ;;  %v9267_v14 = vld [vmem:[%s11394_s0 + $0x10] sm:$0xff]  ;;  %v5976_v16 = vor.u32 %v8265_v11, %v5973_v12  ;;  %v8266_v17 = vld [vmem:[#allocation4 + $0x2c] sm:$0xf]  ;;  %v5981_v18 = vld [vmem:[#allocation4 + $0x38] sm:$0xf0]  ;;  %201 = vmatpush.bf16.msra.mxu0 %v5972_v3 }
  0x18   :  { %v5984_v19 = vor.u32 %v8266_v17, %v5981_v18  ;;  %v8261_v20 = vld [vmem:[#allocation4 + $0x4] sm:$0xf]  ;;  %v5957_v21 = vld [vmem:[#allocation4 + $0x10] sm:$0xf0]  ;;  %v6115_v22 = vld [vmem:[%s11396_s2 + $0xe0] sm:$0xf] }
  0x19   :  { %v8299_v23 = vld [vmem:[%s11396_s2 + $0xec] sm:$0xf0]  ;;  %v8262_v24 = vld [vmem:[#allocation4 + $0xc] sm:$0xf]  ;;  %v5965_v25 = vld [vmem:[#allocation4 + $0x18] sm:$0xf0]  ;;  %v5960_v30 = vor.u32 %v8261_v20, %v5957_v21 }
  0x1a   :  { %8823 = vmatpush.bf16.msra.mxu1 %v5956_v10  ;;  %8824 = vmatpush.bf16.msra.mxu3 %v5956_v10  ;;  %v9283_v26 = vld [vmem:[%s11394_s0] sm:$0xff]  ;;  %v6116_v27 = vor.u32 %v8299_v23, %v6115_v22  ;;  %v6117_v29 = vld [vmem:[%s11396_s2 + $0xf0] sm:$0xf0]  ;;  %v8295_v32 = vld [vmem:[%s11396_s2 + $0xcc] sm:$0xf0]  ;;  %v5968_v34 = vor.u32 %v8262_v24, %v5965_v25 }
  0x1b   :  { %v8297_v28 = vld [vmem:[%s11396_s2 + $0xe4] sm:$0xf]  ;;  %260 = vmatpush.bf16.msra.mxu2 %v5964_v13  ;;  %v6099_v31 = vld [vmem:[%s11396_s2 + $0xc0] sm:$0xf]  ;;  %v8298_v33 = vld [vmem:[%s11396_s2 + $0xec] sm:$0xf]  ;;  %202 = vmatpush.bf16.msra.mxu0 %v5956_v10 }
  0x1c   :  { %v6120_v35 = vor.u32 %v8297_v28, %v6117_v29  ;;  %v6125_v36 = vld [vmem:[%s11396_s2 + $0xf8] sm:$0xf0]  ;;  %v6100_v37 = vor.u32 %v8295_v32, %v6099_v31  ;;  %v8293_v39 = vld [vmem:[%s11396_s2 + $0xc4] sm:$0xf]  ;;  %v6101_v40 = vld [vmem:[%s11396_s2 + $0xd0] sm:$0xf0] }
  0x1d   :  { %5987 = vmatmul.msk.bf16.vlgmr.msra.gmra.mxu1 %vm182_vm0, %v9267_v14  ;;  %5988 = vmatmul.msk.bf16.vlgmr.msra.gmra.mxu3 %vm182_vm0, %v9272_v15  ;;  %v6128_v38 = vor.u32 %v8298_v33, %v6125_v36  ;;  %v6083_v41 = vld [vmem:[%s11396_s2 + $0xa0] sm:$0xf]  ;;  %v8291_v42 = vld [vmem:[%s11396_s2 + $0xac] sm:$0xf0]  ;;  %v8294_v43 = vld [vmem:[%s11396_s2 + $0xcc] sm:$0xf]  ;;  %v6104_v45 = vor.u32 %v8293_v39, %v6101_v40 }
  0x1e   :  { %230 = vmatpush.bf16.msrb.mxu1 %v5976_v16  ;;  %288 = vmatpush.bf16.msrb.mxu3 %v5984_v19  ;;  %v6109_v44 = vld [vmem:[%s11396_s2 + $0xd8] sm:$0xf0]  ;;  %v6084_v46 = vor.u32 %v8291_v42, %v6083_v41  ;;  %v6067_v48 = vld [vmem:[%s11396_s2 + $0x80] sm:$0xf]  ;;  %v8289_v49 = vld [vmem:[%s11396_s2 + $0xa4] sm:$0xf] }
  0x1f   :  { %542 = vmatpush.bf16.msrb.mxu2 %v6116_v27  ;;  %v6112_v47 = vor.u32 %v8294_v43, %v6109_v44  ;;  %v6085_v50 = vld [vmem:[%s11396_s2 + $0xb0] sm:$0xf0]  ;;  %v8287_v51 = vld [vmem:[%s11396_s2 + $0x8c] sm:$0xf0]  ;;  %v8290_v52 = vld [vmem:[%s11396_s2 + $0xac] sm:$0xf]  ;;  %5985 = vmatmul.msk.bf16.vlgmr.msra.gmra.mxu0 %vm182_vm0, %v9283_v26 }
  0x20   :  { %5993 = vmatmul.msk.bf16.vlgmr.msra.gmra.mxu2 %vm182_vm0, %v9283_v26  ;;  %v6093_v53 = vld [vmem:[%s11396_s2 + $0xb8] sm:$0xf0]  ;;  %v6088_v54 = vor.u32 %v8289_v49, %v6085_v50  ;;  %v6068_v55 = vor.u32 %v8287_v51, %v6067_v48  ;;  %v8285_v57 = vld [vmem:[%s11396_s2 + $0x84] sm:$0xf]  ;;  %v6069_v58 = vld [vmem:[%s11396_s2 + $0x90] sm:$0xf0] }
  0x21   :  { %v6096_v56 = vor.u32 %v8290_v52, %v6093_v53  ;;  %v8286_v59 = vld [vmem:[%s11396_s2 + $0x8c] sm:$0xf]  ;;  %v6077_v60 = vld [vmem:[%s11396_s2 + $0x98] sm:$0xf0]  ;;  %v6051_v61 = vld [vmem:[%s11396_s2 + $0x60] sm:$0xf]  ;;  %v6072_v63 = vor.u32 %v8285_v57, %v6069_v58 }
  0x22   :  { %231 = vmatpush.bf16.msrb.mxu1 %v5960_v30  ;;  %289 = vmatpush.bf16.msrb.mxu3 %v5968_v34  ;;  %v8283_v62 = vld [vmem:[%s11396_s2 + $0x6c] sm:$0xf0]  ;;  %v8258_v0 = vld [vmem:[%s11394_s0 + $0x8] sm:$0xff]  ;;  %v6080_v1 = vor.u32 %v8286_v59, %v6077_v60  ;;  %v6035_v3 = vld [vmem:[%s11396_s2 + $0x40] sm:$0xf] }
  0x23   :  { %543 = vmatpush.bf16.msrb.mxu2 %v6100_v37  ;;  %v6052_v2 = vor.u32 %v8283_v62, %v6051_v61  ;;  %v8279_v4 = vld [vmem:[%s11396_s2 + $0x4c] sm:$0xf0]  ;;  %v8281_v5 = vld [vmem:[%s11396_s2 + $0x64] sm:$0xf]  ;;  %v6053_v6 = vld [vmem:[%s11396_s2 + $0x70] sm:$0xf0] }
  0x24   :  { %v6036_v7 = vor.u32 %v8279_v4, %v6035_v3  ;;  %v6019_v8 = vld [vmem:[%s11396_s2 + $0x20] sm:$0xf]  ;;  %v6056_v9 = vor.u32 %v8281_v5, %v6053_v6  ;;  %v8282_v10 = vld [vmem:[%s11396_s2 + $0x6c] sm:$0xf]  ;;  %v6061_v11 = vld [vmem:[%s11396_s2 + $0x78] sm:$0xf0] }
  0x25   :  { %v8275_v12 = vld [vmem:[%s11396_s2 + $0x2c] sm:$0xf0]  ;;  %v6064_v13 = vor.u32 %v8282_v10, %v6061_v11  ;;  %v8277_v16 = vld [vmem:[%s11396_s2 + $0x44] sm:$0xf]  ;;  %v6037_v17 = vld [vmem:[%s11396_s2 + $0x50] sm:$0xf0] }
  0x26   :  { %555 = vmatpush.bf16.msra.mxu1 %v6120_v35  ;;  %581 = vmatpush.bf16.msra.mxu3 %v6128_v38  ;;  %v6040_v18 = vor.u32 %v8277_v16, %v6037_v17  ;;  %v8278_v19 = vld [vmem:[%s11396_s2 + $0x4c] sm:$0xf]  ;;  %v6045_v20 = vld [vmem:[%s11396_s2 + $0x58] sm:$0xf0]  ;;  %v6020_v21 = vor.u32 %v8275_v12, %v6019_v8  ;;  %v6003_v23 = vld [vmem:[%s11396_s2] sm:$0xf] }
  0x27   :  { %544 = vmatpush.bf16.msrb.mxu2 %v6084_v46  ;;  %v6048_v22 = vor.u32 %v8278_v19, %v6045_v20  ;;  %v8271_v24 = vld [vmem:[%s11396_s2 + $0xc] sm:$0xf0]  ;;  %v6123_v25 = vld [vmem:[%s11396_s2 + $0xe8] sm:$0xf]  ;;  %v8296_v30 = vld [vmem:[%s11396_s2 + $0xd4] sm:$0xf0] }
  0x28   :  { %v6004_v27 = vor.u32 %v8271_v24, %v6003_v23  ;;  %v6107_v29 = vld [vmem:[%s11396_s2 + $0xc8] sm:$0xf]  ;;  %v8292_v33 = vld [vmem:[%s11396_s2 + $0xb4] sm:$0xf0]  ;;  %v8273_v34 = vld [vmem:[%s11396_s2 + $0x24] sm:$0xf] }
  0x29   :  { %v6108_v31 = vor.u32 %v8296_v30, %v6107_v29  ;;  %v6091_v32 = vld [vmem:[%s11396_s2 + $0xa8] sm:$0xf]  ;;  %v6021_v35 = vld [vmem:[%s11396_s2 + $0x30] sm:$0xf0]  ;;  %v8274_v37 = vld [vmem:[%s11396_s2 + $0x2c] sm:$0xf] }
  0x2a   :  { %556 = vmatpush.bf16.msra.mxu1 %v6104_v45  ;;  %582 = vmatpush.bf16.msra.mxu3 %v6112_v47  ;;  %v6024_v36 = vor.u32 %v8273_v34, %v6021_v35  ;;  %v6029_v38 = vld [vmem:[%s11396_s2 + $0x38] sm:$0xf0]  ;;  %v6092_v39 = vor.u32 %v8292_v33, %v6091_v32  ;;  %v8269_v41 = vld [vmem:[%s11396_s2 + $0x4] sm:$0xf]  ;;  %v6005_v42 = vld [vmem:[%s11396_s2 + $0x10] sm:$0xf0] }
  0x2b   :  { %545 = vmatpush.bf16.msrb.mxu2 %v6068_v55  ;;  %v6032_v40 = vor.u32 %v8274_v37, %v6029_v38  ;;  %v6075_v43 = vld [vmem:[%s11396_s2 + $0x88] sm:$0xf]  ;;  %v8288_v44 = vld [vmem:[%s11396_s2 + $0x94] sm:$0xf0]  ;;  %v6008_v45 = vor.u32 %v8269_v41, %v6005_v42  ;;  %v8270_v46 = vld [vmem:[%s11396_s2 + $0xc] sm:$0xf] }
  0x2c   :  { %v6013_v47 = vld [vmem:[%s11396_s2 + $0x18] sm:$0xf0]  ;;  %v6076_v49 = vor.u32 %v8288_v44, %v6075_v43  ;;  %v6059_v50 = vld [vmem:[%s11396_s2 + $0x68] sm:$0xf]  ;;  %v8284_v51 = vld [vmem:[%s11396_s2 + $0x74] sm:$0xf0] }
  0x2d   :  { %5989 = vmatmul.msk.bf16.vlgmr.msrb.gmra.mxu1 %vm182_vm0, %v9283_v26  ;;  %5997 = vmatmul.msk.bf16.vlgmr.msrb.gmra.mxu3 %vm182_vm0, %v9283_v26  ;;  %v8300_v26 = vld [vmem:[%s11396_s2 + $0xf4] sm:$0xf0]  ;;  %v6016_v48 = vor.u32 %v8270_v46, %v6013_v47  ;;  %v6060_v52 = vor.u32 %v8284_v51, %v6059_v50  ;;  %v6043_v53 = vld [vmem:[%s11396_s2 + $0x48] sm:$0xf]  ;;  %v9201_v61 = vmov 0  }
  0x2e   :  { %557 = vmatpush.bf16.msra.mxu1 %v6088_v54  ;;  %583 = vmatpush.bf16.msra.mxu3 %v6096_v56  ;;  %v6124_v28 = vor.u32 %v8300_v26, %v6123_v25  ;;  %v8280_v54 = vld [vmem:[%s11396_s2 + $0x54] sm:$0xf0]  ;;  %v6027_v56 = vld [vmem:[%s11396_s2 + $0x28] sm:$0xf]  ;;  %v112_v4 = vld [vmem:[%s11397_s3] sm:$0xf] }
  0x2f   :  { %546 = vmatpush.bf16.msrb.mxu2 %v6052_v2  ;;  %5986 = vmatmul.msk.bf16.gmra.mxu0 %vm182_vm0, %v8258_v0  ;;  %v6044_v55 = vor.u32 %v8280_v54, %v6043_v53  ;;  %v8276_v57 = vld [vmem:[%s11396_s2 + $0x34] sm:$0xf0]  ;;  %v6011_v59 = vld [vmem:[%s11396_s2 + $0x8] sm:$0xf]  ;;  %v9523_v5 = vperm.slane %v112_v4, 2  ;;  %v9534_v11 = vperm.slane %v112_v4, 1 }
  0x30   :  { %5994 = vmatmul.msk.bf16.gmra.mxu2 %vm182_vm0, %v8258_v0  ;;  %v6028_v58 = vor.u32 %v8276_v57, %v6027_v56  ;;  %v9541_v17 = vperm.slane %v112_v4, 3  ;;  %v6246_v32 = vld [vmem:[%s11396_s2 + $0xe0] sm:$0xf]  ;;  %v8331_v33 = vld [vmem:[%s11396_s2 + $0xec] sm:$0xf0] }
  0x31   :  { %v8329_v34 = vld [vmem:[%s11396_s2 + $0xe4] sm:$0xf]  ;;  %v6248_v37 = vld [vmem:[%s11396_s2 + $0xf0] sm:$0xf0]  ;;  %v6254_v38 = vld [vmem:[%s11396_s2 + $0xe8] sm:$0xf] }
  0x32   :  { %558 = vmatpush.bf16.msra.mxu1 %v6072_v63  ;;  %584 = vmatpush.bf16.msra.mxu3 %v6080_v1  ;;  %v6251_v41 = vor.u32 %v8329_v34, %v6248_v37  ;;  %v8330_v43 = vld [vmem:[%s11396_s2 + $0xec] sm:$0xf]  ;;  %v6256_v44 = vld [vmem:[%s11396_s2 + $0xf8] sm:$0xf0]  ;;  %v6230_v50 = vld [vmem:[%s11396_s2 + $0xc0] sm:$0xf] }
  0x33   :  { %547 = vmatpush.bf16.msrb.mxu2 %v6036_v7  ;;  %v6259_v47 = vor.u32 %v8330_v43, %v6256_v44  ;;  %v8327_v51 = vld [vmem:[%s11396_s2 + $0xcc] sm:$0xf0]  ;;  %v6232_v54 = vld [vmem:[%s11396_s2 + $0xd0] sm:$0xf0]  ;;  %v8328_v56 = vld [vmem:[%s11396_s2 + $0xd4] sm:$0xf0] }
  0x34   :  { %v6231_v53 = vor.u32 %v8327_v51, %v6230_v50  ;;  %v6198_v44 = vld [vmem:[%s11396_s2 + $0x80] sm:$0xf]  ;;  %v6200_v51 = vld [vmem:[%s11396_s2 + $0x90] sm:$0xf0] }
  0x36   :  { %559 = vmatpush.bf16.msra.mxu1 %v6056_v9  ;;  %585 = vmatpush.bf16.msra.mxu3 %v6064_v13 }
  0x37   :  { %548 = vmatpush.bf16.msrb.mxu2 %v6020_v21 }
  0x3a   :  { %560 = vmatpush.bf16.msra.mxu1 %v6040_v18  ;;  %586 = vmatpush.bf16.msra.mxu3 %v6048_v22 }
  0x3b   :  { %549 = vmatpush.bf16.msrb.mxu2 %v6004_v27 }
  0x3d   :  { %5990 = vmatmul.msk.bf16.gmra.mxu1 %vm182_vm0, %v8258_v0  ;;  %5998 = vmatmul.msk.bf16.gmra.mxu3 %vm182_vm0, %v8258_v0 }
  0x3e   :  { %561 = vmatpush.bf16.msra.mxu1 %v6024_v36  ;;  %587 = vmatpush.bf16.msra.mxu3 %v6032_v40  ;;  %v6247_v36 = vor.u32 %v8331_v33, %v6246_v32  ;;  %v8324_v32 = vld [vmem:[%s11396_s2 + $0xb4] sm:$0xf0] }
  0x3f   :  { %568 = vmatpush.bf16.msra.mxu2 %v6124_v28 }
  0x40   :  { %5995 = vmatmul.msk.bf16.gmra.mxu2 %vm182_vm0, %v9267_v14  ;;  %862 = vmatpush.bf16.msrb.mxu0 %v6247_v36 }
  0x42   :  { %562 = vmatpush.bf16.msra.mxu1 %v6008_v45  ;;  %588 = vmatpush.bf16.msra.mxu3 %v6016_v48  ;;  %v9594_v45 = vperm.slane %v112_v4, 0 }
  0x43   :  { %569 = vmatpush.bf16.msra.mxu2 %v6108_v31 }
  0x44   :  { %863 = vmatpush.bf16.msrb.mxu0 %v6231_v53 }
  0x46   :  { %875 = vmatpush.bf16.msrb.mxu1 %v6251_v41  ;;  %901 = vmatpush.bf16.msrb.mxu3 %v6259_v47  ;;  %v8317_v47 = vld [vmem:[%s11396_s2 + $0x84] sm:$0xf] }
  0x47   :  { %570 = vmatpush.bf16.msra.mxu2 %v6092_v39  ;;  %v8332_v39 = vld [vmem:[%s11396_s2 + $0xf4] sm:$0xf0]  ;;  %v6203_v53 = vor.u32 %v8317_v47, %v6200_v51  ;;  %v6168_v47 = vld [vmem:[%s11396_s2 + $0x50] sm:$0xf0] }
  0x48   :  { %v6255_v42 = vor.u32 %v8332_v39, %v6254_v38  ;;  %v8322_v38 = vld [vmem:[%s11396_s2 + $0xac] sm:$0xf]  ;;  %v6224_v39 = vld [vmem:[%s11396_s2 + $0xb8] sm:$0xf0] }
  0x49   :  { %v6227_v43 = vor.u32 %v8322_v38, %v6224_v39 }
  0x4b   :  { %571 = vmatpush.bf16.msra.mxu2 %v6076_v49 }
  0x4d   :  { %5991 = vmatmul.msk.bf16.gmra.mxu1 %vm182_vm0, %v9267_v14  ;;  %5999 = vmatmul.msk.bf16.gmra.mxu3 %vm182_vm0, %v9267_v14  ;;  %v8272_v14 = vld [vmem:[%s11396_s2 + $0x14] sm:$0xf0] }
  0x4e   :  { %v6012_v60 = vor.u32 %v8272_v14, %v6011_v59  ;;  %v8326_v59 = vld [vmem:[%s11396_s2 + $0xcc] sm:$0xf]  ;;  %v6240_v14 = vld [vmem:[%s11396_s2 + $0xd8] sm:$0xf0] }
  0x4f   :  { %572 = vmatpush.bf16.msra.mxu2 %v6060_v52  ;;  %v8325_v52 = vld [vmem:[%s11396_s2 + $0xc4] sm:$0xf]  ;;  %v6243_v4 = vor.u32 %v8326_v59, %v6240_v14  ;;  %v6182_v59 = vld [vmem:[%s11396_s2 + $0x60] sm:$0xf]  ;;  %v8315_v14 = vld [vmem:[%s11396_s2 + $0x6c] sm:$0xf0] }
  0x50   :  { %5996 = vmatmul.msk.bf16.gmra.mxu2 %vm182_vm0, %v9272_v15  ;;  %v6235_v57 = vor.u32 %v8325_v52, %v6232_v54  ;;  %v6206_v52 = vld [vmem:[%s11396_s2 + $0x88] sm:$0xf]  ;;  %v8320_v54 = vld [vmem:[%s11396_s2 + $0x94] sm:$0xf0] }
  0x51   :  { %902 = vmatpush.bf16.msrb.mxu3 %v6243_v4 }
  0x52   :  { %876 = vmatpush.bf16.msrb.mxu1 %v6235_v57  ;;  %v6207_v57 = vor.u32 %v8320_v54, %v6206_v52 }
  0x53   :  { %573 = vmatpush.bf16.msra.mxu2 %v6044_v55  ;;  %v6238_v55 = vld [vmem:[%s11396_s2 + $0xc8] sm:$0xf] }
  0x55   :  { %903 = vmatpush.bf16.msrb.mxu3 %v6227_v43  ;;  %v8309_v43 = vld [vmem:[%s11396_s2 + $0x44] sm:$0xf] }
  0x57   :  { %574 = vmatpush.bf16.msra.mxu2 %v6028_v58  ;;  %v6239_v58 = vor.u32 %v8328_v56, %v6238_v55  ;;  %v8318_v55 = vld [vmem:[%s11396_s2 + $0x8c] sm:$0xf]  ;;  %v6208_v56 = vld [vmem:[%s11396_s2 + $0x98] sm:$0xf0] }
  0x5b   :  { %575 = vmatpush.bf16.msra.mxu2 %v6012_v60 }
  0x5d   :  { %5992 = vmatmul.msk.bf16.gmra.mxu1 %vm182_vm0, %v9272_v15  ;;  %6000 = vmatmul.msk.bf16.gmra.mxu3 %vm182_vm0, %v9272_v15 }
  0x60   :  { %550 = vmatmul.bf16.vlgmr.msrb.gmra.mxu2 %v9201_v61 }
  0x61   :  { %888 = vmatpush.bf16.msrb.mxu2 %v6255_v42 }
  0x65   :  { %889 = vmatpush.bf16.msrb.mxu2 %v6239_v58  ;;  %v6211_v58 = vor.u32 %v8318_v55, %v6208_v56  ;;  %v8310_v55 = vld [vmem:[%s11396_s2 + $0x4c] sm:$0xf]  ;;  %v6176_v56 = vld [vmem:[%s11396_s2 + $0x58] sm:$0xf0] }
  0x67   :  { %904 = vmatpush.bf16.msrb.mxu3 %v6211_v58  ;;  %v8307_v58 = vld [vmem:[%s11396_s2 + $0x2c] sm:$0xf0] }
  0x6d   :  { %563 = vmatmul.bf16.vlgmr.msra.gmra.mxu1 %v9201_v61  ;;  %589 = vmatmul.bf16.vlgmr.msra.gmra.mxu3 %v9201_v61 }
  0x70   :  { %576 = vmatmul.bf16.vlgmr.msra.gmra.mxu2 %v9201_v61 }
  0x9a   :  { %v9506_v62 = vpop.f32.mrf.mxu1 }
  0x9c   :  { %v204_v49 = vpop.f32.mrf.mxu0 }
  0x9d   :  { %v205_v60 = vadd.f32 %v204_v49, %v9594_v45 }
  0xa0   :  { %v9508_v63 = vpop.f32.mrf.mxu3 }
  0xa2   :  { %v9512_v1 = vpop.f32.mrf.mxu1 }
  0xa3   :  { %v9510_v0 = vpop.f32.mrf.mxu2 }
  0xa8   :  { %v9514_v2 = vpop.f32.mrf.mxu3 }
  0xaa   :  { %v9518_v3 = vpop.f32.mrf.mxu1 }
  0xab   :  { %v9516_v15 = vpop.f32.mrf.mxu2 }
  0xb0   :  { %v9525_v6 = vpop.f32.mrf.mxu3 }
  0xb2   :  { %v9530_v9 = vpop.f32.mrf.mxu1 }
  0xb3   :  { %v267_v7 = vpop.f32.mrf.mxu2 }
  0xb4   :  { %v9528_v8 = vadd.f32 %v267_v7, %v9523_v5  ;;  %v6214_v7 = vld [vmem:[%s11396_s2 + $0xa0] sm:$0xf] }
  0xb8   :  { %v9532_v10 = vpop.f32.mrf.mxu3 }
  0xba   :  { %v238_v13 = vpop.f32.mrf.mxu1 }
  0xbb   :  { %v9536_v12 = vpop.f32.mrf.mxu2  ;;  %v9539_v16 = vadd.f32 %v238_v13, %v9534_v11  ;;  %v8323_v13 = vld [vmem:[%s11396_s2 + $0xac] sm:$0xf0] }
  0xc0   :  { %v296_v18 = vpop.f32.mrf.mxu3 }
  0xc1   :  { %v9544_v20 = vadd.f32 %v296_v18, %v9541_v17  ;;  %v8321_v18 = vld [vmem:[%s11396_s2 + $0xa4] sm:$0xf] }
  0xc2   :  { %v9549_v22 = vpop.f32.mrf.mxu1 }
  0xc3   :  { %v272_v19 = vpop.f32.mrf.mxu2 }
  0xc4   :  { %v9547_v21 = vadd.f32 %v272_v19, %v9523_v5 }
  0xc8   :  { %v9551_v23 = vpop.f32.mrf.mxu3 }
  0xca   :  { %v243_v25 = vpop.f32.mrf.mxu1 }
  0xcb   :  { %v9553_v24 = vpop.f32.mrf.mxu2  ;;  %v9556_v26 = vadd.f32 %v243_v25, %v9534_v11  ;;  %v6215_v25 = vor.u32 %v8323_v13, %v6214_v7  ;;  %v6183_v7 = vor.u32 %v8315_v14, %v6182_v59  ;;  %v6184_v13 = vld [vmem:[%s11396_s2 + $0x70] sm:$0xf0]  ;;  %v292_v59 = vadd.f32 %v9525_v6, %v9541_v17  ;;  %v8305_v14 = vld [vmem:[%s11396_s2 + $0x24] sm:$0xf]  ;;  %v6158_v6 = vld [vmem:[%s11396_s2 + $0x28] sm:$0xf] }
  0xcd   :  { %864 = vmatpush.bf16.msrb.mxu0 %v6215_v25  ;;  %v234_v25 = vadd.f32 %v9518_v3, %v9534_v11  ;;  %v6166_v3 = vld [vmem:[%s11396_s2 + $0x40] sm:$0xf] }
  0xd0   :  { %v301_v27 = vpop.f32.mrf.mxu3 }
  0xd1   :  { %v9559_v29 = vadd.f32 %v301_v27, %v9541_v17  ;;  %v6216_v27 = vld [vmem:[%s11396_s2 + $0xb0] sm:$0xf0] }
  0xd2   :  { %v9564_v31 = vpop.f32.mrf.mxu1  ;;  %v6219_v36 = vor.u32 %v8321_v18, %v6216_v27  ;;  %v6190_v18 = vld [vmem:[%s11396_s2 + $0x68] sm:$0xf] }
  0xd3   :  { %v277_v28 = vpop.f32.mrf.mxu2 }
  0xd4   :  { %v9562_v30 = vadd.f32 %v277_v28, %v9523_v5  ;;  %v6222_v28 = vld [vmem:[%s11396_s2 + $0xa8] sm:$0xf]  ;;  %877 = vmatpush.bf16.msrb.mxu1 %v6219_v36  ;;  %v6192_v36 = vld [vmem:[%s11396_s2 + $0x78] sm:$0xf0] }
  0xd5   :  { %v6223_v37 = vor.u32 %v8324_v32, %v6222_v28 }
  0xd7   :  { %890 = vmatpush.bf16.msrb.mxu2 %v6223_v37 }
  0xd8   :  { %v9575_v35 = vpop.f32.mrf.mxu3  ;;  %878 = vmatpush.bf16.msrb.mxu1 %v6203_v53  ;;  %v6171_v53 = vor.u32 %v8309_v43, %v6168_v47  ;;  %v6142_v47 = vld [vmem:[%s11396_s2 + $0x8] sm:$0xf] }
  0xda   :  { %v248_v46 = vpop.f32.mrf.mxu1 }
  0xdb   :  { %v9586_v40 = vpop.f32.mrf.mxu2  ;;  %v9597_v48 = vadd.f32 %v248_v46, %v9534_v11  ;;  %v8319_v46 = vld [vmem:[%s11396_s2 + $0x8c] sm:$0xf0]  ;;  %891 = vmatpush.bf16.msrb.mxu2 %v6207_v57  ;;  %v6150_v57 = vld [vmem:[%s11396_s2 + $0x20] sm:$0xf] }
  0xdc   :  { %v6199_v50 = vor.u32 %v8319_v46, %v6198_v44 }
  0xde   :  { %865 = vmatpush.bf16.msrb.mxu0 %v6199_v50  ;;  %v8312_v50 = vld [vmem:[%s11396_s2 + $0x54] sm:$0xf0] }
  0xe0   :  { %v306_v19 = vpop.f32.mrf.mxu3 }
  0xe1   :  { %v9643_v33 = vadd.f32 %v306_v19, %v9541_v17  ;;  %v8316_v19 = vld [vmem:[%s11396_s2 + $0x74] sm:$0xf0] }
  0xe2   :  { %v9651_v42 = vpop.f32.mrf.mxu1  ;;  %v6191_v32 = vor.u32 %v8316_v19, %v6190_v18  ;;  %866 = vmatpush.bf16.msrb.mxu0 %v6183_v7  ;;  %v6179_v7 = vor.u32 %v8310_v55, %v6176_v56  ;;  %v6152_v18 = vld [vmem:[%s11396_s2 + $0x30] sm:$0xf0]  ;;  %v8308_v19 = vld [vmem:[%s11396_s2 + $0x34] sm:$0xf0] }
  0xe3   :  { %v551_v34 = vpop.f32.mrf.mxu2 }
  0xe4   :  { %v594_v41 = vadd.f32 %v551_v34, %v205_v60  ;;  %v8313_v60 = vld [vmem:[%s11396_s2 + $0x64] sm:$0xf]  ;;  %v8314_v34 = vld [vmem:[%s11396_s2 + $0x6c] sm:$0xf]  ;;  %892 = vmatpush.bf16.msrb.mxu2 %v6191_v32 }
  0xe5   :  { %v6187_v28 = vor.u32 %v8313_v60, %v6184_v13  ;;  %v6195_v38 = vor.u32 %v8314_v34, %v6192_v36  ;;  %v6151_v13 = vor.u32 %v8307_v58, %v6150_v57  ;;  %v8306_v32 = vld [vmem:[%s11396_s2 + $0x2c] sm:$0xf]  ;;  %v6160_v34 = vld [vmem:[%s11396_s2 + $0x38] sm:$0xf0] }
  0xe6   :  { %v6129_v49 = vmul.f32 -1.442695, %v594_v41  ;;  %v8311_v41 = vld [vmem:[%s11396_s2 + $0x4c] sm:$0xf0] }
  0xe7   :  { %879 = vmatpush.bf16.msrb.mxu1 %v6187_v28  ;;  %905 = vmatpush.bf16.msrb.mxu3 %v6195_v38  ;;  %v6167_v46 = vor.u32 %v8311_v41, %v6166_v3  ;;  %v6155_v28 = vor.u32 %v8305_v14, %v6152_v18  ;;  %v6163_v38 = vor.u32 %v8306_v32, %v6160_v34  ;;  %v8303_v3 = vld [vmem:[%s11396_s2 + $0xc] sm:$0xf0]  ;;  %v8301_v41 = vld [vmem:[%s11396_s2 + $0x4] sm:$0xf] }
  0xe8   :  { %8835 = vpow2.f32 %v6129_v49  ;;  %v9686_v4 = vpop.f32.mrf.mxu3  ;;  %v6174_v49 = vld [vmem:[%s11396_s2 + $0x48] sm:$0xf] }
  0xe9   :  { %v6175_v54 = vor.u32 %v8312_v50, %v6174_v49  ;;  %867 = vmatpush.bf16.msrb.mxu0 %v6167_v46  ;;  %v6136_v46 = vld [vmem:[%s11396_s2 + $0x10] sm:$0xf0]  ;;  %v8304_v50 = vld [vmem:[%s11396_s2 + $0x14] sm:$0xf0] }
  0xea   :  { %v564_v37 = vpop.f32.mrf.mxu1  ;;  %v6139_v49 = vor.u32 %v8301_v41, %v6136_v46  ;;  %v6143_v55 = vor.u32 %v8304_v50, %v6142_v47 }
  0xeb   :  { %v553_v27 = vpop.f32.mrf.mxu2  ;;  %v595_v39 = vadd.f32 %v564_v37, %v234_v25  ;;  %880 = vmatpush.bf16.msrb.mxu1 %v6171_v53  ;;  %893 = vmatpush.bf16.msrb.mxu2 %v6175_v54  ;;  %v6159_v37 = vor.u32 %v8308_v19, %v6158_v6  ;;  %v6144_v53 = vld [vmem:[%s11396_s2 + $0x18] sm:$0xf0]  ;;  %v263_v19 = vadd.f32 %v9510_v0, %v9523_v5 }
  0xec   :  { %906 = vmatpush.bf16.msrb.mxu3 %v6179_v7 }
  0xed   :  { %v6130_v52 = vmul.f32 -1.442695, %v595_v39  ;;  %868 = vmatpush.bf16.msrb.mxu0 %v6151_v13  ;;  %v6134_v39 = vld [vmem:[%s11396_s2] sm:$0xf] }
  0xee   :  { %v8836_v44 = vpop.eup %8835 }
  0xef   :  { %v9723_v51 = vadd.f32 1.0, %v8836_v44  ;;  %881 = vmatpush.bf16.msrb.mxu1 %v6155_v28  ;;  %v6135_v44 = vor.u32 %v8303_v3, %v6134_v39  ;;  %894 = vmatpush.bf16.msrb.mxu2 %v6159_v37 }
  0xf0   :  { %v590_v60 = vpop.f32.mrf.mxu3  ;;  %907 = vmatpush.bf16.msrb.mxu3 %v6163_v38 }
  0xf1   :  { %8837 = vrcp.f32 %v9723_v51  ;;  %v597_v27 = vadd.f32 %v590_v60, %v292_v59  ;;  %869 = vmatpush.bf16.msrb.mxu0 %v6135_v44  ;;  %vm607_vm1 = vweird.f32 %v9723_v51  ;;  %v611_v38 = vand.u32 2147483647, %v9723_v51 }
  0xf2   :  { %8839 = vpow2.f32 %v6130_v52  ;;  %v566_v36 = vpop.f32.mrf.mxu1  ;;  %v8302_v52 = vld [vmem:[%s11396_s2 + $0xc] sm:$0xf] }
  0xf3   :  { %v577_v25 = vpop.f32.mrf.mxu2  ;;  %v6131_v43 = vmul.f32 -1.442695, %v597_v27  ;;  %v6147_v58 = vor.u32 %v8302_v52, %v6144_v53  ;;  %882 = vmatpush.bf16.msrb.mxu1 %v6139_v49  ;;  %895 = vmatpush.bf16.msrb.mxu2 %v6143_v55  ;;  %v613_v36 = vand.u32 2147483648, %v9723_v51  ;;  %vm612_vm6 = vcmp.eq.f32.partialorder %v611_v38, 8.507059e+37  ;;  %v6379_v38 = vld [vmem:[%s11396_s2 + $0xf0] sm:$0xf0] }
  0xf4   :  { %v596_v28 = vadd.f32 %v577_v25, %v263_v19 }
  0xf5   :  { %8841 = vpow2.f32 %v6131_v43  ;;  %908 = vmatpush.bf16.msrb.mxu3 %v6147_v58  ;;  %v614_v44 = vor.u32 1.1754944e-38, %v613_v36 }
  0xf7   :  { %v8838_v54 = vpop.eup %8837 }
  0xf8   :  { %v8840_v56 = vpop.eup %8839  ;;  %v603_v57 = vmul.f32 %v8838_v54, %v9723_v51  ;;  %v592_v60 = vpop.f32.mrf.mxu3  ;;  %vm608_vm2 = vweird.f32 %v8838_v54 }
  0xf9   :  { %v620_v59 = vadd.f32 1.0, %v8840_v56  ;;  %vm609_vm3 = vmor %vm607_vm1, %vm608_vm2 }
  0xfa   :  { %v604_v14 = vsub.f32 1.0, %v603_v57 }
  0xfb   :  { %8843 = vrcp.f32 %v620_v59  ;;  %v579_v7 = vpop.f32.mrf.mxu2  ;;  %v8842_v13 = vpop.eup %8841  ;;  %v632_v39 = vand.u32 2147483648, %v620_v59  ;;  %v630_v0 = vand.u32 2147483647, %v620_v59  ;;  %vm626_vm5 = vweird.f32 %v620_v59 }
  0xfc   :  { %v605_v18 = vmul.f32 %v8838_v54, %v604_v14  ;;  %v640_v6 = vadd.f32 1.0, %v8842_v13 }
  0xfd   :  { %v633_v47 = vor.u32 1.1754944e-38, %v632_v39  ;;  %vm631_vm8 = vcmp.eq.f32.partialorder %v630_v0, 8.507059e+37  ;;  %v6385_v39 = vld [vmem:[%s11396_s2 + $0xe8] sm:$0xf]  ;;  %v8362_v0 = vld [vmem:[%s11396_s2 + $0xec] sm:$0xf] }
  0xfe   :  { %8845 = vrcp.f32 %v640_v6  ;;  %v606_v34 = vadd.f32 %v8838_v54, %v605_v18  ;;  %vm646_vm10 = vweird.f32 %v640_v6  ;;  %v650_v14 = vand.u32 2147483647, %v640_v6 }
  0xff   :  { %8847 = vtanh.f32 %v596_v28  ;;  %v9795_v28 = vpop.f32.mrf.mxu0 }
 0x100   :  { %v610_v43 = vsel %vm609_vm3, %v8838_v54, %v606_v34  ;;  %vm651_vm12 = vcmp.eq.f32.partialorder %v650_v14, 8.507059e+37  ;;  %v8361_v34 = vld [vmem:[%s11396_s2 + $0xe4] sm:$0xf]  ;;  %v6345_v14 = vld [vmem:[%s11396_s2 + $0xa0] sm:$0xf] }
 0x101   :  { %v8844_v27 = vpop.eup %8843  ;;  %v615_v49 = vsel %vm612_vm6, %v614_v44, %v610_v43  ;;  %v6387_v44 = vld [vmem:[%s11396_s2 + $0xf8] sm:$0xf0] }
 0x102   :  { %v622_v32 = vmul.f32 %v8844_v27, %v620_v59  ;;  %vm627_vm4 = vweird.f32 %v8844_v27  ;;  %v652_v59 = vand.u32 2147483648, %v640_v6 }
 0x103   :  { %vm628_vm7 = vmor %vm626_vm5, %vm627_vm4 }
 0x104   :  { %v623_v37 = vsub.f32 1.0, %v622_v32  ;;  %v8846_v3 = vpop.eup %8845  ;;  %v653_v7 = vor.u32 1.1754944e-38, %v652_v59  ;;  %v8363_v32 = vld [vmem:[%s11396_s2 + $0xec] sm:$0xf0] }
 0x105   :  { %v642_v25 = vmul.f32 %v8846_v3, %v640_v6  ;;  %v8848_v51 = vpop.eup %8847  ;;  %vm647_vm9 = vweird.f32 %v8846_v3  ;;  %v6377_v6 = vld [vmem:[%s11396_s2 + $0xe0] sm:$0xf] }
 0x106   :  { %v624_v41 = vmul.f32 %v8844_v27, %v623_v37  ;;  %v657_v57 = vmul.f32 %v8848_v51, %v615_v49  ;;  %vm648_vm11 = vmor %vm646_vm10, %vm647_vm9  ;;  %v6378_v37 = vor.u32 %v8363_v32, %v6377_v6  ;;  %v8357_v49 = vld [vmem:[%s11396_s2 + $0xc4] sm:$0xf]  ;;  %v6369_v51 = vld [vmem:[%s11396_s2 + $0xc8] sm:$0xf] }
 0x107   :  { %v643_v50 = vsub.f32 1.0, %v642_v25  ;;  %v9806_v36 = vpop.f32.mrf.mxu0  ;;  %v6390_v25 = vor.u32 %v8362_v0, %v6387_v44  ;;  %v8356_v6 = vld [vmem:[%s11396_s2 + $0xb4] sm:$0xf0]  ;;  %v8349_v0 = vld [vmem:[%s11396_s2 + $0x84] sm:$0xf] }
 0x108   :  { %v625_v46 = vadd.f32 %v8844_v27, %v624_v41  ;;  %v6382_v41 = vor.u32 %v8361_v34, %v6379_v38  ;;  %1183 = vmatpush.bf16.msra.mxu0 %v6378_v37  ;;  %v8354_v37 = vld [vmem:[%s11396_s2 + $0xac] sm:$0xf]  ;;  %v6355_v38 = vld [vmem:[%s11396_s2 + $0xb8] sm:$0xf0] }
 0x109   :  { %v644_v55 = vmul.f32 %v8846_v3, %v643_v50  ;;  %1222 = vmatpush.bf16.msra.mxu3 %v6390_v25  ;;  %v6331_v25 = vld [vmem:[%s11396_s2 + $0x90] sm:$0xf0] }
 0x10a   :  { %v629_v52 = vsel %vm628_vm7, %v8844_v27, %v625_v46  ;;  %1196 = vmatpush.bf16.msra.mxu1 %v6382_v41  ;;  %v6361_v46 = vld [vmem:[%s11396_s2 + $0xc0] sm:$0xf] }
 0x10b   :  { %v634_v53 = vsel %vm631_vm8, %v633_v47, %v629_v52  ;;  %v645_v54 = vadd.f32 %v8846_v3, %v644_v55  ;;  %v8359_v47 = vld [vmem:[%s11396_s2 + $0xcc] sm:$0xf0]  ;;  %v6363_v52 = vld [vmem:[%s11396_s2 + $0xd0] sm:$0xf0]  ;;  %v6329_v41 = vld [vmem:[%s11396_s2 + $0x80] sm:$0xf] }
 0x10c   :  { %v656_v56 = vmul.f32 0.0, %v634_v53  ;;  %v6362_v50 = vor.u32 %v8359_v47, %v6361_v46  ;;  %v8360_v53 = vld [vmem:[%s11396_s2 + $0xd4] sm:$0xf0]  ;;  %v6366_v55 = vor.u32 %v8357_v49, %v6363_v52  ;;  %v6337_v46 = vld [vmem:[%s11396_s2 + $0x88] sm:$0xf]  ;;  %v6334_v49 = vor.u32 %v8349_v0, %v6331_v25 }
 0x10d   :  { %v649_v60 = vsel %vm648_vm11, %v8846_v3, %v645_v54  ;;  %v8364_v3 = vld [vmem:[%s11396_s2 + $0xf4] sm:$0xf0]  ;;  %v6371_v54 = vld [vmem:[%s11396_s2 + $0xd8] sm:$0xf0]  ;;  %v8350_v52 = vld [vmem:[%s11396_s2 + $0x8c] sm:$0xf] }
 0x10e   :  { %v9788_v58 = vadd.f32 %v657_v57, %v656_v56  ;;  %v654_v18 = vsel %vm651_vm12, %v653_v7, %v649_v60  ;;  %v6386_v43 = vor.u32 %v8364_v3, %v6385_v39  ;;  %v6370_v56 = vor.u32 %v8360_v53, %v6369_v51  ;;  %v8358_v57 = vld [vmem:[%s11396_s2 + $0xcc] sm:$0xf]  ;;  %1184 = vmatpush.bf16.msra.mxu0 %v6362_v50  ;;  %v8355_v60 = vld [vmem:[%s11396_s2 + $0xac] sm:$0xf0]  ;;  %v8353_v7 = vld [vmem:[%s11396_s2 + $0xa4] sm:$0xf] }
 0x10f   :  { %v6374_v59 = vor.u32 %v8358_v57, %v6371_v54  ;;  %1197 = vmatpush.bf16.msra.mxu1 %v6366_v55  ;;  %v9871_v39 = vpop.f32.mrf.mxu0  ;;  %v6358_v3 = vor.u32 %v8354_v37, %v6355_v38  ;;  %v8352_v47 = vld [vmem:[%s11396_s2 + $0x94] sm:$0xf0]  ;;  %v6339_v51 = vld [vmem:[%s11396_s2 + $0x98] sm:$0xf0]  ;;  %v6313_v55 = vld [vmem:[%s11396_s2 + $0x60] sm:$0xf] }
 0x110   :  { %8849 = vtanh.f32 %v9788_v58  ;;  %1209 = vmatpush.bf16.msra.mxu2 %v6386_v43  ;;  %v8351_v43 = vld [vmem:[%s11396_s2 + $0x8c] sm:$0xf0]  ;;  %v6338_v50 = vor.u32 %v8352_v47, %v6337_v46  ;;  %v6342_v53 = vor.u32 %v8350_v52, %v6339_v51  ;;  %v8345_v57 = vld [vmem:[%s11396_s2 + $0x64] sm:$0xf]  ;;  %v6305_v25 = vld [vmem:[%s11396_s2 + $0x48] sm:$0xf] }
 0x111   :  { %1223 = vmatpush.bf16.msra.mxu3 %v6374_v59  ;;  %v6330_v44 = vor.u32 %v8351_v43, %v6329_v41  ;;  %v6315_v59 = vld [vmem:[%s11396_s2 + $0x70] sm:$0xf0]  ;;  %v8341_v43 = vld [vmem:[%s11396_s2 + $0x44] sm:$0xf]  ;;  %v8344_v46 = vld [vmem:[%s11396_s2 + $0x54] sm:$0xf0] }
 0x112   :  { %v6306_v52 = vor.u32 %v8344_v46, %v6305_v25  ;;  %v8342_v51 = vld [vmem:[%s11396_s2 + $0x4c] sm:$0xf]  ;;  %v6273_v25 = vld [vmem:[%s11396_s2 + $0x8] sm:$0xf]  ;;  %v8336_v46 = vld [vmem:[%s11396_s2 + $0x14] sm:$0xf0] }
 0x114   :  { %1210 = vmatpush.bf16.msra.mxu2 %v6370_v56  ;;  %v8347_v56 = vld [vmem:[%s11396_s2 + $0x6c] sm:$0xf0] }
 0x115   :  { %1224 = vmatpush.bf16.msra.mxu3 %v6358_v3  ;;  %v6314_v54 = vor.u32 %v8347_v56, %v6313_v55  ;;  %v6281_v55 = vld [vmem:[%s11396_s2 + $0x20] sm:$0xf]  ;;  %v8339_v56 = vld [vmem:[%s11396_s2 + $0x2c] sm:$0xf0] }
 0x116   :  { %v8850_v13 = vpop.eup %8849 }
 0x117   :  { %v9791_v19 = vmul.f32 %v8850_v13, %v654_v18  ;;  %v6346_v13 = vor.u32 %v8355_v60, %v6345_v14  ;;  %v6347_v18 = vld [vmem:[%s11396_s2 + $0xb0] sm:$0xf0]  ;;  %v6321_v14 = vld [vmem:[%s11396_s2 + $0x68] sm:$0xf]  ;;  %v8348_v60 = vld [vmem:[%s11396_s2 + $0x74] sm:$0xf0] }
 0x118   :  { %v6350_v32 = vor.u32 %v8353_v7, %v6347_v18  ;;  %v236_v7 = vadd.f32 %v9530_v9, %v9534_v11  ;;  %v6318_v18 = vor.u32 %v8345_v57, %v6315_v59  ;;  %v6297_v9 = vld [vmem:[%s11396_s2 + $0x40] sm:$0xf]  ;;  %v8337_v59 = vld [vmem:[%s11396_s2 + $0x24] sm:$0xf] }
 0x119   :  { %v669_v27 = vpack.c.bf16 %v9791_v19, %v9791_v19  ;;  %1185 = vmatpush.bf16.msra.mxu0 %v6346_v13  ;;  %1225 = vmatpush.bf16.msra.mxu3 %v6342_v53  ;;  %v207_v13 = vadd.f32 %v9795_v28, %v9594_v45  ;;  %v8343_v28 = vld [vmem:[%s11396_s2 + $0x4c] sm:$0xf0]  ;;  %v6307_v53 = vld [vmem:[%s11396_s2 + $0x58] sm:$0xf0] }
 0x11a   :  { %1198 = vmatpush.bf16.msra.mxu1 %v6350_v32  ;;  %v6323_v32 = vld [vmem:[%s11396_s2 + $0x78] sm:$0xf0]  ;;  %v6298_v0 = vor.u32 %v8343_v28, %v6297_v9  ;;  %v6310_v57 = vor.u32 %v8342_v51, %v6307_v53 }
 0x11b   :  { %870 = vmatmul.bf16.vlgmr.msrb.gmra.mxu0 %v669_v27  ;;  %883 = vmatmul.bf16.vlgmr.msrb.gmra.mxu1 %v669_v27 }
 0x11c   :  { %896 = vmatmul.bf16.vlgmr.msrb.gmra.mxu2 %v669_v27  ;;  %909 = vmatmul.bf16.vlgmr.msrb.gmra.mxu3 %v669_v27  ;;  %v6353_v27 = vld [vmem:[%s11396_s2 + $0xa8] sm:$0xf] }
 0x11d   :  { %v6354_v34 = vor.u32 %v8356_v6, %v6353_v27  ;;  %1186 = vmatpush.bf16.msra.mxu0 %v6330_v44  ;;  %v6322_v27 = vor.u32 %v8348_v60, %v6321_v14  ;;  %v8346_v6 = vld [vmem:[%s11396_s2 + $0x6c] sm:$0xf]  ;;  %v6299_v44 = vld [vmem:[%s11396_s2 + $0x50] sm:$0xf0]  ;;  %v6289_v60 = vld [vmem:[%s11396_s2 + $0x28] sm:$0xf] }
 0x11e   :  { %1199 = vmatpush.bf16.msra.mxu1 %v6334_v49  ;;  %v6326_v38 = vor.u32 %v8346_v6, %v6323_v32  ;;  %v6283_v14 = vld [vmem:[%s11396_s2 + $0x30] sm:$0xf0]  ;;  %v6291_v6 = vld [vmem:[%s11396_s2 + $0x38] sm:$0xf0] }
 0x11f   :  { %1211 = vmatpush.bf16.msra.mxu2 %v6354_v34 }
 0x120   :  { %1226 = vmatpush.bf16.msra.mxu3 %v6326_v38 }
 0x121   :  { %1187 = vmatpush.bf16.msra.mxu0 %v6314_v54  ;;  %v6282_v54 = vor.u32 %v8339_v56, %v6281_v55 }
 0x122   :  { %1200 = vmatpush.bf16.msra.mxu1 %v6318_v18  ;;  %v8340_v18 = vld [vmem:[%s11396_s2 + $0x34] sm:$0xf0] }
 0x123   :  { %1212 = vmatpush.bf16.msra.mxu2 %v6338_v50  ;;  %v6302_v50 = vor.u32 %v8341_v43, %v6299_v44  ;;  %v6267_v44 = vld [vmem:[%s11396_s2 + $0x10] sm:$0xf0] }
 0x124   :  { %1227 = vmatpush.bf16.msra.mxu3 %v6310_v57 }
 0x125   :  { %1188 = vmatpush.bf16.msra.mxu0 %v6298_v0 }
 0x126   :  { %1201 = vmatpush.bf16.msra.mxu1 %v6302_v50  ;;  %v8334_v50 = vld [vmem:[%s11396_s2 + $0xc] sm:$0xf] }
 0x127   :  { %1213 = vmatpush.bf16.msra.mxu2 %v6322_v27  ;;  %v8338_v27 = vld [vmem:[%s11396_s2 + $0x2c] sm:$0xf] }
 0x128   :  { %v6294_v38 = vor.u32 %v8338_v27, %v6291_v6 }
 0x129   :  { %1189 = vmatpush.bf16.msra.mxu0 %v6282_v54 }
 0x12a   :  { %1228 = vmatpush.bf16.msra.mxu3 %v6294_v38 }
 0x12b   :  { %1214 = vmatpush.bf16.msra.mxu2 %v6306_v52  ;;  %v6275_v52 = vld [vmem:[%s11396_s2 + $0x18] sm:$0xf0] }
 0x12c   :  { %v6278_v55 = vor.u32 %v8334_v50, %v6275_v52 }
 0x12e   :  { %1229 = vmatpush.bf16.msra.mxu3 %v6278_v55 }
 0x198   :  { %v871_v34 = vpop.f32.mrf.mxu0  ;;  %v884_v37 = vpop.f32.mrf.mxu1 }
 0x199   :  { %v914_v3 = vadd.f32 %v871_v34, %v207_v13  ;;  %v915_v41 = vadd.f32 %v884_v37, %v236_v7  ;;  %v294_v7 = vadd.f32 %v9532_v10, %v9541_v17  ;;  %v6286_v13 = vor.u32 %v8337_v59, %v6283_v14  ;;  %v6265_v10 = vld [vmem:[%s11396_s2] sm:$0xf] }
 0x19a   :  { %v6290_v37 = vor.u32 %v8340_v18, %v6289_v60 }
 0x19b   :  { %v6260_v47 = vmul.f32 -1.442695, %v914_v3  ;;  %v6261_v49 = vmul.f32 -1.442695, %v915_v41  ;;  %v8335_v3 = vld [vmem:[%s11396_s2 + $0xc] sm:$0xf0]  ;;  %1202 = vmatpush.bf16.msra.mxu1 %v6286_v13 }
 0x19c   :  { %v8333_v41 = vld [vmem:[%s11396_s2 + $0x4] sm:$0xf]  ;;  %v6266_v0 = vor.u32 %v8335_v3, %v6265_v10  ;;  %1215 = vmatpush.bf16.msra.mxu2 %v6290_v37 }
 0x19d   :  { %8851 = vpow2.f32 %v6260_v47  ;;  %v6270_v47 = vor.u32 %v8333_v41, %v6267_v44 }
 0x19e   :  { %8853 = vpow2.f32 %v6261_v49  ;;  %v6274_v49 = vor.u32 %v8336_v46, %v6273_v25  ;;  %1190 = vmatpush.bf16.msra.mxu0 %v6266_v0 }
 0x19f   :  { %v897_v32 = vpop.f32.mrf.mxu2  ;;  %v910_v34 = vpop.f32.mrf.mxu3  ;;  %1203 = vmatpush.bf16.msra.mxu1 %v6270_v47 }
 0x1a0   :  { %v917_v9 = vadd.f32 %v910_v34, %v294_v7  ;;  %v873_v28 = vpop.f32.mrf.mxu0  ;;  %v886_v43 = vpop.f32.mrf.mxu1  ;;  %1216 = vmatpush.bf16.msra.mxu2 %v6274_v49  ;;  %v265_v7 = vadd.f32 %v9516_v15, %v9523_v5 }
 0x1a2   :  { %v6262_v51 = vmul.f32 -1.442695, %v917_v9  ;;  %v916_v27 = vadd.f32 %v897_v32, %v265_v7 }
 0x1a3   :  { %v8852_v53 = vpop.eup %8851 }
 0x1a4   :  { %v8854_v56 = vpop.eup %8853  ;;  %v921_v57 = vadd.f32 1.0, %v8852_v53  ;;  %8855 = vpow2.f32 %v6262_v51 }
 0x1a5   :  { %v940_v54 = vadd.f32 1.0, %v8854_v56 }
 0x1a6   :  { %8857 = vrcp.f32 %v921_v57  ;;  %v933_v3 = vand.u32 2147483648, %v921_v57  ;;  %v931_v28 = vand.u32 2147483647, %v921_v57  ;;  %vm927_vm15 = vweird.f32 %v921_v57 }
 0x1a7   :  { %8859 = vrcp.f32 %v940_v54  ;;  %v899_v59 = vpop.f32.mrf.mxu2  ;;  %v912_v14 = vpop.f32.mrf.mxu3  ;;  %v952_v41 = vand.u32 2147483648, %v940_v54  ;;  %v950_v0 = vand.u32 2147483647, %v940_v54  ;;  %vm946_vm0 = vweird.f32 %v940_v54 }
 0x1a8   :  { %v934_v32 = vor.u32 1.1754944e-38, %v933_v3  ;;  %vm932_vm3 = vcmp.eq.f32.partialorder %v931_v28, 8.507059e+37  ;;  %v8396_v28 = vld [vmem:[%s11396_s2 + $0xf4] sm:$0xf0] }
 0x1a9   :  { %v953_v47 = vor.u32 1.1754944e-38, %v952_v41  ;;  %vm951_vm4 = vcmp.eq.f32.partialorder %v950_v0, 8.507059e+37  ;;  %v6510_v41 = vld [vmem:[%s11396_s2 + $0xf0] sm:$0xf0] }
 0x1aa   :  { %v8856_v60 = vpop.eup %8855 }
 0x1ab   :  { %v960_v13 = vadd.f32 1.0, %v8856_v60 }
 0x1ac   :  { %v8858_v18 = vpop.eup %8857 }
 0x1ad   :  { %v8860_v6 = vpop.eup %8859  ;;  %v923_v34 = vmul.f32 %v8858_v18, %v921_v57  ;;  %8861 = vrcp.f32 %v960_v13  ;;  %vm928_vm13 = vweird.f32 %v8858_v18  ;;  %v972_v60 = vand.u32 2147483648, %v960_v13 }
 0x1ae   :  { %v942_v37 = vmul.f32 %v8860_v6, %v940_v54  ;;  %8863 = vtanh.f32 %v916_v27  ;;  %vm947_vm14 = vweird.f32 %v8860_v6  ;;  %vm929_vm1 = vmor %vm927_vm15, %vm928_vm13  ;;  %vm966_vm6 = vweird.f32 %v960_v13 }
 0x1af   :  { %v924_v38 = vsub.f32 1.0, %v923_v34  ;;  %vm948_vm2 = vmor %vm946_vm0, %vm947_vm14  ;;  %v970_v7 = vand.u32 2147483647, %v960_v13  ;;  %v973_v27 = vor.u32 1.1754944e-38, %v972_v60  ;;  %v8387_v60 = vld [vmem:[%s11396_s2 + $0xac] sm:$0xf0] }
 0x1b0   :  { %v943_v10 = vsub.f32 1.0, %v942_v37 }
 0x1b1   :  { %v925_v9 = vmul.f32 %v8858_v18, %v924_v38  ;;  %vm971_vm8 = vcmp.eq.f32.partialorder %v970_v7, 8.507059e+37  ;;  %v6508_v38 = vld [vmem:[%s11396_s2 + $0xe0] sm:$0xf]  ;;  %v8385_v7 = vld [vmem:[%s11396_s2 + $0xa4] sm:$0xf] }
 0x1b2   :  { %v944_v43 = vmul.f32 %v8860_v6, %v943_v10  ;;  %v8393_v10 = vld [vmem:[%s11396_s2 + $0xe4] sm:$0xf] }
 0x1b3   :  { %v8862_v44 = vpop.eup %8861  ;;  %v926_v15 = vadd.f32 %v8858_v18, %v925_v9  ;;  %v6516_v9 = vld [vmem:[%s11396_s2 + $0xe8] sm:$0xf] }
 0x1b4   :  { %v945_v25 = vadd.f32 %v8860_v6, %v944_v43  ;;  %v962_v46 = vmul.f32 %v8862_v44, %v960_v13  ;;  %v8864_v50 = vpop.eup %8863  ;;  %vm967_vm5 = vweird.f32 %v8862_v44  ;;  %v8395_v13 = vld [vmem:[%s11396_s2 + $0xec] sm:$0xf0]  ;;  %v6513_v43 = vor.u32 %v8393_v10, %v6510_v41  ;;  %v6486_v10 = vld [vmem:[%s11396_s2 + $0xb8] sm:$0xf0]  ;;  %v6460_v41 = vld [vmem:[%s11396_s2 + $0x80] sm:$0xf] }
 0x1b5   :  { %v930_v49 = vsel %vm929_vm1, %v8858_v18, %v926_v15  ;;  %vm968_vm7 = vmor %vm966_vm6, %vm967_vm5  ;;  %v6509_v3 = vor.u32 %v8395_v13, %v6508_v38  ;;  %v6517_v0 = vor.u32 %v8396_v28, %v6516_v9  ;;  %v6518_v15 = vld [vmem:[%s11396_s2 + $0xf8] sm:$0xf0]  ;;  %v8386_v13 = vld [vmem:[%s11396_s2 + $0xac] sm:$0xf] }
 0x1b6   :  { %v935_v52 = vsel %vm932_vm3, %v934_v32, %v930_v49  ;;  %v949_v51 = vsel %vm948_vm2, %v8860_v6, %v945_v25  ;;  %v963_v53 = vsub.f32 1.0, %v962_v46  ;;  %1517 = vmatpush.bf16.msrb.mxu1 %v6513_v43  ;;  %v6492_v25 = vld [vmem:[%s11396_s2 + $0xc0] sm:$0xf]  ;;  %v8391_v46 = vld [vmem:[%s11396_s2 + $0xcc] sm:$0xf0] }
 0x1b7   :  { %v954_v55 = vsel %vm951_vm4, %v953_v47, %v949_v51  ;;  %v977_v56 = vmul.f32 %v8864_v50, %v935_v52  ;;  %1504 = vmatpush.bf16.msrb.mxu0 %v6509_v3  ;;  %1530 = vmatpush.bf16.msrb.mxu2 %v6517_v0  ;;  %v8389_v47 = vld [vmem:[%s11396_s2 + $0xc4] sm:$0xf]  ;;  %v6493_v49 = vor.u32 %v8391_v46, %v6492_v25  ;;  %v6494_v50 = vld [vmem:[%s11396_s2 + $0xd0] sm:$0xf0]  ;;  %v6500_v52 = vld [vmem:[%s11396_s2 + $0xc8] sm:$0xf] }
 0x1b8   :  { %v976_v59 = vmul.f32 %v954_v55, %v9788_v58  ;;  %v964_v14 = vmul.f32 %v8862_v44, %v963_v53  ;;  %v8392_v51 = vld [vmem:[%s11396_s2 + $0xd4] sm:$0xf0]  ;;  %v6497_v53 = vor.u32 %v8389_v47, %v6494_v50  ;;  %v6489_v3 = vor.u32 %v8386_v13, %v6486_v10  ;;  %v8383_v9 = vld [vmem:[%s11396_s2 + $0x8c] sm:$0xf0]  ;;  %v8381_v28 = vld [vmem:[%s11396_s2 + $0x84] sm:$0xf] }
 0x1b9   :  { %v6501_v55 = vor.u32 %v8392_v51, %v6500_v52  ;;  %v6461_v43 = vor.u32 %v8383_v9, %v6460_v41  ;;  %v6462_v0 = vld [vmem:[%s11396_s2 + $0x90] sm:$0xf0]  ;;  %v8382_v46 = vld [vmem:[%s11396_s2 + $0x8c] sm:$0xf]  ;;  %v6470_v47 = vld [vmem:[%s11396_s2 + $0x98] sm:$0xf0] }
 0x1ba   :  { %v10002_v57 = vadd.f32 %v977_v56, %v976_v59  ;;  %v965_v54 = vadd.f32 %v8862_v44, %v964_v14  ;;  %v8390_v56 = vld [vmem:[%s11396_s2 + $0xcc] sm:$0xf]  ;;  %v6502_v59 = vld [vmem:[%s11396_s2 + $0xd8] sm:$0xf0]  ;;  %1518 = vmatpush.bf16.msrb.mxu1 %v6497_v53  ;;  %v6444_v50 = vld [vmem:[%s11396_s2 + $0x60] sm:$0xf] }
 0x1bb   :  { %1505 = vmatpush.bf16.msrb.mxu0 %v6493_v49  ;;  %v6505_v14 = vor.u32 %v8390_v56, %v6502_v59  ;;  %1531 = vmatpush.bf16.msrb.mxu2 %v6501_v55  ;;  %v6473_v49 = vor.u32 %v8382_v46, %v6470_v47  ;;  %v8379_v52 = vld [vmem:[%s11396_s2 + $0x6c] sm:$0xf0]  ;;  %v8377_v51 = vld [vmem:[%s11396_s2 + $0x64] sm:$0xf]  ;;  %v6446_v55 = vld [vmem:[%s11396_s2 + $0x70] sm:$0xf0] }
 0x1bc   :  { %8865 = vtanh.f32 %v10002_v57  ;;  %v969_v18 = vsel %vm968_vm7, %v8862_v44, %v965_v54  ;;  %v8394_v44 = vld [vmem:[%s11396_s2 + $0xec] sm:$0xf]  ;;  %v6476_v54 = vld [vmem:[%s11396_s2 + $0xa0] sm:$0xf]  ;;  %v6445_v53 = vor.u32 %v8379_v52, %v6444_v50  ;;  %v6452_v56 = vld [vmem:[%s11396_s2 + $0x68] sm:$0xf] }
 0x1bd   :  { %v974_v34 = vsel %vm971_vm8, %v973_v27, %v969_v18  ;;  %v6521_v32 = vor.u32 %v8394_v44, %v6518_v15  ;;  %v6477_v18 = vor.u32 %v8387_v60, %v6476_v54  ;;  %v6478_v27 = vld [vmem:[%s11396_s2 + $0xb0] sm:$0xf0]  ;;  %v6468_v44 = vld [vmem:[%s11396_s2 + $0x88] sm:$0xf]  ;;  %v8384_v15 = vld [vmem:[%s11396_s2 + $0x94] sm:$0xf0]  ;;  %v6449_v54 = vor.u32 %v8377_v51, %v6446_v55 }
 0x1be   :  { %v6469_v25 = vor.u32 %v8384_v15, %v6468_v44  ;;  %v8380_v59 = vld [vmem:[%s11396_s2 + $0x74] sm:$0xf0]  ;;  %v8375_v13 = vld [vmem:[%s11396_s2 + $0x4c] sm:$0xf0]  ;;  %v8373_v10 = vld [vmem:[%s11396_s2 + $0x44] sm:$0xf] }
 0x1bf   :  { %1543 = vmatpush.bf16.msrb.mxu3 %v6521_v32  ;;  %1506 = vmatpush.bf16.msrb.mxu0 %v6477_v18  ;;  %v6465_v32 = vor.u32 %v8381_v28, %v6462_v0  ;;  %v6453_v60 = vor.u32 %v8380_v59, %v6452_v56  ;;  %v6454_v18 = vld [vmem:[%s11396_s2 + $0x78] sm:$0xf0]  ;;  %v6436_v41 = vld [vmem:[%s11396_s2 + $0x48] sm:$0xf]  ;;  %v8376_v9 = vld [vmem:[%s11396_s2 + $0x54] sm:$0xf0] }
 0x1c0   :  { %v6437_v44 = vor.u32 %v8376_v9, %v6436_v41  ;;  %v8374_v15 = vld [vmem:[%s11396_s2 + $0x4c] sm:$0xf]  ;;  %v8371_v46 = vld [vmem:[%s11396_s2 + $0x2c] sm:$0xf0]  ;;  %v8369_v50 = vld [vmem:[%s11396_s2 + $0x24] sm:$0xf] }
 0x1c1   :  { %v6414_v52 = vld [vmem:[%s11396_s2 + $0x30] sm:$0xf0]  ;;  %v6420_v51 = vld [vmem:[%s11396_s2 + $0x28] sm:$0xf]  ;;  %v8372_v55 = vld [vmem:[%s11396_s2 + $0x34] sm:$0xf0] }
 0x1c2   :  { %v8866_v6 = vpop.eup %8865  ;;  %v8370_v56 = vld [vmem:[%s11396_s2 + $0x2c] sm:$0xf]  ;;  %v6422_v59 = vld [vmem:[%s11396_s2 + $0x38] sm:$0xf0] }
 0x1c3   :  { %v10005_v37 = vmul.f32 %v8866_v6, %v974_v34  ;;  %1544 = vmatpush.bf16.msrb.mxu3 %v6505_v14  ;;  %v6484_v6 = vld [vmem:[%s11396_s2 + $0xa8] sm:$0xf]  ;;  %v8388_v34 = vld [vmem:[%s11396_s2 + $0xb4] sm:$0xf0]  ;;  %1507 = vmatpush.bf16.msrb.mxu0 %v6461_v43  ;;  %v210_v14 = vadd.f32 %v9806_v36, %v9594_v45  ;;  %v6428_v36 = vld [vmem:[%s11396_s2 + $0x40] sm:$0xf] }
 0x1c4   :  { %v6485_v38 = vor.u32 %v8388_v34, %v6484_v6  ;;  %v8366_v41 = vld [vmem:[%s11396_s2 + $0xc] sm:$0xf]  ;;  %v6406_v9 = vld [vmem:[%s11396_s2 + $0x18] sm:$0xf0] }
 0x1c5   :  { %v990_v58 = vpack.c.bf16 %v10005_v37, %v10005_v37 }
 0x1c6   :  { %1532 = vmatpush.bf16.msrb.mxu2 %v6485_v38 }
 0x1c7   :  { %1191 = vmatmul.bf16.vlgmr.msra.gmra.mxu0 %v990_v58  ;;  %1204 = vmatmul.bf16.vlgmr.msra.gmra.mxu1 %v990_v58 }
 0x1c8   :  { %1217 = vmatmul.bf16.vlgmr.msra.gmra.mxu2 %v990_v58  ;;  %1230 = vmatmul.bf16.vlgmr.msra.gmra.mxu3 %v990_v58  ;;  %v6481_v58 = vor.u32 %v8385_v7, %v6478_v27  ;;  %v8378_v7 = vld [vmem:[%s11396_s2 + $0x6c] sm:$0xf] }
 0x1c9   :  { %1545 = vmatpush.bf16.msrb.mxu3 %v6489_v3  ;;  %1508 = vmatpush.bf16.msrb.mxu0 %v6445_v53  ;;  %v6457_v34 = vor.u32 %v8378_v7, %v6454_v18  ;;  %v6429_v3 = vor.u32 %v8375_v13, %v6428_v36  ;;  %v6417_v53 = vor.u32 %v8369_v50, %v6414_v52  ;;  %v6396_v18 = vld [vmem:[%s11396_s2] sm:$0xf]  ;;  %v6398_v13 = vld [vmem:[%s11396_s2 + $0x10] sm:$0xf0] }
 0x1ca   :  { %1519 = vmatpush.bf16.msrb.mxu1 %v6481_v58  ;;  %1533 = vmatpush.bf16.msrb.mxu2 %v6469_v25  ;;  %v6412_v25 = vld [vmem:[%s11396_s2 + $0x20] sm:$0xf]  ;;  %v6425_v7 = vor.u32 %v8370_v56, %v6422_v59 }
 0x1cd   :  { %1546 = vmatpush.bf16.msrb.mxu3 %v6473_v49  ;;  %1509 = vmatpush.bf16.msrb.mxu0 %v6429_v3  ;;  %v6413_v49 = vor.u32 %v8371_v46, %v6412_v25  ;;  %v8368_v3 = vld [vmem:[%s11396_s2 + $0x14] sm:$0xf0] }
 0x1ce   :  { %1520 = vmatpush.bf16.msrb.mxu1 %v6465_v32  ;;  %1534 = vmatpush.bf16.msrb.mxu2 %v6453_v60  ;;  %v6438_v32 = vld [vmem:[%s11396_s2 + $0x58] sm:$0xf0]  ;;  %v6421_v60 = vor.u32 %v8372_v55, %v6420_v51 }
 0x1cf   :  { %v6441_v47 = vor.u32 %v8374_v15, %v6438_v32 }
 0x1d1   :  { %1547 = vmatpush.bf16.msrb.mxu3 %v6457_v34  ;;  %1510 = vmatpush.bf16.msrb.mxu0 %v6413_v49 }
 0x1d2   :  { %1521 = vmatpush.bf16.msrb.mxu1 %v6449_v54  ;;  %1535 = vmatpush.bf16.msrb.mxu2 %v6437_v44 }
 0x1d5   :  { %1548 = vmatpush.bf16.msrb.mxu3 %v6441_v47 }
 0x1d6   :  { %1536 = vmatpush.bf16.msrb.mxu2 %v6421_v60 }
 0x1d9   :  { %1549 = vmatpush.bf16.msrb.mxu3 %v6425_v7 }
 0x244   :  { %v1192_v27 = vpop.f32.mrf.mxu0  ;;  %v1205_v6 = vpop.f32.mrf.mxu1 }
 0x245   :  { %v1235_v58 = vadd.f32 %v1192_v27, %v210_v14  ;;  %v1236_v38 = vadd.f32 %v1205_v6, %v9539_v16  ;;  %v6430_v16 = vld [vmem:[%s11396_s2 + $0x50] sm:$0xf0]  ;;  %v8367_v27 = vld [vmem:[%s11396_s2 + $0xc] sm:$0xf0]  ;;  %v8365_v6 = vld [vmem:[%s11396_s2 + $0x4] sm:$0xf] }
 0x246   :  { %v6433_v0 = vor.u32 %v8373_v10, %v6430_v16  ;;  %v6397_v36 = vor.u32 %v8367_v27, %v6396_v18  ;;  %v6404_v10 = vld [vmem:[%s11396_s2 + $0x8] sm:$0xf]  ;;  %v6401_v16 = vor.u32 %v8365_v6, %v6398_v13 }
 0x247   :  { %v6391_v28 = vmul.f32 -1.442695, %v1235_v58  ;;  %v6392_v43 = vmul.f32 -1.442695, %v1236_v38 }
 0x248   :  { %1522 = vmatpush.bf16.msrb.mxu1 %v6433_v0  ;;  %v6409_v0 = vor.u32 %v8366_v41, %v6406_v9  ;;  %1511 = vmatpush.bf16.msrb.mxu0 %v6397_v36 }
 0x249   :  { %8867 = vpow2.f32 %v6391_v28 }
 0x24a   :  { %8869 = vpow2.f32 %v6392_v43  ;;  %1550 = vmatpush.bf16.msrb.mxu3 %v6409_v0 }
 0x24b   :  { %v1218_v14 = vpop.f32.mrf.mxu2  ;;  %v1231_v54 = vpop.f32.mrf.mxu3 }
 0x24c   :  { %v1238_v34 = vadd.f32 %v1231_v54, %v9544_v20  ;;  %v1194_v58 = vpop.f32.mrf.mxu0  ;;  %v1207_v38 = vpop.f32.mrf.mxu1  ;;  %1523 = vmatpush.bf16.msrb.mxu1 %v6417_v53  ;;  %v6405_v20 = vor.u32 %v8368_v3, %v6404_v10  ;;  %v1237_v52 = vadd.f32 %v1218_v14, %v9528_v8 }
 0x24e   :  { %v6393_v28 = vmul.f32 -1.442695, %v1238_v34  ;;  %1537 = vmatpush.bf16.msrb.mxu2 %v6405_v20 }
 0x24f   :  { %v8868_v43 = vpop.eup %8867 }
 0x250   :  { %v8870_v44 = vpop.eup %8869  ;;  %v1242_v15 = vadd.f32 1.0, %v8868_v43  ;;  %8871 = vpow2.f32 %v6393_v28  ;;  %1524 = vmatpush.bf16.msrb.mxu1 %v6401_v16 }
 0x251   :  { %v1261_v32 = vadd.f32 1.0, %v8870_v44 }
 0x252   :  { %8873 = vrcp.f32 %v1242_v15  ;;  %v1254_v54 = vand.u32 2147483648, %v1242_v15  ;;  %v1252_v18 = vand.u32 2147483647, %v1242_v15  ;;  %vm1248_vm11 = vweird.f32 %v1242_v15 }
 0x253   :  { %8875 = vrcp.f32 %v1261_v32  ;;  %v1220_v25 = vpop.f32.mrf.mxu2  ;;  %v1233_v46 = vpop.f32.mrf.mxu3  ;;  %v1273_v60 = vand.u32 2147483648, %v1261_v32  ;;  %v1271_v6 = vand.u32 2147483647, %v1261_v32  ;;  %vm1267_vm12 = vweird.f32 %v1261_v32 }
 0x254   :  { %v1255_v8 = vor.u32 1.1754944e-38, %v1254_v54  ;;  %vm1253_vm15 = vcmp.eq.f32.partialorder %v1252_v18, 8.507059e+37  ;;  %v8428_v54 = vld [vmem:[%s11396_s2 + $0xf4] sm:$0xf0]  ;;  %v8426_v18 = vld [vmem:[%s11396_s2 + $0xec] sm:$0xf] }
 0x255   :  { %v1274_v36 = vor.u32 1.1754944e-38, %v1273_v60  ;;  %vm1272_vm0 = vcmp.eq.f32.partialorder %v1271_v6, 8.507059e+37 }
 0x256   :  { %v8872_v47 = vpop.eup %8871 }
 0x257   :  { %v1281_v49 = vadd.f32 1.0, %v8872_v47 }
 0x258   :  { %v8874_v50 = vpop.eup %8873 }
 0x259   :  { %v8876_v51 = vpop.eup %8875  ;;  %v1244_v53 = vmul.f32 %v8874_v50, %v1242_v15  ;;  %8877 = vrcp.f32 %v1281_v49  ;;  %vm1249_vm9 = vweird.f32 %v8874_v50  ;;  %v1293_v15 = vand.u32 2147483648, %v1281_v49 }
 0x25a   :  { %v1263_v55 = vmul.f32 %v8876_v51, %v1261_v32  ;;  %8879 = vtanh.f32 %v1237_v52  ;;  %vm1268_vm10 = vweird.f32 %v8876_v51  ;;  %vm1250_vm13 = vmor %vm1248_vm11, %vm1249_vm9  ;;  %vm1287_vm2 = vweird.f32 %v1281_v49 }
 0x25b   :  { %v1245_v56 = vsub.f32 1.0, %v1244_v53  ;;  %vm1269_vm14 = vmor %vm1267_vm12, %vm1268_vm10  ;;  %v1291_v32 = vand.u32 2147483647, %v1281_v49  ;;  %v1294_v46 = vor.u32 1.1754944e-38, %v1293_v15  ;;  %v8425_v53 = vld [vmem:[%s11396_s2 + $0xe4] sm:$0xf] }
 0x25c   :  { %v1264_v59 = vsub.f32 1.0, %v1263_v55  ;;  %v6609_v15 = vld [vmem:[%s11396_s2 + $0xb0] sm:$0xf0] }
 0x25d   :  { %v1246_v7 = vmul.f32 %v8874_v50, %v1245_v56  ;;  %vm1292_vm4 = vcmp.eq.f32.partialorder %v1291_v32, 8.507059e+37  ;;  %v6641_v56 = vld [vmem:[%s11396_s2 + $0xf0] sm:$0xf0]  ;;  %v6615_v32 = vld [vmem:[%s11396_s2 + $0xa8] sm:$0xf] }
 0x25e   :  { %v1265_v27 = vmul.f32 %v8876_v51, %v1264_v59  ;;  %v6647_v59 = vld [vmem:[%s11396_s2 + $0xe8] sm:$0xf]  ;;  %v6644_v60 = vor.u32 %v8425_v53, %v6641_v56  ;;  %v8415_v53 = vld [vmem:[%s11396_s2 + $0x8c] sm:$0xf0] }
 0x25f   :  { %v8878_v34 = vpop.eup %8877  ;;  %v1247_v58 = vadd.f32 %v8874_v50, %v1246_v7  ;;  %v6648_v7 = vor.u32 %v8428_v54, %v6647_v59  ;;  %v6593_v59 = vld [vmem:[%s11396_s2 + $0x90] sm:$0xf0]  ;;  %v6599_v54 = vld [vmem:[%s11396_s2 + $0x88] sm:$0xf] }
 0x260   :  { %v1266_v14 = vadd.f32 %v8876_v51, %v1265_v27  ;;  %v1283_v38 = vmul.f32 %v8878_v34, %v1281_v49  ;;  %v8880_v10 = vpop.eup %8879  ;;  %vm1288_vm1 = vweird.f32 %v8878_v34  ;;  %v8427_v49 = vld [vmem:[%s11396_s2 + $0xec] sm:$0xf0]  ;;  %v6649_v27 = vld [vmem:[%s11396_s2 + $0xf8] sm:$0xf0]  ;;  %1838 = vmatpush.bf16.msra.mxu1 %v6644_v60  ;;  %v8416_v60 = vld [vmem:[%s11396_s2 + $0x94] sm:$0xf0] }
 0x261   :  { %v1251_v13 = vsel %vm1250_vm13, %v8874_v50, %v1247_v58  ;;  %vm1289_vm3 = vmor %vm1287_vm2, %vm1288_vm1  ;;  %v6652_v6 = vor.u32 %v8426_v18, %v6649_v27  ;;  %1851 = vmatpush.bf16.msra.mxu2 %v6648_v7  ;;  %v8423_v58 = vld [vmem:[%s11396_s2 + $0xcc] sm:$0xf0]  ;;  %v6600_v18 = vor.u32 %v8416_v60, %v6599_v54  ;;  %v8414_v27 = vld [vmem:[%s11396_s2 + $0x8c] sm:$0xf] }
 0x262   :  { %v1256_v3 = vsel %vm1253_vm15, %v1255_v8, %v1251_v13  ;;  %v1270_v16 = vsel %vm1269_vm14, %v8876_v51, %v1266_v14  ;;  %v1284_v20 = vsub.f32 1.0, %v1283_v38  ;;  %v6639_v51 = vld [vmem:[%s11396_s2 + $0xe0] sm:$0xf]  ;;  %v8421_v8 = vld [vmem:[%s11396_s2 + $0xc4] sm:$0xf] }
 0x263   :  { %v1275_v41 = vsel %vm1272_vm0, %v1274_v36, %v1270_v16  ;;  %v1298_v9 = vmul.f32 %v8880_v10, %v1256_v3  ;;  %v6640_v55 = vor.u32 %v8427_v49, %v6639_v51  ;;  %1864 = vmatpush.bf16.msra.mxu3 %v6652_v6  ;;  %v6625_v38 = vld [vmem:[%s11396_s2 + $0xd0] sm:$0xf0]  ;;  %v6631_v36 = vld [vmem:[%s11396_s2 + $0xc8] sm:$0xf]  ;;  %v8424_v13 = vld [vmem:[%s11396_s2 + $0xd4] sm:$0xf0] }
 0x264   :  { %v1297_v28 = vmul.f32 %v1275_v41, %v10002_v57  ;;  %v1285_v43 = vmul.f32 %v8878_v34, %v1284_v20  ;;  %v6628_v10 = vor.u32 %v8421_v8, %v6625_v38  ;;  %v6632_v3 = vor.u32 %v8424_v13, %v6631_v36  ;;  %v8422_v16 = vld [vmem:[%s11396_s2 + $0xcc] sm:$0xf]  ;;  %v6633_v20 = vld [vmem:[%s11396_s2 + $0xd8] sm:$0xf0]  ;;  %v6591_v49 = vld [vmem:[%s11396_s2 + $0x80] sm:$0xf] }
 0x265   :  { %1825 = vmatpush.bf16.msra.mxu0 %v6640_v55  ;;  %v6636_v41 = vor.u32 %v8422_v16, %v6633_v20  ;;  %v8413_v55 = vld [vmem:[%s11396_s2 + $0x84] sm:$0xf]  ;;  %v6592_v56 = vor.u32 %v8415_v53, %v6591_v49  ;;  %v6601_v6 = vld [vmem:[%s11396_s2 + $0x98] sm:$0xf0]  ;;  %v8411_v8 = vld [vmem:[%s11396_s2 + $0x6c] sm:$0xf0]  ;;  %v212_v16 = vadd.f32 %v9871_v39, %v9594_v45 }
 0x266   :  { %v10207_v0 = vadd.f32 %v1298_v9, %v1297_v28  ;;  %v1286_v44 = vadd.f32 %v8878_v34, %v1285_v43  ;;  %1839 = vmatpush.bf16.msra.mxu1 %v6628_v10  ;;  %1852 = vmatpush.bf16.msra.mxu2 %v6632_v3  ;;  %v6607_v9 = vld [vmem:[%s11396_s2 + $0xa0] sm:$0xf]  ;;  %v8419_v28 = vld [vmem:[%s11396_s2 + $0xac] sm:$0xf0]  ;;  %v8417_v43 = vld [vmem:[%s11396_s2 + $0xa4] sm:$0xf]  ;;  %v6596_v7 = vor.u32 %v8413_v55, %v6593_v59 }
 0x267   :  { %1865 = vmatpush.bf16.msra.mxu3 %v6636_v41  ;;  %v6577_v36 = vld [vmem:[%s11396_s2 + $0x70] sm:$0xf0]  ;;  %v6583_v13 = vld [vmem:[%s11396_s2 + $0x68] sm:$0xf]  ;;  %v8412_v10 = vld [vmem:[%s11396_s2 + $0x74] sm:$0xf0]  ;;  %v241_v3 = vadd.f32 %v9549_v22, %v9534_v11 }
 0x268   :  { %8881 = vtanh.f32 %v10207_v0  ;;  %v1290_v25 = vsel %vm1289_vm3, %v8878_v34, %v1286_v44  ;;  %v6623_v34 = vld [vmem:[%s11396_s2 + $0xc0] sm:$0xf]  ;;  %v6608_v44 = vor.u32 %v8419_v28, %v6607_v9  ;;  %v6584_v41 = vor.u32 %v8412_v10, %v6583_v13  ;;  %v8410_v9 = vld [vmem:[%s11396_s2 + $0x6c] sm:$0xf]  ;;  %v6585_v28 = vld [vmem:[%s11396_s2 + $0x78] sm:$0xf0] }
 0x269   :  { %v1295_v50 = vsel %vm1292_vm4, %v1294_v46, %v1290_v25  ;;  %v6624_v14 = vor.u32 %v8423_v58, %v6623_v34  ;;  %v8420_v25 = vld [vmem:[%s11396_s2 + $0xb4] sm:$0xf0]  ;;  %v6612_v46 = vor.u32 %v8417_v43, %v6609_v15  ;;  %v6604_v34 = vor.u32 %v8414_v27, %v6601_v6  ;;  %v6575_v58 = vld [vmem:[%s11396_s2 + $0x60] sm:$0xf]  ;;  %v8407_v39 = vld [vmem:[%s11396_s2 + $0x4c] sm:$0xf0] }
 0x26a   :  { %v6576_v38 = vor.u32 %v8411_v8, %v6575_v58  ;;  %v6588_v15 = vor.u32 %v8410_v9, %v6585_v28  ;;  %v6559_v22 = vld [vmem:[%s11396_s2 + $0x40] sm:$0xf]  ;;  %v8406_v59 = vld [vmem:[%s11396_s2 + $0x4c] sm:$0xf]  ;;  %v6569_v54 = vld [vmem:[%s11396_s2 + $0x58] sm:$0xf0]  ;;  %v299_v8 = vadd.f32 %v9551_v23, %v9541_v17 }
 0x26b   :  { %1826 = vmatpush.bf16.msra.mxu0 %v6624_v14  ;;  %1840 = vmatpush.bf16.msra.mxu1 %v6612_v46  ;;  %v8409_v14 = vld [vmem:[%s11396_s2 + $0x64] sm:$0xf]  ;;  %v6543_v60 = vld [vmem:[%s11396_s2 + $0x20] sm:$0xf]  ;;  %v6551_v58 = vld [vmem:[%s11396_s2 + $0x28] sm:$0xf] }
 0x26c   :  { %v6580_v20 = vor.u32 %v8409_v14, %v6577_v36  ;;  %v8405_v46 = vld [vmem:[%s11396_s2 + $0x44] sm:$0xf]  ;;  %v8402_v36 = vld [vmem:[%s11396_s2 + $0x2c] sm:$0xf]  ;;  %v6553_v13 = vld [vmem:[%s11396_s2 + $0x38] sm:$0xf0] }
 0x26d   :  { %v8401_v6 = vld [vmem:[%s11396_s2 + $0x24] sm:$0xf]  ;;  %v6527_v23 = vld [vmem:[%s11396_s2] sm:$0xf] }
 0x26e   :  { %v8882_v47 = vpop.eup %8881  ;;  %v8397_v9 = vld [vmem:[%s11396_s2 + $0x4] sm:$0xf] }
 0x26f   :  { %v10210_v52 = vmul.f32 %v8882_v47, %v1295_v50  ;;  %v6616_v47 = vor.u32 %v8420_v25, %v6615_v32  ;;  %v8418_v50 = vld [vmem:[%s11396_s2 + $0xac] sm:$0xf]  ;;  %1827 = vmatpush.bf16.msra.mxu0 %v6608_v44  ;;  %1841 = vmatpush.bf16.msra.mxu1 %v6596_v7  ;;  %v8403_v7 = vld [vmem:[%s11396_s2 + $0x2c] sm:$0xf0] }
 0x270   :  { %v6544_v27 = vor.u32 %v8403_v7, %v6543_v60  ;;  %v270_v7 = vadd.f32 %v9536_v12, %v9523_v5 }
 0x271   :  { %v1311_v57 = vpack.c.bf16 %v10210_v52, %v10210_v52  ;;  %1853 = vmatpush.bf16.msra.mxu2 %v6616_v47  ;;  %v6560_v47 = vor.u32 %v8407_v39, %v6559_v22  ;;  %v8400_v22 = vld [vmem:[%s11396_s2 + $0x14] sm:$0xf0] }
 0x273   :  { %1512 = vmatmul.bf16.vlgmr.msrb.gmra.mxu0 %v1311_v57  ;;  %1525 = vmatmul.bf16.vlgmr.msrb.gmra.mxu1 %v1311_v57 }
 0x274   :  { %1538 = vmatmul.bf16.vlgmr.msrb.gmra.mxu2 %v1311_v57  ;;  %1551 = vmatmul.bf16.vlgmr.msrb.gmra.mxu3 %v1311_v57  ;;  %v6617_v57 = vld [vmem:[%s11396_s2 + $0xb8] sm:$0xf0] }
 0x275   :  { %v6620_v51 = vor.u32 %v8418_v50, %v6617_v57  ;;  %1828 = vmatpush.bf16.msra.mxu0 %v6592_v56  ;;  %1854 = vmatpush.bf16.msra.mxu2 %v6600_v18  ;;  %v6561_v50 = vld [vmem:[%s11396_s2 + $0x50] sm:$0xf0]  ;;  %v6567_v57 = vld [vmem:[%s11396_s2 + $0x48] sm:$0xf]  ;;  %v6572_v18 = vor.u32 %v8406_v59, %v6569_v54 }
 0x276   :  { %1842 = vmatpush.bf16.msra.mxu1 %v6580_v20  ;;  %v6564_v55 = vor.u32 %v8405_v46, %v6561_v50  ;;  %v6556_v20 = vor.u32 %v8402_v36, %v6553_v13  ;;  %v6537_v50 = vld [vmem:[%s11396_s2 + $0x18] sm:$0xf0] }
 0x277   :  { %1866 = vmatpush.bf16.msra.mxu3 %v6620_v51  ;;  %v8408_v51 = vld [vmem:[%s11396_s2 + $0x54] sm:$0xf0] }
 0x278   :  { %v6568_v56 = vor.u32 %v8408_v51, %v6567_v57 }
 0x279   :  { %1829 = vmatpush.bf16.msra.mxu0 %v6576_v38  ;;  %1855 = vmatpush.bf16.msra.mxu2 %v6584_v41  ;;  %v8404_v38 = vld [vmem:[%s11396_s2 + $0x34] sm:$0xf0]  ;;  %v8399_v41 = vld [vmem:[%s11396_s2 + $0xc] sm:$0xf0] }
 0x27a   :  { %1843 = vmatpush.bf16.msra.mxu1 %v6564_v55 }
 0x27b   :  { %1867 = vmatpush.bf16.msra.mxu3 %v6604_v34  ;;  %v6545_v34 = vld [vmem:[%s11396_s2 + $0x30] sm:$0xf0] }
 0x27c   :  { %v6548_v14 = vor.u32 %v8401_v6, %v6545_v34 }
 0x27d   :  { %1830 = vmatpush.bf16.msra.mxu0 %v6560_v47  ;;  %1856 = vmatpush.bf16.msra.mxu2 %v6568_v56  ;;  %v8398_v47 = vld [vmem:[%s11396_s2 + $0xc] sm:$0xf] }
 0x27e   :  { %1844 = vmatpush.bf16.msra.mxu1 %v6548_v14 }
 0x27f   :  { %1868 = vmatpush.bf16.msra.mxu3 %v6588_v15  ;;  %v6528_v15 = vor.u32 %v8399_v41, %v6527_v23 }
 0x281   :  { %1831 = vmatpush.bf16.msra.mxu0 %v6544_v27 }
 0x283   :  { %1869 = vmatpush.bf16.msra.mxu3 %v6572_v18 }
 0x285   :  { %1832 = vmatpush.bf16.msra.mxu0 %v6528_v15 }
 0x287   :  { %1870 = vmatpush.bf16.msra.mxu3 %v6556_v20 }
 0x2f0   :  { %v1513_v43 = vpop.f32.mrf.mxu0  ;;  %v1526_v44 = vpop.f32.mrf.mxu1 }
 0x2f1   :  { %v1556_v32 = vadd.f32 %v1513_v43, %v212_v16  ;;  %v1557_v25 = vadd.f32 %v1526_v44, %v241_v3  ;;  %v6552_v16 = vor.u32 %v8404_v38, %v6551_v58 }
 0x2f3   :  { %v6522_v49 = vmul.f32 -1.442695, %v1556_v32  ;;  %v6523_v53 = vmul.f32 -1.442695, %v1557_v25  ;;  %v6529_v32 = vld [vmem:[%s11396_s2 + $0x10] sm:$0xf0]  ;;  %1857 = vmatpush.bf16.msra.mxu2 %v6552_v16 }
 0x2f4   :  { %v6535_v25 = vld [vmem:[%s11396_s2 + $0x8] sm:$0xf]  ;;  %v6532_v39 = vor.u32 %v8397_v9, %v6529_v32 }
 0x2f5   :  { %8883 = vpow2.f32 %v6522_v49  ;;  %v6536_v46 = vor.u32 %v8400_v22, %v6535_v25  ;;  %v6540_v49 = vor.u32 %v8398_v47, %v6537_v50 }
 0x2f6   :  { %8885 = vpow2.f32 %v6523_v53  ;;  %1845 = vmatpush.bf16.msra.mxu1 %v6532_v39 }
 0x2f7   :  { %v1539_v10 = vpop.f32.mrf.mxu2  ;;  %v1552_v3 = vpop.f32.mrf.mxu3  ;;  %1858 = vmatpush.bf16.msra.mxu2 %v6536_v46  ;;  %1871 = vmatpush.bf16.msra.mxu3 %v6540_v49 }
 0x2f8   :  { %v1559_v28 = vadd.f32 %v1552_v3, %v299_v8  ;;  %v1515_v43 = vpop.f32.mrf.mxu0  ;;  %v1528_v44 = vpop.f32.mrf.mxu1  ;;  %v1558_v6 = vadd.f32 %v1539_v10, %v270_v7  ;;  %v6770_v7 = vld [vmem:[%s11396_s2 + $0xe0] sm:$0xf] }
 0x2fa   :  { %v6524_v57 = vmul.f32 -1.442695, %v1559_v28 }
 0x2fb   :  { %v8884_v51 = vpop.eup %8883 }
 0x2fc   :  { %v8886_v53 = vpop.eup %8885  ;;  %v1563_v55 = vadd.f32 1.0, %v8884_v51  ;;  %8887 = vpow2.f32 %v6524_v57 }
 0x2fd   :  { %v1582_v56 = vadd.f32 1.0, %v8886_v53 }
 0x2fe   :  { %8889 = vrcp.f32 %v1563_v55  ;;  %v1575_v36 = vand.u32 2147483648, %v1563_v55  ;;  %v1573_v16 = vand.u32 2147483647, %v1563_v55  ;;  %vm1569_vm7 = vweird.f32 %v1563_v55 }
 0x2ff   :  { %8891 = vrcp.f32 %v1582_v56  ;;  %v1541_v59 = vpop.f32.mrf.mxu2  ;;  %v1554_v54 = vpop.f32.mrf.mxu3  ;;  %v1594_v13 = vand.u32 2147483648, %v1582_v56  ;;  %v1592_v23 = vand.u32 2147483647, %v1582_v56  ;;  %vm1588_vm8 = vweird.f32 %v1582_v56 }
 0x300   :  { %v1576_v10 = vor.u32 1.1754944e-38, %v1575_v36  ;;  %vm1574_vm11 = vcmp.eq.f32.partialorder %v1573_v16, 8.507059e+37  ;;  %v8458_v36 = vld [vmem:[%s11396_s2 + $0xec] sm:$0xf]  ;;  %v6754_v16 = vld [vmem:[%s11396_s2 + $0xc0] sm:$0xf] }
 0x301   :  { %v1595_v43 = vor.u32 1.1754944e-38, %v1594_v13  ;;  %vm1593_vm12 = vcmp.eq.f32.partialorder %v1592_v23, 8.507059e+37  ;;  %v6780_v13 = vld [vmem:[%s11396_s2 + $0xf8] sm:$0xf0]  ;;  %v8453_v23 = vld [vmem:[%s11396_s2 + $0xc4] sm:$0xf] }
 0x302   :  { %v8888_v60 = vpop.eup %8887 }
 0x303   :  { %v1602_v18 = vadd.f32 1.0, %v8888_v60 }
 0x304   :  { %v8890_v27 = vpop.eup %8889 }
 0x305   :  { %v8892_v34 = vpop.eup %8891  ;;  %v1565_v58 = vmul.f32 %v8890_v27, %v1563_v55  ;;  %8893 = vrcp.f32 %v1602_v18  ;;  %vm1570_vm5 = vweird.f32 %v8890_v27  ;;  %v1614_v49 = vand.u32 2147483648, %v1602_v18 }
 0x306   :  { %v1584_v8 = vmul.f32 %v8892_v34, %v1582_v56  ;;  %8895 = vtanh.f32 %v1558_v6  ;;  %vm1589_vm6 = vweird.f32 %v8892_v34  ;;  %vm1571_vm9 = vmor %vm1569_vm7, %vm1570_vm5  ;;  %vm1608_vm14 = vweird.f32 %v1602_v18 }
 0x307   :  { %v1566_v14 = vsub.f32 1.0, %v1565_v58  ;;  %vm1590_vm10 = vmor %vm1588_vm8, %vm1589_vm6  ;;  %v1612_v53 = vand.u32 2147483647, %v1602_v18  ;;  %v1615_v56 = vor.u32 1.1754944e-38, %v1614_v49  ;;  %v6778_v58 = vld [vmem:[%s11396_s2 + $0xe8] sm:$0xf] }
 0x308   :  { %v1585_v38 = vsub.f32 1.0, %v1584_v8  ;;  %v8460_v8 = vld [vmem:[%s11396_s2 + $0xf4] sm:$0xf0] }
 0x309   :  { %v1567_v3 = vmul.f32 %v8890_v27, %v1566_v14  ;;  %vm1613_vm0 = vcmp.eq.f32.partialorder %v1612_v53, 8.507059e+37 }
 0x30a   :  { %v1586_v20 = vmul.f32 %v8892_v34, %v1585_v38  ;;  %v6779_v38 = vor.u32 %v8460_v8, %v6778_v58 }
 0x30b   :  { %v8894_v41 = vpop.eup %8893  ;;  %v1568_v12 = vadd.f32 %v8890_v27, %v1567_v3  ;;  %v6783_v3 = vor.u32 %v8458_v36, %v6780_v13  ;;  %v6706_v13 = vld [vmem:[%s11396_s2 + $0x60] sm:$0xf] }
 0x30c   :  { %v1587_v9 = vadd.f32 %v8892_v34, %v1586_v20  ;;  %v1604_v28 = vmul.f32 %v8894_v41, %v1602_v18  ;;  %v8896_v15 = vpop.eup %8895  ;;  %vm1609_vm13 = vweird.f32 %v8894_v41  ;;  %v8459_v18 = vld [vmem:[%s11396_s2 + $0xec] sm:$0xf0]  ;;  %2172 = vmatpush.bf16.msrb.mxu2 %v6779_v38  ;;  %v6732_v38 = vld [vmem:[%s11396_s2 + $0x98] sm:$0xf0] }
 0x30d   :  { %v1572_v44 = vsel %vm1571_vm9, %v8890_v27, %v1568_v12  ;;  %vm1610_vm15 = vmor %vm1608_vm14, %vm1609_vm13  ;;  %v8457_v27 = vld [vmem:[%s11396_s2 + $0xe4] sm:$0xf]  ;;  %v6771_v6 = vor.u32 %v8459_v18, %v6770_v7  ;;  %v8455_v20 = vld [vmem:[%s11396_s2 + $0xcc] sm:$0xf0]  ;;  %2185 = vmatpush.bf16.msrb.mxu3 %v6783_v3 }
 0x30e   :  { %v1577_v32 = vsel %vm1574_vm11, %v1576_v10, %v1572_v44  ;;  %v1591_v25 = vsel %vm1590_vm10, %v8892_v34, %v1587_v9  ;;  %v1605_v22 = vsub.f32 1.0, %v1604_v28  ;;  %v6772_v34 = vld [vmem:[%s11396_s2 + $0xf0] sm:$0xf0]  ;;  %v6762_v10 = vld [vmem:[%s11396_s2 + $0xc8] sm:$0xf] }
 0x30f   :  { %v1596_v39 = vsel %vm1593_vm12, %v1595_v43, %v1591_v25  ;;  %v1619_v46 = vmul.f32 %v8896_v15, %v1577_v32  ;;  %v6775_v14 = vor.u32 %v8457_v27, %v6772_v34  ;;  %2146 = vmatpush.bf16.msrb.mxu0 %v6771_v6  ;;  %v6756_v12 = vld [vmem:[%s11396_s2 + $0xd0] sm:$0xf0]  ;;  %v8456_v9 = vld [vmem:[%s11396_s2 + $0xd4] sm:$0xf0]  ;;  %v8454_v44 = vld [vmem:[%s11396_s2 + $0xcc] sm:$0xf] }
 0x310   :  { %v1618_v47 = vmul.f32 %v1596_v39, %v10207_v0  ;;  %v1606_v50 = vmul.f32 %v8894_v41, %v1605_v22  ;;  %v6759_v28 = vor.u32 %v8453_v23, %v6756_v12  ;;  %v6763_v43 = vor.u32 %v8456_v9, %v6762_v10  ;;  %v6764_v15 = vld [vmem:[%s11396_s2 + $0xd8] sm:$0xf0]  ;;  %v6738_v25 = vld [vmem:[%s11396_s2 + $0xa0] sm:$0xf]  ;;  %v8451_v22 = vld [vmem:[%s11396_s2 + $0xac] sm:$0xf0] }
 0x311   :  { %2159 = vmatpush.bf16.msrb.mxu1 %v6775_v14  ;;  %v6767_v32 = vor.u32 %v8454_v44, %v6764_v15  ;;  %v8449_v39 = vld [vmem:[%s11396_s2 + $0xa4] sm:$0xf]  ;;  %v6724_v27 = vld [vmem:[%s11396_s2 + $0x90] sm:$0xf0]  ;;  %v6730_v6 = vld [vmem:[%s11396_s2 + $0x88] sm:$0xf]  ;;  %v215_v10 = vadd.f32 %v9506_v62, %v9594_v45 }
 0x312   :  { %v10415_v57 = vadd.f32 %v1619_v46, %v1618_v47  ;;  %v1607_v51 = vadd.f32 %v8894_v41, %v1606_v50  ;;  %2173 = vmatpush.bf16.msrb.mxu2 %v6763_v43  ;;  %v6739_v46 = vor.u32 %v8451_v22, %v6738_v25  ;;  %v6740_v47 = vld [vmem:[%s11396_s2 + $0xb0] sm:$0xf0]  ;;  %v6746_v50 = vld [vmem:[%s11396_s2 + $0xa8] sm:$0xf]  ;;  %v8445_v7 = vld [vmem:[%s11396_s2 + $0x84] sm:$0xf] }
 0x313   :  { %2186 = vmatpush.bf16.msrb.mxu3 %v6767_v32  ;;  %v6743_v49 = vor.u32 %v8449_v39, %v6740_v47  ;;  %v8448_v34 = vld [vmem:[%s11396_s2 + $0x94] sm:$0xf0]  ;;  %v6727_v58 = vor.u32 %v8445_v7, %v6724_v27  ;;  %v8446_v14 = vld [vmem:[%s11396_s2 + $0x8c] sm:$0xf]  ;;  %v8443_v3 = vld [vmem:[%s11396_s2 + $0x6c] sm:$0xf0] }
 0x314   :  { %8897 = vtanh.f32 %v10415_v57  ;;  %v1611_v55 = vsel %vm1610_vm15, %v8894_v41, %v1607_v51  ;;  %v6755_v41 = vor.u32 %v8455_v20, %v6754_v16  ;;  %v8452_v51 = vld [vmem:[%s11396_s2 + $0xb4] sm:$0xf0]  ;;  %v6731_v8 = vor.u32 %v8448_v34, %v6730_v6  ;;  %v8441_v16 = vld [vmem:[%s11396_s2 + $0x64] sm:$0xf]  ;;  %v6708_v23 = vld [vmem:[%s11396_s2 + $0x70] sm:$0xf0] }
 0x315   :  { %v1616_v54 = vsel %vm1613_vm0, %v1615_v56, %v1611_v55  ;;  %2160 = vmatpush.bf16.msrb.mxu1 %v6759_v28  ;;  %v6747_v53 = vor.u32 %v8452_v51, %v6746_v50  ;;  %v8450_v55 = vld [vmem:[%s11396_s2 + $0xac] sm:$0xf]  ;;  %v6748_v56 = vld [vmem:[%s11396_s2 + $0xb8] sm:$0xf0]  ;;  %v6735_v36 = vor.u32 %v8446_v14, %v6732_v38  ;;  %v6707_v20 = vor.u32 %v8443_v3, %v6706_v13  ;;  %v8444_v12 = vld [vmem:[%s11396_s2 + $0x74] sm:$0xf0] }
 0x316   :  { %2147 = vmatpush.bf16.msrb.mxu0 %v6755_v41  ;;  %v6714_v41 = vld [vmem:[%s11396_s2 + $0x68] sm:$0xf]  ;;  %v6711_v9 = vor.u32 %v8441_v16, %v6708_v23  ;;  %v8442_v43 = vld [vmem:[%s11396_s2 + $0x6c] sm:$0xf]  ;;  %v6716_v44 = vld [vmem:[%s11396_s2 + $0x78] sm:$0xf0] }
 0x317   :  { %2174 = vmatpush.bf16.msrb.mxu2 %v6747_v53  ;;  %v6715_v28 = vor.u32 %v8444_v12, %v6714_v41  ;;  %v6719_v25 = vor.u32 %v8442_v43, %v6716_v44  ;;  %v6690_v62 = vld [vmem:[%s11396_s2 + $0x40] sm:$0xf]  ;;  %v8437_v47 = vld [vmem:[%s11396_s2 + $0x44] sm:$0xf]  ;;  %v6698_v51 = vld [vmem:[%s11396_s2 + $0x48] sm:$0xf] }
 0x318   :  { %v6674_v7 = vld [vmem:[%s11396_s2 + $0x20] sm:$0xf]  ;;  %v8433_v34 = vld [vmem:[%s11396_s2 + $0x24] sm:$0xf]  ;;  %v8436_v38 = vld [vmem:[%s11396_s2 + $0x34] sm:$0xf0] }
 0x319   :  { %2161 = vmatpush.bf16.msrb.mxu1 %v6743_v49  ;;  %v8440_v49 = vld [vmem:[%s11396_s2 + $0x54] sm:$0xf0]  ;;  %v6684_v13 = vld [vmem:[%s11396_s2 + $0x38] sm:$0xf0]  ;;  %v6658_v41 = vld [vmem:[%s11396_s2] sm:$0xf] }
 0x31a   :  { %v8898_v59 = vpop.eup %8897  ;;  %2148 = vmatpush.bf16.msrb.mxu0 %v6739_v46  ;;  %v8439_v46 = vld [vmem:[%s11396_s2 + $0x4c] sm:$0xf0] }
 0x31b   :  { %v10418_v60 = vmul.f32 %v8898_v59, %v1616_v54  ;;  %v6751_v59 = vor.u32 %v8450_v55, %v6748_v56  ;;  %v6722_v54 = vld [vmem:[%s11396_s2 + $0x80] sm:$0xf]  ;;  %2175 = vmatpush.bf16.msrb.mxu2 %v6731_v8  ;;  %v6691_v50 = vor.u32 %v8439_v46, %v6690_v62  ;;  %v6682_v8 = vld [vmem:[%s11396_s2 + $0x28] sm:$0xf]  ;;  %v8431_v12 = vld [vmem:[%s11396_s2 + $0xc] sm:$0xf0] }
 0x31c   :  { %v6659_v44 = vor.u32 %v8431_v12, %v6658_v41  ;;  %v6668_v62 = vld [vmem:[%s11396_s2 + $0x18] sm:$0xf0] }
 0x31d   :  { %v1632_v0 = vpack.c.bf16 %v10418_v60, %v10418_v60  ;;  %2187 = vmatpush.bf16.msrb.mxu3 %v6751_v59  ;;  %2162 = vmatpush.bf16.msrb.mxu1 %v6727_v58  ;;  %v6699_v59 = vor.u32 %v8440_v49, %v6698_v51  ;;  %v6676_v58 = vld [vmem:[%s11396_s2 + $0x30] sm:$0xf0] }
 0x31e   :  { %v6679_v14 = vor.u32 %v8433_v34, %v6676_v58 }
 0x31f   :  { %1833 = vmatmul.bf16.vlgmr.msra.gmra.mxu0 %v1632_v0  ;;  %1846 = vmatmul.bf16.vlgmr.msra.gmra.mxu1 %v1632_v0 }
 0x320   :  { %1859 = vmatmul.bf16.vlgmr.msra.gmra.mxu2 %v1632_v0  ;;  %1872 = vmatmul.bf16.vlgmr.msra.gmra.mxu3 %v1632_v0  ;;  %v8447_v0 = vld [vmem:[%s11396_s2 + $0x8c] sm:$0xf0] }
 0x321   :  { %v6723_v18 = vor.u32 %v8447_v0, %v6722_v54  ;;  %2188 = vmatpush.bf16.msrb.mxu3 %v6735_v36  ;;  %2163 = vmatpush.bf16.msrb.mxu1 %v6711_v9  ;;  %v8438_v54 = vld [vmem:[%s11396_s2 + $0x4c] sm:$0xf]  ;;  %v6700_v0 = vld [vmem:[%s11396_s2 + $0x58] sm:$0xf0] }
 0x322   :  { %2176 = vmatpush.bf16.msrb.mxu2 %v6715_v28  ;;  %v6703_v27 = vor.u32 %v8438_v54, %v6700_v0  ;;  %v8434_v36 = vld [vmem:[%s11396_s2 + $0x2c] sm:$0xf] }
 0x323   :  { %2149 = vmatpush.bf16.msrb.mxu0 %v6723_v18  ;;  %v8435_v18 = vld [vmem:[%s11396_s2 + $0x2c] sm:$0xf0]  ;;  %v6687_v23 = vor.u32 %v8434_v36, %v6684_v13 }
 0x324   :  { %v6675_v6 = vor.u32 %v8435_v18, %v6674_v7 }
 0x325   :  { %2189 = vmatpush.bf16.msrb.mxu3 %v6719_v25  ;;  %v8432_v25 = vld [vmem:[%s11396_s2 + $0x14] sm:$0xf0] }
 0x326   :  { %2177 = vmatpush.bf16.msrb.mxu2 %v6699_v59 }
 0x327   :  { %2150 = vmatpush.bf16.msrb.mxu0 %v6707_v20  ;;  %v6683_v20 = vor.u32 %v8436_v38, %v6682_v8 }
 0x329   :  { %2190 = vmatpush.bf16.msrb.mxu3 %v6703_v27 }
 0x32a   :  { %2178 = vmatpush.bf16.msrb.mxu2 %v6683_v20 }
 0x32b   :  { %2151 = vmatpush.bf16.msrb.mxu0 %v6691_v50 }
 0x32d   :  { %2191 = vmatpush.bf16.msrb.mxu3 %v6687_v23 }
 0x32f   :  { %2152 = vmatpush.bf16.msrb.mxu0 %v6675_v6 }
 0x333   :  { %2153 = vmatpush.bf16.msrb.mxu0 %v6659_v44 }
 0x39c   :  { %v1834_v15 = vpop.f32.mrf.mxu0  ;;  %v1847_v32 = vpop.f32.mrf.mxu1 }
 0x39d   :  { %v1877_v22 = vadd.f32 %v1834_v15, %v215_v10  ;;  %v1878_v39 = vadd.f32 %v1847_v32, %v9556_v26  ;;  %v6692_v26 = vld [vmem:[%s11396_s2 + $0x50] sm:$0xf0]  ;;  %v8429_v10 = vld [vmem:[%s11396_s2 + $0x4] sm:$0xf]  ;;  %v6666_v32 = vld [vmem:[%s11396_s2 + $0x8] sm:$0xf] }
 0x39e   :  { %v6695_v56 = vor.u32 %v8437_v47, %v6692_v26  ;;  %v6660_v15 = vld [vmem:[%s11396_s2 + $0x10] sm:$0xf0] }
 0x39f   :  { %v6653_v53 = vmul.f32 -1.442695, %v1877_v22  ;;  %v6654_v55 = vmul.f32 -1.442695, %v1878_v39  ;;  %v6663_v22 = vor.u32 %v8429_v10, %v6660_v15  ;;  %v8430_v39 = vld [vmem:[%s11396_s2 + $0xc] sm:$0xf] }
 0x3a0   :  { %2164 = vmatpush.bf16.msrb.mxu1 %v6695_v56  ;;  %v6671_v50 = vor.u32 %v8430_v39, %v6668_v62 }
 0x3a1   :  { %8899 = vpow2.f32 %v6653_v53 }
 0x3a2   :  { %8901 = vpow2.f32 %v6654_v55  ;;  %2192 = vmatpush.bf16.msrb.mxu3 %v6671_v50 }
 0x3a3   :  { %v1860_v3 = vpop.f32.mrf.mxu2  ;;  %v1873_v16 = vpop.f32.mrf.mxu3 }
 0x3a4   :  { %v1880_v9 = vadd.f32 %v1873_v16, %v9559_v29  ;;  %v1836_v28 = vpop.f32.mrf.mxu0  ;;  %v1849_v43 = vpop.f32.mrf.mxu1  ;;  %2165 = vmatpush.bf16.msrb.mxu1 %v6679_v14  ;;  %v6667_v29 = vor.u32 %v8432_v25, %v6666_v32  ;;  %v1879_v0 = vadd.f32 %v1860_v3, %v9547_v21 }
 0x3a6   :  { %v6655_v46 = vmul.f32 -1.442695, %v1880_v9  ;;  %2179 = vmatpush.bf16.msrb.mxu2 %v6667_v29 }
 0x3a7   :  { %v8900_v47 = vpop.eup %8899 }
 0x3a8   :  { %v8902_v26 = vpop.eup %8901  ;;  %v1884_v51 = vadd.f32 1.0, %v8900_v47  ;;  %8903 = vpow2.f32 %v6655_v46  ;;  %2166 = vmatpush.bf16.msrb.mxu1 %v6663_v22 }
 0x3a9   :  { %v1903_v49 = vadd.f32 1.0, %v8902_v26 }
 0x3aa   :  { %8905 = vrcp.f32 %v1884_v51  ;;  %v1896_v58 = vand.u32 2147483648, %v1884_v51  ;;  %v1894_v38 = vand.u32 2147483647, %v1884_v51  ;;  %vm1890_vm3 = vweird.f32 %v1884_v51 }
 0x3ab   :  { %8907 = vrcp.f32 %v1903_v49  ;;  %v1862_v53 = vpop.f32.mrf.mxu2  ;;  %v1875_v55 = vpop.f32.mrf.mxu3  ;;  %v1915_v8 = vand.u32 2147483648, %v1903_v49  ;;  %v1913_v13 = vand.u32 2147483647, %v1903_v49  ;;  %vm1909_vm4 = vweird.f32 %v1903_v49 }
 0x3ac   :  { %v1897_v21 = vor.u32 1.1754944e-38, %v1896_v58  ;;  %vm1895_vm7 = vcmp.eq.f32.partialorder %v1894_v38, 8.507059e+37  ;;  %v8491_v53 = vld [vmem:[%s11396_s2 + $0xec] sm:$0xf0]  ;;  %v8489_v55 = vld [vmem:[%s11396_s2 + $0xe4] sm:$0xf] }
 0x3ad   :  { %v1916_v41 = vor.u32 1.1754944e-38, %v1915_v8  ;;  %vm1914_vm8 = vcmp.eq.f32.partialorder %v1913_v13, 8.507059e+37  ;;  %v6885_v58 = vld [vmem:[%s11396_s2 + $0xc0] sm:$0xf]  ;;  %v8487_v8 = vld [vmem:[%s11396_s2 + $0xcc] sm:$0xf0] }
 0x3ae   :  { %v8904_v56 = vpop.eup %8903  ;;  %v6886_v38 = vor.u32 %v8487_v8, %v6885_v58  ;;  %v6893_v13 = vld [vmem:[%s11396_s2 + $0xc8] sm:$0xf]  ;;  %v8476_v8 = vld [vmem:[%s11396_s2 + $0x74] sm:$0xf0] }
 0x3af   :  { %v1923_v59 = vadd.f32 1.0, %v8904_v56  ;;  %v6845_v58 = vld [vmem:[%s11396_s2 + $0x68] sm:$0xf] }
 0x3b0   :  { %v8906_v54 = vpop.eup %8905 }
 0x3b1   :  { %v8908_v7 = vpop.eup %8907  ;;  %v1886_v18 = vmul.f32 %v8906_v54, %v1884_v51  ;;  %8909 = vrcp.f32 %v1923_v59  ;;  %vm1891_vm1 = vweird.f32 %v8906_v54  ;;  %v1935_v39 = vand.u32 2147483648, %v1923_v59 }
 0x3b2   :  { %v1905_v27 = vmul.f32 %v8908_v7, %v1903_v49  ;;  %8911 = vtanh.f32 %v1879_v0  ;;  %vm1910_vm2 = vweird.f32 %v8908_v7  ;;  %vm1892_vm5 = vmor %vm1890_vm3, %vm1891_vm1  ;;  %vm1929_vm10 = vweird.f32 %v1923_v59  ;;  %v6901_v49 = vld [vmem:[%s11396_s2 + $0xe0] sm:$0xf]  ;;  %v8492_v0 = vld [vmem:[%s11396_s2 + $0xf4] sm:$0xf0] }
 0x3b3   :  { %v1887_v6 = vsub.f32 1.0, %v1886_v18  ;;  %vm1911_vm6 = vmor %vm1909_vm4, %vm1910_vm2  ;;  %v1933_v62 = vand.u32 2147483647, %v1923_v59  ;;  %v1936_v47 = vor.u32 1.1754944e-38, %v1935_v39  ;;  %v6902_v56 = vor.u32 %v8491_v53, %v6901_v49  ;;  %v6879_v39 = vld [vmem:[%s11396_s2 + $0xb8] sm:$0xf0] }
 0x3b4   :  { %v1906_v34 = vsub.f32 1.0, %v1905_v27  ;;  %v8490_v27 = vld [vmem:[%s11396_s2 + $0xec] sm:$0xf]  ;;  %v6861_v49 = vld [vmem:[%s11396_s2 + $0x88] sm:$0xf] }
 0x3b5   :  { %v1888_v14 = vmul.f32 %v8906_v54, %v1887_v6  ;;  %vm1934_vm12 = vcmp.eq.f32.partialorder %v1933_v62, 8.507059e+37  ;;  %v6911_v6 = vld [vmem:[%s11396_s2 + $0xf8] sm:$0xf0]  ;;  %2467 = vmatpush.bf16.msra.mxu0 %v6902_v56  ;;  %v8480_v53 = vld [vmem:[%s11396_s2 + $0x94] sm:$0xf0] }
 0x3b6   :  { %v1907_v36 = vmul.f32 %v8908_v7, %v1906_v34  ;;  %v6914_v34 = vor.u32 %v8490_v27, %v6911_v6  ;;  %v6862_v56 = vor.u32 %v8480_v53, %v6861_v49  ;;  %v8473_v27 = vld [vmem:[%s11396_s2 + $0x64] sm:$0xf]  ;;  %v6807_v49 = vld [vmem:[%s11396_s2 + $0x30] sm:$0xf0]  ;;  %v6813_v53 = vld [vmem:[%s11396_s2 + $0x28] sm:$0xf] }
 0x3b7   :  { %v8910_v16 = vpop.eup %8909  ;;  %v1889_v20 = vadd.f32 %v8906_v54, %v1888_v14  ;;  %v8485_v14 = vld [vmem:[%s11396_s2 + $0xc4] sm:$0xf] }
 0x3b8   :  { %v1908_v3 = vadd.f32 %v8908_v7, %v1907_v36  ;;  %v1925_v23 = vmul.f32 %v8910_v16, %v1923_v59  ;;  %v8912_v10 = vpop.eup %8911  ;;  %vm1930_vm9 = vweird.f32 %v8910_v16  ;;  %v6903_v59 = vld [vmem:[%s11396_s2 + $0xf0] sm:$0xf0]  ;;  %2506 = vmatpush.bf16.msra.mxu3 %v6914_v34 }
 0x3b9   :  { %v1893_v12 = vsel %vm1892_vm5, %v8906_v54, %v1889_v20  ;;  %vm1931_vm11 = vmor %vm1929_vm10, %vm1930_vm9  ;;  %v6909_v54 = vld [vmem:[%s11396_s2 + $0xe8] sm:$0xf]  ;;  %v6887_v36 = vld [vmem:[%s11396_s2 + $0xd0] sm:$0xf0]  ;;  %2468 = vmatpush.bf16.msra.mxu0 %v6886_v38  ;;  %v246_v38 = vadd.f32 %v9564_v31, %v9534_v11 }
 0x3ba   :  { %v1898_v9 = vsel %vm1895_vm7, %v1897_v21, %v1893_v12  ;;  %v1912_v28 = vsel %vm1911_vm6, %v8908_v7, %v1908_v3  ;;  %v1926_v43 = vsub.f32 1.0, %v1925_v23  ;;  %v6906_v7 = vor.u32 %v8489_v55, %v6903_v59  ;;  %v8486_v3 = vld [vmem:[%s11396_s2 + $0xcc] sm:$0xf]  ;;  %v6895_v23 = vld [vmem:[%s11396_s2 + $0xd8] sm:$0xf0] }
 0x3bb   :  { %v1917_v44 = vsel %vm1914_vm8, %v1916_v41, %v1912_v28  ;;  %v1940_v15 = vmul.f32 %v8912_v10, %v1898_v9  ;;  %v6910_v18 = vor.u32 %v8492_v0, %v6909_v54  ;;  %v6890_v20 = vor.u32 %v8485_v14, %v6887_v36  ;;  %v6869_v12 = vld [vmem:[%s11396_s2 + $0xa0] sm:$0xf]  ;;  %v8483_v10 = vld [vmem:[%s11396_s2 + $0xac] sm:$0xf0]  ;;  %v8481_v9 = vld [vmem:[%s11396_s2 + $0xa4] sm:$0xf] }
 0x3bc   :  { %v1939_v32 = vmul.f32 %v1917_v44, %v10415_v57  ;;  %v1927_v25 = vmul.f32 %v8910_v16, %v1926_v43  ;;  %2480 = vmatpush.bf16.msra.mxu1 %v6906_v7  ;;  %v6898_v41 = vor.u32 %v8486_v3, %v6895_v23  ;;  %v6870_v28 = vor.u32 %v8483_v10, %v6869_v12  ;;  %v6871_v43 = vld [vmem:[%s11396_s2 + $0xb0] sm:$0xf0]  ;;  %v6877_v44 = vld [vmem:[%s11396_s2 + $0xa8] sm:$0xf]  ;;  %v8478_v59 = vld [vmem:[%s11396_s2 + $0x8c] sm:$0xf] }
 0x3bd   :  { %2493 = vmatpush.bf16.msra.mxu2 %v6910_v18  ;;  %v6863_v54 = vld [vmem:[%s11396_s2 + $0x98] sm:$0xf0]  ;;  %v6837_v7 = vld [vmem:[%s11396_s2 + $0x60] sm:$0xf]  ;;  %v8475_v18 = vld [vmem:[%s11396_s2 + $0x6c] sm:$0xf0]  ;;  %v217_v14 = vadd.f32 %v9512_v1, %v9594_v45 }
 0x3be   :  { %v10620_v22 = vadd.f32 %v1940_v15, %v1939_v32  ;;  %v1928_v29 = vadd.f32 %v8910_v16, %v1927_v25  ;;  %2507 = vmatpush.bf16.msra.mxu3 %v6898_v41  ;;  %v8484_v15 = vld [vmem:[%s11396_s2 + $0xb4] sm:$0xf0]  ;;  %v6874_v32 = vor.u32 %v8481_v9, %v6871_v43  ;;  %2469 = vmatpush.bf16.msra.mxu0 %v6870_v28  ;;  %v6839_v34 = vld [vmem:[%s11396_s2 + $0x70] sm:$0xf0]  ;;  %v6821_v1 = vld [vmem:[%s11396_s2 + $0x40] sm:$0xf] }
 0x3bf   :  { %v6878_v25 = vor.u32 %v8484_v15, %v6877_v44  ;;  %v6866_v0 = vor.u32 %v8478_v59, %v6863_v54  ;;  %v6838_v6 = vor.u32 %v8475_v18, %v6837_v7  ;;  %v6842_v36 = vor.u32 %v8473_v27, %v6839_v34  ;;  %v8471_v31 = vld [vmem:[%s11396_s2 + $0x4c] sm:$0xf0]  ;;  %v8469_v10 = vld [vmem:[%s11396_s2 + $0x44] sm:$0xf]  ;;  %v6823_v28 = vld [vmem:[%s11396_s2 + $0x50] sm:$0xf0] }
 0x3c0   :  { %8913 = vtanh.f32 %v10620_v22  ;;  %v1932_v46 = vsel %vm1931_vm11, %v8910_v16, %v1928_v29  ;;  %v8488_v16 = vld [vmem:[%s11396_s2 + $0xd4] sm:$0xf0]  ;;  %2481 = vmatpush.bf16.msra.mxu1 %v6890_v20  ;;  %v8482_v29 = vld [vmem:[%s11396_s2 + $0xac] sm:$0xf]  ;;  %v6847_v20 = vld [vmem:[%s11396_s2 + $0x78] sm:$0xf0]  ;;  %v6822_v9 = vor.u32 %v8471_v31, %v6821_v1 }
 0x3c1   :  { %v1937_v26 = vsel %vm1934_vm12, %v1936_v47, %v1932_v46  ;;  %v6894_v21 = vor.u32 %v8488_v16, %v6893_v13  ;;  %v6882_v62 = vor.u32 %v8482_v29, %v6879_v39  ;;  %v6853_v46 = vld [vmem:[%s11396_s2 + $0x80] sm:$0xf]  ;;  %v8479_v47 = vld [vmem:[%s11396_s2 + $0x8c] sm:$0xf0]  ;;  %v6846_v13 = vor.u32 %v8476_v8, %v6845_v58  ;;  %v8474_v16 = vld [vmem:[%s11396_s2 + $0x6c] sm:$0xf] }
 0x3c2   :  { %v6850_v23 = vor.u32 %v8474_v16, %v6847_v20  ;;  %v6829_v43 = vld [vmem:[%s11396_s2 + $0x48] sm:$0xf]  ;;  %v8472_v44 = vld [vmem:[%s11396_s2 + $0x54] sm:$0xf0]  ;;  %v8470_v39 = vld [vmem:[%s11396_s2 + $0x4c] sm:$0xf] }
 0x3c3   :  { %2494 = vmatpush.bf16.msra.mxu2 %v6894_v21  ;;  %2508 = vmatpush.bf16.msra.mxu3 %v6882_v62  ;;  %v6830_v29 = vor.u32 %v8472_v44, %v6829_v43  ;;  %v6831_v62 = vld [vmem:[%s11396_s2 + $0x58] sm:$0xf0]  ;;  %v8468_v59 = vld [vmem:[%s11396_s2 + $0x34] sm:$0xf0]  ;;  %v8466_v54 = vld [vmem:[%s11396_s2 + $0x2c] sm:$0xf] }
 0x3c4   :  { %2482 = vmatpush.bf16.msra.mxu1 %v6874_v32  ;;  %v6814_v27 = vor.u32 %v8468_v59, %v6813_v53  ;;  %v8463_v34 = vld [vmem:[%s11396_s2 + $0xc] sm:$0xf0]  ;;  %v8461_v58 = vld [vmem:[%s11396_s2 + $0x4] sm:$0xf]  ;;  %v6797_v16 = vld [vmem:[%s11396_s2 + $0x8] sm:$0xf] }
 0x3c5   :  { %v8464_v20 = vld [vmem:[%s11396_s2 + $0x14] sm:$0xf0] }
 0x3c6   :  { %v8914_v50 = vpop.eup %8913 }
 0x3c7   :  { %v10623_v51 = vmul.f32 %v8914_v50, %v1937_v26  ;;  %2495 = vmatpush.bf16.msra.mxu2 %v6878_v25  ;;  %v8477_v50 = vld [vmem:[%s11396_s2 + $0x84] sm:$0xf]  ;;  %v6854_v26 = vor.u32 %v8479_v47, %v6853_v46  ;;  %2509 = vmatpush.bf16.msra.mxu3 %v6866_v0  ;;  %v6826_v25 = vor.u32 %v8469_v10, %v6823_v28  ;;  %v6805_v46 = vld [vmem:[%s11396_s2 + $0x20] sm:$0xf]  ;;  %v8467_v47 = vld [vmem:[%s11396_s2 + $0x2c] sm:$0xf0] }
 0x3c8   :  { %v6815_v0 = vld [vmem:[%s11396_s2 + $0x38] sm:$0xf0] }
 0x3c9   :  { %v1953_v57 = vpack.c.bf16 %v10623_v51, %v10623_v51  ;;  %2470 = vmatpush.bf16.msra.mxu0 %v6854_v26  ;;  %v6806_v26 = vor.u32 %v8467_v47, %v6805_v46 }
 0x3cb   :  { %2154 = vmatmul.bf16.vlgmr.msrb.gmra.mxu0 %v1953_v57  ;;  %2167 = vmatmul.bf16.vlgmr.msrb.gmra.mxu1 %v1953_v57 }
 0x3cc   :  { %2180 = vmatmul.bf16.vlgmr.msrb.gmra.mxu2 %v1953_v57  ;;  %2193 = vmatmul.bf16.vlgmr.msrb.gmra.mxu3 %v1953_v57  ;;  %v6855_v57 = vld [vmem:[%s11396_s2 + $0x90] sm:$0xf0] }
 0x3cd   :  { %v6858_v55 = vor.u32 %v8477_v50, %v6855_v57  ;;  %2496 = vmatpush.bf16.msra.mxu2 %v6862_v56  ;;  %2471 = vmatpush.bf16.msra.mxu0 %v6838_v6  ;;  %v6834_v50 = vor.u32 %v8470_v39, %v6831_v62  ;;  %v8465_v57 = vld [vmem:[%s11396_s2 + $0x24] sm:$0xf]  ;;  %v6818_v6 = vor.u32 %v8466_v54, %v6815_v0 }
 0x3ce   :  { %2510 = vmatpush.bf16.msra.mxu3 %v6850_v23  ;;  %v6810_v56 = vor.u32 %v8465_v57, %v6807_v49  ;;  %v8462_v23 = vld [vmem:[%s11396_s2 + $0xc] sm:$0xf] }
 0x3cf   :  { %2483 = vmatpush.bf16.msra.mxu1 %v6858_v55  ;;  %v304_v55 = vadd.f32 %v9575_v35, %v9541_v17  ;;  %v6789_v35 = vld [vmem:[%s11396_s2] sm:$0xf] }
 0x3d1   :  { %2497 = vmatpush.bf16.msra.mxu2 %v6846_v13  ;;  %2472 = vmatpush.bf16.msra.mxu0 %v6822_v9  ;;  %v6791_v13 = vld [vmem:[%s11396_s2 + $0x10] sm:$0xf0] }
 0x3d2   :  { %2511 = vmatpush.bf16.msra.mxu3 %v6834_v50 }
 0x3d3   :  { %2484 = vmatpush.bf16.msra.mxu1 %v6842_v36  ;;  %v6790_v36 = vor.u32 %v8463_v34, %v6789_v35 }
 0x3d5   :  { %2498 = vmatpush.bf16.msra.mxu2 %v6830_v29  ;;  %2473 = vmatpush.bf16.msra.mxu0 %v6806_v26 }
 0x3d6   :  { %2512 = vmatpush.bf16.msra.mxu3 %v6818_v6 }
 0x3d7   :  { %2485 = vmatpush.bf16.msra.mxu1 %v6826_v25 }
 0x3d9   :  { %2499 = vmatpush.bf16.msra.mxu2 %v6814_v27  ;;  %2474 = vmatpush.bf16.msra.mxu0 %v6790_v36 }
 0x3db   :  { %2486 = vmatpush.bf16.msra.mxu1 %v6810_v56 }
 0x448   :  { %v2155_v21 = vpop.f32.mrf.mxu0  ;;  %v2168_v3 = vpop.f32.mrf.mxu1 }
 0x449   :  { %v2198_v41 = vadd.f32 %v2155_v21, %v217_v14  ;;  %v2199_v12 = vadd.f32 %v2168_v3, %v246_v38  ;;  %v6794_v21 = vor.u32 %v8461_v58, %v6791_v13  ;;  %v6798_v3 = vor.u32 %v8464_v20, %v6797_v16 }
 0x44b   :  { %v6784_v15 = vmul.f32 -1.442695, %v2198_v41  ;;  %v6785_v32 = vmul.f32 -1.442695, %v2199_v12  ;;  %v6799_v41 = vld [vmem:[%s11396_s2 + $0x18] sm:$0xf0]  ;;  %2487 = vmatpush.bf16.msra.mxu1 %v6794_v21  ;;  %2500 = vmatpush.bf16.msra.mxu2 %v6798_v3 }
 0x44c   :  { %v6802_v31 = vor.u32 %v8462_v23, %v6799_v41 }
 0x44d   :  { %8915 = vpow2.f32 %v6784_v15 }
 0x44e   :  { %8917 = vpow2.f32 %v6785_v32  ;;  %2513 = vmatpush.bf16.msra.mxu3 %v6802_v31  ;;  %v275_v32 = vadd.f32 %v9553_v24, %v9523_v5 }
 0x44f   :  { %v2181_v7 = vpop.f32.mrf.mxu2  ;;  %v2194_v18 = vpop.f32.mrf.mxu3 }
 0x450   :  { %v2201_v8 = vadd.f32 %v2194_v18, %v304_v55  ;;  %v2157_v14 = vpop.f32.mrf.mxu0  ;;  %v2170_v38 = vpop.f32.mrf.mxu1  ;;  %v2200_v39 = vadd.f32 %v2181_v7, %v275_v32  ;;  %v8524_v32 = vld [vmem:[%s11396_s2 + $0xf4] sm:$0xf0] }
 0x452   :  { %v6786_v12 = vmul.f32 -1.442695, %v2201_v8 }
 0x453   :  { %v8916_v1 = vpop.eup %8915 }
 0x454   :  { %v8918_v10 = vpop.eup %8917  ;;  %v2205_v9 = vadd.f32 1.0, %v8916_v1  ;;  %8919 = vpow2.f32 %v6786_v12 }
 0x455   :  { %v2224_v28 = vadd.f32 1.0, %v8918_v10  ;;  %v7032_v10 = vld [vmem:[%s11396_s2 + $0xe0] sm:$0xf] }
 0x456   :  { %8921 = vrcp.f32 %v2205_v9  ;;  %v2217_v57 = vand.u32 2147483648, %v2205_v9  ;;  %v2215_v55 = vand.u32 2147483647, %v2205_v9  ;;  %vm2211_vm15 = vweird.f32 %v2205_v9 }
 0x457   :  { %8923 = vrcp.f32 %v2224_v28  ;;  %v2183_v43 = vpop.f32.mrf.mxu2  ;;  %v2196_v44 = vpop.f32.mrf.mxu3  ;;  %v2236_v49 = vand.u32 2147483648, %v2224_v28  ;;  %v2234_v59 = vand.u32 2147483647, %v2224_v28  ;;  %vm2230_vm0 = vweird.f32 %v2224_v28 }
 0x458   :  { %v2218_v0 = vor.u32 1.1754944e-38, %v2217_v57  ;;  %vm2216_vm3 = vcmp.eq.f32.partialorder %v2215_v55, 8.507059e+37  ;;  %v7034_v44 = vld [vmem:[%s11396_s2 + $0xf0] sm:$0xf0]  ;;  %v8520_v55 = vld [vmem:[%s11396_s2 + $0xd4] sm:$0xf0] }
 0x459   :  { %v2237_v27 = vor.u32 1.1754944e-38, %v2236_v49  ;;  %vm2235_vm4 = vcmp.eq.f32.partialorder %v2234_v59, 8.507059e+37  ;;  %v7018_v49 = vld [vmem:[%s11396_s2 + $0xd0] sm:$0xf0] }
 0x45a   :  { %v8920_v15 = vpop.eup %8919 }
 0x45b   :  { %v2244_v25 = vadd.f32 1.0, %v8920_v15  ;;  %v7040_v15 = vld [vmem:[%s11396_s2 + $0xe8] sm:$0xf] }
 0x45c   :  { %v8922_v29 = vpop.eup %8921 }
 0x45d   :  { %v8924_v62 = vpop.eup %8923  ;;  %v2207_v46 = vmul.f32 %v8922_v29, %v2205_v9  ;;  %8925 = vrcp.f32 %v2244_v25  ;;  %vm2212_vm13 = vweird.f32 %v8922_v29  ;;  %v2256_v21 = vand.u32 2147483648, %v2244_v25  ;;  %v8523_v9 = vld [vmem:[%s11396_s2 + $0xec] sm:$0xf0] }
 0x45e   :  { %v2226_v47 = vmul.f32 %v8924_v62, %v2224_v28  ;;  %8927 = vtanh.f32 %v2200_v39  ;;  %vm2231_vm14 = vweird.f32 %v8924_v62  ;;  %vm2213_vm1 = vmor %vm2211_vm15, %vm2212_vm13  ;;  %vm2250_vm6 = vweird.f32 %v2244_v25  ;;  %v8521_v28 = vld [vmem:[%s11396_s2 + $0xe4] sm:$0xf]  ;;  %v8522_v39 = vld [vmem:[%s11396_s2 + $0xec] sm:$0xf] }
 0x45f   :  { %v2208_v50 = vsub.f32 1.0, %v2207_v46  ;;  %vm2232_vm2 = vmor %vm2230_vm0, %vm2231_vm14  ;;  %v2254_v3 = vand.u32 2147483647, %v2244_v25  ;;  %v2257_v41 = vor.u32 1.1754944e-38, %v2256_v21  ;;  %v7033_v43 = vor.u32 %v8523_v9, %v7032_v10  ;;  %v8511_v21 = vld [vmem:[%s11396_s2 + $0x8c] sm:$0xf0] }
 0x460   :  { %v2227_v26 = vsub.f32 1.0, %v2226_v47  ;;  %v7016_v47 = vld [vmem:[%s11396_s2 + $0xc0] sm:$0xf]  ;;  %v8510_v9 = vld [vmem:[%s11396_s2 + $0x8c] sm:$0xf] }
 0x461   :  { %v2209_v53 = vmul.f32 %v8922_v29, %v2208_v50  ;;  %vm2255_vm8 = vcmp.eq.f32.partialorder %v2254_v3, 8.507059e+37  ;;  %2788 = vmatpush.bf16.msrb.mxu0 %v7033_v43  ;;  %v8519_v50 = vld [vmem:[%s11396_s2 + $0xcc] sm:$0xf0]  ;;  %v8509_v3 = vld [vmem:[%s11396_s2 + $0x84] sm:$0xf] }
 0x462   :  { %v2228_v56 = vmul.f32 %v8924_v62, %v2227_v26  ;;  %v8517_v26 = vld [vmem:[%s11396_s2 + $0xc4] sm:$0xf]  ;;  %v7017_v57 = vor.u32 %v8519_v50, %v7016_v47  ;;  %v8506_v50 = vld [vmem:[%s11396_s2 + $0x6c] sm:$0xf] }
 0x463   :  { %v8926_v54 = vpop.eup %8925  ;;  %v2210_v24 = vadd.f32 %v8922_v29, %v2209_v53  ;;  %v7024_v53 = vld [vmem:[%s11396_s2 + $0xc8] sm:$0xf] }
 0x464   :  { %v2229_v7 = vadd.f32 %v8924_v62, %v2228_v56  ;;  %v2246_v18 = vmul.f32 %v8926_v54, %v2244_v25  ;;  %v8928_v35 = vpop.eup %8927  ;;  %vm2251_vm5 = vweird.f32 %v8926_v54  ;;  %v7037_v25 = vor.u32 %v8521_v28, %v7034_v44  ;;  %v6994_v28 = vld [vmem:[%s11396_s2 + $0x98] sm:$0xf0]  ;;  %v6968_v44 = vld [vmem:[%s11396_s2 + $0x60] sm:$0xf] }
 0x465   :  { %v2214_v6 = vsel %vm2213_vm1, %v8922_v29, %v2210_v24  ;;  %vm2252_vm7 = vmor %vm2250_vm6, %vm2251_vm5  ;;  %v7041_v29 = vor.u32 %v8524_v32, %v7040_v15  ;;  %v7021_v56 = vor.u32 %v8517_v26, %v7018_v49  ;;  %v7025_v59 = vor.u32 %v8520_v55, %v7024_v53  ;;  %v7026_v24 = vld [vmem:[%s11396_s2 + $0xd8] sm:$0xf0]  ;;  %2789 = vmatpush.bf16.msrb.mxu0 %v7017_v57  ;;  %v8507_v15 = vld [vmem:[%s11396_s2 + $0x6c] sm:$0xf0] }
 0x466   :  { %v2219_v34 = vsel %vm2216_vm3, %v2218_v0, %v2214_v6  ;;  %v2233_v58 = vsel %vm2232_vm2, %v8924_v62, %v2229_v7  ;;  %v2247_v8 = vsub.f32 1.0, %v2246_v18  ;;  %v7042_v62 = vld [vmem:[%s11396_s2 + $0xf8] sm:$0xf0]  ;;  %2801 = vmatpush.bf16.msrb.mxu1 %v7037_v25  ;;  %v7000_v7 = vld [vmem:[%s11396_s2 + $0xa0] sm:$0xf]  ;;  %v6997_v43 = vor.u32 %v8510_v9, %v6994_v28 }
 0x467   :  { %v2238_v14 = vsel %vm2235_vm4, %v2237_v27, %v2233_v58  ;;  %v2261_v38 = vmul.f32 %v8928_v35, %v2219_v34  ;;  %v7045_v46 = vor.u32 %v8522_v39, %v7042_v62  ;;  %2814 = vmatpush.bf16.msrb.mxu2 %v7041_v29  ;;  %v8515_v18 = vld [vmem:[%s11396_s2 + $0xac] sm:$0xf0]  ;;  %v8513_v27 = vld [vmem:[%s11396_s2 + $0xa4] sm:$0xf]  ;;  %v7002_v35 = vld [vmem:[%s11396_s2 + $0xb0] sm:$0xf0]  ;;  %v6969_v25 = vor.u32 %v8507_v15, %v6968_v44 }
 0x468   :  { %v2260_v36 = vmul.f32 %v2238_v14, %v10620_v22  ;;  %v2248_v13 = vmul.f32 %v8926_v54, %v2247_v8  ;;  %v7001_v6 = vor.u32 %v8515_v18, %v7000_v7  ;;  %v7008_v34 = vld [vmem:[%s11396_s2 + $0xa8] sm:$0xf]  ;;  %v8516_v58 = vld [vmem:[%s11396_s2 + $0xb4] sm:$0xf0]  ;;  %v7005_v8 = vor.u32 %v8513_v27, %v7002_v35  ;;  %v8505_v32 = vld [vmem:[%s11396_s2 + $0x64] sm:$0xf] }
 0x469   :  { %2827 = vmatpush.bf16.msrb.mxu3 %v7045_v46  ;;  %v7009_v14 = vor.u32 %v8516_v58, %v7008_v34  ;;  %v6970_v29 = vld [vmem:[%s11396_s2 + $0x70] sm:$0xf0]  ;;  %v6976_v39 = vld [vmem:[%s11396_s2 + $0x68] sm:$0xf]  ;;  %v8508_v62 = vld [vmem:[%s11396_s2 + $0x74] sm:$0xf0] }
 0x46a   :  { %v10828_v16 = vadd.f32 %v2261_v38, %v2260_v36  ;;  %v2249_v20 = vadd.f32 %v8926_v54, %v2248_v13  ;;  %2802 = vmatpush.bf16.msrb.mxu1 %v7021_v56  ;;  %v8514_v38 = vld [vmem:[%s11396_s2 + $0xac] sm:$0xf]  ;;  %v7010_v36 = vld [vmem:[%s11396_s2 + $0xb8] sm:$0xf0]  ;;  %2790 = vmatpush.bf16.msrb.mxu0 %v7001_v6  ;;  %v6973_v46 = vor.u32 %v8505_v32, %v6970_v29  ;;  %v6952_v49 = vld [vmem:[%s11396_s2 + $0x40] sm:$0xf] }
 0x46b   :  { %2815 = vmatpush.bf16.msrb.mxu2 %v7025_v59  ;;  %v7013_v13 = vor.u32 %v8514_v38, %v7010_v36  ;;  %v6977_v47 = vor.u32 %v8508_v62, %v6976_v39  ;;  %v6978_v26 = vld [vmem:[%s11396_s2 + $0x78] sm:$0xf0]  ;;  %v8503_v53 = vld [vmem:[%s11396_s2 + $0x4c] sm:$0xf0]  ;;  %v8501_v55 = vld [vmem:[%s11396_s2 + $0x44] sm:$0xf]  ;;  %v220_v29 = vadd.f32 %v9508_v63, %v9594_v45 }
 0x46c   :  { %8929 = vtanh.f32 %v10828_v16  ;;  %v2253_v23 = vsel %vm2252_vm7, %v8926_v54, %v2249_v20  ;;  %v8518_v54 = vld [vmem:[%s11396_s2 + $0xcc] sm:$0xf]  ;;  %v6984_v20 = vld [vmem:[%s11396_s2 + $0x80] sm:$0xf]  ;;  %v6981_v57 = vor.u32 %v8506_v50, %v6978_v26  ;;  %v6953_v56 = vor.u32 %v8503_v53, %v6952_v49  ;;  %v6954_v59 = vld [vmem:[%s11396_s2 + $0x50] sm:$0xf0] }
 0x46d   :  { %v2258_v1 = vsel %vm2255_vm8, %v2257_v41, %v2253_v23  ;;  %v7029_v0 = vor.u32 %v8518_v54, %v7026_v24  ;;  %v6985_v23 = vor.u32 %v8511_v21, %v6984_v20  ;;  %v6986_v41 = vld [vmem:[%s11396_s2 + $0x90] sm:$0xf0]  ;;  %v6960_v54 = vld [vmem:[%s11396_s2 + $0x48] sm:$0xf]  ;;  %v8504_v24 = vld [vmem:[%s11396_s2 + $0x54] sm:$0xf0] }
 0x46e   :  { %2803 = vmatpush.bf16.msrb.mxu1 %v7005_v8  ;;  %v6961_v7 = vor.u32 %v8504_v24, %v6960_v54  ;;  %v8502_v18 = vld [vmem:[%s11396_s2 + $0x4c] sm:$0xf]  ;;  %v6962_v27 = vld [vmem:[%s11396_s2 + $0x58] sm:$0xf0]  ;;  %v6936_v35 = vld [vmem:[%s11396_s2 + $0x20] sm:$0xf] }
 0x46f   :  { %2828 = vmatpush.bf16.msrb.mxu3 %v7029_v0  ;;  %2816 = vmatpush.bf16.msrb.mxu2 %v7009_v14  ;;  %v6957_v0 = vor.u32 %v8501_v55, %v6954_v59  ;;  %v6965_v6 = vor.u32 %v8502_v18, %v6962_v27  ;;  %v8499_v34 = vld [vmem:[%s11396_s2 + $0x2c] sm:$0xf0]  ;;  %v8497_v58 = vld [vmem:[%s11396_s2 + $0x24] sm:$0xf]  ;;  %v6938_v14 = vld [vmem:[%s11396_s2 + $0x30] sm:$0xf0] }
 0x470   :  { %2791 = vmatpush.bf16.msrb.mxu0 %v6985_v23  ;;  %v6937_v8 = vor.u32 %v8499_v34, %v6936_v35  ;;  %v6944_v38 = vld [vmem:[%s11396_s2 + $0x28] sm:$0xf]  ;;  %v8500_v36 = vld [vmem:[%s11396_s2 + $0x34] sm:$0xf0]  ;;  %v8498_v21 = vld [vmem:[%s11396_s2 + $0x2c] sm:$0xf] }
 0x471   :  { %v6945_v20 = vor.u32 %v8500_v36, %v6944_v38  ;;  %v6928_v9 = vld [vmem:[%s11396_s2 + $0x8] sm:$0xf]  ;;  %v8496_v28 = vld [vmem:[%s11396_s2 + $0x14] sm:$0xf0]  ;;  %v8494_v15 = vld [vmem:[%s11396_s2 + $0xc] sm:$0xf] }
 0x472   :  { %v8930_v12 = vpop.eup %8929  ;;  %v6929_v44 = vor.u32 %v8496_v28, %v6928_v9  ;;  %v6930_v32 = vld [vmem:[%s11396_s2 + $0x18] sm:$0xf0]  ;;  %v8555_v62 = vld [vmem:[#allocation6 + $0xec] sm:$0xf0]  ;;  %v7171_v53 = vld [vmem:[#allocation6 + $0xe8] sm:$0xf] }
 0x473   :  { %v10831_v31 = vmul.f32 %v8930_v12, %v2258_v1  ;;  %2829 = vmatpush.bf16.msrb.mxu3 %v7013_v13  ;;  %v6992_v12 = vld [vmem:[%s11396_s2 + $0x88] sm:$0xf]  ;;  %v8512_v1 = vld [vmem:[%s11396_s2 + $0x94] sm:$0xf0]  ;;  %v6941_v13 = vor.u32 %v8497_v58, %v6938_v14  ;;  %v6933_v39 = vor.u32 %v8494_v15, %v6930_v32  ;;  %v7173_v63 = vld [vmem:[#allocation6 + $0xf8] sm:$0xf0] }
 0x474   :  { %v6993_v10 = vor.u32 %v8512_v1, %v6992_v12  ;;  %2792 = vmatpush.bf16.msrb.mxu0 %v6969_v25  ;;  %v8495_v12 = vld [vmem:[%s11396_s2 + $0xc] sm:$0xf0]  ;;  %v8493_v1 = vld [vmem:[%s11396_s2 + $0x4] sm:$0xf]  ;;  %v7163_v25 = vld [vmem:[#allocation6 + $0xe0] sm:$0xf] }
 0x475   :  { %v2274_v22 = vpack.c.bf16 %v10831_v31, %v10831_v31  ;;  %v8556_v55 = vld [vmem:[#allocation6 + $0xf4] sm:$0xf0]  ;;  %v7149_v35 = vld [vmem:[#allocation6 + $0xd0] sm:$0xf0]  ;;  %v7155_v34 = vld [vmem:[#allocation6 + $0xc8] sm:$0xf] }
 0x476   :  { %2817 = vmatpush.bf16.msrb.mxu2 %v6993_v10  ;;  %v6922_v10 = vld [vmem:[%s11396_s2 + $0x10] sm:$0xf0]  ;;  %v7172_v24 = vor.u32 %v8556_v55, %v7171_v53  ;;  %v8552_v38 = vld [vmem:[#allocation6 + $0xd4] sm:$0xf0]  ;;  %v8546_v9 = vld [vmem:[#allocation6 + $0xac] sm:$0xf] }
 0x477   :  { %2475 = vmatmul.bf16.vlgmr.msra.gmra.mxu0 %v2274_v22  ;;  %2488 = vmatmul.bf16.vlgmr.msra.gmra.mxu1 %v2274_v22  ;;  %v7156_v36 = vor.u32 %v8552_v38, %v7155_v34  ;;  %v7141_v15 = vld [vmem:[#allocation6 + $0xb8] sm:$0xf0]  ;;  %v7115_v32 = vld [vmem:[#allocation6 + $0x80] sm:$0xf] }
 0x478   :  { %2501 = vmatmul.bf16.vlgmr.msra.gmra.mxu2 %v2274_v22  ;;  %2514 = vmatmul.bf16.vlgmr.msra.gmra.mxu3 %v2274_v22  ;;  %v6989_v22 = vor.u32 %v8509_v3, %v6986_v41  ;;  %v6946_v3 = vld [vmem:[%s11396_s2 + $0x38] sm:$0xf0]  ;;  %v6920_v41 = vld [vmem:[%s11396_s2] sm:$0xf] }
 0x479   :  { %2830 = vmatpush.bf16.msrb.mxu3 %v6997_v43  ;;  %2793 = vmatpush.bf16.msrb.mxu0 %v6953_v56  ;;  %v6949_v23 = vor.u32 %v8498_v21, %v6946_v3  ;;  %v6925_v43 = vor.u32 %v8493_v1, %v6922_v10  ;;  %v8554_v56 = vld [vmem:[#allocation6 + $0xec] sm:$0xf]  ;;  %v8547_v3 = vld [vmem:[#allocation6 + $0xac] sm:$0xf0]  ;;  %v8548_v10 = vld [vmem:[#allocation6 + $0xb4] sm:$0xf0] }
 0x47a   :  { %2804 = vmatpush.bf16.msrb.mxu1 %v6989_v22  ;;  %2818 = vmatpush.bf16.msrb.mxu2 %v6977_v47  ;;  %v6921_v22 = vor.u32 %v8495_v12, %v6920_v41  ;;  %v7165_v47 = vld [vmem:[#allocation6 + $0xf0] sm:$0xf0]  ;;  %v7176_v18 = vor.u32 %v8554_v56, %v7173_v63  ;;  %v7125_v53 = vld [vmem:[#allocation6 + $0x98] sm:$0xf0] }
 0x47b   :  { %v7133_v41 = vld [vmem:[#allocation6 + $0xb0] sm:$0xf0] }
 0x47d   :  { %2831 = vmatpush.bf16.msrb.mxu3 %v6981_v57  ;;  %2794 = vmatpush.bf16.msrb.mxu0 %v6937_v8  ;;  %v7164_v57 = vor.u32 %v8555_v62, %v7163_v25  ;;  %v8543_v25 = vld [vmem:[#allocation6 + $0x8c] sm:$0xf0] }
 0x47e   :  { %2805 = vmatpush.bf16.msrb.mxu1 %v6973_v46  ;;  %2819 = vmatpush.bf16.msrb.mxu2 %v6961_v7  ;;  %v8553_v46 = vld [vmem:[#allocation6 + $0xe4] sm:$0xf]  ;;  %v8551_v7 = vld [vmem:[#allocation6 + $0xcc] sm:$0xf0]  ;;  %v7116_v56 = vor.u32 %v8543_v25, %v7115_v32  ;;  %v8536_v32 = vld [vmem:[#allocation6 + $0x54] sm:$0xf0] }
 0x47f   :  { %v7168_v49 = vor.u32 %v8553_v46, %v7165_v47  ;;  %v7144_v46 = vor.u32 %v8546_v9, %v7141_v15  ;;  %v8541_v47 = vld [vmem:[#allocation6 + $0x84] sm:$0xf]  ;;  %v7091_v15 = vld [vmem:[#allocation6 + $0x48] sm:$0xf] }
 0x481   :  { %2832 = vmatpush.bf16.msrb.mxu3 %v6965_v6  ;;  %2795 = vmatpush.bf16.msrb.mxu0 %v6921_v22  ;;  %v8549_v6 = vld [vmem:[#allocation6 + $0xc4] sm:$0xf]  ;;  %v7139_v22 = vld [vmem:[#allocation6 + $0xa8] sm:$0xf] }
 0x482   :  { %2806 = vmatpush.bf16.msrb.mxu1 %v6957_v0  ;;  %2820 = vmatpush.bf16.msrb.mxu2 %v6945_v20  ;;  %v7147_v0 = vld [vmem:[#allocation6 + $0xc0] sm:$0xf]  ;;  %v7152_v14 = vor.u32 %v8549_v6, %v7149_v35  ;;  %v8539_v35 = vld [vmem:[#allocation6 + $0x6c] sm:$0xf0] }
 0x483   :  { %v7148_v27 = vor.u32 %v8551_v7, %v7147_v0  ;;  %v7131_v20 = vld [vmem:[#allocation6 + $0xa0] sm:$0xf] }
 0x484   :  { %v7132_v12 = vor.u32 %v8547_v3, %v7131_v20  ;;  %v8538_v3 = vld [vmem:[#allocation6 + $0x6c] sm:$0xf] }
 0x485   :  { %2833 = vmatpush.bf16.msrb.mxu3 %v6949_v23  ;;  %3123 = vmatpush.bf16.msra.mxu0 %v7164_v57  ;;  %v8545_v23 = vld [vmem:[#allocation6 + $0xa4] sm:$0xf]  ;;  %v8544_v57 = vld [vmem:[#allocation6 + $0x94] sm:$0xf0] }
 0x486   :  { %2807 = vmatpush.bf16.msrb.mxu1 %v6941_v13  ;;  %2821 = vmatpush.bf16.msrb.mxu2 %v6929_v44  ;;  %v7157_v13 = vld [vmem:[#allocation6 + $0xd8] sm:$0xf0]  ;;  %v7136_v1 = vor.u32 %v8545_v23, %v7133_v41  ;;  %v7140_v44 = vor.u32 %v8548_v10, %v7139_v22  ;;  %v7083_v41 = vld [vmem:[#allocation6 + $0x40] sm:$0xf]  ;;  %v8535_v22 = vld [vmem:[#allocation6 + $0x4c] sm:$0xf0] }
 0x487   :  { %v7109_v23 = vld [vmem:[#allocation6 + $0x78] sm:$0xf0]  ;;  %v8533_v10 = vld [vmem:[#allocation6 + $0x44] sm:$0xf] }
 0x489   :  { %2834 = vmatpush.bf16.msrb.mxu3 %v6933_v39  ;;  %3124 = vmatpush.bf16.msra.mxu0 %v7148_v27 }
 0x48a   :  { %2808 = vmatpush.bf16.msrb.mxu1 %v6925_v43  ;;  %3181 = vmatpush.bf16.msra.mxu2 %v7172_v24 }
 0x48d   :  { %3210 = vmatpush.bf16.msra.mxu3 %v7176_v18  ;;  %3125 = vmatpush.bf16.msra.mxu0 %v7132_v12  ;;  %v7099_v18 = vld [vmem:[#allocation6 + $0x60] sm:$0xf] }
 0x48e   :  { %3152 = vmatpush.bf16.msra.mxu1 %v7168_v49  ;;  %3182 = vmatpush.bf16.msra.mxu2 %v7156_v36  ;;  %v8542_v49 = vld [vmem:[#allocation6 + $0x8c] sm:$0xf]  ;;  %v7100_v34 = vor.u32 %v8539_v35, %v7099_v18  ;;  %v7107_v36 = vld [vmem:[#allocation6 + $0x68] sm:$0xf] }
 0x48f   :  { %v7128_v0 = vor.u32 %v8542_v49, %v7125_v53  ;;  %v7092_v49 = vor.u32 %v8536_v32, %v7091_v15  ;;  %v8530_v35 = vld [vmem:[#allocation6 + $0x2c] sm:$0xf]  ;;  %v7061_v32 = vld [vmem:[#allocation6 + $0x18] sm:$0xf0] }
 0x490   :  { %v8526_v15 = vld [vmem:[#allocation6 + $0xc] sm:$0xf] }
 0x491   :  { %3126 = vmatpush.bf16.msra.mxu0 %v7116_v56  ;;  %v7069_v56 = vld [vmem:[#allocation6 + $0x30] sm:$0xf0] }
 0x492   :  { %3153 = vmatpush.bf16.msra.mxu1 %v7152_v14  ;;  %3183 = vmatpush.bf16.msra.mxu2 %v7140_v44  ;;  %v7085_v44 = vld [vmem:[#allocation6 + $0x50] sm:$0xf0] }
 0x495   :  { %3127 = vmatpush.bf16.msra.mxu0 %v7100_v34  ;;  %v7077_v34 = vld [vmem:[#allocation6 + $0x38] sm:$0xf0] }
 0x496   :  { %3154 = vmatpush.bf16.msra.mxu1 %v7136_v1  ;;  %v7112_v1 = vor.u32 %v8538_v3, %v7109_v23  ;;  %v7053_v3 = vld [vmem:[#allocation6 + $0x10] sm:$0xf0]  ;;  %v7059_v23 = vld [vmem:[#allocation6 + $0x8] sm:$0xf] }
 0x4f4   :  { %v2476_v50 = vpop.f32.mrf.mxu0  ;;  %v2489_v26 = vpop.f32.mrf.mxu1 }
 0x4f5   :  { %v2519_v59 = vadd.f32 %v2476_v50, %v220_v29  ;;  %v2520_v54 = vadd.f32 %v2489_v26, %v9597_v48  ;;  %v8550_v48 = vld [vmem:[#allocation6 + $0xcc] sm:$0xf]  ;;  %v7117_v50 = vld [vmem:[#allocation6 + $0x90] sm:$0xf0]  ;;  %v7123_v26 = vld [vmem:[#allocation6 + $0x88] sm:$0xf] }
 0x4f6   :  { %v7160_v21 = vor.u32 %v8550_v48, %v7157_v13  ;;  %v7124_v24 = vor.u32 %v8544_v57, %v7123_v26  ;;  %v8540_v48 = vld [vmem:[#allocation6 + $0x74] sm:$0xf0]  ;;  %v7088_v57 = vor.u32 %v8533_v10, %v7085_v44 }
 0x4f7   :  { %v6915_v58 = vmul.f32 -1.442695, %v2519_v59  ;;  %v6916_v8 = vmul.f32 -1.442695, %v2520_v54  ;;  %v7120_v59 = vor.u32 %v8541_v47, %v7117_v50  ;;  %v8531_v50 = vld [vmem:[#allocation6 + $0x2c] sm:$0xf0] }
 0x4f8   :  { %3211 = vmatpush.bf16.msra.mxu3 %v7160_v21  ;;  %3184 = vmatpush.bf16.msra.mxu2 %v7124_v24  ;;  %v7108_v21 = vor.u32 %v8540_v48, %v7107_v36  ;;  %v8527_v36 = vld [vmem:[#allocation6 + $0xc] sm:$0xf0]  ;;  %v8525_v48 = vld [vmem:[#allocation6 + $0x4] sm:$0xf] }
 0x4f9   :  { %8931 = vpow2.f32 %v6915_v58  ;;  %3155 = vmatpush.bf16.msra.mxu1 %v7120_v59  ;;  %v8537_v58 = vld [vmem:[#allocation6 + $0x64] sm:$0xf] }
 0x4fa   :  { %8933 = vpow2.f32 %v6916_v8  ;;  %v7101_v8 = vld [vmem:[#allocation6 + $0x70] sm:$0xf0] }
 0x4fb   :  { %v2502_v28 = vpop.f32.mrf.mxu2  ;;  %v2515_v43 = vpop.f32.mrf.mxu3  ;;  %v7104_v38 = vor.u32 %v8537_v58, %v7101_v8 }
 0x4fc   :  { %v2522_v29 = vadd.f32 %v2515_v43, %v9643_v33  ;;  %v2478_v39 = vpop.f32.mrf.mxu0  ;;  %v2491_v62 = vpop.f32.mrf.mxu1  ;;  %3212 = vmatpush.bf16.msra.mxu3 %v7144_v46  ;;  %v2521_v20 = vadd.f32 %v2502_v28, %v9562_v30  ;;  %3185 = vmatpush.bf16.msra.mxu2 %v7108_v21  ;;  %v7084_v43 = vor.u32 %v8535_v22, %v7083_v41  ;;  %v8534_v28 = vld [vmem:[#allocation6 + $0x4c] sm:$0xf]  ;;  %v8528_v41 = vld [vmem:[#allocation6 + $0x14] sm:$0xf0] }
 0x4fd   :  { %3156 = vmatpush.bf16.msra.mxu1 %v7104_v38  ;;  %v7067_v39 = vld [vmem:[#allocation6 + $0x20] sm:$0xf] }
 0x4fe   :  { %v6917_v55 = vmul.f32 -1.442695, %v2522_v29  ;;  %v7093_v29 = vld [vmem:[#allocation6 + $0x58] sm:$0xf0]  ;;  %3128 = vmatpush.bf16.msra.mxu0 %v7084_v43  ;;  %v7051_v38 = vld [vmem:[#allocation6] sm:$0xf] }
 0x4ff   :  { %v8932_v54 = vpop.eup %8931  ;;  %v7096_v53 = vor.u32 %v8534_v28, %v7093_v29  ;;  %v7052_v21 = vor.u32 %v8527_v36, %v7051_v38  ;;  %v7060_v28 = vor.u32 %v8528_v41, %v7059_v23  ;;  %v7277_v23 = vld [vmem:[#allocation8 + $0xd0] sm:$0xf0]  ;;  %v8582_v41 = vld [vmem:[#allocation8 + $0xcc] sm:$0xf] }
 0x500   :  { %v8934_v63 = vpop.eup %8933  ;;  %v11031_v33 = vadd.f32 1.0, %v8932_v54  ;;  %8935 = vpow2.f32 %v6917_v55  ;;  %3213 = vmatpush.bf16.msra.mxu3 %v7128_v0  ;;  %v8529_v55 = vld [vmem:[#allocation6 + $0x24] sm:$0xf]  ;;  %v7075_v0 = vld [vmem:[#allocation6 + $0x28] sm:$0xf]  ;;  %3186 = vmatpush.bf16.msra.mxu2 %v7092_v49 }
 0x501   :  { %v11033_v7 = vadd.f32 1.0, %v8934_v63  ;;  %v7068_v63 = vor.u32 %v8531_v50, %v7067_v39  ;;  %3157 = vmatpush.bf16.msra.mxu1 %v7088_v57 }
 0x502   :  { %8937 = vrcp.f32 %v11031_v33  ;;  %v2536_v14 = vand.u32 2147483647, %v11031_v33  ;;  %v2538_v47 = vand.u32 2147483648, %v11031_v33  ;;  %vm2532_vm13 = vweird.f32 %v11031_v33 }
 0x503   :  { %8939 = vrcp.f32 %v11033_v7  ;;  %v2504_v27 = vpop.f32.mrf.mxu2  ;;  %v2517_v6 = vpop.f32.mrf.mxu3  ;;  %v2557_v46 = vand.u32 2147483648, %v11033_v7  ;;  %v2555_v24 = vand.u32 2147483647, %v11033_v7  ;;  %3129 = vmatpush.bf16.msra.mxu0 %v7068_v63  ;;  %vm2551_vm12 = vweird.f32 %v11033_v7  ;;  %v8587_v63 = vld [vmem:[#allocation8 + $0xec] sm:$0xf0] }
 0x504   :  { %3214 = vmatpush.bf16.msra.mxu3 %v7112_v1  ;;  %vm11052_vm9 = vcmp.eq.f32.partialorder %v2536_v14, 8.507059e+37  ;;  %v7072_v27 = vor.u32 %v8529_v55, %v7069_v56  ;;  %v8532_v6 = vld [vmem:[#allocation6 + $0x34] sm:$0xf0]  ;;  %v7080_v14 = vor.u32 %v8530_v35, %v7077_v34  ;;  %v2539_v10 = vor.u32 1.1754944e-38, %v2538_v47  ;;  %v7301_v34 = vld [vmem:[#allocation8 + $0xf8] sm:$0xf0] }
 0x505   :  { %v7076_v8 = vor.u32 %v8532_v6, %v7075_v0  ;;  %v2558_v22 = vor.u32 1.1754944e-38, %v2557_v46  ;;  %vm2556_vm0 = vcmp.eq.f32.partialorder %v2555_v24, 8.507059e+37  ;;  %v7064_v46 = vor.u32 %v8526_v15, %v7061_v32  ;;  %v8585_v0 = vld [vmem:[#allocation8 + $0xe4] sm:$0xf]  ;;  %v7261_v32 = vld [vmem:[#allocation8 + $0xb0] sm:$0xf0] }
 0x506   :  { %v8936_v13 = vpop.eup %8935  ;;  %3158 = vmatpush.bf16.msra.mxu1 %v7072_v27  ;;  %v2917_v24 = vpack.c.bf16 %v10005_v37, %v9791_v19  ;;  %v7293_v27 = vld [vmem:[#allocation8 + $0xf0] sm:$0xf0]  ;;  %v2918_v35 = vpack.c.bf16 %v10418_v60, %v10210_v52  ;;  %v2919_v19 = vpack.c.bf16 %v10831_v31, %v10623_v51  ;;  %v8586_v37 = vld [vmem:[#allocation8 + $0xec] sm:$0xf]  ;;  %v222_v52 = vadd.f32 %v9514_v2, %v9594_v45  ;;  %v7283_v2 = vld [vmem:[#allocation8 + $0xc8] sm:$0xf] }
 0x507   :  { %v11039_v12 = vadd.f32 1.0, %v8936_v13  ;;  %3187 = vmatpush.bf16.msra.mxu2 %v7076_v8  ;;  %3130 = vmatpush.bf16.msra.mxu0 %v7052_v21  ;;  %v7296_v6 = vor.u32 %v8585_v0, %v7293_v27  ;;  %v7299_v8 = vld [vmem:[#allocation8 + $0xe8] sm:$0xf]  ;;  %v251_v60 = vadd.f32 %v9651_v42, %v9534_v11  ;;  %v8581_v21 = vld [vmem:[#allocation8 + $0xc4] sm:$0xf] }
 0x508   :  { %v11041_v9 = vpop.eup %8937  ;;  %3215 = vmatpush.bf16.msra.mxu3 %v7096_v53  ;;  %v7259_v45 = vld [vmem:[#allocation8 + $0xa0] sm:$0xf]  ;;  %v8579_v11 = vld [vmem:[#allocation8 + $0xac] sm:$0xf0]  ;;  %v8577_v42 = vld [vmem:[#allocation8 + $0xa4] sm:$0xf] }
 0x509   :  { %v11043_v25 = vpop.eup %8939  ;;  %v2528_v30 = vmul.f32 %v11041_v9, %v11031_v33  ;;  %8941 = vrcp.f32 %v11039_v12  ;;  %vm2533_vm10 = vweird.f32 %v11041_v9  ;;  %vm2571_vm2 = vweird.f32 %v11039_v12  ;;  %v8571_v0 = vld [vmem:[#allocation8 + $0x6c] sm:$0xf0] }
 0x50a   :  { %v2547_v62 = vmul.f32 %v11043_v25, %v11033_v7  ;;  %8943 = vtanh.f32 %v2521_v20  ;;  %vm2552_vm11 = vweird.f32 %v11043_v25  ;;  %vm2534_vm14 = vmor %vm2532_vm13, %vm2533_vm10  ;;  %v2575_v49 = vand.u32 2147483647, %v11039_v12 }
 0x50b   :  { %v2529_v26 = vsub.f32 1.0, %v2528_v30  ;;  %vm2553_vm15 = vmor %vm2551_vm12, %vm2552_vm11  ;;  %v7056_v30 = vor.u32 %v8525_v48, %v7053_v3  ;;  %3188 = vmatpush.bf16.msra.mxu2 %v7060_v28  ;;  %v7260_v15 = vor.u32 %v8579_v11, %v7259_v45  ;;  %v309_v28 = vadd.f32 %v9686_v4, %v9541_v17  ;;  %v7267_v17 = vld [vmem:[#allocation8 + $0xa8] sm:$0xf]  ;;  %v8580_v4 = vld [vmem:[#allocation8 + $0xb4] sm:$0xf0] }
 0x50c   :  { %v2548_v59 = vsub.f32 1.0, %v2547_v62  ;;  %3216 = vmatpush.bf16.msra.mxu3 %v7080_v14  ;;  %vm2576_vm4 = vcmp.eq.f32.partialorder %v2575_v49, 8.507059e+37  ;;  %v8588_v14 = vld [vmem:[#allocation8 + $0xf4] sm:$0xf0]  ;;  %v8574_v49 = vld [vmem:[#allocation8 + $0x8c] sm:$0xf] }
 0x50d   :  { %v2530_v18 = vmul.f32 %v11041_v9, %v2529_v26  ;;  %3159 = vmatpush.bf16.msra.mxu1 %v7056_v30  ;;  %v7300_v38 = vor.u32 %v8588_v14, %v7299_v8  ;;  %v7269_v30 = vld [vmem:[#allocation8 + $0xb8] sm:$0xf0]  ;;  %v8576_v8 = vld [vmem:[#allocation8 + $0x94] sm:$0xf0]  ;;  %v7195_v45 = vld [vmem:[#allocation8 + $0x20] sm:$0xf] }
 0x50e   :  { %v2549_v58 = vmul.f32 %v11043_v25, %v2548_v59  ;;  %v8563_v11 = vld [vmem:[#allocation8 + $0x2c] sm:$0xf0] }
 0x50f   :  { %v8942_v13 = vpop.eup %8941  ;;  %v2531_v20 = vadd.f32 %v11041_v9, %v2530_v18 }
 0x510   :  { %v8944_v1 = vpop.eup %8943  ;;  %v2550_v43 = vadd.f32 %v11043_v25, %v2549_v58  ;;  %v2567_v44 = vmul.f32 %v8942_v13, %v11039_v12  ;;  %3217 = vmatpush.bf16.msra.mxu3 %v7064_v46  ;;  %vm2572_vm1 = vweird.f32 %v8942_v13  ;;  %v7304_v58 = vor.u32 %v8586_v37, %v7301_v34  ;;  %v7243_v46 = vld [vmem:[#allocation8 + $0x80] sm:$0xf]  ;;  %v7237_v34 = vld [vmem:[#allocation8 + $0x78] sm:$0xf0] }
 0x511   :  { %v2535_v33 = vsel %vm2534_vm14, %v11041_v9, %v2531_v20  ;;  %vm2573_vm3 = vmor %vm2571_vm2, %vm2572_vm1  ;;  %v8583_v20 = vld [vmem:[#allocation8 + $0xcc] sm:$0xf0] }
 0x512   :  { %v2540_v29 = vsel %vm11052_vm9, %v2539_v10, %v2535_v33  ;;  %v2554_v39 = vsel %vm2553_vm15, %v11043_v25, %v2550_v43  ;;  %v2568_v62 = vsub.f32 1.0, %v2567_v44  ;;  %v2577_v25 = vand.u32 2147483648, %v11039_v12  ;;  %v7291_v12 = vld [vmem:[#allocation8 + $0xe0] sm:$0xf]  ;;  %v8578_v33 = vld [vmem:[#allocation8 + $0xac] sm:$0xf] }
 0x513   :  { %v2559_v47 = vsel %vm2556_vm0, %v2558_v22, %v2554_v39  ;;  %v2582_v50 = vmul.f32 %v8944_v1, %v2540_v29  ;;  %v7292_v18 = vor.u32 %v8587_v63, %v7291_v12  ;;  %v7285_v1 = vld [vmem:[#allocation8 + $0xd8] sm:$0xf0]  ;;  %v7280_v43 = vor.u32 %v8581_v21, %v7277_v23  ;;  %v7227_v63 = vld [vmem:[#allocation8 + $0x60] sm:$0xf]  ;;  %v7213_v21 = vld [vmem:[#allocation8 + $0x50] sm:$0xf0] }
 0x514   :  { %v2581_v7 = vmul.f32 %v2559_v47, %v10828_v16  ;;  %v2569_v26 = vmul.f32 %v8942_v13, %v2568_v62  ;;  %v2578_v55 = vor.u32 1.1754944e-38, %v2577_v25  ;;  %v7288_v44 = vor.u32 %v8582_v41, %v7285_v1  ;;  %v8584_v62 = vld [vmem:[#allocation8 + $0xd4] sm:$0xf0]  ;;  %v8575_v47 = vld [vmem:[#allocation8 + $0x8c] sm:$0xf0] }
 0x515   :  { %v7264_v29 = vor.u32 %v8577_v42, %v7261_v32  ;;  %v7272_v39 = vor.u32 %v8578_v33, %v7269_v30  ;;  %v7245_v25 = vld [vmem:[#allocation8 + $0x90] sm:$0xf0]  ;;  %v7221_v1 = vld [vmem:[#allocation8 + $0x58] sm:$0xf0]  ;;  %v8561_v33 = vld [vmem:[#allocation8 + $0x24] sm:$0xf] }
 0x516   :  { %v11077_v9 = vadd.f32 %v2582_v50, %v2581_v7  ;;  %v2570_v57 = vadd.f32 %v8942_v13, %v2569_v26  ;;  %v7284_v26 = vor.u32 %v8584_v62, %v7283_v2  ;;  %v7197_v30 = vld [vmem:[#allocation8 + $0x30] sm:$0xf0] }
 0x518   :  { %8945 = vtanh.f32 %v11077_v9  ;;  %v2574_v53 = vsel %vm2573_vm3, %v8942_v13, %v2570_v57  ;;  %v7275_v13 = vld [vmem:[#allocation8 + $0xc0] sm:$0xf]  ;;  %v8573_v57 = vld [vmem:[#allocation8 + $0x84] sm:$0xf] }
 0x519   :  { %v2579_v56 = vsel %vm2576_vm4, %v2578_v55, %v2574_v53  ;;  %v7276_v3 = vor.u32 %v8583_v20, %v7275_v13  ;;  %v8565_v20 = vld [vmem:[#allocation8 + $0x44] sm:$0xf] }
 0x51e   :  { %v8946_v16 = vpop.eup %8945 }
 0x51f   :  { %v11083_v59 = vmul.f32 %v8946_v16, %v2579_v56  ;;  %v7244_v56 = vor.u32 %v8575_v47, %v7243_v46  ;;  %v7196_v47 = vor.u32 %v8563_v11, %v7195_v45 }
 0x521   :  { %v2595_v54 = vpack.c.bf16 %v11083_v59, %v11083_v59 }
 0x523   :  { %2796 = vmatmul.bf16.vlgmr.msrb.gmra.mxu0 %v2595_v54  ;;  %2809 = vmatmul.bf16.vlgmr.msrb.gmra.mxu1 %v2595_v54 }
 0x524   :  { %2822 = vmatmul.bf16.vlgmr.msrb.gmra.mxu2 %v2595_v54  ;;  %2835 = vmatmul.bf16.vlgmr.msrb.gmra.mxu3 %v2595_v54  ;;  %v7253_v54 = vld [vmem:[#allocation8 + $0x98] sm:$0xf0] }
 0x525   :  { %3467 = vmatpush.bf16.msrb.mxu0 %v7292_v18  ;;  %3480 = vmatpush.bf16.msrb.mxu1 %v7296_v6  ;;  %v7256_v12 = vor.u32 %v8574_v49, %v7253_v54  ;;  %v8569_v18 = vld [vmem:[#allocation8 + $0x64] sm:$0xf]  ;;  %v7268_v6 = vor.u32 %v8580_v4, %v7267_v17  ;;  %v8564_v54 = vld [vmem:[#allocation8 + $0x34] sm:$0xf0] }
 0x526   :  { %3506 = vmatpush.bf16.msrb.mxu3 %v7304_v58  ;;  %3493 = vmatpush.bf16.msrb.mxu2 %v7300_v38  ;;  %v7251_v58 = vld [vmem:[#allocation8 + $0x88] sm:$0xf] }
 0x527   :  { %v7252_v13 = vor.u32 %v8576_v8, %v7251_v58 }
 0x529   :  { %3468 = vmatpush.bf16.msrb.mxu0 %v7276_v3  ;;  %3481 = vmatpush.bf16.msrb.mxu1 %v7280_v43  ;;  %v8566_v3 = vld [vmem:[#allocation8 + $0x4c] sm:$0xf]  ;;  %v8572_v43 = vld [vmem:[#allocation8 + $0x74] sm:$0xf0] }
 0x52a   :  { %3507 = vmatpush.bf16.msrb.mxu3 %v7288_v44  ;;  %3494 = vmatpush.bf16.msrb.mxu2 %v7284_v26  ;;  %v7216_v44 = vor.u32 %v8565_v20, %v7213_v21  ;;  %v7224_v2 = vor.u32 %v8566_v3, %v7221_v1  ;;  %v7205_v26 = vld [vmem:[#allocation8 + $0x38] sm:$0xf0] }
 0x52d   :  { %3469 = vmatpush.bf16.msrb.mxu0 %v7260_v15  ;;  %3482 = vmatpush.bf16.msrb.mxu1 %v7264_v29  ;;  %v280_v15 = vadd.f32 %v9586_v40, %v9523_v5  ;;  %v7219_v29 = vld [vmem:[#allocation8 + $0x48] sm:$0xf]  ;;  %v7200_v40 = vor.u32 %v8561_v33, %v7197_v30 }
 0x52e   :  { %3508 = vmatpush.bf16.msrb.mxu3 %v7272_v39  ;;  %3495 = vmatpush.bf16.msrb.mxu2 %v7268_v6  ;;  %v8568_v39 = vld [vmem:[#allocation8 + $0x54] sm:$0xf0] }
 0x531   :  { %3470 = vmatpush.bf16.msrb.mxu0 %v7244_v56  ;;  %v7203_v56 = vld [vmem:[#allocation8 + $0x28] sm:$0xf] }
 0x532   :  { %3509 = vmatpush.bf16.msrb.mxu3 %v7256_v12  ;;  %3496 = vmatpush.bf16.msrb.mxu2 %v7252_v13  ;;  %v8559_v12 = vld [vmem:[#allocation8 + $0xc] sm:$0xf0] }
 0x533   :  { %3131 = vmatmul.bf16.vlgmr.msra.gmra.mxu0 %v2917_v24  ;;  %3160 = vmatmul.bf16.vlgmr.msra.gmra.mxu1 %v2917_v24 }
 0x534   :  { %3189 = vmatmul.bf16.vlgmr.msra.gmra.mxu2 %v2917_v24  ;;  %3218 = vmatmul.bf16.vlgmr.msra.gmra.mxu3 %v2917_v24  ;;  %v7248_v24 = vor.u32 %v8573_v57, %v7245_v25 }
 0x536   :  { %3483 = vmatpush.bf16.msrb.mxu1 %v7248_v24  ;;  %v7179_v24 = vld [vmem:[#allocation8] sm:$0xf] }
 0x543   :  { %3136 = vmatmul.bf16.gmra.mxu0 %v2918_v35  ;;  %3165 = vmatmul.bf16.gmra.mxu1 %v2918_v35 }
 0x544   :  { %3194 = vmatmul.bf16.gmra.mxu2 %v2918_v35  ;;  %3223 = vmatmul.bf16.gmra.mxu3 %v2918_v35  ;;  %v7229_v35 = vld [vmem:[#allocation8 + $0x70] sm:$0xf0] }
 0x553   :  { %3141 = vmatmul.bf16.gmra.mxu0 %v2919_v19  ;;  %3170 = vmatmul.bf16.gmra.mxu1 %v2919_v19 }
 0x554   :  { %3199 = vmatmul.bf16.gmra.mxu2 %v2919_v19  ;;  %3228 = vmatmul.bf16.gmra.mxu3 %v2919_v19  ;;  %v8570_v19 = vld [vmem:[#allocation8 + $0x6c] sm:$0xf] }
 0x5a0   :  { %v2797_v36 = vpop.f32.mrf.mxu0  ;;  %v2810_v48 = vpop.f32.mrf.mxu1 }
 0x5a1   :  { %v2840_v51 = vadd.f32 %v2797_v36, %v222_v52  ;;  %v2841_v31 = vadd.f32 %v2810_v48, %v251_v60  ;;  %v7228_v52 = vor.u32 %v8571_v0, %v7227_v63  ;;  %v7232_v36 = vor.u32 %v8569_v18, %v7229_v35  ;;  %v8557_v18 = vld [vmem:[#allocation8 + $0x4] sm:$0xf] }
 0x5a2   :  { %v7240_v48 = vor.u32 %v8570_v19, %v7237_v34  ;;  %v7180_v35 = vor.u32 %v8559_v12, %v7179_v24  ;;  %v8558_v34 = vld [vmem:[#allocation8 + $0xc] sm:$0xf]  ;;  %v8619_v24 = vld [vmem:[#allocation8 + $0xec] sm:$0xf0]  ;;  %v8617_v12 = vld [vmem:[#allocation8 + $0xe4] sm:$0xf] }
 0x5a3   :  { %v7046_v22 = vmul.f32 -1.442695, %v2840_v51  ;;  %v7047_v10 = vmul.f32 -1.442695, %v2841_v31  ;;  %v7211_v51 = vld [vmem:[#allocation8 + $0x40] sm:$0xf]  ;;  %3471 = vmatpush.bf16.msrb.mxu0 %v7228_v52  ;;  %3484 = vmatpush.bf16.msrb.mxu1 %v7232_v36 }
 0x5a4   :  { %v8567_v31 = vld [vmem:[#allocation8 + $0x4c] sm:$0xf0]  ;;  %3510 = vmatpush.bf16.msrb.mxu3 %v7240_v48  ;;  %v8560_v52 = vld [vmem:[#allocation8 + $0x14] sm:$0xf0]  ;;  %v7189_v36 = vld [vmem:[#allocation8 + $0x18] sm:$0xf0] }
 0x5a5   :  { %8947 = vpow2.f32 %v7046_v22  ;;  %v7212_v22 = vor.u32 %v8567_v31, %v7211_v51  ;;  %v7192_v13 = vor.u32 %v8558_v34, %v7189_v36  ;;  %v7406_v36 = vld [vmem:[#allocation8 + $0xc0] sm:$0xf] }
 0x5a6   :  { %8949 = vpow2.f32 %v7047_v10  ;;  %v7235_v10 = vld [vmem:[#allocation8 + $0x68] sm:$0xf] }
 0x5a7   :  { %v11099_v50 = vpop.f32.mrf.mxu2  ;;  %v2836_v7 = vpop.f32.mrf.mxu3  ;;  %v7236_v32 = vor.u32 %v8572_v43, %v7235_v10  ;;  %3472 = vmatpush.bf16.msrb.mxu0 %v7212_v22  ;;  %3485 = vmatpush.bf16.msrb.mxu1 %v7216_v44 }
 0x5a8   :  { %v2843_v53 = vadd.f32 %v2836_v7, %v309_v28  ;;  %v2799_v55 = vpop.f32.mrf.mxu0  ;;  %v2812_v16 = vpop.f32.mrf.mxu1  ;;  %v2842_v46 = vadd.f32 %v11099_v50, %v280_v15  ;;  %v8562_v7 = vld [vmem:[#allocation8 + $0x2c] sm:$0xf]  ;;  %3511 = vmatpush.bf16.msrb.mxu3 %v7224_v2  ;;  %v7220_v50 = vor.u32 %v8568_v39, %v7219_v29 }
 0x5a9   :  { %3497 = vmatpush.bf16.msrb.mxu2 %v7236_v32  ;;  %v7208_v16 = vor.u32 %v8562_v7, %v7205_v26 }
 0x5aa   :  { %v7048_v27 = vmul.f32 -1.442695, %v2843_v53 }
 0x5ab   :  { %v8948_v37 = vpop.eup %8947  ;;  %3473 = vmatpush.bf16.msrb.mxu0 %v7196_v47  ;;  %3486 = vmatpush.bf16.msrb.mxu1 %v7200_v40 }
 0x5ac   :  { %v8950_v14 = vpop.eup %8949  ;;  %v11101_v38 = vadd.f32 1.0, %v8948_v37  ;;  %8951 = vpow2.f32 %v7048_v27  ;;  %3512 = vmatpush.bf16.msrb.mxu3 %v7208_v16  ;;  %v7181_v27 = vld [vmem:[#allocation8 + $0x10] sm:$0xf0]  ;;  %v7204_v37 = vor.u32 %v8564_v54, %v7203_v56 }
 0x5ad   :  { %v11103_v60 = vadd.f32 1.0, %v8950_v14  ;;  %3498 = vmatpush.bf16.msrb.mxu2 %v7220_v50  ;;  %v7184_v19 = vor.u32 %v8557_v18, %v7181_v27  ;;  %v7187_v14 = vld [vmem:[#allocation8 + $0x8] sm:$0xf]  ;;  %v7424_v27 = vld [vmem:[#allocation8 + $0xf0] sm:$0xf0] }
 0x5ae   :  { %8953 = vrcp.f32 %v11101_v38  ;;  %v2857_v49 = vand.u32 2147483647, %v11101_v38  ;;  %v2859_v55 = vand.u32 2147483648, %v11101_v38  ;;  %vm2853_vm8 = vweird.f32 %v11101_v38 }
 0x5af   :  { %8955 = vrcp.f32 %v11103_v60  ;;  %v2825_v23 = vpop.f32.mrf.mxu2  ;;  %v2838_v41 = vpop.f32.mrf.mxu3  ;;  %v2878_v4 = vand.u32 2147483648, %v11103_v60  ;;  %v2876_v0 = vand.u32 2147483647, %v11103_v60  ;;  %vm2872_vm7 = vweird.f32 %v11103_v60  ;;  %3474 = vmatpush.bf16.msrb.mxu0 %v7180_v35  ;;  %3487 = vmatpush.bf16.msrb.mxu1 %v7184_v19  ;;  %v8620_v35 = vld [vmem:[#allocation8 + $0xf4] sm:$0xf0] }
 0x5b0   :  { %v2860_v48 = vor.u32 1.1754944e-38, %v2859_v55  ;;  %vm2858_vm11 = vcmp.eq.f32.partialorder %v2857_v49, 8.507059e+37  ;;  %v7188_v41 = vor.u32 %v8560_v52, %v7187_v14  ;;  %3513 = vmatpush.bf16.msrb.mxu3 %v7192_v13  ;;  %v11151_v29 = vpop.f32.mrf.mxu1  ;;  %v7427_v34 = vor.u32 %v8617_v12, %v7424_v27  ;;  %v7432_v14 = vld [vmem:[#allocation8 + $0xf8] sm:$0xf0]  ;;  %v7408_v13 = vld [vmem:[#allocation8 + $0xd0] sm:$0xf0] }
 0x5b1   :  { %vm2877_vm12 = vcmp.eq.f32.partialorder %v2876_v0, 8.507059e+37  ;;  %3499 = vmatpush.bf16.msrb.mxu2 %v7204_v37 }
 0x5b2   :  { %v8952_v42 = vpop.eup %8951 }
 0x5b3   :  { %v11109_v28 = vadd.f32 1.0, %v8952_v42  ;;  %3797 = vmatpush.bf16.msra.mxu1 %v7427_v34  ;;  %v8605_v34 = vld [vmem:[#allocation8 + $0x84] sm:$0xf] }
 0x5b4   :  { %v11111_v62 = vpop.eup %8953 }
 0x5b5   :  { %v11114_v57 = vpop.eup %8955  ;;  %v2849_v5 = vmul.f32 %v11111_v62, %v11101_v38  ;;  %8957 = vrcp.f32 %v11109_v28  ;;  %vm2854_vm6 = vweird.f32 %v11111_v62  ;;  %3500 = vmatpush.bf16.msrb.mxu2 %v7188_v41  ;;  %v2898_v45 = vand.u32 2147483648, %v11109_v28  ;;  %v11204_v41 = vld [vmem:[%s11400_s6] sm:$0xf] }
 0x5b6   :  { %v2868_v25 = vmul.f32 %v11114_v57, %v11103_v60  ;;  %8959 = vtanh.f32 %v2842_v46  ;;  %vm2873_vm5 = vweird.f32 %v11114_v57  ;;  %vm2855_vm9 = vmor %vm2853_vm8, %vm2854_vm6  ;;  %v2879_v60 = vor.u32 1.1754944e-38, %v2878_v4  ;;  %v7422_v4 = vld [vmem:[#allocation8 + $0xe0] sm:$0xf] }
 0x5b7   :  { %v2850_v53 = vsub.f32 1.0, %v2849_v5  ;;  %vm2874_vm10 = vmor %vm2872_vm7, %vm2873_vm5  ;;  %vm2892_vm14 = vweird.f32 %v11109_v28  ;;  %v2896_v11 = vand.u32 2147483647, %v11109_v28  ;;  %v2899_v15 = vor.u32 1.1754944e-38, %v2898_v45  ;;  %v11153_v39 = vpop.f32.mrf.mxu2 }
 0x5b8   :  { %v2869_v17 = vsub.f32 1.0, %v2868_v25  ;;  %v11159_v46 = vpop.f32.mrf.mxu1  ;;  %v7423_v18 = vor.u32 %v8619_v24, %v7422_v4  ;;  %v8610_v4 = vld [vmem:[#allocation8 + $0xac] sm:$0xf]  ;;  %v7400_v24 = vld [vmem:[#allocation8 + $0xb8] sm:$0xf0]  ;;  %v11215_v12 = vperm.slane %v11204_v41, 0 }
 0x5b9   :  { %v2851_v63 = vmul.f32 %v11111_v62, %v2850_v53  ;;  %vm2897_vm0 = vcmp.eq.f32.partialorder %v2896_v11, 8.507059e+37  ;;  %v7392_v11 = vld [vmem:[#allocation8 + $0xb0] sm:$0xf0]  ;;  %v7403_v27 = vor.u32 %v8610_v4, %v7400_v24  ;;  %v7368_v4 = vld [vmem:[#allocation8 + $0x78] sm:$0xf0] }
 0x5ba   :  { %v2870_v6 = vmul.f32 %v11114_v57, %v2869_v17  ;;  %3784 = vmatpush.bf16.msra.mxu0 %v7423_v18  ;;  %v11218_v18 = vperm.slane %v11204_v41, 1 }
 0x5bb   :  { %v8958_v58 = vpop.eup %8957  ;;  %v2852_v8 = vadd.f32 %v11111_v62, %v2851_v63 }
 0x5bc   :  { %v2871_v51 = vadd.f32 %v11114_v57, %v2870_v6  ;;  %v2888_v31 = vmul.f32 %v8958_v58, %v11109_v28  ;;  %v8960_v38 = vpop.eup %8959  ;;  %vm2893_vm13 = vweird.f32 %v8958_v58  ;;  %v11149_v28 = vpop.f32.mrf.mxu0  ;;  %v7430_v6 = vld [vmem:[#allocation8 + $0xe8] sm:$0xf] }
 0x5bd   :  { %v2856_v20 = vsel %vm2855_vm9, %v11111_v62, %v2852_v8  ;;  %vm2894_vm15 = vmor %vm2892_vm14, %vm2893_vm13  ;;  %v11155_v62 = vpop.f32.mrf.mxu3  ;;  %v8618_v8 = vld [vmem:[#allocation8 + $0xec] sm:$0xf] }
 0x5be   :  { %v2861_v21 = vsel %vm2858_vm11, %v2860_v48, %v2856_v20  ;;  %v2875_v3 = vsel %vm2874_vm10, %v11114_v57, %v2871_v51  ;;  %v2889_v23 = vsub.f32 1.0, %v2888_v31  ;;  %v7435_v52 = vor.u32 %v8618_v8, %v7432_v14  ;;  %v8615_v48 = vld [vmem:[#allocation8 + $0xcc] sm:$0xf0]  ;;  %v8613_v51 = vld [vmem:[#allocation8 + $0xc4] sm:$0xf] }
 0x5bf   :  { %v2880_v1 = vsel %vm2877_vm12, %v2879_v60, %v2875_v3  ;;  %v2903_v22 = vmul.f32 %v8960_v38, %v2861_v21  ;;  %v11161_v47 = vpop.f32.mrf.mxu2  ;;  %v7407_v31 = vor.u32 %v8615_v48, %v7406_v36  ;;  %v7414_v60 = vld [vmem:[#allocation8 + $0xc8] sm:$0xf]  ;;  %v8616_v20 = vld [vmem:[#allocation8 + $0xd4] sm:$0xf0]  ;;  %v7411_v38 = vor.u32 %v8613_v51, %v7408_v13  ;;  %v8614_v3 = vld [vmem:[#allocation8 + $0xcc] sm:$0xf] }
 0x5c0   :  { %v2902_v10 = vmul.f32 %v2880_v1, %v11077_v9  ;;  %v2890_v43 = vmul.f32 %v8958_v58, %v2889_v23  ;;  %v11167_v57 = vpop.f32.mrf.mxu1  ;;  %3823 = vmatpush.bf16.msra.mxu3 %v7435_v52  ;;  %v7415_v21 = vor.u32 %v8616_v20, %v7414_v60  ;;  %v7416_v23 = vld [vmem:[#allocation8 + $0xd8] sm:$0xf0]  ;;  %v7376_v8 = vld [vmem:[#allocation8 + $0x90] sm:$0xf0]  ;;  %v7382_v14 = vld [vmem:[#allocation8 + $0x88] sm:$0xf] }
 0x5c1   :  { %3785 = vmatpush.bf16.msra.mxu0 %v7407_v31  ;;  %v7419_v1 = vor.u32 %v8614_v3, %v7416_v23  ;;  %3798 = vmatpush.bf16.msra.mxu1 %v7411_v38  ;;  %v8608_v52 = vld [vmem:[#allocation8 + $0x94] sm:$0xf0]  ;;  %v7379_v36 = vor.u32 %v8605_v34, %v7376_v8  ;;  %v8606_v51 = vld [vmem:[#allocation8 + $0x8c] sm:$0xf]  ;;  %v7384_v31 = vld [vmem:[#allocation8 + $0x98] sm:$0xf0]  ;;  %v3162_v3 = vadd.f32 %v11151_v29, %v11218_v18 }
 0x5c2   :  { %v2904_v44 = vadd.f32 %v2903_v22, %v2902_v10  ;;  %v2891_v2 = vadd.f32 %v8958_v58, %v2890_v43  ;;  %v7390_v22 = vld [vmem:[#allocation8 + $0xa0] sm:$0xf]  ;;  %v8611_v10 = vld [vmem:[#allocation8 + $0xac] sm:$0xf0]  ;;  %v8609_v43 = vld [vmem:[#allocation8 + $0xa4] sm:$0xf]  ;;  %v7383_v48 = vor.u32 %v8608_v52, %v7382_v14  ;;  %v7387_v13 = vor.u32 %v8606_v51, %v7384_v31 }
 0x5c3   :  { %v7391_v45 = vor.u32 %v8611_v10, %v7390_v22  ;;  %v7358_v60 = vld [vmem:[#allocation8 + $0x60] sm:$0xf]  ;;  %v8603_v20 = vld [vmem:[#allocation8 + $0x6c] sm:$0xf0]  ;;  %v8601_v38 = vld [vmem:[#allocation8 + $0x64] sm:$0xf] }
 0x5c4   :  { %8961 = vtanh.f32 %v2904_v44  ;;  %v2895_v42 = vsel %vm2894_vm15, %v8958_v58, %v2891_v2  ;;  %v7431_v58 = vor.u32 %v8620_v35, %v7430_v6  ;;  %3824 = vmatpush.bf16.msra.mxu3 %v7419_v1  ;;  %v7374_v6 = vld [vmem:[#allocation8 + $0x80] sm:$0xf]  ;;  %v8607_v35 = vld [vmem:[#allocation8 + $0x8c] sm:$0xf0]  ;;  %v7359_v22 = vor.u32 %v8603_v20, %v7358_v60  ;;  %v7360_v10 = vld [vmem:[#allocation8 + $0x70] sm:$0xf0] }
 0x5c5   :  { %v2900_v33 = vsel %vm2897_vm0, %v2899_v15, %v2895_v42  ;;  %v11163_v7 = vpop.f32.mrf.mxu3  ;;  %v7398_v42 = vld [vmem:[#allocation8 + $0xa8] sm:$0xf]  ;;  %v8612_v15 = vld [vmem:[#allocation8 + $0xb4] sm:$0xf0]  ;;  %3786 = vmatpush.bf16.msra.mxu0 %v7391_v45  ;;  %v8597_v34 = vld [vmem:[#allocation8 + $0x44] sm:$0xf] }
 0x5c6   :  { %3810 = vmatpush.bf16.msra.mxu2 %v7431_v58  ;;  %v7375_v58 = vor.u32 %v8607_v35, %v7374_v6  ;;  %v8604_v45 = vld [vmem:[#allocation8 + $0x74] sm:$0xf0]  ;;  %v7342_v6 = vld [vmem:[#allocation8 + $0x40] sm:$0xf]  ;;  %v8599_v35 = vld [vmem:[#allocation8 + $0x4c] sm:$0xf0] }
 0x5c7   :  { %v7343_v14 = vor.u32 %v8599_v35, %v7342_v6  ;;  %v7344_v52 = vld [vmem:[#allocation8 + $0x50] sm:$0xf0]  ;;  %v8600_v51 = vld [vmem:[#allocation8 + $0x54] sm:$0xf0]  ;;  %v8598_v31 = vld [vmem:[#allocation8 + $0x4c] sm:$0xf] }
 0x5c8   :  { %v11175_v25 = vpop.f32.mrf.mxu1  ;;  %3825 = vmatpush.bf16.msra.mxu3 %v7403_v27  ;;  %v7352_v60 = vld [vmem:[#allocation8 + $0x58] sm:$0xf0]  ;;  %v7326_v20 = vld [vmem:[#allocation8 + $0x20] sm:$0xf] }
 0x5c9   :  { %3787 = vmatpush.bf16.msra.mxu0 %v7375_v58  ;;  %v7310_v35 = vld [vmem:[#allocation8] sm:$0xf] }
 0x5ca   :  { %v8962_v32 = vpop.eup %8961  ;;  %3811 = vmatpush.bf16.msra.mxu2 %v7415_v21  ;;  %v3133_v21 = vadd.f32 %v11149_v28, %v11215_v12  ;;  %v11229_v28 = vperm.slane %v11204_v41, 3 }
 0x5cb   :  { %v2906_v30 = vmul.f32 %v8962_v32, %v2900_v33 }
 0x5cc   :  { %3826 = vmatpush.bf16.msra.mxu3 %v7387_v13 }
 0x5cd   :  { %v2920_v9 = vpack.c.bf16 %v2906_v30, %v11083_v59  ;;  %v11157_v59 = vpop.f32.mrf.mxu0  ;;  %v11171_v5 = vpop.f32.mrf.mxu3  ;;  %v7395_v30 = vor.u32 %v8609_v43, %v7392_v11  ;;  %v7366_v43 = vld [vmem:[#allocation8 + $0x68] sm:$0xf]  ;;  %3788 = vmatpush.bf16.msra.mxu0 %v7359_v22 }
 0x5cf   :  { %3146 = vmatmul.bf16.gmra.mxu0 %v2920_v9  ;;  %3175 = vmatmul.bf16.gmra.mxu1 %v2920_v9 }
 0x5d0   :  { %3204 = vmatmul.bf16.gmra.mxu2 %v2920_v9  ;;  %3233 = vmatmul.bf16.gmra.mxu3 %v2920_v9  ;;  %v11183_v55 = vpop.f32.mrf.mxu1  ;;  %v7399_v9 = vor.u32 %v8612_v15, %v7398_v42  ;;  %v7363_v15 = vor.u32 %v8601_v38, %v7360_v10  ;;  %v8595_v38 = vld [vmem:[#allocation8 + $0x2c] sm:$0xf0]  ;;  %v8593_v10 = vld [vmem:[#allocation8 + $0x24] sm:$0xf] }
 0x5d1   :  { %3799 = vmatpush.bf16.msra.mxu1 %v7395_v30  ;;  %v7367_v30 = vor.u32 %v8604_v45, %v7366_v43  ;;  %3789 = vmatpush.bf16.msra.mxu0 %v7343_v14  ;;  %v7327_v22 = vor.u32 %v8595_v38, %v7326_v20  ;;  %v7328_v43 = vld [vmem:[#allocation8 + $0x30] sm:$0xf0]  ;;  %v7334_v45 = vld [vmem:[#allocation8 + $0x28] sm:$0xf] }
 0x5d2   :  { %3812 = vmatpush.bf16.msra.mxu2 %v7399_v9  ;;  %v8602_v9 = vld [vmem:[#allocation8 + $0x6c] sm:$0xf]  ;;  %v7312_v14 = vld [vmem:[#allocation8 + $0x10] sm:$0xf0] }
 0x5d3   :  { %v7371_v27 = vor.u32 %v8602_v9, %v7368_v4  ;;  %v8594_v9 = vld [vmem:[#allocation8 + $0x2c] sm:$0xf]  ;;  %v7336_v4 = vld [vmem:[#allocation8 + $0x38] sm:$0xf0] }
 0x5d5   :  { %v11165_v26 = vpop.f32.mrf.mxu0  ;;  %v11179_v50 = vpop.f32.mrf.mxu3  ;;  %3800 = vmatpush.bf16.msra.mxu1 %v7379_v36  ;;  %3827 = vmatpush.bf16.msra.mxu3 %v7371_v27  ;;  %v7347_v36 = vor.u32 %v8597_v34, %v7344_v52  ;;  %v8591_v34 = vld [vmem:[#allocation8 + $0xc] sm:$0xf0]  ;;  %v7318_v52 = vld [vmem:[#allocation8 + $0x8] sm:$0xf] }
 0x5d6   :  { %3813 = vmatpush.bf16.msra.mxu2 %v7383_v48  ;;  %v7350_v48 = vld [vmem:[#allocation8 + $0x48] sm:$0xf]  ;;  %3790 = vmatpush.bf16.msra.mxu0 %v7327_v22  ;;  %v11234_v22 = vperm.slane %v11204_v41, 2 }
 0x5d7   :  { %v7351_v13 = vor.u32 %v8600_v51, %v7350_v48 }
 0x5d8   :  { %v11191_v17 = vpop.f32.mrf.mxu1 }
 0x5d9   :  { %3801 = vmatpush.bf16.msra.mxu1 %v7363_v15  ;;  %v7331_v15 = vor.u32 %v8593_v10, %v7328_v43 }
 0x5da   :  { %3814 = vmatpush.bf16.msra.mxu2 %v7367_v30  ;;  %v8596_v30 = vld [vmem:[#allocation8 + $0x34] sm:$0xf0] }
 0x5db   :  { %v7335_v6 = vor.u32 %v8596_v30, %v7334_v45 }
 0x5dd   :  { %v11173_v40 = vpop.f32.mrf.mxu0  ;;  %v11187_v56 = vpop.f32.mrf.mxu3  ;;  %3802 = vmatpush.bf16.msra.mxu1 %v7347_v36  ;;  %v8592_v36 = vld [vmem:[#allocation8 + $0x14] sm:$0xf0] }
 0x5de   :  { %3815 = vmatpush.bf16.msra.mxu2 %v7351_v13  ;;  %v7320_v13 = vld [vmem:[#allocation8 + $0x18] sm:$0xf0]  ;;  %v7319_v20 = vor.u32 %v8592_v36, %v7318_v52 }
 0x5df   :  { %3475 = vmatmul.bf16.vlgmr.msrb.gmra.mxu0 %v9201_v61  ;;  %3488 = vmatmul.bf16.vlgmr.msrb.gmra.mxu1 %v9201_v61 }
 0x5e0   :  { %3501 = vmatmul.bf16.vlgmr.msrb.gmra.mxu2 %v9201_v61  ;;  %3514 = vmatmul.bf16.vlgmr.msrb.gmra.mxu3 %v9201_v61  ;;  %v11169_v61 = vpop.f32.mrf.mxu2 }
 0x5e1   :  { %3803 = vmatpush.bf16.msra.mxu1 %v7331_v15  ;;  %v3191_v15 = vadd.f32 %v11153_v39, %v11234_v22 }
 0x5e2   :  { %3816 = vmatpush.bf16.msra.mxu2 %v7335_v6 }
 0x5e5   :  { %v11181_v53 = vpop.f32.mrf.mxu0  ;;  %v11195_v0 = vpop.f32.mrf.mxu3 }
 0x5e6   :  { %3817 = vmatpush.bf16.msra.mxu2 %v7319_v20 }
 0x5e8   :  { %v11177_v49 = vpop.f32.mrf.mxu2 }
 0x5ed   :  { %v11189_v54 = vpop.f32.mrf.mxu0 }
 0x5f0   :  { %v11185_v16 = vpop.f32.mrf.mxu2 }
 0x5f8   :  { %v11193_v63 = vpop.f32.mrf.mxu2 }
 0x64c   :  { %v11197_v19 = vpop.f32.mrf.mxu0  ;;  %v11199_v37 = vpop.f32.mrf.mxu1 }
 0x653   :  { %v11206_v44 = vpop.f32.mrf.mxu2  ;;  %v11208_v2 = vpop.f32.mrf.mxu3 }
 0x654   :  { %v11210_v32 = vpop.f32.mrf.mxu0  ;;  %v11212_v33 = vpop.f32.mrf.mxu1 }
 0x65b   :  { %v11224_v23 = vpop.f32.mrf.mxu2  ;;  %v11226_v1 = vpop.f32.mrf.mxu3 }
 0x65c   :  { %v3476_v11 = vpop.f32.mrf.mxu0  ;;  %v3489_v42 = vpop.f32.mrf.mxu1 }
 0x65d   :  { %v3519_v24 = vadd.f32 %v3476_v11, %v3133_v21  ;;  %v3520_v29 = vadd.f32 %v3489_v42, %v3162_v3  ;;  %v3220_v21 = vadd.f32 %v11155_v62, %v11229_v28  ;;  %v7355_v3 = vor.u32 %v8598_v31, %v7352_v60  ;;  %v8590_v31 = vld [vmem:[#allocation8 + $0xc] sm:$0xf] }
 0x65e   :  { %v7339_v62 = vor.u32 %v8594_v9, %v7336_v4 }
 0x65f   :  { %v7305_v58 = vmul.f32 -1.442695, %v3519_v24  ;;  %v7306_v8 = vmul.f32 -1.442695, %v3520_v29  ;;  %3828 = vmatpush.bf16.msra.mxu3 %v7355_v3  ;;  %v7323_v3 = vor.u32 %v8590_v31, %v7320_v13 }
 0x661   :  { %8963 = vpow2.f32 %v7305_v58  ;;  %v8589_v58 = vld [vmem:[#allocation8 + $0x4] sm:$0xf] }
 0x662   :  { %8965 = vpow2.f32 %v7306_v8  ;;  %v7311_v8 = vor.u32 %v8591_v34, %v7310_v35  ;;  %v7315_v51 = vor.u32 %v8589_v58, %v7312_v14 }
 0x663   :  { %v3502_v11 = vpop.f32.mrf.mxu2  ;;  %v3515_v42 = vpop.f32.mrf.mxu3  ;;  %3829 = vmatpush.bf16.msra.mxu3 %v7339_v62 }
 0x664   :  { %v3522_v24 = vadd.f32 %v3515_v42, %v3220_v21  ;;  %v3478_v29 = vpop.f32.mrf.mxu0  ;;  %v3491_v27 = vpop.f32.mrf.mxu1  ;;  %3791 = vmatpush.bf16.msra.mxu0 %v7311_v8  ;;  %3804 = vmatpush.bf16.msra.mxu1 %v7315_v51  ;;  %v3521_v4 = vadd.f32 %v3502_v11, %v3191_v15 }
 0x666   :  { %v7307_v48 = vmul.f32 -1.442695, %v3522_v24 }
 0x667   :  { %v8964_v60 = vpop.eup %8963  ;;  %3830 = vmatpush.bf16.msra.mxu3 %v7323_v3 }
 0x668   :  { %v8966_v38 = vpop.eup %8965  ;;  %v3526_v21 = vadd.f32 1.0, %v8964_v60  ;;  %8967 = vpow2.f32 %v7307_v48 }
 0x669   :  { %v3545_v10 = vadd.f32 1.0, %v8966_v38 }
 0x66a   :  { %8969 = vrcp.f32 %v3526_v21  ;;  %v3538_v62 = vand.u32 2147483648, %v3526_v21  ;;  %v3536_v58 = vand.u32 2147483647, %v3526_v21  ;;  %vm3532_vm3 = vweird.f32 %v3526_v21 }
 0x66b   :  { %8971 = vrcp.f32 %v3545_v10  ;;  %v3517_v43 = vpop.f32.mrf.mxu3  ;;  %v3504_v45 = vpop.f32.mrf.mxu2  ;;  %v3557_v35 = vand.u32 2147483648, %v3545_v10  ;;  %v3555_v14 = vand.u32 2147483647, %v3545_v10  ;;  %vm3551_vm4 = vweird.f32 %v3545_v10 }
 0x66c   :  { %v3539_v11 = vor.u32 1.1754944e-38, %v3538_v62  ;;  %vm3537_vm6 = vcmp.eq.f32.partialorder %v3536_v58, 8.507059e+37  ;;  %v7553_v62 = vld [vmem:[#allocation8 + $0xe0] sm:$0xf] }
 0x66d   :  { %v3558_v51 = vor.u32 1.1754944e-38, %v3557_v35  ;;  %vm3556_vm8 = vcmp.eq.f32.partialorder %v3555_v14, 8.507059e+37  ;;  %v8651_v35 = vld [vmem:[#allocation8 + $0xec] sm:$0xf0]  ;;  %v8652_v14 = vld [vmem:[#allocation8 + $0xf4] sm:$0xf0] }
 0x66e   :  { %v8968_v42 = vpop.eup %8967  ;;  %v7554_v58 = vor.u32 %v8651_v35, %v7553_v62  ;;  %v8644_v62 = vld [vmem:[#allocation8 + $0xb4] sm:$0xf0] }
 0x66f   :  { %v3565_v30 = vadd.f32 1.0, %v8968_v42 }
 0x670   :  { %v8970_v9 = vpop.eup %8969  ;;  %4101 = vmatpush.bf16.msrb.mxu0 %v7554_v58  ;;  %v8642_v58 = vld [vmem:[#allocation8 + $0xac] sm:$0xf] }
 0x671   :  { %v8972_v24 = vpop.eup %8971  ;;  %v3528_v29 = vmul.f32 %v8970_v9, %v3526_v21  ;;  %8973 = vrcp.f32 %v3565_v30  ;;  %vm3533_vm1 = vweird.f32 %v8970_v9  ;;  %vm3571_vm10 = vweird.f32 %v3565_v30 }
 0x672   :  { %v3547_v27 = vmul.f32 %v8972_v24, %v3545_v10  ;;  %8975 = vtanh.f32 %v3521_v4  ;;  %vm3552_vm2 = vweird.f32 %v8972_v24  ;;  %vm3534_vm5 = vmor %vm3532_vm3, %vm3533_vm1  ;;  %v3577_v10 = vand.u32 2147483648, %v3565_v30 }
 0x673   :  { %v3529_v41 = vsub.f32 1.0, %v3528_v29  ;;  %vm3553_vm7 = vmor %vm3551_vm4, %vm3552_vm2 }
 0x674   :  { %v3548_v6 = vsub.f32 1.0, %v3547_v27  ;;  %v3578_v29 = vor.u32 1.1754944e-38, %v3577_v10 }
 0x675   :  { %v3530_v34 = vmul.f32 %v8970_v9, %v3529_v41 }
 0x676   :  { %v3549_v8 = vmul.f32 %v8972_v24, %v3548_v6 }
 0x677   :  { %v8974_v52 = vpop.eup %8973  ;;  %v3531_v39 = vadd.f32 %v8970_v9, %v3530_v34  ;;  %v8649_v34 = vld [vmem:[#allocation8 + $0xe4] sm:$0xf] }
 0x678   :  { %v3550_v36 = vadd.f32 %v8972_v24, %v3549_v8  ;;  %v3567_v48 = vmul.f32 %v8974_v52, %v3565_v30  ;;  %v8976_v13 = vpop.eup %8975  ;;  %vm3572_vm9 = vweird.f32 %v8974_v52  ;;  %v7561_v8 = vld [vmem:[#allocation8 + $0xe8] sm:$0xf] }
 0x679   :  { %v3535_v31 = vsel %vm3534_vm5, %v8970_v9, %v3531_v39  ;;  %v3575_v9 = vand.u32 2147483647, %v3565_v30  ;;  %vm3573_vm11 = vmor %vm3571_vm10, %vm3572_vm9  ;;  %v7555_v30 = vld [vmem:[#allocation8 + $0xf0] sm:$0xf0]  ;;  %v7562_v39 = vor.u32 %v8652_v14, %v7561_v8  ;;  %v7505_v14 = vld [vmem:[#allocation8 + $0x80] sm:$0xf] }
 0x67a   :  { %v3540_v60 = vsel %vm3537_vm6, %v3539_v11, %v3535_v31  ;;  %v3554_v20 = vsel %vm3553_vm7, %v8972_v24, %v3550_v36  ;;  %v3568_v38 = vsub.f32 1.0, %v3567_v48  ;;  %v8650_v11 = vld [vmem:[#allocation8 + $0xec] sm:$0xf]  ;;  %v7563_v36 = vld [vmem:[#allocation8 + $0xf8] sm:$0xf0] }
 0x67b   :  { %v3559_v3 = vsel %vm3556_vm8, %v3558_v51, %v3554_v20  ;;  %v3582_v43 = vmul.f32 %v8976_v13, %v3540_v60  ;;  %vm3576_vm12 = vcmp.eq.f32.partialorder %v3575_v9, 8.507059e+37  ;;  %v7566_v48 = vor.u32 %v8650_v11, %v7563_v36  ;;  %4127 = vmatpush.bf16.msrb.mxu2 %v7562_v39  ;;  %v7537_v51 = vld [vmem:[#allocation8 + $0xc0] sm:$0xf]  ;;  %v8647_v31 = vld [vmem:[#allocation8 + $0xcc] sm:$0xf0] }
 0x67c   :  { %v3581_v45 = vmul.f32 0.0, %v3559_v3  ;;  %v3569_v42 = vmul.f32 %v8974_v52, %v3568_v38  ;;  %v8645_v13 = vld [vmem:[#allocation8 + $0xc4] sm:$0xf]  ;;  %v7538_v60 = vor.u32 %v8647_v31, %v7537_v51  ;;  %v7539_v20 = vld [vmem:[#allocation8 + $0xd0] sm:$0xf0] }
 0x67d   :  { %4140 = vmatpush.bf16.msrb.mxu3 %v7566_v48  ;;  %v7545_v38 = vld [vmem:[#allocation8 + $0xc8] sm:$0xf]  ;;  %v8648_v3 = vld [vmem:[#allocation8 + $0xd4] sm:$0xf0]  ;;  %v7521_v9 = vld [vmem:[#allocation8 + $0xa0] sm:$0xf] }
 0x67e   :  { %v11238_v15 = vadd.f32 %v3582_v43, %v3581_v45  ;;  %v3570_v21 = vadd.f32 %v8974_v52, %v3569_v42  ;;  %v7542_v43 = vor.u32 %v8645_v13, %v7539_v20  ;;  %v7546_v45 = vor.u32 %v8648_v3, %v7545_v38  ;;  %v8646_v42 = vld [vmem:[#allocation8 + $0xcc] sm:$0xf]  ;;  %4102 = vmatpush.bf16.msrb.mxu0 %v7538_v60  ;;  %v8637_v39 = vld [vmem:[#allocation8 + $0x84] sm:$0xf]  ;;  %v7507_v36 = vld [vmem:[#allocation8 + $0x90] sm:$0xf0] }
 0x67f   :  { %v7513_v48 = vld [vmem:[#allocation8 + $0x88] sm:$0xf]  ;;  %v8640_v51 = vld [vmem:[#allocation8 + $0x94] sm:$0xf0]  ;;  %v7510_v31 = vor.u32 %v8637_v39, %v7507_v36  ;;  %v8638_v60 = vld [vmem:[#allocation8 + $0x8c] sm:$0xf] }
 0x680   :  { %8977 = vtanh.f32 %v11238_v15  ;;  %v3574_v4 = vsel %vm3573_vm11, %v8974_v52, %v3570_v21  ;;  %v7558_v52 = vor.u32 %v8649_v34, %v7555_v30  ;;  %v7547_v21 = vld [vmem:[#allocation8 + $0xd8] sm:$0xf0]  ;;  %4128 = vmatpush.bf16.msrb.mxu2 %v7546_v45  ;;  %v7514_v13 = vor.u32 %v8640_v51, %v7513_v48  ;;  %v7489_v3 = vld [vmem:[#allocation8 + $0x60] sm:$0xf]  ;;  %v8633_v45 = vld [vmem:[#allocation8 + $0x64] sm:$0xf] }
 0x681   :  { %v3579_v27 = vsel %vm3576_vm12, %v3578_v29, %v3574_v4  ;;  %v7550_v10 = vor.u32 %v8646_v42, %v7547_v21  ;;  %v8643_v4 = vld [vmem:[#allocation8 + $0xac] sm:$0xf0]  ;;  %v8641_v29 = vld [vmem:[#allocation8 + $0xa4] sm:$0xf]  ;;  %v7531_v30 = vld [vmem:[#allocation8 + $0xb8] sm:$0xf0]  ;;  %v3135_v42 = vadd.f32 %v11157_v59, %v11215_v12  ;;  %v3164_v21 = vadd.f32 %v11159_v46, %v11218_v18 }
 0x682   :  { %4114 = vmatpush.bf16.msrb.mxu1 %v7558_v52  ;;  %v7534_v8 = vor.u32 %v8642_v58, %v7531_v30  ;;  %v8639_v52 = vld [vmem:[#allocation8 + $0x8c] sm:$0xf0]  ;;  %v7515_v20 = vld [vmem:[#allocation8 + $0x98] sm:$0xf0]  ;;  %v7473_v59 = vld [vmem:[#allocation8 + $0x40] sm:$0xf] }
 0x683   :  { %4141 = vmatpush.bf16.msrb.mxu3 %v7550_v10  ;;  %v7506_v11 = vor.u32 %v8639_v52, %v7505_v14  ;;  %v7518_v38 = vor.u32 %v8638_v60, %v7515_v20  ;;  %v8631_v14 = vld [vmem:[#allocation8 + $0x4c] sm:$0xf0]  ;;  %v8629_v46 = vld [vmem:[#allocation8 + $0x44] sm:$0xf]  ;;  %v7475_v36 = vld [vmem:[#allocation8 + $0x50] sm:$0xf0] }
 0x684   :  { %v7478_v48 = vor.u32 %v8629_v46, %v7475_v36  ;;  %v7481_v51 = vld [vmem:[#allocation8 + $0x48] sm:$0xf]  ;;  %v7483_v20 = vld [vmem:[#allocation8 + $0x58] sm:$0xf0] }
 0x686   :  { %v8978_v24 = vpop.eup %8977  ;;  %4115 = vmatpush.bf16.msrb.mxu1 %v7542_v43  ;;  %v8635_v43 = vld [vmem:[#allocation8 + $0x6c] sm:$0xf0] }
 0x687   :  { %v11241_v41 = vmul.f32 %v8978_v24, %v3579_v27  ;;  %v7522_v24 = vor.u32 %v8643_v4, %v7521_v9  ;;  %v7523_v27 = vld [vmem:[#allocation8 + $0xb0] sm:$0xf0]  ;;  %4142 = vmatpush.bf16.msrb.mxu3 %v7534_v8  ;;  %v7490_v10 = vor.u32 %v8635_v43, %v7489_v3  ;;  %v7497_v4 = vld [vmem:[#allocation8 + $0x68] sm:$0xf]  ;;  %v8627_v3 = vld [vmem:[#allocation8 + $0x2c] sm:$0xf0]  ;;  %v3222_v43 = vadd.f32 %v11163_v7, %v11229_v28 }
 0x688   :  { %v7526_v35 = vor.u32 %v8641_v29, %v7523_v27  ;;  %v7491_v9 = vld [vmem:[#allocation8 + $0x70] sm:$0xf0]  ;;  %v8636_v29 = vld [vmem:[#allocation8 + $0x74] sm:$0xf0] }
 0x689   :  { %v3591_v6 = vpack.c.bf16 %v11241_v41, %v11241_v41  ;;  %4103 = vmatpush.bf16.msrb.mxu0 %v7522_v24 }
 0x68a   :  { %4116 = vmatpush.bf16.msrb.mxu1 %v7526_v35  ;;  %v8634_v35 = vld [vmem:[#allocation8 + $0x6c] sm:$0xf] }
 0x68b   :  { %3792 = vmatmul.bf16.vlgmr.msra.gmra.mxu0 %v3591_v6  ;;  %3805 = vmatmul.bf16.vlgmr.msra.gmra.mxu1 %v3591_v6 }
 0x68c   :  { %3818 = vmatmul.bf16.vlgmr.msra.gmra.mxu2 %v3591_v6  ;;  %3831 = vmatmul.bf16.vlgmr.msra.gmra.mxu3 %v3591_v6  ;;  %v7529_v6 = vld [vmem:[#allocation8 + $0xa8] sm:$0xf] }
 0x68d   :  { %v7530_v34 = vor.u32 %v8644_v62, %v7529_v6  ;;  %4104 = vmatpush.bf16.msrb.mxu0 %v7506_v11  ;;  %4143 = vmatpush.bf16.msrb.mxu3 %v7518_v38  ;;  %v7494_v6 = vor.u32 %v8633_v45, %v7491_v9  ;;  %v7498_v62 = vor.u32 %v8636_v29, %v7497_v4  ;;  %v7457_v38 = vld [vmem:[#allocation8 + $0x20] sm:$0xf]  ;;  %v7465_v9 = vld [vmem:[#allocation8 + $0x28] sm:$0xf] }
 0x68e   :  { %4117 = vmatpush.bf16.msrb.mxu1 %v7510_v31  ;;  %v7474_v11 = vor.u32 %v8631_v14, %v7473_v59  ;;  %v8632_v31 = vld [vmem:[#allocation8 + $0x54] sm:$0xf0]  ;;  %v8623_v59 = vld [vmem:[#allocation8 + $0xc] sm:$0xf0]  ;;  %v8621_v14 = vld [vmem:[#allocation8 + $0x4] sm:$0xf] }
 0x68f   :  { %4129 = vmatpush.bf16.msrb.mxu2 %v7530_v34  ;;  %v7499_v34 = vld [vmem:[#allocation8 + $0x78] sm:$0xf0]  ;;  %v7482_v60 = vor.u32 %v8632_v31, %v7481_v51  ;;  %v8622_v51 = vld [vmem:[#allocation8 + $0xc] sm:$0xf] }
 0x690   :  { %v7502_v8 = vor.u32 %v8634_v35, %v7499_v34  ;;  %v7451_v31 = vld [vmem:[#allocation8 + $0x18] sm:$0xf0] }
 0x691   :  { %4105 = vmatpush.bf16.msrb.mxu0 %v7490_v10  ;;  %v7459_v10 = vld [vmem:[#allocation8 + $0x30] sm:$0xf0] }
 0x692   :  { %4118 = vmatpush.bf16.msrb.mxu1 %v7494_v6  ;;  %4144 = vmatpush.bf16.msrb.mxu3 %v7502_v8  ;;  %v8626_v6 = vld [vmem:[#allocation8 + $0x2c] sm:$0xf]  ;;  %v7441_v8 = vld [vmem:[#allocation8] sm:$0xf] }
 0x693   :  { %4130 = vmatpush.bf16.msrb.mxu2 %v7514_v13  ;;  %v8630_v13 = vld [vmem:[#allocation8 + $0x4c] sm:$0xf]  ;;  %v7442_v46 = vor.u32 %v8623_v59, %v7441_v8 }
 0x694   :  { %v7486_v45 = vor.u32 %v8630_v13, %v7483_v20 }
 0x695   :  { %4106 = vmatpush.bf16.msrb.mxu0 %v7474_v11  ;;  %v8624_v11 = vld [vmem:[#allocation8 + $0x14] sm:$0xf0] }
 0x696   :  { %4119 = vmatpush.bf16.msrb.mxu1 %v7478_v48  ;;  %4145 = vmatpush.bf16.msrb.mxu3 %v7486_v45 }
 0x697   :  { %4131 = vmatpush.bf16.msrb.mxu2 %v7498_v62  ;;  %v7467_v62 = vld [vmem:[#allocation8 + $0x38] sm:$0xf0] }
 0x698   :  { %v7470_v7 = vor.u32 %v8626_v6, %v7467_v62 }
 0x69a   :  { %4146 = vmatpush.bf16.msrb.mxu3 %v7470_v7 }
 0x69b   :  { %4132 = vmatpush.bf16.msrb.mxu2 %v7482_v60 }
 0x708   :  { %v3793_v24 = vpop.f32.mrf.mxu0  ;;  %v3806_v27 = vpop.f32.mrf.mxu1 }
 0x709   :  { %v3836_v58 = vadd.f32 %v3793_v24, %v3135_v42  ;;  %v3837_v30 = vadd.f32 %v3806_v27, %v3164_v21  ;;  %v7458_v42 = vor.u32 %v8627_v3, %v7457_v38  ;;  %v8625_v21 = vld [vmem:[#allocation8 + $0x24] sm:$0xf]  ;;  %v8628_v27 = vld [vmem:[#allocation8 + $0x34] sm:$0xf0]  ;;  %v7454_v3 = vor.u32 %v8622_v51, %v7451_v31 }
 0x70a   :  { %v7462_v24 = vor.u32 %v8625_v21, %v7459_v10  ;;  %v3193_v10 = vadd.f32 %v11161_v47, %v11234_v22 }
 0x70b   :  { %v7436_v52 = vmul.f32 -1.442695, %v3836_v58  ;;  %v7437_v39 = vmul.f32 -1.442695, %v3837_v30  ;;  %v7466_v30 = vor.u32 %v8628_v27, %v7465_v9  ;;  %4107 = vmatpush.bf16.msrb.mxu0 %v7458_v42  ;;  %4147 = vmatpush.bf16.msrb.mxu3 %v7454_v3 }
 0x70c   :  { %4120 = vmatpush.bf16.msrb.mxu1 %v7462_v24 }
 0x70d   :  { %8979 = vpow2.f32 %v7436_v52  ;;  %v7443_v52 = vld [vmem:[#allocation8 + $0x10] sm:$0xf0]  ;;  %4133 = vmatpush.bf16.msrb.mxu2 %v7466_v30 }
 0x70e   :  { %8981 = vpow2.f32 %v7437_v39  ;;  %v7449_v39 = vld [vmem:[#allocation8 + $0x8] sm:$0xf]  ;;  %v7446_v48 = vor.u32 %v8621_v14, %v7443_v52 }
 0x70f   :  { %v3819_v4 = vpop.f32.mrf.mxu2  ;;  %v3832_v29 = vpop.f32.mrf.mxu3  ;;  %v7450_v60 = vor.u32 %v8624_v11, %v7449_v39  ;;  %4108 = vmatpush.bf16.msrb.mxu0 %v7442_v46 }
 0x710   :  { %v3839_v35 = vadd.f32 %v3832_v29, %v3222_v43  ;;  %v3795_v34 = vpop.f32.mrf.mxu0  ;;  %v3808_v58 = vpop.f32.mrf.mxu1  ;;  %4121 = vmatpush.bf16.msrb.mxu1 %v7446_v48  ;;  %v3838_v24 = vadd.f32 %v3819_v4, %v3193_v10 }
 0x711   :  { %4134 = vmatpush.bf16.msrb.mxu2 %v7450_v60 }
 0x712   :  { %v7438_v36 = vmul.f32 -1.442695, %v3839_v35 }
 0x713   :  { %v8980_v13 = vpop.eup %8979 }
 0x714   :  { %v8982_v20 = vpop.eup %8981  ;;  %v3843_v38 = vadd.f32 1.0, %v8980_v13  ;;  %8983 = vpow2.f32 %v7438_v36 }
 0x715   :  { %v3862_v43 = vadd.f32 1.0, %v8982_v20 }
 0x716   :  { %8985 = vrcp.f32 %v3843_v38  ;;  %v3855_v58 = vand.u32 2147483648, %v3843_v38  ;;  %v3853_v8 = vand.u32 2147483647, %v3843_v38  ;;  %vm3849_vm15 = vweird.f32 %v3843_v38 }
 0x717   :  { %8987 = vrcp.f32 %v3862_v43  ;;  %v3821_v45 = vpop.f32.mrf.mxu2  ;;  %v3834_v42 = vpop.f32.mrf.mxu3  ;;  %v3874_v30 = vand.u32 2147483648, %v3862_v43  ;;  %v3872_v14 = vand.u32 2147483647, %v3862_v43  ;;  %vm3868_vm0 = vweird.f32 %v3862_v43 }
 0x718   :  { %v3856_v4 = vor.u32 1.1754944e-38, %v3855_v58  ;;  %vm3854_vm3 = vcmp.eq.f32.partialorder %v3853_v8, 8.507059e+37 }
 0x719   :  { %v3875_v11 = vor.u32 1.1754944e-38, %v3874_v30  ;;  %vm3873_vm4 = vcmp.eq.f32.partialorder %v3872_v14, 8.507059e+37  ;;  %v7692_v30 = vld [vmem:[#allocation8 + $0xe8] sm:$0xf]  ;;  %v8682_v14 = vld [vmem:[#allocation8 + $0xec] sm:$0xf] }
 0x71a   :  { %v8984_v21 = vpop.eup %8983 }
 0x71b   :  { %v3882_v9 = vadd.f32 1.0, %v8984_v21 }
 0x71c   :  { %v8986_v29 = vpop.eup %8985 }
 0x71d   :  { %v8988_v27 = vpop.eup %8987  ;;  %v3845_v6 = vmul.f32 %v8986_v29, %v3843_v38  ;;  %8989 = vrcp.f32 %v3882_v9  ;;  %vm3850_vm13 = vweird.f32 %v8986_v29  ;;  %v3894_v42 = vand.u32 2147483648, %v3882_v9 }
 0x71e   :  { %v3864_v62 = vmul.f32 %v8988_v27, %v3862_v43  ;;  %8991 = vtanh.f32 %v3838_v24  ;;  %vm3869_vm14 = vweird.f32 %v8988_v27  ;;  %vm3851_vm1 = vmor %vm3849_vm15, %vm3850_vm13  ;;  %vm3888_vm6 = vweird.f32 %v3882_v9 }
 0x71f   :  { %v3846_v35 = vsub.f32 1.0, %v3845_v6  ;;  %vm3870_vm2 = vmor %vm3868_vm0, %vm3869_vm14  ;;  %v3892_v21 = vand.u32 2147483647, %v3882_v9 }
 0x720   :  { %v3865_v34 = vsub.f32 1.0, %v3864_v62  ;;  %v7684_v62 = vld [vmem:[#allocation8 + $0xe0] sm:$0xf] }
 0x721   :  { %v3847_v7 = vmul.f32 %v8986_v29, %v3846_v35  ;;  %vm3893_vm8 = vcmp.eq.f32.partialorder %v3892_v21, 8.507059e+37  ;;  %v8683_v35 = vld [vmem:[#allocation8 + $0xec] sm:$0xf0] }
 0x722   :  { %v3866_v59 = vmul.f32 %v8988_v27, %v3865_v34  ;;  %v8681_v34 = vld [vmem:[#allocation8 + $0xe4] sm:$0xf]  ;;  %v7685_v58 = vor.u32 %v8683_v35, %v7684_v62  ;;  %v8674_v62 = vld [vmem:[#allocation8 + $0xac] sm:$0xf]  ;;  %v7662_v35 = vld [vmem:[#allocation8 + $0xb8] sm:$0xf0] }
 0x723   :  { %v8990_v46 = vpop.eup %8989  ;;  %v3848_v47 = vadd.f32 %v8986_v29, %v3847_v7  ;;  %v8684_v7 = vld [vmem:[#allocation8 + $0xf4] sm:$0xf0] }
 0x724   :  { %v3867_v52 = vadd.f32 %v8988_v27, %v3866_v59  ;;  %v3884_v39 = vmul.f32 %v8990_v46, %v3882_v9  ;;  %v8992_v48 = vpop.eup %8991  ;;  %vm3889_vm5 = vweird.f32 %v8990_v46  ;;  %v7686_v9 = vld [vmem:[#allocation8 + $0xf0] sm:$0xf0]  ;;  %v7693_v59 = vor.u32 %v8684_v7, %v7692_v30  ;;  %4418 = vmatpush.bf16.msra.mxu0 %v7685_v58  ;;  %v7636_v58 = vld [vmem:[#allocation8 + $0x80] sm:$0xf]  ;;  %v8669_v30 = vld [vmem:[#allocation8 + $0x84] sm:$0xf] }
 0x725   :  { %v3852_v36 = vsel %vm3851_vm1, %v8986_v29, %v3848_v47  ;;  %vm3890_vm7 = vmor %vm3888_vm6, %vm3889_vm5  ;;  %v3895_v29 = vor.u32 1.1754944e-38, %v3894_v42  ;;  %v7689_v8 = vor.u32 %v8681_v34, %v7686_v9  ;;  %v8673_v42 = vld [vmem:[#allocation8 + $0xa4] sm:$0xf]  ;;  %v7665_v34 = vor.u32 %v8674_v62, %v7662_v35  ;;  %v8671_v9 = vld [vmem:[#allocation8 + $0x8c] sm:$0xf0] }
 0x726   :  { %v3857_v51 = vsel %vm3854_vm3, %v3856_v4, %v3852_v36  ;;  %v3871_v31 = vsel %vm3870_vm2, %v8988_v27, %v3867_v52  ;;  %v3885_v13 = vsub.f32 1.0, %v3884_v39  ;;  %4444 = vmatpush.bf16.msra.mxu2 %v7693_v59  ;;  %v7668_v4 = vld [vmem:[#allocation8 + $0xc0] sm:$0xf]  ;;  %v8679_v52 = vld [vmem:[#allocation8 + $0xcc] sm:$0xf0]  ;;  %v7637_v7 = vor.u32 %v8671_v9, %v7636_v58 }
 0x727   :  { %v3876_v60 = vsel %vm3873_vm4, %v3875_v11, %v3871_v31  ;;  %v3899_v20 = vmul.f32 %v8992_v48, %v3857_v51  ;;  %4431 = vmatpush.bf16.msra.mxu1 %v7689_v8  ;;  %v8677_v39 = vld [vmem:[#allocation8 + $0xc4] sm:$0xf]  ;;  %v7669_v11 = vor.u32 %v8679_v52, %v7668_v4  ;;  %v7670_v36 = vld [vmem:[#allocation8 + $0xd0] sm:$0xf0]  ;;  %v7676_v48 = vld [vmem:[#allocation8 + $0xc8] sm:$0xf] }
 0x728   :  { %v3898_v3 = vmul.f32 %v3876_v60, %v11238_v15  ;;  %v3886_v45 = vmul.f32 %v8990_v46, %v3885_v13  ;;  %v8680_v51 = vld [vmem:[#allocation8 + $0xd4] sm:$0xf0]  ;;  %v7673_v31 = vor.u32 %v8677_v39, %v7670_v36  ;;  %v8678_v60 = vld [vmem:[#allocation8 + $0xcc] sm:$0xf]  ;;  %v7638_v8 = vld [vmem:[#allocation8 + $0x90] sm:$0xf0] }
 0x729   :  { %v7677_v13 = vor.u32 %v8680_v51, %v7676_v48  ;;  %4419 = vmatpush.bf16.msra.mxu0 %v7669_v11  ;;  %v7644_v59 = vld [vmem:[#allocation8 + $0x88] sm:$0xf]  ;;  %v8670_v4 = vld [vmem:[#allocation8 + $0x8c] sm:$0xf]  ;;  %v7646_v52 = vld [vmem:[#allocation8 + $0x98] sm:$0xf0]  ;;  %v3138_v51 = vadd.f32 %v11165_v26, %v11215_v12 }
 0x72a   :  { %v11254_v38 = vadd.f32 %v3899_v20, %v3898_v3  ;;  %v3887_v43 = vadd.f32 %v8990_v46, %v3886_v45  ;;  %v7678_v20 = vld [vmem:[#allocation8 + $0xd8] sm:$0xf0]  ;;  %v7652_v45 = vld [vmem:[#allocation8 + $0xa0] sm:$0xf]  ;;  %v7649_v39 = vor.u32 %v8670_v4, %v7646_v52  ;;  %v8667_v36 = vld [vmem:[#allocation8 + $0x6c] sm:$0xf0]  ;;  %v3225_v52 = vadd.f32 %v11171_v5, %v11229_v28 }
 0x72b   :  { %v7681_v3 = vor.u32 %v8678_v60, %v7678_v20  ;;  %4432 = vmatpush.bf16.msra.mxu1 %v7673_v31  ;;  %4445 = vmatpush.bf16.msra.mxu2 %v7677_v13  ;;  %v7620_v11 = vld [vmem:[#allocation8 + $0x60] sm:$0xf]  ;;  %v8665_v48 = vld [vmem:[#allocation8 + $0x64] sm:$0xf]  ;;  %v3167_v31 = vadd.f32 %v11167_v57, %v11218_v18  ;;  %v7622_v60 = vld [vmem:[#allocation8 + $0x70] sm:$0xf0] }
 0x72c   :  { %8993 = vtanh.f32 %v11254_v38  ;;  %v3891_v10 = vsel %vm3890_vm7, %v8990_v46, %v3887_v43  ;;  %v7694_v46 = vld [vmem:[#allocation8 + $0xf8] sm:$0xf0]  ;;  %v8675_v43 = vld [vmem:[#allocation8 + $0xac] sm:$0xf0]  ;;  %v7621_v13 = vor.u32 %v8667_v36, %v7620_v11  ;;  %v7628_v20 = vld [vmem:[#allocation8 + $0x68] sm:$0xf] }
 0x72d   :  { %v3896_v27 = vsel %vm3893_vm8, %v3895_v29, %v3891_v10  ;;  %v7697_v47 = vor.u32 %v8682_v14, %v7694_v46  ;;  %v7653_v21 = vor.u32 %v8675_v43, %v7652_v45  ;;  %v7654_v10 = vld [vmem:[#allocation8 + $0xb0] sm:$0xf0]  ;;  %v7660_v29 = vld [vmem:[#allocation8 + $0xa8] sm:$0xf]  ;;  %v8672_v14 = vld [vmem:[#allocation8 + $0x94] sm:$0xf0]  ;;  %v7641_v46 = vor.u32 %v8669_v30, %v7638_v8 }
 0x72e   :  { %v7604_v26 = vld [vmem:[#allocation8 + $0x40] sm:$0xf]  ;;  %v8663_v62 = vld [vmem:[#allocation8 + $0x4c] sm:$0xf0]  ;;  %v8661_v57 = vld [vmem:[#allocation8 + $0x44] sm:$0xf] }
 0x72f   :  { %4457 = vmatpush.bf16.msra.mxu3 %v7697_v47  ;;  %4420 = vmatpush.bf16.msra.mxu0 %v7653_v21  ;;  %v7645_v47 = vor.u32 %v8672_v14, %v7644_v59  ;;  %v7605_v58 = vor.u32 %v8663_v62, %v7604_v26  ;;  %v7606_v9 = vld [vmem:[#allocation8 + $0x50] sm:$0xf0]  ;;  %v8664_v8 = vld [vmem:[#allocation8 + $0x54] sm:$0xf0]  ;;  %v8662_v59 = vld [vmem:[#allocation8 + $0x4c] sm:$0xf] }
 0x730   :  { %v7609_v30 = vor.u32 %v8661_v57, %v7606_v9  ;;  %v8659_v4 = vld [vmem:[#allocation8 + $0x2c] sm:$0xf0]  ;;  %v8657_v36 = vld [vmem:[#allocation8 + $0x24] sm:$0xf]  ;;  %v7574_v26 = vld [vmem:[#allocation8 + $0x10] sm:$0xf0] }
 0x731   :  { %v7580_v62 = vld [vmem:[#allocation8 + $0x8] sm:$0xf]  ;;  %v8656_v57 = vld [vmem:[#allocation8 + $0x14] sm:$0xf0]  ;;  %v7582_v9 = vld [vmem:[#allocation8 + $0x18] sm:$0xf0] }
 0x732   :  { %v8994_v24 = vpop.eup %8993 }
 0x733   :  { %v11257_v6 = vmul.f32 %v8994_v24, %v3896_v27  ;;  %4458 = vmatpush.bf16.msra.mxu3 %v7681_v3  ;;  %v8676_v24 = vld [vmem:[#allocation8 + $0xb4] sm:$0xf0]  ;;  %v7657_v27 = vor.u32 %v8673_v42, %v7654_v10  ;;  %4421 = vmatpush.bf16.msra.mxu0 %v7637_v7  ;;  %v7625_v42 = vor.u32 %v8665_v48, %v7622_v60  ;;  %v8666_v10 = vld [vmem:[#allocation8 + $0x6c] sm:$0xf]  ;;  %v7612_v7 = vld [vmem:[#allocation8 + $0x48] sm:$0xf] }
 0x734   :  { %v8668_v3 = vld [vmem:[#allocation8 + $0x74] sm:$0xf0]  ;;  %v7613_v14 = vor.u32 %v8664_v8, %v7612_v7  ;;  %v7590_v48 = vld [vmem:[#allocation8 + $0x30] sm:$0xf0]  ;;  %v7581_v7 = vor.u32 %v8656_v57, %v7580_v62 }
 0x735   :  { %v3908_v15 = vpack.c.bf16 %v11257_v6, %v11257_v6  ;;  %4433 = vmatpush.bf16.msra.mxu1 %v7657_v27  ;;  %v7629_v21 = vor.u32 %v8668_v3, %v7628_v20  ;;  %v7593_v60 = vor.u32 %v8657_v36, %v7590_v48  ;;  %v8660_v20 = vld [vmem:[#allocation8 + $0x34] sm:$0xf0]  ;;  %v8658_v3 = vld [vmem:[#allocation8 + $0x2c] sm:$0xf] }
 0x737   :  { %4109 = vmatmul.bf16.vlgmr.msrb.gmra.mxu0 %v3908_v15  ;;  %4122 = vmatmul.bf16.vlgmr.msrb.gmra.mxu1 %v3908_v15 }
 0x738   :  { %4135 = vmatmul.bf16.vlgmr.msrb.gmra.mxu2 %v3908_v15  ;;  %4148 = vmatmul.bf16.vlgmr.msrb.gmra.mxu3 %v3908_v15  ;;  %v7661_v15 = vor.u32 %v8676_v24, %v7660_v29  ;;  %v7630_v29 = vld [vmem:[#allocation8 + $0x78] sm:$0xf0] }
 0x739   :  { %4459 = vmatpush.bf16.msra.mxu3 %v7665_v34  ;;  %4434 = vmatpush.bf16.msra.mxu1 %v7641_v46  ;;  %v7614_v46 = vld [vmem:[#allocation8 + $0x58] sm:$0xf0] }
 0x73a   :  { %4446 = vmatpush.bf16.msra.mxu2 %v7661_v15  ;;  %4422 = vmatpush.bf16.msra.mxu0 %v7621_v13  ;;  %v7633_v15 = vor.u32 %v8666_v10, %v7630_v29  ;;  %v7572_v29 = vld [vmem:[#allocation8] sm:$0xf] }
 0x73d   :  { %4460 = vmatpush.bf16.msra.mxu3 %v7649_v39  ;;  %4435 = vmatpush.bf16.msra.mxu1 %v7625_v42  ;;  %v7617_v39 = vor.u32 %v8662_v59, %v7614_v46 }
 0x73e   :  { %4447 = vmatpush.bf16.msra.mxu2 %v7645_v47  ;;  %4423 = vmatpush.bf16.msra.mxu0 %v7605_v58  ;;  %v7588_v47 = vld [vmem:[#allocation8 + $0x20] sm:$0xf]  ;;  %v8654_v58 = vld [vmem:[#allocation8 + $0xc] sm:$0xf] }
 0x73f   :  { %v7589_v11 = vor.u32 %v8659_v4, %v7588_v47 }
 0x741   :  { %4461 = vmatpush.bf16.msra.mxu3 %v7633_v15  ;;  %4436 = vmatpush.bf16.msra.mxu1 %v7609_v30 }
 0x742   :  { %4448 = vmatpush.bf16.msra.mxu2 %v7629_v21  ;;  %4424 = vmatpush.bf16.msra.mxu0 %v7589_v11 }
 0x745   :  { %4462 = vmatpush.bf16.msra.mxu3 %v7617_v39  ;;  %4437 = vmatpush.bf16.msra.mxu1 %v7593_v60  ;;  %v3196_v39 = vadd.f32 %v11169_v61, %v11234_v22 }
 0x746   :  { %4449 = vmatpush.bf16.msra.mxu2 %v7613_v14  ;;  %v7585_v14 = vor.u32 %v8654_v58, %v7582_v9 }
 0x7b4   :  { %v4110_v45 = vpop.f32.mrf.mxu0  ;;  %v4123_v43 = vpop.f32.mrf.mxu1 }
 0x7b5   :  { %v4153_v24 = vadd.f32 %v4110_v45, %v3138_v51  ;;  %v4154_v27 = vadd.f32 %v4123_v43, %v3167_v31  ;;  %v7596_v51 = vld [vmem:[#allocation8 + $0x28] sm:$0xf]  ;;  %v7598_v45 = vld [vmem:[#allocation8 + $0x38] sm:$0xf0] }
 0x7b6   :  { %v7597_v10 = vor.u32 %v8660_v20, %v7596_v51  ;;  %v7601_v5 = vor.u32 %v8658_v3, %v7598_v45 }
 0x7b7   :  { %v7567_v35 = vmul.f32 -1.442695, %v4153_v24  ;;  %v7568_v34 = vmul.f32 -1.442695, %v4154_v27  ;;  %v8655_v24 = vld [vmem:[#allocation8 + $0xc] sm:$0xf0] }
 0x7b8   :  { %v8653_v27 = vld [vmem:[#allocation8 + $0x4] sm:$0xf]  ;;  %v7573_v15 = vor.u32 %v8655_v24, %v7572_v29  ;;  %4450 = vmatpush.bf16.msra.mxu2 %v7597_v10  ;;  %4463 = vmatpush.bf16.msra.mxu3 %v7601_v5 }
 0x7b9   :  { %8995 = vpow2.f32 %v7567_v35 }
 0x7ba   :  { %8997 = vpow2.f32 %v7568_v34  ;;  %v7577_v34 = vor.u32 %v8653_v27, %v7574_v26  ;;  %4425 = vmatpush.bf16.msra.mxu0 %v7573_v15 }
 0x7bb   :  { %v4136_v31 = vpop.f32.mrf.mxu2  ;;  %v4149_v13 = vpop.f32.mrf.mxu3 }
 0x7bc   :  { %v4156_v43 = vadd.f32 %v4149_v13, %v3225_v52  ;;  %v4112_v42 = vpop.f32.mrf.mxu0  ;;  %v4125_v21 = vpop.f32.mrf.mxu1  ;;  %4438 = vmatpush.bf16.msra.mxu1 %v7577_v34  ;;  %4451 = vmatpush.bf16.msra.mxu2 %v7581_v7  ;;  %v4155_v48 = vadd.f32 %v4136_v31, %v3196_v39 }
 0x7bd   :  { %4464 = vmatpush.bf16.msra.mxu3 %v7585_v14 }
 0x7be   :  { %v7569_v35 = vmul.f32 -1.442695, %v4156_v43 }
 0x7bf   :  { %v8996_v30 = vpop.eup %8995 }
 0x7c0   :  { %v8998_v8 = vpop.eup %8997  ;;  %v4160_v59 = vadd.f32 1.0, %v8996_v30  ;;  %8999 = vpow2.f32 %v7569_v35 }
 0x7c1   :  { %v4179_v46 = vadd.f32 1.0, %v8998_v8 }
 0x7c2   :  { %9001 = vrcp.f32 %v4160_v59  ;;  %v4172_v45 = vand.u32 2147483648, %v4160_v59  ;;  %v4170_v21 = vand.u32 2147483647, %v4160_v59  ;;  %vm4166_vm11 = vweird.f32 %v4160_v59 }
 0x7c3   :  { %9003 = vrcp.f32 %v4179_v46  ;;  %v4138_v47 = vpop.f32.mrf.mxu2  ;;  %v4151_v4 = vpop.f32.mrf.mxu3  ;;  %v4191_v43 = vand.u32 2147483648, %v4179_v46  ;;  %v4189_v5 = vand.u32 2147483647, %v4179_v46  ;;  %vm4185_vm12 = vweird.f32 %v4179_v46 }
 0x7c4   :  { %v4173_v31 = vor.u32 1.1754944e-38, %v4172_v45  ;;  %vm4171_vm15 = vcmp.eq.f32.partialorder %v4170_v21, 8.507059e+37  ;;  %v7825_v21 = vld [vmem:[#allocation8 + $0xf8] sm:$0xf0] }
 0x7c5   :  { %v4192_v15 = vor.u32 1.1754944e-38, %v4191_v43  ;;  %vm4190_vm0 = vcmp.eq.f32.partialorder %v4189_v5, 8.507059e+37  ;;  %v7799_v5 = vld [vmem:[#allocation8 + $0xc0] sm:$0xf] }
 0x7c6   :  { %v9000_v52 = vpop.eup %8999 }
 0x7c7   :  { %v4199_v11 = vadd.f32 1.0, %v9000_v52 }
 0x7c8   :  { %v9002_v36 = vpop.eup %9001 }
 0x7c9   :  { %v9004_v51 = vpop.eup %9003  ;;  %v4162_v13 = vmul.f32 %v9002_v36, %v4160_v59  ;;  %9005 = vrcp.f32 %v4199_v11  ;;  %vm4167_vm9 = vweird.f32 %v9002_v36  ;;  %v4211_v14 = vand.u32 2147483648, %v4199_v11 }
 0x7ca   :  { %v4181_v60 = vmul.f32 %v9004_v51, %v4179_v46  ;;  %9007 = vtanh.f32 %v4155_v48  ;;  %vm4186_vm10 = vweird.f32 %v9004_v51  ;;  %vm4168_vm13 = vmor %vm4166_vm11, %vm4167_vm9  ;;  %vm4205_vm2 = vweird.f32 %v4199_v11  ;;  %v7815_v48 = vld [vmem:[#allocation8 + $0xe0] sm:$0xf] }
 0x7cb   :  { %v4163_v20 = vsub.f32 1.0, %v4162_v13  ;;  %vm4187_vm14 = vmor %vm4185_vm12, %vm4186_vm10  ;;  %v4209_v46 = vand.u32 2147483647, %v4199_v11  ;;  %v4212_v4 = vor.u32 1.1754944e-38, %v4211_v14  ;;  %v8713_v13 = vld [vmem:[#allocation8 + $0xe4] sm:$0xf] }
 0x7cc   :  { %v4182_v3 = vsub.f32 1.0, %v4181_v60  ;;  %v7791_v14 = vld [vmem:[#allocation8 + $0xa8] sm:$0xf] }
 0x7cd   :  { %v4164_v42 = vmul.f32 %v9002_v36, %v4163_v20  ;;  %vm4210_vm4 = vcmp.eq.f32.partialorder %v4209_v46, 8.507059e+37  ;;  %v7823_v20 = vld [vmem:[#allocation8 + $0xe8] sm:$0xf]  ;;  %v8708_v46 = vld [vmem:[#allocation8 + $0xb4] sm:$0xf0] }
 0x7ce   :  { %v4183_v10 = vmul.f32 %v9004_v51, %v4182_v3  ;;  %v8716_v3 = vld [vmem:[#allocation8 + $0xf4] sm:$0xf0] }
 0x7cf   :  { %v9006_v29 = vpop.eup %9005  ;;  %v4165_v61 = vadd.f32 %v9002_v36, %v4164_v42  ;;  %v7824_v43 = vor.u32 %v8716_v3, %v7823_v20  ;;  %v8714_v42 = vld [vmem:[#allocation8 + $0xec] sm:$0xf]  ;;  %v7775_v20 = vld [vmem:[#allocation8 + $0x88] sm:$0xf]  ;;  %v8704_v3 = vld [vmem:[#allocation8 + $0x94] sm:$0xf0] }
 0x7d0   :  { %v4184_v24 = vadd.f32 %v9004_v51, %v4183_v10  ;;  %v4201_v27 = vmul.f32 %v9006_v29, %v4199_v11  ;;  %v9008_v62 = vpop.eup %9007  ;;  %vm4206_vm1 = vweird.f32 %v9006_v29  ;;  %v7817_v11 = vld [vmem:[#allocation8 + $0xf0] sm:$0xf0]  ;;  %v7828_v10 = vor.u32 %v8714_v42, %v7825_v21  ;;  %v8702_v42 = vld [vmem:[#allocation8 + $0x8c] sm:$0xf]  ;;  %v7777_v21 = vld [vmem:[#allocation8 + $0x98] sm:$0xf0] }
 0x7d1   :  { %v4169_v26 = vsel %vm4168_vm13, %v9002_v36, %v4165_v61  ;;  %vm4207_vm3 = vmor %vm4205_vm2, %vm4206_vm1  ;;  %v7820_v45 = vor.u32 %v8713_v13, %v7817_v11  ;;  %4761 = vmatpush.bf16.msrb.mxu2 %v7824_v43  ;;  %v8709_v61 = vld [vmem:[#allocation8 + $0xc4] sm:$0xf]  ;;  %v7769_v11 = vld [vmem:[#allocation8 + $0x90] sm:$0xf0]  ;;  %v7776_v43 = vor.u32 %v8704_v3, %v7775_v20 }
 0x7d2   :  { %v4174_v57 = vsel %vm4171_vm15, %v4173_v31, %v4169_v26  ;;  %v4188_v35 = vsel %vm4187_vm14, %v9004_v51, %v4184_v24  ;;  %v4202_v34 = vsub.f32 1.0, %v4201_v27  ;;  %v8715_v51 = vld [vmem:[#allocation8 + $0xec] sm:$0xf0]  ;;  %4774 = vmatpush.bf16.msrb.mxu3 %v7828_v10  ;;  %v7801_v24 = vld [vmem:[#allocation8 + $0xd0] sm:$0xf0]  ;;  %v7780_v10 = vor.u32 %v8702_v42, %v7777_v21 }
 0x7d3   :  { %v4193_v58 = vsel %vm4190_vm0, %v4192_v15, %v4188_v35  ;;  %v4216_v9 = vmul.f32 %v9008_v62, %v4174_v57  ;;  %v7816_v60 = vor.u32 %v8715_v51, %v7815_v48  ;;  %4748 = vmatpush.bf16.msrb.mxu1 %v7820_v45  ;;  %v7807_v27 = vld [vmem:[#allocation8 + $0xc8] sm:$0xf]  ;;  %v8712_v15 = vld [vmem:[#allocation8 + $0xd4] sm:$0xf0]  ;;  %v7804_v26 = vor.u32 %v8709_v61, %v7801_v24  ;;  %v8710_v57 = vld [vmem:[#allocation8 + $0xcc] sm:$0xf] }
 0x7d4   :  { %v4215_v30 = vmul.f32 %v4193_v58, %v11254_v38  ;;  %v4203_v7 = vmul.f32 %v9006_v29, %v4202_v34  ;;  %v7808_v62 = vor.u32 %v8712_v15, %v7807_v27  ;;  %v7809_v35 = vld [vmem:[#allocation8 + $0xd8] sm:$0xf0]  ;;  %v7783_v58 = vld [vmem:[#allocation8 + $0xa0] sm:$0xf]  ;;  %v8703_v51 = vld [vmem:[#allocation8 + $0x8c] sm:$0xf0]  ;;  %v3169_v24 = vadd.f32 %v11175_v25, %v11218_v18 }
 0x7d5   :  { %4735 = vmatpush.bf16.msrb.mxu0 %v7816_v60  ;;  %v7812_v34 = vor.u32 %v8710_v57, %v7809_v35  ;;  %v7767_v48 = vld [vmem:[#allocation8 + $0x80] sm:$0xf]  ;;  %v8701_v13 = vld [vmem:[#allocation8 + $0x84] sm:$0xf]  ;;  %v7753_v15 = vld [vmem:[#allocation8 + $0x70] sm:$0xf0] }
 0x7d6   :  { %v11270_v8 = vadd.f32 %v4216_v9, %v4215_v30  ;;  %v4204_v59 = vadd.f32 %v9006_v29, %v4203_v7  ;;  %4762 = vmatpush.bf16.msrb.mxu2 %v7808_v62  ;;  %v8707_v9 = vld [vmem:[#allocation8 + $0xac] sm:$0xf0]  ;;  %v8705_v30 = vld [vmem:[#allocation8 + $0xa4] sm:$0xf]  ;;  %v7768_v60 = vor.u32 %v8703_v51, %v7767_v48  ;;  %v7772_v45 = vor.u32 %v8701_v13, %v7769_v11  ;;  %v8700_v62 = vld [vmem:[#allocation8 + $0x74] sm:$0xf0] }
 0x7d7   :  { %4749 = vmatpush.bf16.msrb.mxu1 %v7804_v26  ;;  %4775 = vmatpush.bf16.msrb.mxu3 %v7812_v34  ;;  %v7784_v7 = vor.u32 %v8707_v9, %v7783_v58  ;;  %v8697_v61 = vld [vmem:[#allocation8 + $0x64] sm:$0xf]  ;;  %v7759_v26 = vld [vmem:[#allocation8 + $0x68] sm:$0xf]  ;;  %v8698_v9 = vld [vmem:[#allocation8 + $0x6c] sm:$0xf] }
 0x7d8   :  { %9009 = vtanh.f32 %v11270_v8  ;;  %v4208_v47 = vsel %vm4207_vm3, %v9006_v29, %v4204_v59  ;;  %v8711_v29 = vld [vmem:[#allocation8 + $0xcc] sm:$0xf0]  ;;  %v7785_v59 = vld [vmem:[#allocation8 + $0xb0] sm:$0xf0]  ;;  %v7756_v34 = vor.u32 %v8697_v61, %v7753_v15  ;;  %v7760_v58 = vor.u32 %v8700_v62, %v7759_v26  ;;  %v8693_v25 = vld [vmem:[#allocation8 + $0x44] sm:$0xf] }
 0x7d9   :  { %v4213_v39 = vsel %vm4210_vm4, %v4212_v4, %v4208_v47  ;;  %v7800_v31 = vor.u32 %v8711_v29, %v7799_v5  ;;  %v7788_v47 = vor.u32 %v8705_v30, %v7785_v59  ;;  %v7792_v4 = vor.u32 %v8708_v46, %v7791_v14  ;;  %v7751_v5 = vld [vmem:[#allocation8 + $0x60] sm:$0xf]  ;;  %v8699_v29 = vld [vmem:[#allocation8 + $0x6c] sm:$0xf0]  ;;  %v7761_v30 = vld [vmem:[#allocation8 + $0x78] sm:$0xf0] }
 0x7da   :  { %v7752_v27 = vor.u32 %v8699_v29, %v7751_v5  ;;  %v7764_v14 = vor.u32 %v8698_v9, %v7761_v30  ;;  %v8695_v46 = vld [vmem:[#allocation8 + $0x4c] sm:$0xf0]  ;;  %v7743_v48 = vld [vmem:[#allocation8 + $0x48] sm:$0xf]  ;;  %v8696_v51 = vld [vmem:[#allocation8 + $0x54] sm:$0xf0] }
 0x7db   :  { %4736 = vmatpush.bf16.msrb.mxu0 %v7800_v31  ;;  %4750 = vmatpush.bf16.msrb.mxu1 %v7788_v47  ;;  %v3140_v31 = vadd.f32 %v11173_v40, %v11215_v12  ;;  %v7735_v40 = vld [vmem:[#allocation8 + $0x40] sm:$0xf]  ;;  %v8694_v13 = vld [vmem:[#allocation8 + $0x4c] sm:$0xf]  ;;  %v7745_v11 = vld [vmem:[#allocation8 + $0x58] sm:$0xf0] }
 0x7dc   :  { %4763 = vmatpush.bf16.msrb.mxu2 %v7792_v4  ;;  %v7719_v20 = vld [vmem:[#allocation8 + $0x20] sm:$0xf]  ;;  %v8691_v3 = vld [vmem:[#allocation8 + $0x2c] sm:$0xf0]  ;;  %v8689_v21 = vld [vmem:[#allocation8 + $0x24] sm:$0xf] }
 0x7dd   :  { %v7720_v42 = vor.u32 %v8691_v3, %v7719_v20  ;;  %v7727_v5 = vld [vmem:[#allocation8 + $0x28] sm:$0xf]  ;;  %v7729_v15 = vld [vmem:[#allocation8 + $0x38] sm:$0xf0]  ;;  %v8685_v9 = vld [vmem:[#allocation8 + $0x4] sm:$0xf]  ;;  %v3198_v20 = vadd.f32 %v11177_v49, %v11234_v22 }
 0x7de   :  { %v9010_v52 = vpop.eup %9009 }
 0x7df   :  { %v11273_v36 = vmul.f32 %v9010_v52, %v4213_v39  ;;  %v8706_v52 = vld [vmem:[#allocation8 + $0xac] sm:$0xf]  ;;  %v7793_v39 = vld [vmem:[#allocation8 + $0xb8] sm:$0xf0]  ;;  %4737 = vmatpush.bf16.msrb.mxu0 %v7784_v7  ;;  %4751 = vmatpush.bf16.msrb.mxu1 %v7772_v45  ;;  %v3227_v45 = vadd.f32 %v11179_v50, %v11229_v28 }
 0x7e0   :  { %4764 = vmatpush.bf16.msrb.mxu2 %v7776_v43  ;;  %v7748_v43 = vor.u32 %v8694_v13, %v7745_v11 }
 0x7e1   :  { %v4225_v38 = vpack.c.bf16 %v11273_v36, %v11273_v36 }
 0x7e3   :  { %4426 = vmatmul.bf16.vlgmr.msra.gmra.mxu0 %v4225_v38  ;;  %4439 = vmatmul.bf16.vlgmr.msra.gmra.mxu1 %v4225_v38 }
 0x7e4   :  { %4452 = vmatmul.bf16.vlgmr.msra.gmra.mxu2 %v4225_v38  ;;  %4465 = vmatmul.bf16.vlgmr.msra.gmra.mxu3 %v4225_v38  ;;  %v7796_v38 = vor.u32 %v8706_v52, %v7793_v39  ;;  %v7736_v52 = vor.u32 %v8695_v46, %v7735_v40  ;;  %v7737_v39 = vld [vmem:[#allocation8 + $0x50] sm:$0xf0] }
 0x7e5   :  { %4738 = vmatpush.bf16.msrb.mxu0 %v7768_v60  ;;  %4752 = vmatpush.bf16.msrb.mxu1 %v7756_v34  ;;  %v7744_v60 = vor.u32 %v8696_v51, %v7743_v48  ;;  %v7703_v34 = vld [vmem:[#allocation8] sm:$0xf] }
 0x7e6   :  { %4776 = vmatpush.bf16.msrb.mxu3 %v7796_v38  ;;  %4765 = vmatpush.bf16.msrb.mxu2 %v7760_v58  ;;  %v7740_v38 = vor.u32 %v8693_v25, %v7737_v39  ;;  %v8687_v58 = vld [vmem:[#allocation8 + $0xc] sm:$0xf0]  ;;  %v8686_v25 = vld [vmem:[#allocation8 + $0xc] sm:$0xf] }
 0x7e7   :  { %v7704_v30 = vor.u32 %v8687_v58, %v7703_v34 }
 0x7e9   :  { %4739 = vmatpush.bf16.msrb.mxu0 %v7752_v27  ;;  %4753 = vmatpush.bf16.msrb.mxu1 %v7740_v38  ;;  %v8690_v27 = vld [vmem:[#allocation8 + $0x2c] sm:$0xf] }
 0x7ea   :  { %4777 = vmatpush.bf16.msrb.mxu3 %v7780_v10  ;;  %v7721_v10 = vld [vmem:[#allocation8 + $0x30] sm:$0xf0]  ;;  %4766 = vmatpush.bf16.msrb.mxu2 %v7744_v60  ;;  %v7732_v50 = vor.u32 %v8690_v27, %v7729_v15 }
 0x7ed   :  { %4740 = vmatpush.bf16.msrb.mxu0 %v7736_v52 }
 0x7ee   :  { %4778 = vmatpush.bf16.msrb.mxu3 %v7764_v14  ;;  %v8688_v14 = vld [vmem:[#allocation8 + $0x14] sm:$0xf0] }
 0x7f1   :  { %4741 = vmatpush.bf16.msrb.mxu0 %v7720_v42 }
 0x7f2   :  { %4779 = vmatpush.bf16.msrb.mxu3 %v7748_v43 }
 0x7f5   :  { %4742 = vmatpush.bf16.msrb.mxu0 %v7704_v30 }
 0x7f6   :  { %4780 = vmatpush.bf16.msrb.mxu3 %v7732_v50 }
 0x860   :  { %v4427_v57 = vpop.f32.mrf.mxu0  ;;  %v4440_v35 = vpop.f32.mrf.mxu1 }
 0x861   :  { %v4470_v7 = vadd.f32 %v4427_v57, %v3140_v31  ;;  %v4471_v59 = vadd.f32 %v4440_v35, %v3169_v24  ;;  %v7724_v31 = vor.u32 %v8689_v21, %v7721_v10  ;;  %v8692_v24 = vld [vmem:[#allocation8 + $0x34] sm:$0xf0] }
 0x862   :  { %v7728_v35 = vor.u32 %v8692_v24, %v7727_v5 }
 0x863   :  { %v7698_v47 = vmul.f32 -1.442695, %v4470_v7  ;;  %v7699_v4 = vmul.f32 -1.442695, %v4471_v59  ;;  %v7705_v7 = vld [vmem:[#allocation8 + $0x10] sm:$0xf0]  ;;  %4754 = vmatpush.bf16.msrb.mxu1 %v7724_v31 }
 0x864   :  { %v7711_v59 = vld [vmem:[#allocation8 + $0x8] sm:$0xf]  ;;  %v7708_v46 = vor.u32 %v8685_v9, %v7705_v7  ;;  %4767 = vmatpush.bf16.msrb.mxu2 %v7728_v35 }
 0x865   :  { %9011 = vpow2.f32 %v7698_v47  ;;  %v7713_v47 = vld [vmem:[#allocation8 + $0x18] sm:$0xf0]  ;;  %v7712_v52 = vor.u32 %v8688_v14, %v7711_v59 }
 0x866   :  { %9013 = vpow2.f32 %v7699_v4  ;;  %v7716_v48 = vor.u32 %v8686_v25, %v7713_v47 }
 0x867   :  { %v4453_v29 = vpop.f32.mrf.mxu2  ;;  %v4466_v61 = vpop.f32.mrf.mxu3  ;;  %4755 = vmatpush.bf16.msrb.mxu1 %v7708_v46 }
 0x868   :  { %v4473_v26 = vadd.f32 %v4466_v61, %v3227_v45  ;;  %v4429_v62 = vpop.f32.mrf.mxu0  ;;  %v4442_v57 = vpop.f32.mrf.mxu1  ;;  %4768 = vmatpush.bf16.msrb.mxu2 %v7712_v52  ;;  %4781 = vmatpush.bf16.msrb.mxu3 %v7716_v48  ;;  %v4472_v43 = vadd.f32 %v4453_v29, %v3198_v20  ;;  %v8747_v20 = vld [vmem:[#allocation8 + $0xec] sm:$0xf0] }
 0x86a   :  { %v7700_v40 = vmul.f32 -1.442695, %v4473_v26 }
 0x86b   :  { %v9012_v4 = vpop.eup %9011 }
 0x86c   :  { %v9014_v39 = vpop.eup %9013  ;;  %v4477_v38 = vadd.f32 1.0, %v9012_v4  ;;  %9015 = vpow2.f32 %v7700_v40 }
 0x86d   :  { %v4496_v51 = vadd.f32 1.0, %v9014_v39 }
 0x86e   :  { %9017 = vrcp.f32 %v4477_v38  ;;  %v4489_v31 = vand.u32 2147483648, %v4477_v38  ;;  %v4487_v15 = vand.u32 2147483647, %v4477_v38  ;;  %vm4483_vm7 = vweird.f32 %v4477_v38 }
 0x86f   :  { %9019 = vrcp.f32 %v4496_v51  ;;  %v4455_v13 = vpop.f32.mrf.mxu2  ;;  %v4468_v60 = vpop.f32.mrf.mxu3  ;;  %v4508_v24 = vand.u32 2147483648, %v4496_v51  ;;  %v4506_v62 = vand.u32 2147483647, %v4496_v51  ;;  %vm4502_vm8 = vweird.f32 %v4496_v51 }
 0x870   :  { %v4490_v29 = vor.u32 1.1754944e-38, %v4489_v31  ;;  %vm4488_vm11 = vcmp.eq.f32.partialorder %v4487_v15, 8.507059e+37  ;;  %v7956_v31 = vld [vmem:[#allocation8 + $0xf8] sm:$0xf0]  ;;  %v8743_v15 = vld [vmem:[#allocation8 + $0xcc] sm:$0xf0] }
 0x871   :  { %v4509_v34 = vor.u32 1.1754944e-38, %v4508_v24  ;;  %vm4507_vm12 = vcmp.eq.f32.partialorder %v4506_v62, 8.507059e+37 }
 0x872   :  { %v9016_v11 = vpop.eup %9015 }
 0x873   :  { %v4516_v3 = vadd.f32 1.0, %v9016_v11  ;;  %v7946_v11 = vld [vmem:[#allocation8 + $0xe0] sm:$0xf] }
 0x874   :  { %v9018_v45 = vpop.eup %9017 }
 0x875   :  { %v9020_v42 = vpop.eup %9019  ;;  %v4479_v21 = vmul.f32 %v9018_v45, %v4477_v38  ;;  %9021 = vrcp.f32 %v4516_v3  ;;  %vm4484_vm5 = vweird.f32 %v9018_v45  ;;  %v4528_v52 = vand.u32 2147483648, %v4516_v3 }
 0x876   :  { %v4498_v10 = vmul.f32 %v9020_v42, %v4496_v51  ;;  %9023 = vtanh.f32 %v4472_v43  ;;  %vm4503_vm6 = vweird.f32 %v9020_v42  ;;  %vm4485_vm9 = vmor %vm4483_vm7, %vm4484_vm5  ;;  %vm4522_vm14 = vweird.f32 %v4516_v3 }
 0x877   :  { %v4480_v5 = vsub.f32 1.0, %v4479_v21  ;;  %vm4504_vm10 = vmor %vm4502_vm8, %vm4503_vm6  ;;  %v4526_v39 = vand.u32 2147483647, %v4516_v3  ;;  %v4529_v48 = vor.u32 1.1754944e-38, %v4528_v52  ;;  %v7947_v43 = vor.u32 %v8747_v20, %v7946_v11  ;;  %v8748_v21 = vld [vmem:[#allocation8 + $0xf4] sm:$0xf0] }
 0x878   :  { %v4499_v61 = vsub.f32 1.0, %v4498_v10  ;;  %v7900_v20 = vld [vmem:[#allocation8 + $0x90] sm:$0xf0] }
 0x879   :  { %v4481_v27 = vmul.f32 %v9018_v45, %v4480_v5  ;;  %vm4527_vm0 = vcmp.eq.f32.partialorder %v4526_v39, 8.507059e+37  ;;  %5052 = vmatpush.bf16.msra.mxu0 %v7947_v43  ;;  %v8738_v39 = vld [vmem:[#allocation8 + $0xac] sm:$0xf]  ;;  %v8736_v43 = vld [vmem:[#allocation8 + $0x94] sm:$0xf0] }
 0x87a   :  { %v4500_v26 = vmul.f32 %v9020_v42, %v4499_v61  ;;  %v8746_v61 = vld [vmem:[#allocation8 + $0xec] sm:$0xf] }
 0x87b   :  { %v9022_v57 = vpop.eup %9021  ;;  %v4482_v49 = vadd.f32 %v9018_v45, %v4481_v27  ;;  %v7959_v24 = vor.u32 %v8746_v61, %v7956_v31  ;;  %v7930_v27 = vld [vmem:[#allocation8 + $0xc0] sm:$0xf]  ;;  %v8731_v31 = vld [vmem:[#allocation8 + $0x6c] sm:$0xf0] }
 0x87c   :  { %v4501_v35 = vadd.f32 %v9020_v42, %v4500_v26  ;;  %v4518_v50 = vmul.f32 %v9022_v57, %v4516_v3  ;;  %v9024_v9 = vpop.eup %9023  ;;  %vm4523_vm13 = vweird.f32 %v9022_v57  ;;  %v7948_v3 = vld [vmem:[#allocation8 + $0xf0] sm:$0xf0]  ;;  %v8741_v26 = vld [vmem:[#allocation8 + $0xc4] sm:$0xf]  ;;  %v7931_v62 = vor.u32 %v8743_v15, %v7930_v27  ;;  %v7882_v61 = vld [vmem:[#allocation8 + $0x60] sm:$0xf] }
 0x87d   :  { %v4486_v58 = vsel %vm4485_vm9, %v9018_v45, %v4482_v49  ;;  %vm4524_vm15 = vmor %vm4522_vm14, %vm4523_vm13  ;;  %v8745_v45 = vld [vmem:[#allocation8 + $0xe4] sm:$0xf]  ;;  %5091 = vmatpush.bf16.msra.mxu3 %v7959_v24  ;;  %v7938_v49 = vld [vmem:[#allocation8 + $0xc8] sm:$0xf]  ;;  %v3143_v27 = vadd.f32 %v11181_v53, %v11215_v12  ;;  %v3172_v15 = vadd.f32 %v11183_v55, %v11218_v18 }
 0x87e   :  { %v4491_v30 = vsel %vm4488_vm11, %v4490_v29, %v4486_v58  ;;  %v4505_v7 = vsel %vm4504_vm10, %v9020_v42, %v4501_v35  ;;  %v4519_v59 = vsub.f32 1.0, %v4518_v50  ;;  %v7954_v42 = vld [vmem:[#allocation8 + $0xe8] sm:$0xf]  ;;  %v7951_v10 = vor.u32 %v8745_v45, %v7948_v3  ;;  %v8744_v29 = vld [vmem:[#allocation8 + $0xd4] sm:$0xf0]  ;;  %5053 = vmatpush.bf16.msra.mxu0 %v7931_v62 }
 0x87f   :  { %v4510_v14 = vsel %vm4507_vm12, %v4509_v34, %v4505_v7  ;;  %v4533_v40 = vmul.f32 %v9024_v9, %v4491_v30  ;;  %v7955_v5 = vor.u32 %v8748_v21, %v7954_v42  ;;  %v7939_v50 = vor.u32 %v8744_v29, %v7938_v49  ;;  %v8742_v34 = vld [vmem:[#allocation8 + $0xcc] sm:$0xf]  ;;  %v7940_v58 = vld [vmem:[#allocation8 + $0xd8] sm:$0xf0]  ;;  %v7914_v30 = vld [vmem:[#allocation8 + $0xa0] sm:$0xf] }
 0x880   :  { %v4532_v46 = vmul.f32 %v4510_v14, %v11270_v8  ;;  %v4520_v25 = vmul.f32 %v9022_v57, %v4519_v59  ;;  %5065 = vmatpush.bf16.msra.mxu1 %v7951_v10  ;;  %v7943_v9 = vor.u32 %v8742_v34, %v7940_v58  ;;  %v8739_v7 = vld [vmem:[#allocation8 + $0xac] sm:$0xf0]  ;;  %v8737_v59 = vld [vmem:[#allocation8 + $0xa4] sm:$0xf]  ;;  %v7906_v45 = vld [vmem:[#allocation8 + $0x88] sm:$0xf] }
 0x881   :  { %5078 = vmatpush.bf16.msra.mxu2 %v7955_v5  ;;  %v7915_v14 = vor.u32 %v8739_v7, %v7914_v30  ;;  %v7907_v42 = vor.u32 %v8736_v43, %v7906_v45  ;;  %v8734_v21 = vld [vmem:[#allocation8 + $0x8c] sm:$0xf]  ;;  %v7908_v10 = vld [vmem:[#allocation8 + $0x98] sm:$0xf0]  ;;  %v8729_v24 = vld [vmem:[#allocation8 + $0x64] sm:$0xf] }
 0x882   :  { %v11286_v47 = vadd.f32 %v4533_v40, %v4532_v46  ;;  %v4521_v4 = vadd.f32 %v9022_v57, %v4520_v25  ;;  %5092 = vmatpush.bf16.msra.mxu3 %v7943_v9  ;;  %v7916_v40 = vld [vmem:[#allocation8 + $0xb0] sm:$0xf0]  ;;  %v7922_v46 = vld [vmem:[#allocation8 + $0xa8] sm:$0xf]  ;;  %v8740_v25 = vld [vmem:[#allocation8 + $0xb4] sm:$0xf0]  ;;  %v7911_v5 = vor.u32 %v8734_v21, %v7908_v10 }
 0x883   :  { %v7923_v52 = vor.u32 %v8740_v25, %v7922_v46  ;;  %5054 = vmatpush.bf16.msra.mxu0 %v7915_v14  ;;  %v7884_v62 = vld [vmem:[#allocation8 + $0x70] sm:$0xf0]  ;;  %v8732_v49 = vld [vmem:[#allocation8 + $0x74] sm:$0xf0]  ;;  %v8730_v58 = vld [vmem:[#allocation8 + $0x6c] sm:$0xf] }
 0x884   :  { %9025 = vtanh.f32 %v11286_v47  ;;  %v4525_v38 = vsel %vm4524_vm15, %v9022_v57, %v4521_v4  ;;  %v7932_v57 = vld [vmem:[#allocation8 + $0xd0] sm:$0xf0]  ;;  %v7919_v4 = vor.u32 %v8737_v59, %v7916_v40  ;;  %v7892_v9 = vld [vmem:[#allocation8 + $0x78] sm:$0xf0]  ;;  %v7866_v53 = vld [vmem:[#allocation8 + $0x40] sm:$0xf] }
 0x885   :  { %v4530_v13 = vsel %vm4527_vm0, %v4529_v48, %v4525_v38  ;;  %v7935_v35 = vor.u32 %v8741_v26, %v7932_v57  ;;  %5079 = vmatpush.bf16.msra.mxu2 %v7939_v50  ;;  %v7924_v38 = vld [vmem:[#allocation8 + $0xb8] sm:$0xf0]  ;;  %v7883_v26 = vor.u32 %v8731_v31, %v7882_v61  ;;  %v7890_v57 = vld [vmem:[#allocation8 + $0x68] sm:$0xf]  ;;  %v7887_v50 = vor.u32 %v8729_v24, %v7884_v62  ;;  %v8727_v14 = vld [vmem:[#allocation8 + $0x4c] sm:$0xf0] }
 0x886   :  { %v7927_v48 = vor.u32 %v8738_v39, %v7924_v38  ;;  %v7891_v34 = vor.u32 %v8732_v49, %v7890_v57  ;;  %v7895_v59 = vor.u32 %v8730_v58, %v7892_v9  ;;  %v8725_v55 = vld [vmem:[#allocation8 + $0x44] sm:$0xf]  ;;  %v7867_v25 = vor.u32 %v8727_v14, %v7866_v53  ;;  %v7874_v39 = vld [vmem:[#allocation8 + $0x48] sm:$0xf]  ;;  %v8728_v38 = vld [vmem:[#allocation8 + $0x54] sm:$0xf0] }
 0x887   :  { %5066 = vmatpush.bf16.msra.mxu1 %v7935_v35  ;;  %v7858_v21 = vld [vmem:[#allocation8 + $0x28] sm:$0xf]  ;;  %v8724_v31 = vld [vmem:[#allocation8 + $0x34] sm:$0xf0]  ;;  %v8722_v24 = vld [vmem:[#allocation8 + $0x2c] sm:$0xf] }
 0x888   :  { %5093 = vmatpush.bf16.msra.mxu3 %v7927_v48  ;;  %v8726_v48 = vld [vmem:[#allocation8 + $0x4c] sm:$0xf]  ;;  %v7859_v57 = vor.u32 %v8724_v31, %v7858_v21  ;;  %v7834_v49 = vld [vmem:[#allocation8] sm:$0xf]  ;;  %v7842_v58 = vld [vmem:[#allocation8 + $0x8] sm:$0xf] }
 0x889   :  { %5080 = vmatpush.bf16.msra.mxu2 %v7923_v52  ;;  %v8720_v9 = vld [vmem:[#allocation8 + $0x14] sm:$0xf0]  ;;  %v7844_v53 = vld [vmem:[#allocation8 + $0x18] sm:$0xf0] }
 0x88a   :  { %v9026_v51 = vpop.eup %9025 }
 0x88b   :  { %v11289_v60 = vmul.f32 %v9026_v51, %v4530_v13  ;;  %5067 = vmatpush.bf16.msra.mxu1 %v7919_v4  ;;  %v7898_v51 = vld [vmem:[#allocation8 + $0x80] sm:$0xf]  ;;  %v8735_v13 = vld [vmem:[#allocation8 + $0x8c] sm:$0xf0]  ;;  %v7868_v4 = vld [vmem:[#allocation8 + $0x50] sm:$0xf0] }
 0x88c   :  { %v7899_v11 = vor.u32 %v8735_v13, %v7898_v51  ;;  %5094 = vmatpush.bf16.msra.mxu3 %v7911_v5  ;;  %v7871_v52 = vor.u32 %v8725_v55, %v7868_v4  ;;  %v7875_v51 = vor.u32 %v8728_v38, %v7874_v39  ;;  %v7876_v13 = vld [vmem:[#allocation8 + $0x58] sm:$0xf0]  ;;  %v7843_v55 = vor.u32 %v8720_v9, %v7842_v58 }
 0x88d   :  { %v4542_v8 = vpack.c.bf16 %v11289_v60, %v11289_v60  ;;  %5081 = vmatpush.bf16.msra.mxu2 %v7907_v42  ;;  %v7879_v45 = vor.u32 %v8726_v48, %v7876_v13  ;;  %v7852_v42 = vld [vmem:[#allocation8 + $0x30] sm:$0xf0]  ;;  %v3201_v48 = vadd.f32 %v11185_v16, %v11234_v22 }
 0x88e   :  { %5055 = vmatpush.bf16.msra.mxu0 %v7899_v11  ;;  %v8723_v11 = vld [vmem:[#allocation8 + $0x2c] sm:$0xf0] }
 0x88f   :  { %4743 = vmatmul.bf16.vlgmr.msrb.gmra.mxu0 %v4542_v8  ;;  %4756 = vmatmul.bf16.vlgmr.msrb.gmra.mxu1 %v4542_v8 }
 0x890   :  { %4769 = vmatmul.bf16.vlgmr.msrb.gmra.mxu2 %v4542_v8  ;;  %4782 = vmatmul.bf16.vlgmr.msrb.gmra.mxu3 %v4542_v8  ;;  %v8733_v8 = vld [vmem:[#allocation8 + $0x84] sm:$0xf] }
 0x891   :  { %v7903_v3 = vor.u32 %v8733_v8, %v7900_v20  ;;  %5082 = vmatpush.bf16.msra.mxu2 %v7891_v34  ;;  %5095 = vmatpush.bf16.msra.mxu3 %v7895_v59  ;;  %v7850_v8 = vld [vmem:[#allocation8 + $0x20] sm:$0xf]  ;;  %v3230_v20 = vadd.f32 %v11187_v56, %v11229_v28  ;;  %v7836_v34 = vld [vmem:[#allocation8 + $0x10] sm:$0xf0]  ;;  %v8718_v59 = vld [vmem:[#allocation8 + $0xc] sm:$0xf] }
 0x892   :  { %5056 = vmatpush.bf16.msra.mxu0 %v7883_v26  ;;  %v7851_v43 = vor.u32 %v8723_v11, %v7850_v8 }
 0x893   :  { %5068 = vmatpush.bf16.msra.mxu1 %v7903_v3  ;;  %v8721_v3 = vld [vmem:[#allocation8 + $0x24] sm:$0xf] }
 0x894   :  { %v7855_v61 = vor.u32 %v8721_v3, %v7852_v42 }
 0x895   :  { %5083 = vmatpush.bf16.msra.mxu2 %v7875_v51  ;;  %5096 = vmatpush.bf16.msra.mxu3 %v7879_v45 }
 0x896   :  { %5057 = vmatpush.bf16.msra.mxu0 %v7867_v25  ;;  %v7847_v25 = vor.u32 %v8718_v59, %v7844_v53 }
 0x897   :  { %5069 = vmatpush.bf16.msra.mxu1 %v7887_v50 }
 0x899   :  { %5084 = vmatpush.bf16.msra.mxu2 %v7859_v57 }
 0x89a   :  { %5058 = vmatpush.bf16.msra.mxu0 %v7851_v43 }
 0x89b   :  { %5070 = vmatpush.bf16.msra.mxu1 %v7871_v52 }
 0x89d   :  { %5085 = vmatpush.bf16.msra.mxu2 %v7843_v55 }
 0x89f   :  { %5071 = vmatpush.bf16.msra.mxu1 %v7855_v61 }
 0x90c   :  { %v4744_v29 = vpop.f32.mrf.mxu0  ;;  %v4757_v35 = vpop.f32.mrf.mxu1 }
 0x90d   :  { %v4787_v30 = vadd.f32 %v4744_v29, %v3143_v27  ;;  %v4788_v7 = vadd.f32 %v4757_v35, %v3172_v15  ;;  %v7860_v27 = vld [vmem:[#allocation8 + $0x38] sm:$0xf0]  ;;  %v8719_v29 = vld [vmem:[#allocation8 + $0xc] sm:$0xf0]  ;;  %v8717_v35 = vld [vmem:[#allocation8 + $0x4] sm:$0xf] }
 0x90e   :  { %v7863_v56 = vor.u32 %v8722_v24, %v7860_v27  ;;  %v7835_v50 = vor.u32 %v8719_v29, %v7834_v49 }
 0x90f   :  { %v7829_v40 = vmul.f32 -1.442695, %v4787_v30  ;;  %v7830_v46 = vmul.f32 -1.442695, %v4788_v7  ;;  %v7839_v7 = vor.u32 %v8717_v35, %v7836_v34 }
 0x910   :  { %5097 = vmatpush.bf16.msra.mxu3 %v7863_v56  ;;  %5059 = vmatpush.bf16.msra.mxu0 %v7835_v50 }
 0x911   :  { %9027 = vpow2.f32 %v7829_v40  ;;  %5072 = vmatpush.bf16.msra.mxu1 %v7839_v7 }
 0x912   :  { %9029 = vpow2.f32 %v7830_v46 }
 0x913   :  { %v4770_v10 = vpop.f32.mrf.mxu2  ;;  %v4783_v5 = vpop.f32.mrf.mxu3 }
 0x914   :  { %v4790_v15 = vadd.f32 %v4783_v5, %v3230_v20  ;;  %v4746_v26 = vpop.f32.mrf.mxu0  ;;  %v4759_v62 = vpop.f32.mrf.mxu1  ;;  %5098 = vmatpush.bf16.msra.mxu3 %v7847_v25  ;;  %v4789_v8 = vadd.f32 %v4770_v10, %v3201_v48  ;;  %v8079_v48 = vld [vmem:[#allocation8 + $0xf0] sm:$0xf0] }
 0x916   :  { %v7831_v30 = vmul.f32 -1.442695, %v4790_v15 }
 0x917   :  { %v9028_v14 = vpop.eup %9027 }
 0x918   :  { %v9030_v40 = vpop.eup %9029  ;;  %v4794_v46 = vadd.f32 1.0, %v9028_v14  ;;  %9031 = vpow2.f32 %v7831_v30 }
 0x919   :  { %v4813_v4 = vadd.f32 1.0, %v9030_v40 }
 0x91a   :  { %9033 = vrcp.f32 %v4794_v46  ;;  %v4806_v42 = vand.u32 2147483648, %v4794_v46  ;;  %v4804_v61 = vand.u32 2147483647, %v4794_v46  ;;  %vm4800_vm3 = vweird.f32 %v4794_v46 }
 0x91b   :  { %9035 = vrcp.f32 %v4813_v4  ;;  %v4772_v52 = vpop.f32.mrf.mxu2  ;;  %v4785_v39 = vpop.f32.mrf.mxu3  ;;  %v4825_v21 = vand.u32 2147483648, %v4813_v4  ;;  %v4823_v24 = vand.u32 2147483647, %v4813_v4  ;;  %vm4819_vm4 = vweird.f32 %v4813_v4 }
 0x91c   :  { %v4807_v10 = vor.u32 1.1754944e-38, %v4806_v42  ;;  %vm4805_vm7 = vcmp.eq.f32.partialorder %v4804_v61, 8.507059e+37  ;;  %v8779_v52 = vld [vmem:[#allocation8 + $0xec] sm:$0xf0]  ;;  %v8777_v39 = vld [vmem:[#allocation8 + $0xe4] sm:$0xf] }
 0x91d   :  { %v4826_v62 = vor.u32 1.1754944e-38, %v4825_v21  ;;  %vm4824_vm8 = vcmp.eq.f32.partialorder %v4823_v24, 8.507059e+37  ;;  %v8775_v42 = vld [vmem:[#allocation8 + $0xcc] sm:$0xf0]  ;;  %v8773_v21 = vld [vmem:[#allocation8 + $0xc4] sm:$0xf] }
 0x91e   :  { %v9032_v38 = vpop.eup %9031  ;;  %v8063_v61 = vld [vmem:[#allocation8 + $0xd0] sm:$0xf0]  ;;  %v8776_v24 = vld [vmem:[#allocation8 + $0xd4] sm:$0xf0] }
 0x91f   :  { %v4833_v51 = vadd.f32 1.0, %v9032_v38 }
 0x920   :  { %v9034_v13 = vpop.eup %9033 }
 0x921   :  { %v9036_v11 = vpop.eup %9035  ;;  %v4796_v20 = vmul.f32 %v9034_v13, %v4794_v46  ;;  %9037 = vrcp.f32 %v4833_v51  ;;  %vm4801_vm1 = vweird.f32 %v9034_v13  ;;  %v4845_v59 = vand.u32 2147483648, %v4833_v51 }
 0x922   :  { %v4815_v45 = vmul.f32 %v9036_v11, %v4813_v4  ;;  %9039 = vtanh.f32 %v4789_v8  ;;  %vm4820_vm2 = vweird.f32 %v9036_v11  ;;  %vm4802_vm5 = vmor %vm4800_vm3, %vm4801_vm1  ;;  %vm4839_vm10 = vweird.f32 %v4833_v51  ;;  %v8077_v4 = vld [vmem:[#allocation8 + $0xe0] sm:$0xf] }
 0x923   :  { %v4797_v43 = vsub.f32 1.0, %v4796_v20  ;;  %vm4821_vm6 = vmor %vm4819_vm4, %vm4820_vm2  ;;  %v4843_v53 = vand.u32 2147483647, %v4833_v51  ;;  %v4846_v55 = vor.u32 1.1754944e-38, %v4845_v59  ;;  %v8078_v38 = vor.u32 %v8779_v52, %v8077_v4  ;;  %v8778_v20 = vld [vmem:[#allocation8 + $0xec] sm:$0xf] }
 0x924   :  { %v4816_v3 = vsub.f32 1.0, %v4815_v45  ;;  %v8082_v8 = vor.u32 %v8777_v39, %v8079_v48  ;;  %v8087_v45 = vld [vmem:[#allocation8 + $0xf8] sm:$0xf0]  ;;  %v8768_v4 = vld [vmem:[#allocation8 + $0x94] sm:$0xf0] }
 0x925   :  { %v4798_v5 = vmul.f32 %v9034_v13, %v4797_v43  ;;  %vm4844_vm12 = vcmp.eq.f32.partialorder %v4843_v53, 8.507059e+37  ;;  %5369 = vmatpush.bf16.msrb.mxu0 %v8078_v38  ;;  %v8090_v43 = vor.u32 %v8778_v20, %v8087_v45  ;;  %v8029_v53 = vld [vmem:[#allocation8 + $0x80] sm:$0xf]  ;;  %v8766_v38 = vld [vmem:[#allocation8 + $0x8c] sm:$0xf]  ;;  %v3145_v20 = vadd.f32 %v11189_v54, %v11215_v12 }
 0x926   :  { %v4817_v31 = vmul.f32 %v9036_v11, %v4816_v3  ;;  %5382 = vmatpush.bf16.msrb.mxu1 %v8082_v8  ;;  %v8061_v3 = vld [vmem:[#allocation8 + $0xc0] sm:$0xf]  ;;  %v8039_v48 = vld [vmem:[#allocation8 + $0x98] sm:$0xf0]  ;;  %v8763_v8 = vld [vmem:[#allocation8 + $0x6c] sm:$0xf0]  ;;  %v3174_v45 = vadd.f32 %v11191_v17, %v11218_v18 }
 0x927   :  { %v9038_v27 = vpop.eup %9037  ;;  %v4799_v16 = vadd.f32 %v9034_v13, %v4798_v5  ;;  %5408 = vmatpush.bf16.msrb.mxu3 %v8090_v43  ;;  %v8062_v5 = vor.u32 %v8775_v42, %v8061_v3  ;;  %v8015_v3 = vld [vmem:[#allocation8 + $0x70] sm:$0xf0]  ;;  %v8021_v42 = vld [vmem:[#allocation8 + $0x68] sm:$0xf]  ;;  %v7997_v54 = vld [vmem:[#allocation8 + $0x40] sm:$0xf] }
 0x928   :  { %v4818_v15 = vadd.f32 %v9036_v11, %v4817_v31  ;;  %v4835_v26 = vmul.f32 %v9038_v27, %v4833_v51  ;;  %v9040_v56 = vpop.eup %9039  ;;  %vm4840_vm9 = vweird.f32 %v9038_v27  ;;  %v8085_v51 = vld [vmem:[#allocation8 + $0xe8] sm:$0xf]  ;;  %v8757_v17 = vld [vmem:[#allocation8 + $0x44] sm:$0xf] }
 0x929   :  { %v4803_v57 = vsel %vm4802_vm5, %v9034_v13, %v4799_v16  ;;  %vm4841_vm11 = vmor %vm4839_vm10, %vm4840_vm9  ;;  %v8780_v13 = vld [vmem:[#allocation8 + $0xf4] sm:$0xf0]  ;;  %v8069_v31 = vld [vmem:[#allocation8 + $0xc8] sm:$0xf]  ;;  %5370 = vmatpush.bf16.msrb.mxu0 %v8062_v5 }
 0x92a   :  { %v4808_v49 = vsel %vm4805_vm7, %v4807_v10, %v4803_v57  ;;  %v4822_v29 = vsel %vm4821_vm6, %v9036_v11, %v4818_v15  ;;  %v4836_v35 = vsub.f32 1.0, %v4835_v26  ;;  %v8086_v11 = vor.u32 %v8780_v13, %v8085_v51  ;;  %v8774_v10 = vld [vmem:[#allocation8 + $0xcc] sm:$0xf]  ;;  %v8071_v15 = vld [vmem:[#allocation8 + $0xd8] sm:$0xf0] }
 0x92b   :  { %v4827_v50 = vsel %vm4824_vm8, %v4826_v62, %v4822_v29  ;;  %v4850_v34 = vmul.f32 %v9040_v56, %v4808_v49  ;;  %v8070_v16 = vor.u32 %v8776_v24, %v8069_v31  ;;  %v8074_v26 = vor.u32 %v8774_v10, %v8071_v15  ;;  %v8045_v62 = vld [vmem:[#allocation8 + $0xa0] sm:$0xf]  ;;  %v8771_v57 = vld [vmem:[#allocation8 + $0xac] sm:$0xf0]  ;;  %v8769_v56 = vld [vmem:[#allocation8 + $0xa4] sm:$0xf] }
 0x92c   :  { %v4849_v58 = vmul.f32 %v4827_v50, %v11286_v47  ;;  %v4837_v9 = vmul.f32 %v9038_v27, %v4836_v35  ;;  %5395 = vmatpush.bf16.msrb.mxu2 %v8086_v11  ;;  %v8046_v49 = vor.u32 %v8771_v57, %v8045_v62  ;;  %v8047_v29 = vld [vmem:[#allocation8 + $0xb0] sm:$0xf0]  ;;  %v8053_v35 = vld [vmem:[#allocation8 + $0xa8] sm:$0xf]  ;;  %v8772_v50 = vld [vmem:[#allocation8 + $0xb4] sm:$0xf0]  ;;  %v8042_v51 = vor.u32 %v8766_v38, %v8039_v48 }
 0x92d   :  { %5409 = vmatpush.bf16.msrb.mxu3 %v8074_v26  ;;  %v8013_v13 = vld [vmem:[#allocation8 + $0x60] sm:$0xf]  ;;  %v8761_v11 = vld [vmem:[#allocation8 + $0x64] sm:$0xf]  ;;  %v8759_v62 = vld [vmem:[#allocation8 + $0x4c] sm:$0xf0] }
 0x92e   :  { %v11302_v30 = vadd.f32 %v4850_v34, %v4849_v58  ;;  %v4838_v7 = vadd.f32 %v9038_v27, %v4837_v9  ;;  %v8050_v34 = vor.u32 %v8769_v56, %v8047_v29  ;;  %v8054_v58 = vor.u32 %v8772_v50, %v8053_v35  ;;  %v8770_v9 = vld [vmem:[#allocation8 + $0xac] sm:$0xf]  ;;  %5371 = vmatpush.bf16.msrb.mxu0 %v8046_v49  ;;  %v7999_v29 = vld [vmem:[#allocation8 + $0x50] sm:$0xf0]  ;;  %v8005_v50 = vld [vmem:[#allocation8 + $0x48] sm:$0xf] }
 0x92f   :  { %v8014_v43 = vor.u32 %v8763_v8, %v8013_v13  ;;  %v8018_v31 = vor.u32 %v8761_v11, %v8015_v3  ;;  %v7998_v49 = vor.u32 %v8759_v62, %v7997_v54  ;;  %v8002_v35 = vor.u32 %v8757_v17, %v7999_v29  ;;  %v8756_v48 = vld [vmem:[#allocation8 + $0x34] sm:$0xf0]  ;;  %v7991_v13 = vld [vmem:[#allocation8 + $0x38] sm:$0xf0]  ;;  %v8751_v3 = vld [vmem:[#allocation8 + $0xc] sm:$0xf0] }
 0x930   :  { %9041 = vtanh.f32 %v11302_v30  ;;  %v4842_v14 = vsel %vm4841_vm11, %v9038_v27, %v4838_v7  ;;  %v8066_v27 = vor.u32 %v8773_v21, %v8063_v61  ;;  %5396 = vmatpush.bf16.msrb.mxu2 %v8070_v16  ;;  %v8055_v7 = vld [vmem:[#allocation8 + $0xb8] sm:$0xf0]  ;;  %v8764_v21 = vld [vmem:[#allocation8 + $0x74] sm:$0xf0] }
 0x931   :  { %v4847_v46 = vsel %vm4844_vm12, %v4846_v55, %v4842_v14  ;;  %v8058_v59 = vor.u32 %v8770_v9, %v8055_v7  ;;  %v8767_v14 = vld [vmem:[#allocation8 + $0x8c] sm:$0xf0]  ;;  %v8765_v55 = vld [vmem:[#allocation8 + $0x84] sm:$0xf]  ;;  %v8022_v24 = vor.u32 %v8764_v21, %v8021_v42  ;;  %v8023_v16 = vld [vmem:[#allocation8 + $0x78] sm:$0xf0] }
 0x932   :  { %5383 = vmatpush.bf16.msrb.mxu1 %v8066_v27  ;;  %v8762_v27 = vld [vmem:[#allocation8 + $0x6c] sm:$0xf]  ;;  %v8007_v7 = vld [vmem:[#allocation8 + $0x58] sm:$0xf0]  ;;  %v8749_v42 = vld [vmem:[#allocation8 + $0x4] sm:$0xf] }
 0x933   :  { %5410 = vmatpush.bf16.msrb.mxu3 %v8058_v59  ;;  %v8026_v26 = vor.u32 %v8762_v27, %v8023_v16  ;;  %v7981_v59 = vld [vmem:[#allocation8 + $0x20] sm:$0xf]  ;;  %v8750_v16 = vld [vmem:[#allocation8 + $0xc] sm:$0xf] }
 0x934   :  { %5397 = vmatpush.bf16.msrb.mxu2 %v8054_v58  ;;  %v8758_v58 = vld [vmem:[#allocation8 + $0x4c] sm:$0xf] }
 0x936   :  { %v9042_v40 = vpop.eup %9041  ;;  %5384 = vmatpush.bf16.msrb.mxu1 %v8050_v34  ;;  %v8760_v34 = vld [vmem:[#allocation8 + $0x54] sm:$0xf0] }
 0x937   :  { %v11305_v25 = vmul.f32 %v9042_v40, %v4847_v46  ;;  %v8030_v40 = vor.u32 %v8767_v14, %v8029_v53  ;;  %v8031_v46 = vld [vmem:[#allocation8 + $0x90] sm:$0xf0]  ;;  %5411 = vmatpush.bf16.msrb.mxu3 %v8042_v51  ;;  %v8006_v9 = vor.u32 %v8760_v34, %v8005_v50  ;;  %v8755_v53 = vld [vmem:[#allocation8 + $0x2c] sm:$0xf0]  ;;  %v3232_v14 = vadd.f32 %v11195_v0, %v11229_v28  ;;  %v8754_v51 = vld [vmem:[#allocation8 + $0x2c] sm:$0xf] }
 0x938   :  { %v8034_v52 = vor.u32 %v8765_v55, %v8031_v46  ;;  %v8010_v55 = vor.u32 %v8758_v58, %v8007_v7  ;;  %v8753_v46 = vld [vmem:[#allocation8 + $0x24] sm:$0xf]  ;;  %v7994_v0 = vor.u32 %v8754_v51, %v7991_v13 }
 0x939   :  { %v4859_v47 = vpack.c.bf16 %v11305_v25, %v11305_v25  ;;  %5372 = vmatpush.bf16.msrb.mxu0 %v8030_v40  ;;  %v7982_v40 = vor.u32 %v8755_v53, %v7981_v59 }
 0x93a   :  { %5385 = vmatpush.bf16.msrb.mxu1 %v8034_v52 }
 0x93b   :  { %5060 = vmatmul.bf16.vlgmr.msra.gmra.mxu0 %v4859_v47  ;;  %5073 = vmatmul.bf16.vlgmr.msra.gmra.mxu1 %v4859_v47 }
 0x93c   :  { %5086 = vmatmul.bf16.vlgmr.msra.gmra.mxu2 %v4859_v47  ;;  %5099 = vmatmul.bf16.vlgmr.msra.gmra.mxu3 %v4859_v47  ;;  %v8037_v47 = vld [vmem:[#allocation8 + $0x88] sm:$0xf] }
 0x93d   :  { %v8038_v39 = vor.u32 %v8768_v4, %v8037_v47  ;;  %5373 = vmatpush.bf16.msrb.mxu0 %v8014_v43  ;;  %5412 = vmatpush.bf16.msrb.mxu3 %v8026_v26  ;;  %v7983_v47 = vld [vmem:[#allocation8 + $0x30] sm:$0xf0]  ;;  %v7989_v4 = vld [vmem:[#allocation8 + $0x28] sm:$0xf]  ;;  %v7965_v43 = vld [vmem:[#allocation8] sm:$0xf] }
 0x93e   :  { %5386 = vmatpush.bf16.msrb.mxu1 %v8018_v31  ;;  %v7986_v38 = vor.u32 %v8753_v46, %v7983_v47  ;;  %v7966_v21 = vor.u32 %v8751_v3, %v7965_v43  ;;  %v8752_v31 = vld [vmem:[#allocation8 + $0x14] sm:$0xf0] }
 0x93f   :  { %5398 = vmatpush.bf16.msrb.mxu2 %v8038_v39 }
 0x941   :  { %5374 = vmatpush.bf16.msrb.mxu0 %v7998_v49  ;;  %5413 = vmatpush.bf16.msrb.mxu3 %v8010_v55 }
 0x942   :  { %5387 = vmatpush.bf16.msrb.mxu1 %v8002_v35  ;;  %v3203_v35 = vadd.f32 %v11193_v63, %v11234_v22 }
 0x943   :  { %5399 = vmatpush.bf16.msrb.mxu2 %v8022_v24 }
 0x945   :  { %5375 = vmatpush.bf16.msrb.mxu0 %v7982_v40  ;;  %5414 = vmatpush.bf16.msrb.mxu3 %v7994_v0 }
 0x946   :  { %5388 = vmatpush.bf16.msrb.mxu1 %v7986_v38 }
 0x947   :  { %5400 = vmatpush.bf16.msrb.mxu2 %v8006_v9 }
 0x949   :  { %5376 = vmatpush.bf16.msrb.mxu0 %v7966_v21 }
 0x9b8   :  { %v5061_v5 = vpop.f32.mrf.mxu0  ;;  %v5074_v61 = vpop.f32.mrf.mxu1 }
 0x9b9   :  { %v5104_v10 = vadd.f32 %v5061_v5, %v3145_v20  ;;  %v5105_v15 = vadd.f32 %v5074_v61, %v3174_v45  ;;  %v7990_v45 = vor.u32 %v8756_v48, %v7989_v4  ;;  %v7967_v5 = vld [vmem:[#allocation8 + $0x10] sm:$0xf0]  ;;  %v7973_v61 = vld [vmem:[#allocation8 + $0x8] sm:$0xf] }
 0x9ba   :  { %v7970_v27 = vor.u32 %v8749_v42, %v7967_v5  ;;  %v7974_v26 = vor.u32 %v8752_v31, %v7973_v61 }
 0x9bb   :  { %v7960_v57 = vmul.f32 -1.442695, %v5104_v10  ;;  %v7961_v56 = vmul.f32 -1.442695, %v5105_v15  ;;  %v7975_v10 = vld [vmem:[#allocation8 + $0x18] sm:$0xf0]  ;;  %5401 = vmatpush.bf16.msrb.mxu2 %v7990_v45 }
 0x9bc   :  { %v7978_v17 = vor.u32 %v8750_v16, %v7975_v10  ;;  %5389 = vmatpush.bf16.msrb.mxu1 %v7970_v27 }
 0x9bd   :  { %9043 = vpow2.f32 %v7960_v57 }
 0x9be   :  { %9045 = vpow2.f32 %v7961_v56  ;;  %5415 = vmatpush.bf16.msrb.mxu3 %v7978_v17 }
 0x9bf   :  { %v5087_v52 = vpop.f32.mrf.mxu2  ;;  %v5100_v39 = vpop.f32.mrf.mxu3  ;;  %5402 = vmatpush.bf16.msrb.mxu2 %v7974_v26 }
 0x9c0   :  { %v5107_v8 = vadd.f32 %v5100_v39, %v3232_v14  ;;  %v5063_v11 = vpop.f32.mrf.mxu0  ;;  %v5076_v20 = vpop.f32.mrf.mxu1  ;;  %v5106_v58 = vadd.f32 %v5087_v52, %v3203_v35  ;;  %v8803_v35 = vld [vmem:[#allocation8 + $0xac] sm:$0xf0] }
 0x9c2   :  { %v7962_v24 = vmul.f32 -1.442695, %v5107_v8 }
 0x9c3   :  { %v9044_v15 = vpop.eup %9043 }
 0x9c4   :  { %v9046_v54 = vpop.eup %9045  ;;  %v5111_v62 = vadd.f32 1.0, %v9044_v15  ;;  %9047 = vpow2.f32 %v7962_v24 }
 0x9c5   :  { %v5130_v57 = vadd.f32 1.0, %v9046_v54  ;;  %v8208_v54 = vld [vmem:[#allocation8 + $0xe0] sm:$0xf] }
 0x9c6   :  { %9049 = vrcp.f32 %v5111_v62  ;;  %v5123_v55 = vand.u32 2147483648, %v5111_v62  ;;  %v5121_v47 = vand.u32 2147483647, %v5111_v62  ;;  %vm5117_vm15 = vweird.f32 %v5111_v62 }
 0x9c7   :  { %9051 = vrcp.f32 %v5130_v57  ;;  %v5089_v56 = vpop.f32.mrf.mxu2  ;;  %v5102_v49 = vpop.f32.mrf.mxu3  ;;  %v5142_v40 = vand.u32 2147483648, %v5130_v57  ;;  %v5140_v39 = vand.u32 2147483647, %v5130_v57  ;;  %vm5136_vm0 = vweird.f32 %v5130_v57 }
 0x9c8   :  { %v5124_v52 = vor.u32 1.1754944e-38, %v5123_v55  ;;  %vm5122_vm3 = vcmp.eq.f32.partialorder %v5121_v47, 8.507059e+37  ;;  %v8807_v56 = vld [vmem:[#allocation8 + $0xcc] sm:$0xf0]  ;;  %v8812_v55 = vld [vmem:[#allocation8 + $0xf4] sm:$0xf0] }
 0x9c9   :  { %v5143_v13 = vor.u32 1.1754944e-38, %v5142_v40  ;;  %vm5141_vm4 = vcmp.eq.f32.partialorder %v5140_v39, 8.507059e+37  ;;  %v8810_v40 = vld [vmem:[#allocation8 + $0xec] sm:$0xf]  ;;  %v8144_v39 = vld [vmem:[#allocation8 + $0x60] sm:$0xf] }
 0x9ca   :  { %v9048_v29 = vpop.eup %9047 }
 0x9cb   :  { %v5150_v50 = vadd.f32 1.0, %v9048_v29  ;;  %v8176_v29 = vld [vmem:[#allocation8 + $0xa0] sm:$0xf] }
 0x9cc   :  { %v9050_v34 = vpop.eup %9049 }
 0x9cd   :  { %v9052_v9 = vpop.eup %9051  ;;  %v5113_v7 = vmul.f32 %v9050_v34, %v5111_v62  ;;  %9053 = vrcp.f32 %v5150_v50  ;;  %vm5118_vm13 = vweird.f32 %v9050_v34  ;;  %v5162_v31 = vand.u32 2147483648, %v5150_v50  ;;  %v8811_v62 = vld [vmem:[#allocation8 + $0xec] sm:$0xf0] }
 0x9ce   :  { %v5132_v59 = vmul.f32 %v9052_v9, %v5130_v57  ;;  %9055 = vtanh.f32 %v5106_v58  ;;  %vm5137_vm14 = vweird.f32 %v9052_v9  ;;  %vm5119_vm1 = vmor %vm5117_vm15, %vm5118_vm13  ;;  %vm5156_vm6 = vweird.f32 %v5150_v50  ;;  %v8192_v57 = vld [vmem:[#allocation8 + $0xc0] sm:$0xf]  ;;  %v8799_v58 = vld [vmem:[#allocation8 + $0x8c] sm:$0xf0] }
 0x9cf   :  { %v5114_v53 = vsub.f32 1.0, %v5113_v7  ;;  %vm5138_vm2 = vmor %vm5136_vm0, %vm5137_vm14  ;;  %v5160_v24 = vand.u32 2147483647, %v5150_v50  ;;  %v5163_v16 = vor.u32 1.1754944e-38, %v5162_v31  ;;  %v8209_v17 = vor.u32 %v8811_v62, %v8208_v54  ;;  %v8809_v7 = vld [vmem:[#allocation8 + $0xe4] sm:$0xf] }
 0x9d0   :  { %v5133_v14 = vsub.f32 1.0, %v5132_v59  ;;  %v8193_v49 = vor.u32 %v8807_v56, %v8192_v57  ;;  %v8210_v59 = vld [vmem:[#allocation8 + $0xf0] sm:$0xf0]  ;;  %v8184_v31 = vld [vmem:[#allocation8 + $0xa8] sm:$0xf] }
 0x9d1   :  { %v5115_v46 = vmul.f32 %v9050_v34, %v5114_v53  ;;  %vm5161_vm8 = vcmp.eq.f32.partialorder %v5160_v24, 8.507059e+37  ;;  %5686 = vmatpush.bf16.msra.mxu0 %v8209_v17  ;;  %v8216_v53 = vld [vmem:[#allocation8 + $0xe8] sm:$0xf]  ;;  %v8112_v54 = vld [vmem:[#allocation8 + $0x20] sm:$0xf] }
 0x9d2   :  { %v5134_v4 = vmul.f32 %v9052_v9, %v5133_v14  ;;  %v8213_v14 = vor.u32 %v8809_v7, %v8210_v59  ;;  %v8217_v47 = vor.u32 %v8812_v55, %v8216_v53  ;;  %v8787_v62 = vld [vmem:[#allocation8 + $0x2c] sm:$0xf0]  ;;  %v8797_v57 = vld [vmem:[#allocation8 + $0x84] sm:$0xf]  ;;  %v8162_v56 = vld [vmem:[#allocation8 + $0x90] sm:$0xf0] }
 0x9d3   :  { %v9054_v38 = vpop.eup %9053  ;;  %v5116_v63 = vadd.f32 %v9050_v34, %v5115_v46  ;;  %v8218_v46 = vld [vmem:[#allocation8 + $0xf8] sm:$0xf0]  ;;  %v8113_v17 = vor.u32 %v8787_v62, %v8112_v54  ;;  %v8096_v7 = vld [vmem:[#allocation8] sm:$0xf]  ;;  %v8783_v59 = vld [vmem:[#allocation8 + $0xc] sm:$0xf0] }
 0x9d4   :  { %v5135_v48 = vadd.f32 %v9052_v9, %v5134_v4  ;;  %v5152_v51 = vmul.f32 %v9054_v38, %v5150_v50  ;;  %v9056_v11 = vpop.eup %9055  ;;  %vm5157_vm5 = vweird.f32 %v9054_v38  ;;  %v8177_v50 = vor.u32 %v8803_v35, %v8176_v29  ;;  %5699 = vmatpush.bf16.msra.mxu1 %v8213_v14  ;;  %5712 = vmatpush.bf16.msra.mxu2 %v8217_v47  ;;  %v8800_v35 = vld [vmem:[#allocation8 + $0x94] sm:$0xf0]  ;;  %v8793_v14 = vld [vmem:[#allocation8 + $0x64] sm:$0xf]  ;;  %v8146_v55 = vld [vmem:[#allocation8 + $0x70] sm:$0xf0] }
 0x9d5   :  { %v5120_v8 = vsel %vm5119_vm1, %v9050_v34, %v5116_v63  ;;  %vm5158_vm7 = vmor %vm5156_vm6, %vm5157_vm5  ;;  %5687 = vmatpush.bf16.msra.mxu0 %v8193_v49  ;;  %v8160_v34 = vld [vmem:[#allocation8 + $0x80] sm:$0xf]  ;;  %v8221_v4 = vor.u32 %v8810_v40, %v8218_v46  ;;  %v8168_v49 = vld [vmem:[#allocation8 + $0x88] sm:$0xf]  ;;  %v8165_v29 = vor.u32 %v8797_v57, %v8162_v56  ;;  %v8097_v53 = vor.u32 %v8783_v59, %v8096_v7 }
 0x9d6   :  { %v5125_v20 = vsel %vm5122_vm3, %v5124_v52, %v5120_v8  ;;  %v5139_v45 = vsel %vm5138_vm2, %v9052_v9, %v5135_v48  ;;  %v5153_v0 = vsub.f32 1.0, %v5152_v51  ;;  %v8161_v9 = vor.u32 %v8799_v58, %v8160_v34  ;;  %v8805_v52 = vld [vmem:[#allocation8 + $0xc4] sm:$0xf]  ;;  %v8194_v48 = vld [vmem:[#allocation8 + $0xd0] sm:$0xf0] }
 0x9d7   :  { %v5144_v43 = vsel %vm5141_vm4, %v5143_v13, %v5139_v45  ;;  %v5167_v3 = vmul.f32 %v9056_v11, %v5125_v20  ;;  %5725 = vmatpush.bf16.msra.mxu3 %v8221_v4  ;;  %v8200_v51 = vld [vmem:[#allocation8 + $0xc8] sm:$0xf]  ;;  %v8197_v13 = vor.u32 %v8805_v52, %v8194_v48  ;;  %v8808_v8 = vld [vmem:[#allocation8 + $0xd4] sm:$0xf0]  ;;  %v8806_v11 = vld [vmem:[#allocation8 + $0xcc] sm:$0xf]  ;;  %v8169_v58 = vor.u32 %v8800_v35, %v8168_v49 }
 0x9d8   :  { %v5166_v42 = vmul.f32 %v5144_v43, %v11302_v30  ;;  %v5154_v21 = vmul.f32 %v9054_v38, %v5153_v0  ;;  %v8202_v20 = vld [vmem:[#allocation8 + $0xd8] sm:$0xf0]  ;;  %v8201_v45 = vor.u32 %v8808_v8, %v8200_v51  ;;  %v8128_v43 = vld [vmem:[#allocation8 + $0x40] sm:$0xf]  ;;  %v8152_v40 = vld [vmem:[#allocation8 + $0x68] sm:$0xf]  ;;  %v3148_v46 = vadd.f32 %v11197_v19, %v11215_v12 }
 0x9d9   :  { %5688 = vmatpush.bf16.msra.mxu0 %v8177_v50  ;;  %v8205_v0 = vor.u32 %v8806_v11, %v8202_v20  ;;  %5700 = vmatpush.bf16.msra.mxu1 %v8197_v13  ;;  %v8798_v50 = vld [vmem:[#allocation8 + $0x8c] sm:$0xf]  ;;  %v8170_v34 = vld [vmem:[#allocation8 + $0x98] sm:$0xf0]  ;;  %v3177_v47 = vadd.f32 %v11199_v37, %v11218_v18  ;;  %v8149_v4 = vor.u32 %v8793_v14, %v8146_v55  ;;  %v8130_v19 = vld [vmem:[#allocation8 + $0x50] sm:$0xf0] }
 0x9da   :  { %v11318_v5 = vadd.f32 %v5167_v3, %v5166_v42  ;;  %v5155_v61 = vadd.f32 %v9054_v38, %v5154_v21  ;;  %v8791_v3 = vld [vmem:[#allocation8 + $0x4c] sm:$0xf0]  ;;  %5713 = vmatpush.bf16.msra.mxu2 %v8201_v45  ;;  %v8801_v21 = vld [vmem:[#allocation8 + $0xa4] sm:$0xf]  ;;  %v8820_v8 = vld [vmem:[#allocation9 + $0x38] sm:$0xff] }
 0x9db   :  { %5726 = vmatpush.bf16.msra.mxu3 %v8205_v0  ;;  %v8129_v42 = vor.u32 %v8791_v3, %v8128_v43  ;;  %v8789_v45 = vld [vmem:[#allocation8 + $0x44] sm:$0xf]  ;;  %v8136_v0 = vld [vmem:[#allocation8 + $0x48] sm:$0xf]  ;;  %v8788_v62 = vld [vmem:[#allocation8 + $0x34] sm:$0xf0] }
 0x9dc   :  { %9057 = vtanh.f32 %v11318_v5  ;;  %v5159_v27 = vsel %vm5158_vm7, %v9054_v38, %v5155_v61  ;;  %v8795_v38 = vld [vmem:[#allocation8 + $0x6c] sm:$0xf0]  ;;  %v8178_v61 = vld [vmem:[#allocation8 + $0xb0] sm:$0xf0]  ;;  %v8133_v3 = vor.u32 %v8789_v45, %v8130_v19  ;;  %v8122_v57 = vld [vmem:[#allocation8 + $0x38] sm:$0xf0] }
 0x9dd   :  { %v5164_v15 = vsel %vm5161_vm8, %v5163_v16, %v5159_v27  ;;  %5689 = vmatpush.bf16.msra.mxu0 %v8161_v9  ;;  %v8145_v63 = vor.u32 %v8795_v38, %v8144_v39  ;;  %v8181_v24 = vor.u32 %v8801_v21, %v8178_v61  ;;  %v8804_v27 = vld [vmem:[#allocation8 + $0xb4] sm:$0xf0]  ;;  %v8802_v16 = vld [vmem:[#allocation8 + $0xac] sm:$0xf]  ;;  %v8173_v9 = vor.u32 %v8798_v50, %v8170_v34  ;;  %v8781_v34 = vld [vmem:[#allocation8 + $0x4] sm:$0xf] }
 0x9de   :  { %v8796_v39 = vld [vmem:[#allocation8 + $0x74] sm:$0xf0]  ;;  %v8794_v38 = vld [vmem:[#allocation8 + $0x6c] sm:$0xf]  ;;  %v8815_v19 = vld [vmem:[#allocation9 + $0x10] sm:$0xff] }
 0x9df   :  { %5701 = vmatpush.bf16.msra.mxu1 %v8181_v24  ;;  %v8153_v51 = vor.u32 %v8796_v39, %v8152_v40  ;;  %v8790_v61 = vld [vmem:[#allocation8 + $0x4c] sm:$0xf]  ;;  %v8819_v24 = vld [vmem:[#allocation9 + $0x30] sm:$0xff]  ;;  %v8106_v40 = vld [vmem:[#allocation8 + $0x18] sm:$0xf0] }
 0x9e0   :  { %v8818_v50 = vld [vmem:[#allocation9 + $0x28] sm:$0xff] }
 0x9e1   :  { %5690 = vmatpush.bf16.msra.mxu0 %v8145_v63  ;;  %v8154_v63 = vld [vmem:[#allocation8 + $0x78] sm:$0xf0]  ;;  %v8782_v14 = vld [vmem:[#allocation8 + $0xc] sm:$0xf] }
 0x9e2   :  { %v9058_v10 = vpop.eup %9057  ;;  %v8157_v13 = vor.u32 %v8794_v38, %v8154_v63  ;;  %v8109_v39 = vor.u32 %v8782_v14, %v8106_v40  ;;  %v8817_v38 = vld [vmem:[#allocation9 + $0x20] sm:$0xff] }
 0x9e3   :  { %v11321_v26 = vmul.f32 %v9058_v10, %v5164_v15  ;;  %v8186_v10 = vld [vmem:[#allocation8 + $0xb8] sm:$0xf0]  ;;  %v8185_v15 = vor.u32 %v8804_v27, %v8184_v31  ;;  %5702 = vmatpush.bf16.msra.mxu1 %v8165_v29 }
 0x9e4   :  { %v8138_v31 = vld [vmem:[#allocation8 + $0x58] sm:$0xf0] }
 0x9e5   :  { %v5176_v30 = vpack.c.bf16 %v11321_v26, %v11321_v26  ;;  %5691 = vmatpush.bf16.msra.mxu0 %v8129_v42  ;;  %5714 = vmatpush.bf16.msra.mxu2 %v8185_v15  ;;  %v8792_v42 = vld [vmem:[#allocation8 + $0x54] sm:$0xf0]  ;;  %v8141_v27 = vor.u32 %v8790_v61, %v8138_v31  ;;  %v8120_v15 = vld [vmem:[#allocation8 + $0x28] sm:$0xf] }
 0x9e6   :  { %v8137_v21 = vor.u32 %v8792_v42, %v8136_v0  ;;  %v8121_v29 = vor.u32 %v8788_v62, %v8120_v15  ;;  %v8814_v61 = vld [vmem:[#allocation9 + $0x8] sm:$0xff]  ;;  %v8813_v62 = vld [vmem:[#allocation9] sm:$0xff] }
 0x9e7   :  { %5377 = vmatmul.bf16.vlgmr.msrb.gmra.mxu0 %v5176_v30  ;;  %5390 = vmatmul.bf16.vlgmr.msrb.gmra.mxu1 %v5176_v30 }
 0x9e8   :  { %5403 = vmatmul.bf16.vlgmr.msrb.gmra.mxu2 %v5176_v30  ;;  %5416 = vmatmul.bf16.vlgmr.msrb.gmra.mxu3 %v5176_v30  ;;  %v8189_v30 = vor.u32 %v8802_v16, %v8186_v10  ;;  %v8785_v16 = vld [vmem:[#allocation8 + $0x24] sm:$0xf]  ;;  %v8114_v10 = vld [vmem:[#allocation8 + $0x30] sm:$0xf0] }
 0x9e9   :  { %5692 = vmatpush.bf16.msra.mxu0 %v8113_v17  ;;  %5715 = vmatpush.bf16.msra.mxu2 %v8169_v58  ;;  %v8117_v54 = vor.u32 %v8785_v16, %v8114_v10  ;;  %v8786_v17 = vld [vmem:[#allocation8 + $0x2c] sm:$0xf]  ;;  %v8098_v58 = vld [vmem:[#allocation8 + $0x10] sm:$0xf0] }
 0x9ea   :  { %5727 = vmatpush.bf16.msra.mxu3 %v8189_v30  ;;  %5703 = vmatpush.bf16.msra.mxu1 %v8149_v4  ;;  %v3235_v30 = vadd.f32 %v11208_v2, %v11229_v28  ;;  %v8125_v35 = vor.u32 %v8786_v17, %v8122_v57  ;;  %v8784_v2 = vld [vmem:[#allocation8 + $0x14] sm:$0xf0]  ;;  %v8101_v55 = vor.u32 %v8781_v34, %v8098_v58 }
 0x9ed   :  { %5693 = vmatpush.bf16.msra.mxu0 %v8097_v53  ;;  %5716 = vmatpush.bf16.msra.mxu2 %v8153_v51  ;;  %v8104_v53 = vld [vmem:[#allocation8 + $0x8] sm:$0xf] }
 0x9ee   :  { %5728 = vmatpush.bf16.msra.mxu3 %v8173_v9  ;;  %5704 = vmatpush.bf16.msra.mxu1 %v8133_v3 }
 0x9f1   :  { %5886 = vmatpush.bf16.msrb.mxu0 %v8820_v8  ;;  %5717 = vmatpush.bf16.msra.mxu2 %v8137_v21  ;;  %v8816_v8 = vld [vmem:[#allocation9 + $0x18] sm:$0xff] }
 0x9f2   :  { %5729 = vmatpush.bf16.msra.mxu3 %v8157_v13  ;;  %5705 = vmatpush.bf16.msra.mxu1 %v8117_v54 }
 0x9f5   :  { %5887 = vmatpush.bf16.msrb.mxu0 %v8819_v24  ;;  %5718 = vmatpush.bf16.msra.mxu2 %v8121_v29 }
 0x9f6   :  { %5730 = vmatpush.bf16.msra.mxu3 %v8141_v27  ;;  %5706 = vmatpush.bf16.msra.mxu1 %v8101_v55 }
 0x9f9   :  { %5888 = vmatpush.bf16.msrb.mxu0 %v8818_v50 }
 0x9fa   :  { %5731 = vmatpush.bf16.msra.mxu3 %v8125_v35 }
 0x9fd   :  { %5889 = vmatpush.bf16.msrb.mxu0 %v8817_v38 }
 0x9fe   :  { %5732 = vmatpush.bf16.msra.mxu3 %v8109_v39 }
 0xa01   :  { %5890 = vmatpush.bf16.msrb.mxu0 %v8816_v8 }
 0xa05   :  { %5891 = vmatpush.bf16.msrb.mxu0 %v8815_v19 }
 0xa09   :  { %5892 = vmatpush.bf16.msrb.mxu0 %v8814_v61  ;;  %v3208_v61 = vadd.f32 %v11224_v23, %v11234_v22 }
 0xa0d   :  { %5893 = vmatpush.bf16.msrb.mxu0 %v8813_v62 }
 0xa64   :  { %v5378_v52 = vpop.f32.mrf.mxu0  ;;  %v5391_v48 = vpop.f32.mrf.mxu1 }
 0xa65   :  { %v5421_v11 = vadd.f32 %v5378_v52, %v3148_v46  ;;  %v5422_v20 = vadd.f32 %v5391_v48, %v3177_v47  ;;  %v8105_v47 = vor.u32 %v8784_v2, %v8104_v53 }
 0xa67   :  { %v8091_v43 = vmul.f32 -1.442695, %v5421_v11  ;;  %v8092_v37 = vmul.f32 -1.442695, %v5422_v20  ;;  %5719 = vmatpush.bf16.msra.mxu2 %v8105_v47  ;;  %v3206_v20 = vadd.f32 %v11206_v44, %v11234_v22 }
 0xa69   :  { %9059 = vpow2.f32 %v8091_v43 }
 0xa6a   :  { %9061 = vpow2.f32 %v8092_v37 }
 0xa6b   :  { %v5404_v56 = vpop.f32.mrf.mxu2  ;;  %v5417_v49 = vpop.f32.mrf.mxu3 }
 0xa6c   :  { %v5424_v9 = vadd.f32 %v5417_v49, %v3235_v30  ;;  %v5380_v7 = vpop.f32.mrf.mxu0  ;;  %v5393_v59 = vpop.f32.mrf.mxu1  ;;  %v5423_v43 = vadd.f32 %v5404_v56, %v3206_v20 }
 0xa6e   :  { %v8093_v46 = vmul.f32 -1.442695, %v5424_v9 }
 0xa6f   :  { %v9060_v4 = vpop.eup %9059 }
 0xa70   :  { %v9062_v63 = vpop.eup %9061  ;;  %v5428_v52 = vadd.f32 1.0, %v9060_v4  ;;  %9063 = vpow2.f32 %v8093_v46 }
 0xa71   :  { %v5447_v48 = vadd.f32 1.0, %v9062_v63  ;;  %v5814_v63 = vpack.c.bf16 %v11257_v6, %v11241_v41 }
 0xa72   :  { %9065 = vrcp.f32 %v5428_v52  ;;  %v5440_v24 = vand.u32 2147483648, %v5428_v52  ;;  %v5438_v10 = vand.u32 2147483647, %v5428_v52  ;;  %vm5434_vm11 = vweird.f32 %v5428_v52 }
 0xa73   :  { %9067 = vrcp.f32 %v5447_v48  ;;  %v5406_v51 = vpop.f32.mrf.mxu2  ;;  %v5419_v13 = vpop.f32.mrf.mxu3  ;;  %v5459_v27 = vand.u32 2147483648, %v5447_v48  ;;  %v5457_v15 = vand.u32 2147483647, %v5447_v48  ;;  %vm5453_vm12 = vweird.f32 %v5447_v48 }
 0xa74   :  { %v5441_v17 = vor.u32 1.1754944e-38, %v5440_v24  ;;  %vm5439_vm15 = vcmp.eq.f32.partialorder %v5438_v10, 8.507059e+37  ;;  %v3150_v51 = vadd.f32 %v11210_v32, %v11215_v12  ;;  %v3179_v13 = vadd.f32 %v11212_v33, %v11218_v18 }
 0xa75   :  { %v5460_v49 = vor.u32 1.1754944e-38, %v5459_v27  ;;  %vm5458_vm0 = vcmp.eq.f32.partialorder %v5457_v15, 8.507059e+37 }
 0xa76   :  { %v9064_v11 = vpop.eup %9063 }
 0xa77   :  { %v5467_v45 = vadd.f32 1.0, %v9064_v11 }
 0xa78   :  { %v9066_v0 = vpop.eup %9065 }
 0xa79   :  { %v9068_v37 = vpop.eup %9067  ;;  %v5430_v3 = vmul.f32 %v9066_v0, %v5428_v52  ;;  %9069 = vrcp.f32 %v5467_v45  ;;  %vm5435_vm9 = vweird.f32 %v9066_v0  ;;  %v5479_v55 = vand.u32 2147483648, %v5467_v45 }
 0xa7a   :  { %v5449_v42 = vmul.f32 %v9068_v37, %v5447_v48  ;;  %9071 = vtanh.f32 %v5423_v43  ;;  %vm5454_vm10 = vweird.f32 %v9068_v37  ;;  %vm5436_vm13 = vmor %vm5434_vm11, %vm5435_vm9  ;;  %vm5473_vm2 = vweird.f32 %v5467_v45 }
 0xa7b   :  { %v5431_v21 = vsub.f32 1.0, %v5430_v3  ;;  %vm5455_vm14 = vmor %vm5453_vm12, %vm5454_vm10  ;;  %v5477_v40 = vand.u32 2147483647, %v5467_v45  ;;  %v5480_v47 = vor.u32 1.1754944e-38, %v5479_v55  ;;  %v5815_v52 = vpack.c.bf16 %v11289_v60, %v11273_v36 }
 0xa7c   :  { %v5450_v31 = vsub.f32 1.0, %v5449_v42  ;;  %v5816_v48 = vpack.c.bf16 %v11321_v26, %v11305_v25  ;;  %v3237_v36 = vadd.f32 %v11226_v1, %v11229_v28 }
 0xa7d   :  { %v5432_v16 = vmul.f32 %v9066_v0, %v5431_v21  ;;  %vm5478_vm4 = vcmp.eq.f32.partialorder %v5477_v40, 8.507059e+37 }
 0xa7e   :  { %v5451_v44 = vmul.f32 %v9068_v37, %v5450_v31 }
 0xa7f   :  { %v9070_v30 = vpop.eup %9069  ;;  %v5433_v54 = vadd.f32 %v9066_v0, %v5432_v16 }
 0xa80   :  { %v5452_v57 = vadd.f32 %v9068_v37, %v5451_v44  ;;  %v5469_v56 = vmul.f32 %v9070_v30, %v5467_v45  ;;  %v9072_v35 = vpop.eup %9071  ;;  %vm5474_vm1 = vweird.f32 %v9070_v30 }
 0xa81   :  { %v5437_v29 = vsel %vm5436_vm13, %v9066_v0, %v5433_v54  ;;  %vm5475_vm3 = vmor %vm5473_vm2, %vm5474_vm1 }
 0xa82   :  { %v5442_v50 = vsel %vm5439_vm15, %v5441_v17, %v5437_v29  ;;  %v5456_v34 = vsel %vm5455_vm14, %v9068_v37, %v5452_v57  ;;  %v5470_v58 = vsub.f32 1.0, %v5469_v56  ;;  %v11356_v37 = vld [vmem:[%s11402_s8] ss:$0 sm:$0xff] }
 0xa83   :  { %v5461_v9 = vsel %vm5458_vm0, %v5460_v49, %v5456_v34  ;;  %v5484_v7 = vmul.f32 %v9072_v35, %v5442_v50 }
 0xa84   :  { %v5483_v59 = vmul.f32 %v5461_v9, %v11318_v5  ;;  %v5471_v53 = vmul.f32 %v9070_v30, %v5470_v58 }
 0xa86   :  { %v11334_v2 = vadd.f32 %v5484_v7, %v5483_v59  ;;  %v5472_v14 = vadd.f32 %v9070_v30, %v5471_v53 }
 0xa88   :  { %9073 = vtanh.f32 %v11334_v2  ;;  %v5476_v46 = vsel %vm5475_vm3, %v9070_v30, %v5472_v14 }
 0xa89   :  { %v5481_v39 = vsel %vm5478_vm4, %v5480_v47, %v5476_v46 }
 0xa8e   :  { %v9074_v4 = vpop.eup %9073 }
 0xa8f   :  { %v11337_v38 = vmul.f32 %v9074_v4, %v5481_v39 }
 0xa91   :  { %v5493_v5 = vpack.c.bf16 %v11337_v38, %v11337_v38 }
 0xa93   :  { %5694 = vmatmul.bf16.vlgmr.msra.gmra.mxu0 %v5493_v5  ;;  %5707 = vmatmul.bf16.vlgmr.msra.gmra.mxu1 %v5493_v5 }
 0xa94   :  { %5720 = vmatmul.bf16.vlgmr.msra.gmra.mxu2 %v5493_v5  ;;  %5733 = vmatmul.bf16.vlgmr.msra.gmra.mxu3 %v5493_v5 }
 0xaa3   :  { %5894 = vmatmul.bf16.vlgmr.msrb.gmra.mxu0 %v5814_v63 }
 0xab3   :  { %5899 = vmatmul.bf16.gmra.mxu0 %v5815_v52 }
 0xac3   :  { %5904 = vmatmul.bf16.gmra.mxu0 %v5816_v48 }
 0xb10   :  { %v5695_v8 = vpop.f32.mrf.mxu0  ;;  %v5708_v11 = vpop.f32.mrf.mxu1 }
 0xb11   :  { %v5738_v20 = vadd.f32 %v5695_v8, %v3150_v51  ;;  %v5739_v45 = vadd.f32 %v5708_v11, %v3179_v13 }
 0xb13   :  { %v8222_v41 = vmul.f32 -1.442695, %v5738_v20  ;;  %v8223_v6 = vmul.f32 -1.442695, %v5739_v45 }
 0xb15   :  { %9075 = vpow2.f32 %v8222_v41 }
 0xb16   :  { %9077 = vpow2.f32 %v8223_v6 }
 0xb17   :  { %v5721_v60 = vpop.f32.mrf.mxu2  ;;  %v5734_v25 = vpop.f32.mrf.mxu3 }
 0xb18   :  { %v5741_v26 = vadd.f32 %v5734_v25, %v3237_v36  ;;  %v5697_v19 = vpop.f32.mrf.mxu0  ;;  %v5710_v0 = vpop.f32.mrf.mxu1  ;;  %v5740_v27 = vadd.f32 %v5721_v60, %v3208_v61 }
 0xb1a   :  { %v8224_v32 = vmul.f32 -1.442695, %v5741_v26 }
 0xb1b   :  { %v9076_v12 = vpop.eup %9075 }
 0xb1c   :  { %v9078_v43 = vpop.eup %9077  ;;  %v5745_v33 = vadd.f32 1.0, %v9076_v12  ;;  %9079 = vpow2.f32 %v8224_v32 }
 0xb1d   :  { %v5764_v18 = vadd.f32 1.0, %v9078_v43 }
 0xb1e   :  { %9081 = vrcp.f32 %v5745_v33  ;;  %v5755_v54 = vand.u32 2147483647, %v5745_v33  ;;  %v5757_v62 = vand.u32 2147483648, %v5745_v33  ;;  %vm5751_vm7 = vweird.f32 %v5745_v33 }
 0xb1f   :  { %9083 = vrcp.f32 %v5764_v18  ;;  %v5723_v1 = vpop.f32.mrf.mxu2  ;;  %v5736_v28 = vpop.f32.mrf.mxu3  ;;  %v5776_v57 = vand.u32 2147483648, %v5764_v18  ;;  %v5774_v49 = vand.u32 2147483647, %v5764_v18  ;;  %vm5770_vm8 = vweird.f32 %v5764_v18 }
 0xb20   :  { %v5895_v3 = vpop.f32.mrf.mxu0  ;;  %v5758_v50 = vor.u32 1.1754944e-38, %v5757_v62  ;;  %vm5756_vm11 = vcmp.eq.f32.partialorder %v5755_v54, 8.507059e+37 }
 0xb21   :  { %v5896_v42 = vadd.f32 %v11356_v37, %v5895_v3  ;;  %v5777_v9 = vor.u32 1.1754944e-38, %v5776_v57  ;;  %vm5775_vm12 = vcmp.eq.f32.partialorder %v5774_v49, 8.507059e+37 }
 0xb22   :  { %v9080_v21 = vpop.eup %9079 }
 0xb23   :  { %v5784_v31 = vadd.f32 1.0, %v9080_v21  ;;  %5915 = vst [vmem:[%s11403_s9] sm:$0xff] %v5896_v42 }
 0xb24   :  { %v9082_v24 = vpop.eup %9081 }
 0xb25   :  { %v9084_v16 = vpop.eup %9083  ;;  %v5747_v10 = vmul.f32 %v9082_v24, %v5745_v33  ;;  %9085 = vrcp.f32 %v5784_v31  ;;  %vm5752_vm5 = vweird.f32 %v9082_v24  ;;  %v5796_v48 = vand.u32 2147483648, %v5784_v31 }
 0xb26   :  { %v5766_v44 = vmul.f32 %v9084_v16, %v5764_v18  ;;  %9087 = vtanh.f32 %v5740_v27  ;;  %vm5771_vm6 = vweird.f32 %v9084_v16  ;;  %vm5753_vm9 = vmor %vm5751_vm7, %vm5752_vm5  ;;  %vm5790_vm14 = vweird.f32 %v5784_v31 }
 0xb27   :  { %v5748_v15 = vsub.f32 1.0, %v5747_v10  ;;  %vm5772_vm10 = vmor %vm5770_vm8, %vm5771_vm6  ;;  %v5794_v51 = vand.u32 2147483647, %v5784_v31  ;;  %v5797_v11 = vor.u32 1.1754944e-38, %v5796_v48 }
 0xb28   :  { %v5767_v30 = vsub.f32 1.0, %v5766_v44  ;;  %v5897_v17 = vpop.f32.mrf.mxu0 }
 0xb29   :  { %v5749_v56 = vmul.f32 %v9082_v24, %v5748_v15  ;;  %v5898_v23 = vadd.f32 %v11356_v37, %v5897_v17  ;;  %vm5795_vm0 = vcmp.eq.f32.partialorder %v5794_v51, 8.507059e+37 }
 0xb2a   :  { %v5768_v22 = vmul.f32 %v9084_v16, %v5767_v30 }
 0xb2b   :  { %v9086_v29 = vpop.eup %9085  ;;  %v5750_v35 = vadd.f32 %v9082_v24, %v5749_v56  ;;  %5916 = vst [vmem:[%s11403_s9 + $0x8] sm:$0xff] %v5898_v23 }
 0xb2c   :  { %v5769_v34 = vadd.f32 %v9084_v16, %v5768_v22  ;;  %v5786_v58 = vmul.f32 %v9086_v29, %v5784_v31  ;;  %v9088_v59 = vpop.eup %9087  ;;  %vm5791_vm13 = vweird.f32 %v9086_v29 }
 0xb2d   :  { %v5754_v7 = vsel %vm5753_vm9, %v9082_v24, %v5750_v35  ;;  %vm5792_vm15 = vmor %vm5790_vm14, %vm5791_vm13 }
 0xb2e   :  { %v5759_v53 = vsel %vm5756_vm11, %v5758_v50, %v5754_v7  ;;  %v5773_v14 = vsel %vm5772_vm10, %v9084_v16, %v5769_v34  ;;  %v5787_v55 = vsub.f32 1.0, %v5786_v58 }
 0xb2f   :  { %v5778_v40 = vsel %vm5775_vm12, %v5777_v9, %v5773_v14  ;;  %v5801_v46 = vmul.f32 %v9088_v59, %v5759_v53 }
 0xb30   :  { %v5800_v47 = vmul.f32 %v5778_v40, %v11334_v2  ;;  %v5900_v4 = vpop.f32.mrf.mxu0  ;;  %v5788_v39 = vmul.f32 %v9086_v29, %v5787_v55 }
 0xb31   :  { %v5901_v5 = vadd.f32 %v11356_v37, %v5900_v4 }
 0xb32   :  { %v5802_v63 = vadd.f32 %v5801_v46, %v5800_v47  ;;  %v5789_v52 = vadd.f32 %v9086_v29, %v5788_v39 }
 0xb33   :  { %5917 = vst [vmem:[%s11403_s9 + $0x10] sm:$0xff] %v5901_v5 }
 0xb34   :  { %9089 = vtanh.f32 %v5802_v63  ;;  %v5793_v13 = vsel %vm5792_vm15, %v9086_v29, %v5789_v52 }
 0xb35   :  { %v5798_v45 = vsel %vm5795_vm0, %v5797_v11, %v5793_v13 }
 0xb38   :  { %v5902_v8 = vpop.f32.mrf.mxu0 }
 0xb39   :  { %v5903_v2 = vadd.f32 %v11356_v37, %v5902_v8 }
 0xb3a   :  { %v9090_v20 = vpop.eup %9089 }
 0xb3b   :  { %5918 = vst [vmem:[%s11403_s9 + $0x18] sm:$0xff] %v5903_v2  ;;  %v5804_v41 = vmul.f32 %v9090_v20, %v5798_v45 }
 0xb3d   :  { %v5817_v6 = vpack.c.bf16 %v5804_v41, %v11337_v38 }
 0xb3f   :  { %5909 = vmatmul.bf16.gmra.mxu0 %v5817_v6 }
 0xb40   :  { %v5905_v36 = vpop.f32.mrf.mxu0 }
 0xb41   :  { %v5906_v60 = vadd.f32 %v11356_v37, %v5905_v36 }
 0xb43   :  { %5919 = vst [vmem:[%s11403_s9 + $0x20] sm:$0xff] %v5906_v60 }
 0xb48   :  { %v5907_v25 = vpop.f32.mrf.mxu0 }
 0xb49   :  { %v5908_v26 = vadd.f32 %v11356_v37, %v5907_v25 }
 0xb4b   :  { %5920 = vst [vmem:[%s11403_s9 + $0x28] sm:$0xff] %v5908_v26 }
 0xbbc   :  { %v5910_v19 = vpop.f32.mrf.mxu0 }
 0xbbd   :  { %v5911_v0 = vadd.f32 %v11356_v37, %v5910_v19 }
 0xbbf   :  { %5921 = vst [vmem:[%s11403_s9 + $0x30] sm:$0xff] %v5911_v0 }
 0xbc4   :  { %v5912_v38 = vpop.f32.mrf.mxu0 }
 0xbc5   :  { %v5913_v32 = vadd.f32 %v11356_v37, %v5912_v38 }
 0xbc7   :  { %5922 = vst [vmem:[%s11403_s9 + $0x38] sm:$0xff] %v5913_v32 }
 0xbc8   :  { %5927 = vsyncpa [#allocation5], 1 }
 0xbc9   :  { %5928 = vsyncpa [#allocation7], 1 }
 0xbca   :  { %5929 = vsyncpa [#allocation10], 1 }

</bundles_post_ra>
